<compile_context>
chip_gen: v7x
topology: tpu7x:2x2x1
jax: 0.10.0
libtpu: 0.0.40
codegen_flags: <defaults>
</compile_context>

<pallas_src>
import functools

import jax
import jax.numpy as jnp
from jax.experimental import pallas as pl
from jax.experimental.pallas import tpu as pltpu


# -----------------------------------------------------------------------------
# Fused kernel (one grid step == one batch element)
# -----------------------------------------------------------------------------
def _rfb_small_kernel(xp_ref, mask_ref,
                      w_ent_ref, w_f0_ref, w_b1_ref, w_f1_ref, w_b2_ref,
                      w_f2_ref, w_b31_ref, w_b32_ref, w_f3_ref, b_ref,
                      o_ref,
                      ent_ref, mida_ref, midb_ref, acc_ref, stk_ref,
                      *, R0, NC, inter, t33, t31, t13, t33d3, t33d5):
    f32 = jnp.float32
    Co = o_ref.shape[0]
    i2 = inter // 2
    i34 = (inter // 4) * 3
    nb = 3 * inter + i2                      # branch-entry channels (112)
    off_sc = nb                              # shortcut bias rows
    off_b1 = nb + Co
    off_b2 = off_b1 + inter
    off_b31 = off_b2 + inter
    off_b32 = off_b31 + i34
    off_hd = off_b32 + inter

    mask = mask_ref[...]                     # (1, NC): 1 on interior columns

    # Zero the top/bottom row halos of the padded scratch buffers every step
    # (column halos inside the computed rows are re-zeroed via `mask`).  Done
    # unconditionally so each TensorCore's private scratch is initialised even
    # when the "parallel" batch grid is split across cores (v7x megacore).
    for buf in (ent_ref, mida_ref, midb_ref):
        z = jnp.zeros((buf.shape[0], R0), f32)
        buf[:, 0:R0] = z
        buf[:, R0 + NC:R0 + NC + R0] = z

    def conv(src_ref, c0, cin, offs, w_ref):
        # Stage the Kh*Kw lane-shifted tap slices into one (T*cin, NC) slab,
        # then a single full-K MXU contraction.
        for t, off in enumerate(offs):
            stk_ref[t * cin:(t + 1) * cin, :] = (
                src_ref[c0:c0 + cin, R0 + off:R0 + off + NC])
        kdim = cin * len(offs)
        return jnp.dot(w_ref[...], stk_ref[0:kdim, :],
                       preferred_element_type=f32)

    def mid(src_ref, c0, cin, offs, w_ref, boff, cout, dst_ref):
        y = conv(src_ref, c0, cin, offs, w_ref) + b_ref[boff:boff + cout, :]
        dst_ref[0:cout, R0:R0 + NC] = jnp.maximum(y, 0.0) * mask

    # ---- fused entry: four branch 1x1s + shortcut 1x1, one MXU pass (M=240) --
    e = jnp.dot(w_ent_ref[...], xp_ref[:, R0:R0 + NC],
                preferred_element_type=f32)                       # (240, NC)
    ent_ref[:, R0:R0 + NC] = jnp.maximum(e[0:nb] + b_ref[0:nb, :], 0.0) * mask
    acc_ref[...] = e[nb:nb + Co] + b_ref[off_sc:off_sc + Co, :]   # shortcut

    # ---- branch 0: 3x3 (merged with ConvLinear slab 0 and scale) ------------
    acc_ref[...] += conv(ent_ref, 0, inter, t33, w_f0_ref)

    # ---- branch 1: (3,1) relu -> 3x3 dil 3 (merged) --------------------------
    mid(ent_ref, inter, inter, t31, w_b1_ref, off_b1, inter, mida_ref)
    acc_ref[...] += conv(mida_ref, 0, inter, t33d3, w_f1_ref)

    # ---- branch 2: (1,3) relu -> 3x3 dil 3 (merged) --------------------------
    mid(ent_ref, 2 * inter, inter, t13, w_b2_ref, off_b2, inter, mida_ref)
    acc_ref[...] += conv(mida_ref, 0, inter, t33d3, w_f2_ref)

    # ---- branch 3: (1,3) relu -> (3,1) relu -> 3x3 dil 5 (merged) ------------
    mid(ent_ref, 3 * inter, i2, t13, w_b31_ref, off_b31, i34, mida_ref)
    mid(mida_ref, 0, i34, t31, w_b32_ref, off_b32, inter, midb_ref)
    acc_ref[...] += conv(midb_ref, 0, inter, t33d5, w_f3_ref)

    # ---- head: acc already holds shortcut + scale*ConvLinear(cat) -----------
    o_ref[...] = jnp.maximum(acc_ref[...] + b_ref[off_hd:off_hd + Co, :],
                             0.0).astype(o_ref.dtype)


# -----------------------------------------------------------------------------
# One-time weight preparation (fold BN, fuse entry convs, merge ConvLinear)
# -----------------------------------------------------------------------------
def fold_bn(p, eps=1e-5):
    s = p["gamma"] / jnp.sqrt(p["var"] + eps)
    return p["w"] * s[:, None, None, None], p["beta"] - p["mean"] * s


def _taps_matrix(w):
    # (Co, Ci, kh, kw) -> (Co, kh*kw*Ci), tap-major / channel-minor columns.
    co, ci, kh, kw = w.shape
    return jnp.transpose(w, (0, 2, 3, 1)).reshape(co, kh * kw * ci)


def prepare_rfb_small(P, *, scale=0.1):
    """Precompute all folded / fused weights once (outside the forward jit)."""
    hi = jax.lax.Precision.HIGHEST
    w00, b00 = fold_bn(P["b0_0"]); w10, b10 = fold_bn(P["b1_0"])
    w20, b20 = fold_bn(P["b2_0"]); w30, b30 = fold_bn(P["b3_0"])
    wsc, bsc = fold_bn(P["short"])
    wb1, bb1 = fold_bn(P["b1_1"]); wb2, bb2 = fold_bn(P["b2_1"])
    wb31, bb31 = fold_bn(P["b3_1"]); wb32, bb32 = fold_bn(P["b3_2"])
    finals = [fold_bn(P[k]) for k in ("b0_1", "b1_2", "b2_2", "b3_3")]
    wl, bl = fold_bn(P["lin"])
    co = wl.shape[0]
    inter = wl.shape[1] // 4
    wl2 = wl.reshape(co, 4 * inter)

    # Fused entry weight: [b0_0; b1_0; b2_0; b3_0; shortcut]  -> (240, Cin)
    w_ent = jnp.concatenate([_taps_matrix(w00), _taps_matrix(w10),
                             _taps_matrix(w20), _taps_matrix(w30),
                             _taps_matrix(wsc)], axis=0)

    # Merge ConvLinear slab k (and `scale`) into branch-final conv k.
    w_fin, b_head = [], bl
    for k, (wk, bk) in enumerate(finals):
        slab = wl2[:, k * inter:(k + 1) * inter]          # (Co, inter)
        w_fin.append(scale * jnp.dot(slab, _taps_matrix(wk), precision=hi))
        b_head = b_head + jnp.dot(slab, bk, precision=hi)
    b_head = scale * b_head

    biases = jnp.concatenate(
        [b00, b10, b20, b30, bsc, bb1, bb2, bb31, bb32, b_head])[:, None]

    return {"w_ent": w_ent, "w_f0": w_fin[0], "w_b1": _taps_matrix(wb1),
            "w_f1": w_fin[1], "w_b2": _taps_matrix(wb2), "w_f2": w_fin[2],
            "w_b31": _taps_matrix(wb31), "w_b32": _taps_matrix(wb32),
            "w_f3": w_fin[3], "b": biases}


# -----------------------------------------------------------------------------
# Forward wrapper
# -----------------------------------------------------------------------------
def basic_rfb_small_pallas(x, fw, *, stride=1):
    """BasicRFB_small forward (NCHW in / NCHW out), single fused kernel."""
    if stride != 1:
        # TODO(synk): stride=2 path not implemented in the fused kernel.
        raise NotImplementedError("fused BasicRFB_small kernel: stride=1 only")

    B, cin, H, Wd = x.shape
    Co, k9 = fw["w_f0"].shape
    inter = k9 // 9

    PH = PW = 8                               # halo >= dilation-5 reach (5)
    Wp, Hp = Wd + 2 * PW, H + 2 * PH
    L, R0, NC = Hp * Wp, PH * Wp, H * Wp      # 16x16 -> L=1024, R0=256, NC=512

    xp = jnp.pad(x, ((0, 0), (0, 0), (PH, PH), (PW, PW))).reshape(B, cin, L)
    col = jnp.arange(NC, dtype=jnp.int32) % Wp
    mask = ((col >= PW) & (col < PW + Wd)).astype(x.dtype)[None, :]

    def taps(kh, kw, d=1):
        ph, pw = d * (kh - 1) // 2, d * (kw - 1) // 2
        return tuple((d * i - ph) * Wp + (d * j - pw)
                     for i in range(kh) for j in range(kw))

    kernel = functools.partial(
        _rfb_small_kernel, R0=R0, NC=NC, inter=inter,
        t33=taps(3, 3), t31=taps(3, 1), t13=taps(1, 3),
        t33d3=taps(3, 3, 3), t33d5=taps(3, 3, 5))

    const = lambda b: (0, 0)
    wspec = lambda a: pl.BlockSpec(a.shape, const)

    out = pl.pallas_call(
        kernel,
        out_shape=jax.ShapeDtypeStruct((B, Co, NC), x.dtype),
        grid_spec=pltpu.PrefetchScalarGridSpec(
            num_scalar_prefetch=0,
            grid=(B,),
            in_specs=[
                pl.BlockSpec((None, cin, L), lambda b: (b, 0, 0)),
                pl.BlockSpec((1, NC), const),
                wspec(fw["w_ent"]), wspec(fw["w_f0"]), wspec(fw["w_b1"]),
                wspec(fw["w_f1"]), wspec(fw["w_b2"]), wspec(fw["w_f2"]),
                wspec(fw["w_b31"]), wspec(fw["w_b32"]), wspec(fw["w_f3"]),
                wspec(fw["b"]),
            ],
            out_specs=pl.BlockSpec((None, Co, NC), lambda b: (b, 0, 0)),
            scratch_shapes=[
                pltpu.VMEM((3 * inter + inter // 2, L), jnp.float32),  # entry
                pltpu.VMEM((inter, L), jnp.float32),                   # mid A
                pltpu.VMEM((inter, L), jnp.float32),                   # mid B
                pltpu.VMEM((Co, NC), jnp.float32),                     # head acc
                pltpu.VMEM((9 * inter, NC), jnp.float32),              # tap stack
            ],
        ),
        compiler_params=pltpu.CompilerParams(
            dimension_semantics=("parallel",),
            vmem_limit_bytes=32 << 20,   # fits all generations (<= 1/2 of v7x)
        ),
    )(xp, mask, fw["w_ent"], fw["w_f0"], fw["w_b1"], fw["w_f1"], fw["w_b2"],
      fw["w_f2"], fw["w_b31"], fw["w_b32"], fw["w_f3"], fw["b"])

    return out.reshape(B, Co, H, Wp)[:, :, :, PW:PW + Wd]


# -----------------------------------------------------------------------------
# Pure-JAX reference mirroring the PyTorch module (eval-mode BN)
# -----------------------------------------------------------------------------
def basic_conv_ref(x, p, *, stride=1, padding=(0, 0), dilation=1, relu=True):
    y = jax.lax.conv_general_dilated(
        x, p["w"], window_strides=(stride, stride),
        padding=((padding[0], padding[0]), (padding[1], padding[1])),
        rhs_dilation=(dilation, dilation),
        dimension_numbers=("NCHW", "OIHW", "NCHW"),
        precision=jax.lax.Precision.HIGHEST)
    s = p["gamma"] / jnp.sqrt(p["var"] + 1e-5)
    y = y * s[None, :, None, None] + (p["beta"] - p["mean"] * s)[None, :, None, None]
    return jnp.maximum(y, 0.0) if relu else y


def basic_rfb_small_ref(x, P, *, stride=1, scale=0.1):
    x0 = basic_conv_ref(x, P["b0_0"])
    x0 = basic_conv_ref(x0, P["b0_1"], padding=(1, 1), relu=False)
    x1 = basic_conv_ref(x, P["b1_0"])
    x1 = basic_conv_ref(x1, P["b1_1"], padding=(1, 0))
    x1 = basic_conv_ref(x1, P["b1_2"], padding=(3, 3), dilation=3, relu=False)
    x2 = basic_conv_ref(x, P["b2_0"])
    x2 = basic_conv_ref(x2, P["b2_1"], stride=stride, padding=(0, 1))
    x2 = basic_conv_ref(x2, P["b2_2"], padding=(3, 3), dilation=3, relu=False)
    x3 = basic_conv_ref(x, P["b3_0"])
    x3 = basic_conv_ref(x3, P["b3_1"], padding=(0, 1))
    x3 = basic_conv_ref(x3, P["b3_2"], stride=stride, padding=(1, 0))
    x3 = basic_conv_ref(x3, P["b3_3"], padding=(5, 5), dilation=5, relu=False)
    out = jnp.concatenate([x0, x1, x2, x3], axis=1)
    out = basic_conv_ref(out, P["lin"], relu=False)
    short = basic_conv_ref(x, P["short"], stride=stride, relu=False)
    return jnp.maximum(out * scale + short, 0.0)


# -----------------------------------------------------------------------------
# Test driver
# -----------------------------------------------------------------------------
def make_conv_params(key, cout, cin, kh, kw):
    kw_key, kg, kb, km, kv = jax.random.split(key, 5)
    return {
        "w": 0.1 * jax.random.normal(kw_key, (cout, cin, kh, kw), jnp.float32),
        "gamma": 1.0 + 0.1 * jax.random.normal(kg, (cout,), jnp.float32),
        "beta": 0.1 * jax.random.normal(kb, (cout,), jnp.float32),
        "mean": 0.1 * jax.random.normal(km, (cout,), jnp.float32),
        "var": 1.0 + 0.1 * jnp.abs(jax.random.normal(kv, (cout,), jnp.float32)),
    }


if __name__ == "__main__":
    # Module spec: "[rfbs] filters = 128", stride = 1, scale = 0.1.
    B, C, H, W = 2, 128, 16, 16
    out_planes, stride, scale = 128, 1, 0.1
    inter = C // 4

    key = jax.random.PRNGKey(0)
    keys = jax.random.split(key, 15)
    x = jax.random.normal(keys[0], (B, C, H, W), dtype=jnp.float32)

    shapes = {
        "b0_0": (inter, C, 1, 1),
        "b0_1": (inter, inter, 3, 3),
        "b1_0": (inter, C, 1, 1),
        "b1_1": (inter, inter, 3, 1),
        "b1_2": (inter, inter, 3, 3),
        "b2_0": (inter, C, 1, 1),
        "b2_1": (inter, inter, 1, 3),
        "b2_2": (inter, inter, 3, 3),
        "b3_0": (inter // 2, C, 1, 1),
        "b3_1": (inter // 4 * 3, inter // 2, 1, 3),
        "b3_2": (inter, inter // 4 * 3, 3, 1),
        "b3_3": (inter, inter, 3, 3),
        "lin": (out_planes, 4 * inter, 1, 1),
        "short": (out_planes, C, 1, 1),
    }
    P = {name: make_conv_params(k, *shp)
         for k, (name, shp) in zip(keys[1:], shapes.items())}

    # One-time weight folding / fusion (hoisted out of the per-forward jit).
    fw = jax.tree_util.tree_map(jax.block_until_ready,
                                prepare_rfb_small(P, scale=scale))

    run = jax.jit(functools.partial(basic_rfb_small_pallas, stride=stride))
    out = jax.block_until_ready(run(x, fw))

    ref_fn = jax.jit(lambda xv, pv: basic_rfb_small_ref(xv, pv, stride=stride,
                                                        scale=scale))
    ref = jax.block_until_ready(ref_fn(x, P))

    assert out.shape == (B, out_planes, H, W), out.shape
    max_err = float(jnp.max(jnp.abs(out - ref)))
    assert jnp.allclose(out, ref, atol=2e-3, rtol=2e-3), max_err

    print("KERNEL_OK")
</pallas_src>

<mosaic_0001>
module attributes {stable_mosaic.version = 11 : i64} {
  func.func @_rfb_small_kernel(%arg0: i32, %arg1: memref<1x128x1024xf32, #tpu.memory_space<vmem>>, %arg2: memref<1x512xf32, #tpu.memory_space<vmem>>, %arg3: memref<240x128xf32, #tpu.memory_space<vmem>>, %arg4: memref<128x288xf32, #tpu.memory_space<vmem>>, %arg5: memref<32x96xf32, #tpu.memory_space<vmem>>, %arg6: memref<128x288xf32, #tpu.memory_space<vmem>>, %arg7: memref<32x96xf32, #tpu.memory_space<vmem>>, %arg8: memref<128x288xf32, #tpu.memory_space<vmem>>, %arg9: memref<24x48xf32, #tpu.memory_space<vmem>>, %arg10: memref<32x72xf32, #tpu.memory_space<vmem>>, %arg11: memref<128x288xf32, #tpu.memory_space<vmem>>, %arg12: memref<488x1xf32, #tpu.memory_space<vmem>>, %arg13: memref<1x128x512xf32, #tpu.memory_space<vmem>>, %arg14: memref<112x1024xf32, #tpu.memory_space<vmem>>, %arg15: memref<32x1024xf32, #tpu.memory_space<vmem>>, %arg16: memref<32x1024xf32, #tpu.memory_space<vmem>>, %arg17: memref<128x512xf32, #tpu.memory_space<vmem>>, %arg18: memref<288x512xf32, #tpu.memory_space<vmem>>) attributes {dimension_semantics = [#tpu.dimension_semantics<parallel>], iteration_bounds = array<i64: 2>, scalar_prefetch = 0 : i64, scratch_operands = 5 : i64, tpu.core_type = #tpu.core_type<tc>, window_params = [{transform_indices = @transform_0, window_bounds = array<i64: 1, 128, 1024>}, {pipeline_mode = #tpu.pipeline_mode<synchronous>, transform_indices = @transform_1, window_bounds = array<i64: 1, 512>}, {pipeline_mode = #tpu.pipeline_mode<synchronous>, transform_indices = @transform_2, window_bounds = array<i64: 240, 128>}, {pipeline_mode = #tpu.pipeline_mode<synchronous>, transform_indices = @transform_3, window_bounds = array<i64: 128, 288>}, {pipeline_mode = #tpu.pipeline_mode<synchronous>, transform_indices = @transform_4, window_bounds = array<i64: 32, 96>}, {pipeline_mode = #tpu.pipeline_mode<synchronous>, transform_indices = @transform_5, window_bounds = array<i64: 128, 288>}, {pipeline_mode = #tpu.pipeline_mode<synchronous>, transform_indices = @transform_6, window_bounds = array<i64: 32, 96>}, {pipeline_mode = #tpu.pipeline_mode<synchronous>, transform_indices = @transform_7, window_bounds = array<i64: 128, 288>}, {pipeline_mode = #tpu.pipeline_mode<synchronous>, transform_indices = @transform_8, window_bounds = array<i64: 24, 48>}, {pipeline_mode = #tpu.pipeline_mode<synchronous>, transform_indices = @transform_9, window_bounds = array<i64: 32, 72>}, {pipeline_mode = #tpu.pipeline_mode<synchronous>, transform_indices = @transform_10, window_bounds = array<i64: 128, 288>}, {pipeline_mode = #tpu.pipeline_mode<synchronous>, transform_indices = @transform_11, window_bounds = array<i64: 488, 1>}, {transform_indices = @transform_12, window_bounds = array<i64: 1, 128, 512>}]} {
    %c0 = arith.constant 0 : index
    %c0_0 = arith.constant 0 : index
    %0 = vector.load %arg2[%c0, %c0_0] : memref<1x512xf32, #tpu.memory_space<vmem>>, vector<1x512xf32>
    %cst = arith.constant 0.000000e+00 : f32
    %1 = vector.broadcast %cst : f32 to vector<112x256xf32>
    %c0_1 = arith.constant 0 : index
    %c0_2 = arith.constant 0 : index
    %2 = vector.load %arg14[%c0_1, %c0_2] : memref<112x1024xf32, #tpu.memory_space<vmem>>, vector<112x256xf32>
    tpu.vector_store %arg14[%c0_1, %c0_2], %1 {strides = array<i32>} : memref<112x1024xf32, #tpu.memory_space<vmem>>, vector<112x256xf32>,
    %c0_3 = arith.constant 0 : index
    %c768 = arith.constant 768 : index
    %3 = vector.load %arg14[%c0_3, %c768] : memref<112x1024xf32, #tpu.memory_space<vmem>>, vector<112x256xf32>
    tpu.vector_store %arg14[%c0_3, %c768], %1 {strides = array<i32>} : memref<112x1024xf32, #tpu.memory_space<vmem>>, vector<112x256xf32>,
    %cst_4 = arith.constant 0.000000e+00 : f32
    %4 = vector.broadcast %cst_4 : f32 to vector<32x256xf32>
    %c0_5 = arith.constant 0 : index
    %c0_6 = arith.constant 0 : index
    %5 = vector.load %arg15[%c0_5, %c0_6] : memref<32x1024xf32, #tpu.memory_space<vmem>>, vector<32x256xf32>
    tpu.vector_store %arg15[%c0_5, %c0_6], %4 {strides = array<i32>} : memref<32x1024xf32, #tpu.memory_space<vmem>>, vector<32x256xf32>,
    %c0_7 = arith.constant 0 : index
    %c768_8 = arith.constant 768 : index
    %6 = vector.load %arg15[%c0_7, %c768_8] : memref<32x1024xf32, #tpu.memory_space<vmem>>, vector<32x256xf32>
    tpu.vector_store %arg15[%c0_7, %c768_8], %4 {strides = array<i32>} : memref<32x1024xf32, #tpu.memory_space<vmem>>, vector<32x256xf32>,
    %cst_9 = arith.constant 0.000000e+00 : f32
    %7 = vector.broadcast %cst_9 : f32 to vector<32x256xf32>
    %c0_10 = arith.constant 0 : index
    %c0_11 = arith.constant 0 : index
    %8 = vector.load %arg16[%c0_10, %c0_11] : memref<32x1024xf32, #tpu.memory_space<vmem>>, vector<32x256xf32>
    tpu.vector_store %arg16[%c0_10, %c0_11], %7 {strides = array<i32>} : memref<32x1024xf32, #tpu.memory_space<vmem>>, vector<32x256xf32>,
    %c0_12 = arith.constant 0 : index
    %c768_13 = arith.constant 768 : index
    %9 = vector.load %arg16[%c0_12, %c768_13] : memref<32x1024xf32, #tpu.memory_space<vmem>>, vector<32x256xf32>
    tpu.vector_store %arg16[%c0_12, %c768_13], %7 {strides = array<i32>} : memref<32x1024xf32, #tpu.memory_space<vmem>>, vector<32x256xf32>,
    %c0_14 = arith.constant 0 : index
    %c0_15 = arith.constant 0 : index
    %10 = vector.load %arg3[%c0_14, %c0_15] : memref<240x128xf32, #tpu.memory_space<vmem>>, vector<240x128xf32>
    %c0_16 = arith.constant 0 : index
    %c0_17 = arith.constant 0 : index
    %c256 = arith.constant 256 : index
    %11 = vector.load %arg1[%c0_16, %c0_17, %c256] : memref<1x128x1024xf32, #tpu.memory_space<vmem>>, vector<1x128x512xf32>
    %12 = vector.shape_cast %11 : vector<1x128x512xf32> to vector<128x512xf32>
    %cst_18 = arith.constant dense<0.000000e+00> : vector<240x512xf32>
    %13 = tpu.matmul %10, %12, %cst_18 {dimension_numbers = #tpu.dot_dimension_numbers<[1], [0], [0], [1], [0, 0, 1, 1], [], []>} : vector<240x128xf32>, vector<128x512xf32>, vector<240x512xf32> -> vector<240x512xf32>
    %14 = vector.extract_strided_slice %13 {offsets = [0, 0], sizes = [112, 512], strides = [1, 1]} : vector<240x512xf32> to vector<112x512xf32>
    %c0_19 = arith.constant 0 : index
    %c0_20 = arith.constant 0 : index
    %15 = vector.load %arg12[%c0_19, %c0_20] : memref<488x1xf32, #tpu.memory_space<vmem>>, vector<112x1xf32>
    %16 = vector.broadcast %15 : vector<112x1xf32> to vector<112x512xf32>
    %17 = arith.addf %14, %16 : vector<112x512xf32>
    %cst_21 = arith.constant 0.000000e+00 : f32
    %18 = vector.broadcast %cst_21 : f32 to vector<112x512xf32>
    %19 = arith.maximumf %17, %18 : vector<112x512xf32>
    %20 = vector.broadcast %0 : vector<1x512xf32> to vector<112x512xf32>
    %21 = arith.mulf %19, %20 : vector<112x512xf32>
    %c0_22 = arith.constant 0 : index
    %c256_23 = arith.constant 256 : index
    %22 = vector.load %arg14[%c0_22, %c256_23] : memref<112x1024xf32, #tpu.memory_space<vmem>>, vector<112x512xf32>
    tpu.vector_store %arg14[%c0_22, %c256_23], %21 {strides = array<i32>} : memref<112x1024xf32, #tpu.memory_space<vmem>>, vector<112x512xf32>,
    %23 = vector.extract_strided_slice %13 {offsets = [112, 0], sizes = [128, 512], strides = [1, 1]} : vector<240x512xf32> to vector<128x512xf32>
    %c112 = arith.constant 112 : index
    %c0_24 = arith.constant 0 : index
    %24 = vector.load %arg12[%c112, %c0_24] : memref<488x1xf32, #tpu.memory_space<vmem>>, vector<128x1xf32>
    %25 = vector.broadcast %24 : vector<128x1xf32> to vector<128x512xf32>
    %26 = arith.addf %23, %25 : vector<128x512xf32>
    %c0_25 = arith.constant 0 : index
    %c0_26 = arith.constant 0 : index
    %27 = vector.load %arg17[%c0_25, %c0_26] : memref<128x512xf32, #tpu.memory_space<vmem>>, vector<128x512xf32>
    tpu.vector_store %arg17[%c0_25, %c0_26], %26 {strides = array<i32>} : memref<128x512xf32, #tpu.memory_space<vmem>>, vector<128x512xf32>,
    %c0_27 = arith.constant 0 : index
    %c0_28 = arith.constant 0 : index
    %28 = vector.load %arg17[%c0_27, %c0_28] : memref<128x512xf32, #tpu.memory_space<vmem>>, vector<128x512xf32>
    %c0_29 = arith.constant 0 : index
    %c223 = arith.constant 223 : index
    %29 = vector.load %arg14[%c0_29, %c223] : memref<112x1024xf32, #tpu.memory_space<vmem>>, vector<32x512xf32>
    %c0_30 = arith.constant 0 : index
    %c0_31 = arith.constant 0 : index
    %30 = vector.load %arg18[%c0_30, %c0_31] : memref<288x512xf32, #tpu.memory_space<vmem>>, vector<32x512xf32>
    tpu.vector_store %arg18[%c0_30, %c0_31], %29 {strides = array<i32>} : memref<288x512xf32, #tpu.memory_space<vmem>>, vector<32x512xf32>,
    %c0_32 = arith.constant 0 : index
    %c224 = arith.constant 224 : index
    %31 = vector.load %arg14[%c0_32, %c224] : memref<112x1024xf32, #tpu.memory_space<vmem>>, vector<32x512xf32>
    %c32 = arith.constant 32 : index
    %c0_33 = arith.constant 0 : index
    %32 = vector.load %arg18[%c32, %c0_33] : memref<288x512xf32, #tpu.memory_space<vmem>>, vector<32x512xf32>
    tpu.vector_store %arg18[%c32, %c0_33], %31 {strides = array<i32>} : memref<288x512xf32, #tpu.memory_space<vmem>>, vector<32x512xf32>,
    %c0_34 = arith.constant 0 : index
    %c225 = arith.constant 225 : index
    %33 = vector.load %arg14[%c0_34, %c225] : memref<112x1024xf32, #tpu.memory_space<vmem>>, vector<32x512xf32>
    %c64 = arith.constant 64 : index
    %c0_35 = arith.constant 0 : index
    %34 = vector.load %arg18[%c64, %c0_35] : memref<288x512xf32, #tpu.memory_space<vmem>>, vector<32x512xf32>
    tpu.vector_store %arg18[%c64, %c0_35], %33 {strides = array<i32>} : memref<288x512xf32, #tpu.memory_space<vmem>>, vector<32x512xf32>,
    %c0_36 = arith.constant 0 : index
    %c255 = arith.constant 255 : index
    %35 = vector.load %arg14[%c0_36, %c255] : memref<112x1024xf32, #tpu.memory_space<vmem>>, vector<32x512xf32>
    %c96 = arith.constant 96 : index
    %c0_37 = arith.constant 0 : index
    %36 = vector.load %arg18[%c96, %c0_37] : memref<288x512xf32, #tpu.memory_space<vmem>>, vector<32x512xf32>
    tpu.vector_store %arg18[%c96, %c0_37], %35 {strides = array<i32>} : memref<288x512xf32, #tpu.memory_space<vmem>>, vector<32x512xf32>,
    %c0_38 = arith.constant 0 : index
    %c256_39 = arith.constant 256 : index
    %37 = vector.load %arg14[%c0_38, %c256_39] : memref<112x1024xf32, #tpu.memory_space<vmem>>, vector<32x512xf32>
    %c128 = arith.constant 128 : index
    %c0_40 = arith.constant 0 : index
    %38 = vector.load %arg18[%c128, %c0_40] : memref<288x512xf32, #tpu.memory_space<vmem>>, vector<32x512xf32>
    tpu.vector_store %arg18[%c128, %c0_40], %37 {strides = array<i32>} : memref<288x512xf32, #tpu.memory_space<vmem>>, vector<32x512xf32>,
    %c0_41 = arith.constant 0 : index
    %c257 = arith.constant 257 : index
    %39 = vector.load %arg14[%c0_41, %c257] : memref<112x1024xf32, #tpu.memory_space<vmem>>, vector<32x512xf32>
    %c160 = arith.constant 160 : index
    %c0_42 = arith.constant 0 : index
    %40 = vector.load %arg18[%c160, %c0_42] : memref<288x512xf32, #tpu.memory_space<vmem>>, vector<32x512xf32>
    tpu.vector_store %arg18[%c160, %c0_42], %39 {strides = array<i32>} : memref<288x512xf32, #tpu.memory_space<vmem>>, vector<32x512xf32>,
    %c0_43 = arith.constant 0 : index
    %c287 = arith.constant 287 : index
    %41 = vector.load %arg14[%c0_43, %c287] : memref<112x1024xf32, #tpu.memory_space<vmem>>, vector<32x512xf32>
    %c192 = arith.constant 192 : index
    %c0_44 = arith.constant 0 : index
    %42 = vector.load %arg18[%c192, %c0_44] : memref<288x512xf32, #tpu.memory_space<vmem>>, vector<32x512xf32>
    tpu.vector_store %arg18[%c192, %c0_44], %41 {strides = array<i32>} : memref<288x512xf32, #tpu.memory_space<vmem>>, vector<32x512xf32>,
    %c0_45 = arith.constant 0 : index
    %c288 = arith.constant 288 : index
    %43 = vector.load %arg14[%c0_45, %c288] : memref<112x1024xf32, #tpu.memory_space<vmem>>, vector<32x512xf32>
    %c224_46 = arith.constant 224 : index
    %c0_47 = arith.constant 0 : index
    %44 = vector.load %arg18[%c224_46, %c0_47] : memref<288x512xf32, #tpu.memory_space<vmem>>, vector<32x512xf32>
    tpu.vector_store %arg18[%c224_46, %c0_47], %43 {strides = array<i32>} : memref<288x512xf32, #tpu.memory_space<vmem>>, vector<32x512xf32>,
    %c0_48 = arith.constant 0 : index
    %c289 = arith.constant 289 : index
    %45 = vector.load %arg14[%c0_48, %c289] : memref<112x1024xf32, #tpu.memory_space<vmem>>, vector<32x512xf32>
    %c256_49 = arith.constant 256 : index
    %c0_50 = arith.constant 0 : index
    %46 = vector.load %arg18[%c256_49, %c0_50] : memref<288x512xf32, #tpu.memory_space<vmem>>, vector<32x512xf32>
    tpu.vector_store %arg18[%c256_49, %c0_50], %45 {strides = array<i32>} : memref<288x512xf32, #tpu.memory_space<vmem>>, vector<32x512xf32>,
    %c0_51 = arith.constant 0 : index
    %c0_52 = arith.constant 0 : index
    %47 = vector.load %arg4[%c0_51, %c0_52] : memref<128x288xf32, #tpu.memory_space<vmem>>, vector<128x288xf32>
    %c0_53 = arith.constant 0 : index
    %c0_54 = arith.constant 0 : index
    %48 = vector.load %arg18[%c0_53, %c0_54] : memref<288x512xf32, #tpu.memory_space<vmem>>, vector<288x512xf32>
    %cst_55 = arith.constant dense<0.000000e+00> : vector<128x512xf32>
    %49 = tpu.matmul %47, %48, %cst_55 {dimension_numbers = #tpu.dot_dimension_numbers<[1], [0], [0], [1], [0, 0, 1, 1], [], []>} : vector<128x288xf32>, vector<288x512xf32>, vector<128x512xf32> -> vector<128x512xf32>
    %50 = arith.addf %28, %49 : vector<128x512xf32>
    %c0_56 = arith.constant 0 : index
    %c0_57 = arith.constant 0 : index
    %51 = vector.load %arg17[%c0_56, %c0_57] : memref<128x512xf32, #tpu.memory_space<vmem>>, vector<128x512xf32>
    tpu.vector_store %arg17[%c0_56, %c0_57], %50 {strides = array<i32>} : memref<128x512xf32, #tpu.memory_space<vmem>>, vector<128x512xf32>,
    %c32_58 = arith.constant 32 : index
    %c224_59 = arith.constant 224 : index
    %52 = vector.load %arg14[%c32_58, %c224_59] : memref<112x1024xf32, #tpu.memory_space<vmem>>, vector<32x512xf32>
    %c0_60 = arith.constant 0 : index
    %c0_61 = arith.constant 0 : index
    %53 = vector.load %arg18[%c0_60, %c0_61] : memref<288x512xf32, #tpu.memory_space<vmem>>, vector<32x512xf32>
    tpu.vector_store %arg18[%c0_60, %c0_61], %52 {strides = array<i32>} : memref<288x512xf32, #tpu.memory_space<vmem>>, vector<32x512xf32>,
    %c32_62 = arith.constant 32 : index
    %c256_63 = arith.constant 256 : index
    %54 = vector.load %arg14[%c32_62, %c256_63] : memref<112x1024xf32, #tpu.memory_space<vmem>>, vector<32x512xf32>
    %c32_64 = arith.constant 32 : index
    %c0_65 = arith.constant 0 : index
    %55 = vector.load %arg18[%c32_64, %c0_65] : memref<288x512xf32, #tpu.memory_space<vmem>>, vector<32x512xf32>
    tpu.vector_store %arg18[%c32_64, %c0_65], %54 {strides = array<i32>} : memref<288x512xf32, #tpu.memory_space<vmem>>, vector<32x512xf32>,
    %c32_66 = arith.constant 32 : index
    %c288_67 = arith.constant 288 : index
    %56 = vector.load %arg14[%c32_66, %c288_67] : memref<112x1024xf32, #tpu.memory_space<vmem>>, vector<32x512xf32>
    %c64_68 = arith.constant 64 : index
    %c0_69 = arith.constant 0 : index
    %57 = vector.load %arg18[%c64_68, %c0_69] : memref<288x512xf32, #tpu.memory_space<vmem>>, vector<32x512xf32>
    tpu.vector_store %arg18[%c64_68, %c0_69], %56 {strides = array<i32>} : memref<288x512xf32, #tpu.memory_space<vmem>>, vector<32x512xf32>,
    %c0_70 = arith.constant 0 : index
    %c0_71 = arith.constant 0 : index
    %58 = vector.load %arg5[%c0_70, %c0_71] : memref<32x96xf32, #tpu.memory_space<vmem>>, vector<32x96xf32>
    %c0_72 = arith.constant 0 : index
    %c0_73 = arith.constant 0 : index
    %59 = vector.load %arg18[%c0_72, %c0_73] : memref<288x512xf32, #tpu.memory_space<vmem>>, vector<96x512xf32>
    %cst_74 = arith.constant dense<0.000000e+00> : vector<32x512xf32>
    %60 = tpu.matmul %58, %59, %cst_74 {dimension_numbers = #tpu.dot_dimension_numbers<[1], [0], [0], [1], [0, 0, 1, 1], [], []>} : vector<32x96xf32>, vector<96x512xf32>, vector<32x512xf32> -> vector<32x512xf32>
    %c240 = arith.constant 240 : index
    %c0_75 = arith.constant 0 : index
    %61 = vector.load %arg12[%c240, %c0_75] : memref<488x1xf32, #tpu.memory_space<vmem>>, vector<32x1xf32>
    %62 = vector.broadcast %61 : vector<32x1xf32> to vector<32x512xf32>
    %63 = arith.addf %60, %62 : vector<32x512xf32>
    %cst_76 = arith.constant 0.000000e+00 : f32
    %64 = vector.broadcast %cst_76 : f32 to vector<32x512xf32>
    %65 = arith.maximumf %63, %64 : vector<32x512xf32>
    %66 = vector.broadcast %0 : vector<1x512xf32> to vector<32x512xf32>
    %67 = arith.mulf %65, %66 : vector<32x512xf32>
    %c0_77 = arith.constant 0 : index
    %c256_78 = arith.constant 256 : index
    %68 = vector.load %arg15[%c0_77, %c256_78] : memref<32x1024xf32, #tpu.memory_space<vmem>>, vector<32x512xf32>
    tpu.vector_store %arg15[%c0_77, %c256_78], %67 {strides = array<i32>} : memref<32x1024xf32, #tpu.memory_space<vmem>>, vector<32x512xf32>,
    %c0_79 = arith.constant 0 : index
    %c0_80 = arith.constant 0 : index
    %69 = vector.load %arg17[%c0_79, %c0_80] : memref<128x512xf32, #tpu.memory_space<vmem>>, vector<128x512xf32>
    %c0_81 = arith.constant 0 : index
    %c157 = arith.constant 157 : index
    %70 = vector.load %arg15[%c0_81, %c157] : memref<32x1024xf32, #tpu.memory_space<vmem>>, vector<32x512xf32>
    %c0_82 = arith.constant 0 : index
    %c0_83 = arith.constant 0 : index
    %71 = vector.load %arg18[%c0_82, %c0_83] : memref<288x512xf32, #tpu.memory_space<vmem>>, vector<32x512xf32>
    tpu.vector_store %arg18[%c0_82, %c0_83], %70 {strides = array<i32>} : memref<288x512xf32, #tpu.memory_space<vmem>>, vector<32x512xf32>,
    %c0_84 = arith.constant 0 : index
    %c160_85 = arith.constant 160 : index
    %72 = vector.load %arg15[%c0_84, %c160_85] : memref<32x1024xf32, #tpu.memory_space<vmem>>, vector<32x512xf32>
    %c32_86 = arith.constant 32 : index
    %c0_87 = arith.constant 0 : index
    %73 = vector.load %arg18[%c32_86, %c0_87] : memref<288x512xf32, #tpu.memory_space<vmem>>, vector<32x512xf32>
    tpu.vector_store %arg18[%c32_86, %c0_87], %72 {strides = array<i32>} : memref<288x512xf32, #tpu.memory_space<vmem>>, vector<32x512xf32>,
    %c0_88 = arith.constant 0 : index
    %c163 = arith.constant 163 : index
    %74 = vector.load %arg15[%c0_88, %c163] : memref<32x1024xf32, #tpu.memory_space<vmem>>, vector<32x512xf32>
    %c64_89 = arith.constant 64 : index
    %c0_90 = arith.constant 0 : index
    %75 = vector.load %arg18[%c64_89, %c0_90] : memref<288x512xf32, #tpu.memory_space<vmem>>, vector<32x512xf32>
    tpu.vector_store %arg18[%c64_89, %c0_90], %74 {strides = array<i32>} : memref<288x512xf32, #tpu.memory_space<vmem>>, vector<32x512xf32>,
    %c0_91 = arith.constant 0 : index
    %c253 = arith.constant 253 : index
    %76 = vector.load %arg15[%c0_91, %c253] : memref<32x1024xf32, #tpu.memory_space<vmem>>, vector<32x512xf32>
    %c96_92 = arith.constant 96 : index
    %c0_93 = arith.constant 0 : index
    %77 = vector.load %arg18[%c96_92, %c0_93] : memref<288x512xf32, #tpu.memory_space<vmem>>, vector<32x512xf32>
    tpu.vector_store %arg18[%c96_92, %c0_93], %76 {strides = array<i32>} : memref<288x512xf32, #tpu.memory_space<vmem>>, vector<32x512xf32>,
    %c0_94 = arith.constant 0 : index
    %c256_95 = arith.constant 256 : index
    %78 = vector.load %arg15[%c0_94, %c256_95] : memref<32x1024xf32, #tpu.memory_space<vmem>>, vector<32x512xf32>
    %c128_96 = arith.constant 128 : index
    %c0_97 = arith.constant 0 : index
    %79 = vector.load %arg18[%c128_96, %c0_97] : memref<288x512xf32, #tpu.memory_space<vmem>>, vector<32x512xf32>
    tpu.vector_store %arg18[%c128_96, %c0_97], %78 {strides = array<i32>} : memref<288x512xf32, #tpu.memory_space<vmem>>, vector<32x512xf32>,
    %c0_98 = arith.constant 0 : index
    %c259 = arith.constant 259 : index
    %80 = vector.load %arg15[%c0_98, %c259] : memref<32x1024xf32, #tpu.memory_space<vmem>>, vector<32x512xf32>
    %c160_99 = arith.constant 160 : index
    %c0_100 = arith.constant 0 : index
    %81 = vector.load %arg18[%c160_99, %c0_100] : memref<288x512xf32, #tpu.memory_space<vmem>>, vector<32x512xf32>
    tpu.vector_store %arg18[%c160_99, %c0_100], %80 {strides = array<i32>} : memref<288x512xf32, #tpu.memory_space<vmem>>, vector<32x512xf32>,
    %c0_101 = arith.constant 0 : index
    %c349 = arith.constant 349 : index
    %82 = vector.load %arg15[%c0_101, %c349] : memref<32x1024xf32, #tpu.memory_space<vmem>>, vector<32x512xf32>
    %c192_102 = arith.constant 192 : index
    %c0_103 = arith.constant 0 : index
    %83 = vector.load %arg18[%c192_102, %c0_103] : memref<288x512xf32, #tpu.memory_space<vmem>>, vector<32x512xf32>
    tpu.vector_store %arg18[%c192_102, %c0_103], %82 {strides = array<i32>} : memref<288x512xf32, #tpu.memory_space<vmem>>, vector<32x512xf32>,
    %c0_104 = arith.constant 0 : index
    %c352 = arith.constant 352 : index
    %84 = vector.load %arg15[%c0_104, %c352] : memref<32x1024xf32, #tpu.memory_space<vmem>>, vector<32x512xf32>
    %c224_105 = arith.constant 224 : index
    %c0_106 = arith.constant 0 : index
    %85 = vector.load %arg18[%c224_105, %c0_106] : memref<288x512xf32, #tpu.memory_space<vmem>>, vector<32x512xf32>
    tpu.vector_store %arg18[%c224_105, %c0_106], %84 {strides = array<i32>} : memref<288x512xf32, #tpu.memory_space<vmem>>, vector<32x512xf32>,
    %c0_107 = arith.constant 0 : index
    %c355 = arith.constant 355 : index
    %86 = vector.load %arg15[%c0_107, %c355] : memref<32x1024xf32, #tpu.memory_space<vmem>>, vector<32x512xf32>
    %c256_108 = arith.constant 256 : index
    %c0_109 = arith.constant 0 : index
    %87 = vector.load %arg18[%c256_108, %c0_109] : memref<288x512xf32, #tpu.memory_space<vmem>>, vector<32x512xf32>
    tpu.vector_store %arg18[%c256_108, %c0_109], %86 {strides = array<i32>} : memref<288x512xf32, #tpu.memory_space<vmem>>, vector<32x512xf32>,
    %c0_110 = arith.constant 0 : index
    %c0_111 = arith.constant 0 : index
    %88 = vector.load %arg6[%c0_110, %c0_111] : memref<128x288xf32, #tpu.memory_space<vmem>>, vector<128x288xf32>
    %c0_112 = arith.constant 0 : index
    %c0_113 = arith.constant 0 : index
    %89 = vector.load %arg18[%c0_112, %c0_113] : memref<288x512xf32, #tpu.memory_space<vmem>>, vector<288x512xf32>
    %cst_114 = arith.constant dense<0.000000e+00> : vector<128x512xf32>
    %90 = tpu.matmul %88, %89, %cst_114 {dimension_numbers = #tpu.dot_dimension_numbers<[1], [0], [0], [1], [0, 0, 1, 1], [], []>} : vector<128x288xf32>, vector<288x512xf32>, vector<128x512xf32> -> vector<128x512xf32>
    %91 = arith.addf %69, %90 : vector<128x512xf32>
    %c0_115 = arith.constant 0 : index
    %c0_116 = arith.constant 0 : index
    %92 = vector.load %arg17[%c0_115, %c0_116] : memref<128x512xf32, #tpu.memory_space<vmem>>, vector<128x512xf32>
    tpu.vector_store %arg17[%c0_115, %c0_116], %91 {strides = array<i32>} : memref<128x512xf32, #tpu.memory_space<vmem>>, vector<128x512xf32>,
    %c64_117 = arith.constant 64 : index
    %c255_118 = arith.constant 255 : index
    %93 = vector.load %arg14[%c64_117, %c255_118] : memref<112x1024xf32, #tpu.memory_space<vmem>>, vector<32x512xf32>
    %c0_119 = arith.constant 0 : index
    %c0_120 = arith.constant 0 : index
    %94 = vector.load %arg18[%c0_119, %c0_120] : memref<288x512xf32, #tpu.memory_space<vmem>>, vector<32x512xf32>
    tpu.vector_store %arg18[%c0_119, %c0_120], %93 {strides = array<i32>} : memref<288x512xf32, #tpu.memory_space<vmem>>, vector<32x512xf32>,
    %c64_121 = arith.constant 64 : index
    %c256_122 = arith.constant 256 : index
    %95 = vector.load %arg14[%c64_121, %c256_122] : memref<112x1024xf32, #tpu.memory_space<vmem>>, vector<32x512xf32>
    %c32_123 = arith.constant 32 : index
    %c0_124 = arith.constant 0 : index
    %96 = vector.load %arg18[%c32_123, %c0_124] : memref<288x512xf32, #tpu.memory_space<vmem>>, vector<32x512xf32>
    tpu.vector_store %arg18[%c32_123, %c0_124], %95 {strides = array<i32>} : memref<288x512xf32, #tpu.memory_space<vmem>>, vector<32x512xf32>,
    %c64_125 = arith.constant 64 : index
    %c257_126 = arith.constant 257 : index
    %97 = vector.load %arg14[%c64_125, %c257_126] : memref<112x1024xf32, #tpu.memory_space<vmem>>, vector<32x512xf32>
    %c64_127 = arith.constant 64 : index
    %c0_128 = arith.constant 0 : index
    %98 = vector.load %arg18[%c64_127, %c0_128] : memref<288x512xf32, #tpu.memory_space<vmem>>, vector<32x512xf32>
    tpu.vector_store %arg18[%c64_127, %c0_128], %97 {strides = array<i32>} : memref<288x512xf32, #tpu.memory_space<vmem>>, vector<32x512xf32>,
    %c0_129 = arith.constant 0 : index
    %c0_130 = arith.constant 0 : index
    %99 = vector.load %arg7[%c0_129, %c0_130] : memref<32x96xf32, #tpu.memory_space<vmem>>, vector<32x96xf32>
    %c0_131 = arith.constant 0 : index
    %c0_132 = arith.constant 0 : index
    %100 = vector.load %arg18[%c0_131, %c0_132] : memref<288x512xf32, #tpu.memory_space<vmem>>, vector<96x512xf32>
    %cst_133 = arith.constant dense<0.000000e+00> : vector<32x512xf32>
    %101 = tpu.matmul %99, %100, %cst_133 {dimension_numbers = #tpu.dot_dimension_numbers<[1], [0], [0], [1], [0, 0, 1, 1], [], []>} : vector<32x96xf32>, vector<96x512xf32>, vector<32x512xf32> -> vector<32x512xf32>
    %c272 = arith.constant 272 : index
    %c0_134 = arith.constant 0 : index
    %102 = vector.load %arg12[%c272, %c0_134] : memref<488x1xf32, #tpu.memory_space<vmem>>, vector<32x1xf32>
    %103 = vector.broadcast %102 : vector<32x1xf32> to vector<32x512xf32>
    %104 = arith.addf %101, %103 : vector<32x512xf32>
    %cst_135 = arith.constant 0.000000e+00 : f32
    %105 = vector.broadcast %cst_135 : f32 to vector<32x512xf32>
    %106 = arith.maximumf %104, %105 : vector<32x512xf32>
    %107 = vector.broadcast %0 : vector<1x512xf32> to vector<32x512xf32>
    %108 = arith.mulf %106, %107 : vector<32x512xf32>
    %c0_136 = arith.constant 0 : index
    %c256_137 = arith.constant 256 : index
    %109 = vector.load %arg15[%c0_136, %c256_137] : memref<32x1024xf32, #tpu.memory_space<vmem>>, vector<32x512xf32>
    tpu.vector_store %arg15[%c0_136, %c256_137], %108 {strides = array<i32>} : memref<32x1024xf32, #tpu.memory_space<vmem>>, vector<32x512xf32>,
    %c0_138 = arith.constant 0 : index
    %c0_139 = arith.constant 0 : index
    %110 = vector.load %arg17[%c0_138, %c0_139] : memref<128x512xf32, #tpu.memory_space<vmem>>, vector<128x512xf32>
    %c0_140 = arith.constant 0 : index
    %c157_141 = arith.constant 157 : index
    %111 = vector.load %arg15[%c0_140, %c157_141] : memref<32x1024xf32, #tpu.memory_space<vmem>>, vector<32x512xf32>
    %c0_142 = arith.constant 0 : index
    %c0_143 = arith.constant 0 : index
    %112 = vector.load %arg18[%c0_142, %c0_143] : memref<288x512xf32, #tpu.memory_space<vmem>>, vector<32x512xf32>
    tpu.vector_store %arg18[%c0_142, %c0_143], %111 {strides = array<i32>} : memref<288x512xf32, #tpu.memory_space<vmem>>, vector<32x512xf32>,
    %c0_144 = arith.constant 0 : index
    %c160_145 = arith.constant 160 : index
    %113 = vector.load %arg15[%c0_144, %c160_145] : memref<32x1024xf32, #tpu.memory_space<vmem>>, vector<32x512xf32>
    %c32_146 = arith.constant 32 : index
    %c0_147 = arith.constant 0 : index
    %114 = vector.load %arg18[%c32_146, %c0_147] : memref<288x512xf32, #tpu.memory_space<vmem>>, vector<32x512xf32>
    tpu.vector_store %arg18[%c32_146, %c0_147], %113 {strides = array<i32>} : memref<288x512xf32, #tpu.memory_space<vmem>>, vector<32x512xf32>,
    %c0_148 = arith.constant 0 : index
    %c163_149 = arith.constant 163 : index
    %115 = vector.load %arg15[%c0_148, %c163_149] : memref<32x1024xf32, #tpu.memory_space<vmem>>, vector<32x512xf32>
    %c64_150 = arith.constant 64 : index
    %c0_151 = arith.constant 0 : index
    %116 = vector.load %arg18[%c64_150, %c0_151] : memref<288x512xf32, #tpu.memory_space<vmem>>, vector<32x512xf32>
    tpu.vector_store %arg18[%c64_150, %c0_151], %115 {strides = array<i32>} : memref<288x512xf32, #tpu.memory_space<vmem>>, vector<32x512xf32>,
    %c0_152 = arith.constant 0 : index
    %c253_153 = arith.constant 253 : index
    %117 = vector.load %arg15[%c0_152, %c253_153] : memref<32x1024xf32, #tpu.memory_space<vmem>>, vector<32x512xf32>
    %c96_154 = arith.constant 96 : index
    %c0_155 = arith.constant 0 : index
    %118 = vector.load %arg18[%c96_154, %c0_155] : memref<288x512xf32, #tpu.memory_space<vmem>>, vector<32x512xf32>
    tpu.vector_store %arg18[%c96_154, %c0_155], %117 {strides = array<i32>} : memref<288x512xf32, #tpu.memory_space<vmem>>, vector<32x512xf32>,
    %c0_156 = arith.constant 0 : index
    %c256_157 = arith.constant 256 : index
    %119 = vector.load %arg15[%c0_156, %c256_157] : memref<32x1024xf32, #tpu.memory_space<vmem>>, vector<32x512xf32>
    %c128_158 = arith.constant 128 : index
    %c0_159 = arith.constant 0 : index
    %120 = vector.load %arg18[%c128_158, %c0_159] : memref<288x512xf32, #tpu.memory_space<vmem>>, vector<32x512xf32>
    tpu.vector_store %arg18[%c128_158, %c0_159], %119 {strides = array<i32>} : memref<288x512xf32, #tpu.memory_space<vmem>>, vector<32x512xf32>,
    %c0_160 = arith.constant 0 : index
    %c259_161 = arith.constant 259 : index
    %121 = vector.load %arg15[%c0_160, %c259_161] : memref<32x1024xf32, #tpu.memory_space<vmem>>, vector<32x512xf32>
    %c160_162 = arith.constant 160 : index
    %c0_163 = arith.constant 0 : index
    %122 = vector.load %arg18[%c160_162, %c0_163] : memref<288x512xf32, #tpu.memory_space<vmem>>, vector<32x512xf32>
    tpu.vector_store %arg18[%c160_162, %c0_163], %121 {strides = array<i32>} : memref<288x512xf32, #tpu.memory_space<vmem>>, vector<32x512xf32>,
    %c0_164 = arith.constant 0 : index
    %c349_165 = arith.constant 349 : index
    %123 = vector.load %arg15[%c0_164, %c349_165] : memref<32x1024xf32, #tpu.memory_space<vmem>>, vector<32x512xf32>
    %c192_166 = arith.constant 192 : index
    %c0_167 = arith.constant 0 : index
    %124 = vector.load %arg18[%c192_166, %c0_167] : memref<288x512xf32, #tpu.memory_space<vmem>>, vector<32x512xf32>
    tpu.vector_store %arg18[%c192_166, %c0_167], %123 {strides = array<i32>} : memref<288x512xf32, #tpu.memory_space<vmem>>, vector<32x512xf32>,
    %c0_168 = arith.constant 0 : index
    %c352_169 = arith.constant 352 : index
    %125 = vector.load %arg15[%c0_168, %c352_169] : memref<32x1024xf32, #tpu.memory_space<vmem>>, vector<32x512xf32>
    %c224_170 = arith.constant 224 : index
    %c0_171 = arith.constant 0 : index
    %126 = vector.load %arg18[%c224_170, %c0_171] : memref<288x512xf32, #tpu.memory_space<vmem>>, vector<32x512xf32>
    tpu.vector_store %arg18[%c224_170, %c0_171], %125 {strides = array<i32>} : memref<288x512xf32, #tpu.memory_space<vmem>>, vector<32x512xf32>,
    %c0_172 = arith.constant 0 : index
    %c355_173 = arith.constant 355 : index
    %127 = vector.load %arg15[%c0_172, %c355_173] : memref<32x1024xf32, #tpu.memory_space<vmem>>, vector<32x512xf32>
    %c256_174 = arith.constant 256 : index
    %c0_175 = arith.constant 0 : index
    %128 = vector.load %arg18[%c256_174, %c0_175] : memref<288x512xf32, #tpu.memory_space<vmem>>, vector<32x512xf32>
    tpu.vector_store %arg18[%c256_174, %c0_175], %127 {strides = array<i32>} : memref<288x512xf32, #tpu.memory_space<vmem>>, vector<32x512xf32>,
    %c0_176 = arith.constant 0 : index
    %c0_177 = arith.constant 0 : index
    %129 = vector.load %arg8[%c0_176, %c0_177] : memref<128x288xf32, #tpu.memory_space<vmem>>, vector<128x288xf32>
    %c0_178 = arith.constant 0 : index
    %c0_179 = arith.constant 0 : index
    %130 = vector.load %arg18[%c0_178, %c0_179] : memref<288x512xf32, #tpu.memory_space<vmem>>, vector<288x512xf32>
    %cst_180 = arith.constant dense<0.000000e+00> : vector<128x512xf32>
    %131 = tpu.matmul %129, %130, %cst_180 {dimension_numbers = #tpu.dot_dimension_numbers<[1], [0], [0], [1], [0, 0, 1, 1], [], []>} : vector<128x288xf32>, vector<288x512xf32>, vector<128x512xf32> -> vector<128x512xf32>
    %132 = arith.addf %110, %131 : vector<128x512xf32>
    %c0_181 = arith.constant 0 : index
    %c0_182 = arith.constant 0 : index
    %133 = vector.load %arg17[%c0_181, %c0_182] : memref<128x512xf32, #tpu.memory_space<vmem>>, vector<128x512xf32>
    tpu.vector_store %arg17[%c0_181, %c0_182], %132 {strides = array<i32>} : memref<128x512xf32, #tpu.memory_space<vmem>>, vector<128x512xf32>,
    %c96_183 = arith.constant 96 : index
    %c255_184 = arith.constant 255 : index
    %134 = vector.load %arg14[%c96_183, %c255_184] : memref<112x1024xf32, #tpu.memory_space<vmem>>, vector<16x512xf32>
    %c0_185 = arith.constant 0 : index
    %c0_186 = arith.constant 0 : index
    %135 = vector.load %arg18[%c0_185, %c0_186] : memref<288x512xf32, #tpu.memory_space<vmem>>, vector<16x512xf32>
    tpu.vector_store %arg18[%c0_185, %c0_186], %134 {strides = array<i32>} : memref<288x512xf32, #tpu.memory_space<vmem>>, vector<16x512xf32>,
    %c96_187 = arith.constant 96 : index
    %c256_188 = arith.constant 256 : index
    %136 = vector.load %arg14[%c96_187, %c256_188] : memref<112x1024xf32, #tpu.memory_space<vmem>>, vector<16x512xf32>
    %c16 = arith.constant 16 : index
    %c0_189 = arith.constant 0 : index
    %137 = vector.load %arg18[%c16, %c0_189] : memref<288x512xf32, #tpu.memory_space<vmem>>, vector<16x512xf32>
    tpu.vector_store %arg18[%c16, %c0_189], %136 {strides = array<i32>} : memref<288x512xf32, #tpu.memory_space<vmem>>, vector<16x512xf32>,
    %c96_190 = arith.constant 96 : index
    %c257_191 = arith.constant 257 : index
    %138 = vector.load %arg14[%c96_190, %c257_191] : memref<112x1024xf32, #tpu.memory_space<vmem>>, vector<16x512xf32>
    %c32_192 = arith.constant 32 : index
    %c0_193 = arith.constant 0 : index
    %139 = vector.load %arg18[%c32_192, %c0_193] : memref<288x512xf32, #tpu.memory_space<vmem>>, vector<16x512xf32>
    tpu.vector_store %arg18[%c32_192, %c0_193], %138 {strides = array<i32>} : memref<288x512xf32, #tpu.memory_space<vmem>>, vector<16x512xf32>,
    %c0_194 = arith.constant 0 : index
    %c0_195 = arith.constant 0 : index
    %140 = vector.load %arg9[%c0_194, %c0_195] : memref<24x48xf32, #tpu.memory_space<vmem>>, vector<24x48xf32>
    %c0_196 = arith.constant 0 : index
    %c0_197 = arith.constant 0 : index
    %141 = vector.load %arg18[%c0_196, %c0_197] : memref<288x512xf32, #tpu.memory_space<vmem>>, vector<48x512xf32>
    %cst_198 = arith.constant dense<0.000000e+00> : vector<24x512xf32>
    %142 = tpu.matmul %140, %141, %cst_198 {dimension_numbers = #tpu.dot_dimension_numbers<[1], [0], [0], [1], [0, 0, 1, 1], [], []>} : vector<24x48xf32>, vector<48x512xf32>, vector<24x512xf32> -> vector<24x512xf32>
    %c304 = arith.constant 304 : index
    %c0_199 = arith.constant 0 : index
    %143 = vector.load %arg12[%c304, %c0_199] : memref<488x1xf32, #tpu.memory_space<vmem>>, vector<24x1xf32>
    %144 = vector.broadcast %143 : vector<24x1xf32> to vector<24x512xf32>
    %145 = arith.addf %142, %144 : vector<24x512xf32>
    %cst_200 = arith.constant 0.000000e+00 : f32
    %146 = vector.broadcast %cst_200 : f32 to vector<24x512xf32>
    %147 = arith.maximumf %145, %146 : vector<24x512xf32>
    %148 = vector.broadcast %0 : vector<1x512xf32> to vector<24x512xf32>
    %149 = arith.mulf %147, %148 : vector<24x512xf32>
    %c0_201 = arith.constant 0 : index
    %c256_202 = arith.constant 256 : index
    %150 = vector.load %arg15[%c0_201, %c256_202] : memref<32x1024xf32, #tpu.memory_space<vmem>>, vector<24x512xf32>
    tpu.vector_store %arg15[%c0_201, %c256_202], %149 {strides = array<i32>} : memref<32x1024xf32, #tpu.memory_space<vmem>>, vector<24x512xf32>,
    %c0_203 = arith.constant 0 : index
    %c224_204 = arith.constant 224 : index
    %151 = vector.load %arg15[%c0_203, %c224_204] : memref<32x1024xf32, #tpu.memory_space<vmem>>, vector<24x512xf32>
    %c0_205 = arith.constant 0 : index
    %c0_206 = arith.constant 0 : index
    %152 = vector.load %arg18[%c0_205, %c0_206] : memref<288x512xf32, #tpu.memory_space<vmem>>, vector<24x512xf32>
    tpu.vector_store %arg18[%c0_205, %c0_206], %151 {strides = array<i32>} : memref<288x512xf32, #tpu.memory_space<vmem>>, vector<24x512xf32>,
    %c0_207 = arith.constant 0 : index
    %c256_208 = arith.constant 256 : index
    %153 = vector.load %arg15[%c0_207, %c256_208] : memref<32x1024xf32, #tpu.memory_space<vmem>>, vector<24x512xf32>
    %c24 = arith.constant 24 : index
    %c0_209 = arith.constant 0 : index
    %154 = vector.load %arg18[%c24, %c0_209] : memref<288x512xf32, #tpu.memory_space<vmem>>, vector<24x512xf32>
    tpu.vector_store %arg18[%c24, %c0_209], %153 {strides = array<i32>} : memref<288x512xf32, #tpu.memory_space<vmem>>, vector<24x512xf32>,
    %c0_210 = arith.constant 0 : index
    %c288_211 = arith.constant 288 : index
    %155 = vector.load %arg15[%c0_210, %c288_211] : memref<32x1024xf32, #tpu.memory_space<vmem>>, vector<24x512xf32>
    %c48 = arith.constant 48 : index
    %c0_212 = arith.constant 0 : index
    %156 = vector.load %arg18[%c48, %c0_212] : memref<288x512xf32, #tpu.memory_space<vmem>>, vector<24x512xf32>
    tpu.vector_store %arg18[%c48, %c0_212], %155 {strides = array<i32>} : memref<288x512xf32, #tpu.memory_space<vmem>>, vector<24x512xf32>,
    %c0_213 = arith.constant 0 : index
    %c0_214 = arith.constant 0 : index
    %157 = vector.load %arg10[%c0_213, %c0_214] : memref<32x72xf32, #tpu.memory_space<vmem>>, vector<32x72xf32>
    %c0_215 = arith.constant 0 : index
    %c0_216 = arith.constant 0 : index
    %158 = vector.load %arg18[%c0_215, %c0_216] : memref<288x512xf32, #tpu.memory_space<vmem>>, vector<72x512xf32>
    %cst_217 = arith.constant dense<0.000000e+00> : vector<32x512xf32>
    %159 = tpu.matmul %157, %158, %cst_217 {dimension_numbers = #tpu.dot_dimension_numbers<[1], [0], [0], [1], [0, 0, 1, 1], [], []>} : vector<32x72xf32>, vector<72x512xf32>, vector<32x512xf32> -> vector<32x512xf32>
    %c328 = arith.constant 328 : index
    %c0_218 = arith.constant 0 : index
    %160 = vector.load %arg12[%c328, %c0_218] : memref<488x1xf32, #tpu.memory_space<vmem>>, vector<32x1xf32>
    %161 = vector.broadcast %160 : vector<32x1xf32> to vector<32x512xf32>
    %162 = arith.addf %159, %161 : vector<32x512xf32>
    %cst_219 = arith.constant 0.000000e+00 : f32
    %163 = vector.broadcast %cst_219 : f32 to vector<32x512xf32>
    %164 = arith.maximumf %162, %163 : vector<32x512xf32>
    %165 = vector.broadcast %0 : vector<1x512xf32> to vector<32x512xf32>
    %166 = arith.mulf %164, %165 : vector<32x512xf32>
    %c0_220 = arith.constant 0 : index
    %c256_221 = arith.constant 256 : index
    %167 = vector.load %arg16[%c0_220, %c256_221] : memref<32x1024xf32, #tpu.memory_space<vmem>>, vector<32x512xf32>
    tpu.vector_store %arg16[%c0_220, %c256_221], %166 {strides = array<i32>} : memref<32x1024xf32, #tpu.memory_space<vmem>>, vector<32x512xf32>,
    %c0_222 = arith.constant 0 : index
    %c0_223 = arith.constant 0 : index
    %168 = vector.load %arg17[%c0_222, %c0_223] : memref<128x512xf32, #tpu.memory_space<vmem>>, vector<128x512xf32>
    %c0_224 = arith.constant 0 : index
    %c91 = arith.constant 91 : index
    %169 = vector.load %arg16[%c0_224, %c91] : memref<32x1024xf32, #tpu.memory_space<vmem>>, vector<32x512xf32>
    %c0_225 = arith.constant 0 : index
    %c0_226 = arith.constant 0 : index
    %170 = vector.load %arg18[%c0_225, %c0_226] : memref<288x512xf32, #tpu.memory_space<vmem>>, vector<32x512xf32>
    tpu.vector_store %arg18[%c0_225, %c0_226], %169 {strides = array<i32>} : memref<288x512xf32, #tpu.memory_space<vmem>>, vector<32x512xf32>,
    %c0_227 = arith.constant 0 : index
    %c96_228 = arith.constant 96 : index
    %171 = vector.load %arg16[%c0_227, %c96_228] : memref<32x1024xf32, #tpu.memory_space<vmem>>, vector<32x512xf32>
    %c32_229 = arith.constant 32 : index
    %c0_230 = arith.constant 0 : index
    %172 = vector.load %arg18[%c32_229, %c0_230] : memref<288x512xf32, #tpu.memory_space<vmem>>, vector<32x512xf32>
    tpu.vector_store %arg18[%c32_229, %c0_230], %171 {strides = array<i32>} : memref<288x512xf32, #tpu.memory_space<vmem>>, vector<32x512xf32>,
    %c0_231 = arith.constant 0 : index
    %c101 = arith.constant 101 : index
    %173 = vector.load %arg16[%c0_231, %c101] : memref<32x1024xf32, #tpu.memory_space<vmem>>, vector<32x512xf32>
    %c64_232 = arith.constant 64 : index
    %c0_233 = arith.constant 0 : index
    %174 = vector.load %arg18[%c64_232, %c0_233] : memref<288x512xf32, #tpu.memory_space<vmem>>, vector<32x512xf32>
    tpu.vector_store %arg18[%c64_232, %c0_233], %173 {strides = array<i32>} : memref<288x512xf32, #tpu.memory_space<vmem>>, vector<32x512xf32>,
    %c0_234 = arith.constant 0 : index
    %c251 = arith.constant 251 : index
    %175 = vector.load %arg16[%c0_234, %c251] : memref<32x1024xf32, #tpu.memory_space<vmem>>, vector<32x512xf32>
    %c96_235 = arith.constant 96 : index
    %c0_236 = arith.constant 0 : index
    %176 = vector.load %arg18[%c96_235, %c0_236] : memref<288x512xf32, #tpu.memory_space<vmem>>, vector<32x512xf32>
    tpu.vector_store %arg18[%c96_235, %c0_236], %175 {strides = array<i32>} : memref<288x512xf32, #tpu.memory_space<vmem>>, vector<32x512xf32>,
    %c0_237 = arith.constant 0 : index
    %c256_238 = arith.constant 256 : index
    %177 = vector.load %arg16[%c0_237, %c256_238] : memref<32x1024xf32, #tpu.memory_space<vmem>>, vector<32x512xf32>
    %c128_239 = arith.constant 128 : index
    %c0_240 = arith.constant 0 : index
    %178 = vector.load %arg18[%c128_239, %c0_240] : memref<288x512xf32, #tpu.memory_space<vmem>>, vector<32x512xf32>
    tpu.vector_store %arg18[%c128_239, %c0_240], %177 {strides = array<i32>} : memref<288x512xf32, #tpu.memory_space<vmem>>, vector<32x512xf32>,
    %c0_241 = arith.constant 0 : index
    %c261 = arith.constant 261 : index
    %179 = vector.load %arg16[%c0_241, %c261] : memref<32x1024xf32, #tpu.memory_space<vmem>>, vector<32x512xf32>
    %c160_242 = arith.constant 160 : index
    %c0_243 = arith.constant 0 : index
    %180 = vector.load %arg18[%c160_242, %c0_243] : memref<288x512xf32, #tpu.memory_space<vmem>>, vector<32x512xf32>
    tpu.vector_store %arg18[%c160_242, %c0_243], %179 {strides = array<i32>} : memref<288x512xf32, #tpu.memory_space<vmem>>, vector<32x512xf32>,
    %c0_244 = arith.constant 0 : index
    %c411 = arith.constant 411 : index
    %181 = vector.load %arg16[%c0_244, %c411] : memref<32x1024xf32, #tpu.memory_space<vmem>>, vector<32x512xf32>
    %c192_245 = arith.constant 192 : index
    %c0_246 = arith.constant 0 : index
    %182 = vector.load %arg18[%c192_245, %c0_246] : memref<288x512xf32, #tpu.memory_space<vmem>>, vector<32x512xf32>
    tpu.vector_store %arg18[%c192_245, %c0_246], %181 {strides = array<i32>} : memref<288x512xf32, #tpu.memory_space<vmem>>, vector<32x512xf32>,
    %c0_247 = arith.constant 0 : index
    %c416 = arith.constant 416 : index
    %183 = vector.load %arg16[%c0_247, %c416] : memref<32x1024xf32, #tpu.memory_space<vmem>>, vector<32x512xf32>
    %c224_248 = arith.constant 224 : index
    %c0_249 = arith.constant 0 : index
    %184 = vector.load %arg18[%c224_248, %c0_249] : memref<288x512xf32, #tpu.memory_space<vmem>>, vector<32x512xf32>
    tpu.vector_store %arg18[%c224_248, %c0_249], %183 {strides = array<i32>} : memref<288x512xf32, #tpu.memory_space<vmem>>, vector<32x512xf32>,
    %c0_250 = arith.constant 0 : index
    %c421 = arith.constant 421 : index
    %185 = vector.load %arg16[%c0_250, %c421] : memref<32x1024xf32, #tpu.memory_space<vmem>>, vector<32x512xf32>
    %c256_251 = arith.constant 256 : index
    %c0_252 = arith.constant 0 : index
    %186 = vector.load %arg18[%c256_251, %c0_252] : memref<288x512xf32, #tpu.memory_space<vmem>>, vector<32x512xf32>
    tpu.vector_store %arg18[%c256_251, %c0_252], %185 {strides = array<i32>} : memref<288x512xf32, #tpu.memory_space<vmem>>, vector<32x512xf32>,
    %c0_253 = arith.constant 0 : index
    %c0_254 = arith.constant 0 : index
    %187 = vector.load %arg11[%c0_253, %c0_254] : memref<128x288xf32, #tpu.memory_space<vmem>>, vector<128x288xf32>
    %c0_255 = arith.constant 0 : index
    %c0_256 = arith.constant 0 : index
    %188 = vector.load %arg18[%c0_255, %c0_256] : memref<288x512xf32, #tpu.memory_space<vmem>>, vector<288x512xf32>
    %cst_257 = arith.constant dense<0.000000e+00> : vector<128x512xf32>
    %189 = tpu.matmul %187, %188, %cst_257 {dimension_numbers = #tpu.dot_dimension_numbers<[1], [0], [0], [1], [0, 0, 1, 1], [], []>} : vector<128x288xf32>, vector<288x512xf32>, vector<128x512xf32> -> vector<128x512xf32>
    %190 = arith.addf %168, %189 : vector<128x512xf32>
    %c0_258 = arith.constant 0 : index
    %c0_259 = arith.constant 0 : index
    %191 = vector.load %arg17[%c0_258, %c0_259] : memref<128x512xf32, #tpu.memory_space<vmem>>, vector<128x512xf32>
    tpu.vector_store %arg17[%c0_258, %c0_259], %190 {strides = array<i32>} : memref<128x512xf32, #tpu.memory_space<vmem>>, vector<128x512xf32>,
    %c0_260 = arith.constant 0 : index
    %c0_261 = arith.constant 0 : index
    %192 = vector.load %arg17[%c0_260, %c0_261] : memref<128x512xf32, #tpu.memory_space<vmem>>, vector<128x512xf32>
    %c360 = arith.constant 360 : index
    %c0_262 = arith.constant 0 : index
    %193 = vector.load %arg12[%c360, %c0_262] : memref<488x1xf32, #tpu.memory_space<vmem>>, vector<128x1xf32>
    %194 = vector.broadcast %193 : vector<128x1xf32> to vector<128x512xf32>
    %195 = arith.addf %192, %194 : vector<128x512xf32>
    %cst_263 = arith.constant 0.000000e+00 : f32
    %196 = vector.broadcast %cst_263 : f32 to vector<128x512xf32>
    %197 = arith.maximumf %195, %196 : vector<128x512xf32>
    %c0_264 = arith.constant 0 : index
    %c0_265 = arith.constant 0 : index
    %c0_266 = arith.constant 0 : index
    %198 = vector.load %arg13[%c0_264, %c0_265, %c0_266] : memref<1x128x512xf32, #tpu.memory_space<vmem>>, vector<1x128x512xf32>
    %199 = vector.shape_cast %198 : vector<1x128x512xf32> to vector<128x512xf32>
    %200 = vector.shape_cast %197 : vector<128x512xf32> to vector<1x128x512xf32>
    tpu.vector_store %arg13[%c0_264, %c0_265, %c0_266], %200 {strides = array<i32>} : memref<1x128x512xf32, #tpu.memory_space<vmem>>, vector<1x128x512xf32>,
    return
  }
  func.func @transform_0(%arg0: i32) -> (i32, i32, i32) {
    %c0_i32 = arith.constant 0 : i32
    %c0_i32_0 = arith.constant 0 : i32
    %c0_i32_1 = arith.constant 0 : i32
    return %arg0, %c0_i32, %c0_i32_0 : i32, i32, i32
  }
  func.func @transform_1(%arg0: i32) -> (i32, i32) {
    %c0_i32 = arith.constant 0 : i32
    %c0_i32_0 = arith.constant 0 : i32
    %c0_i32_1 = arith.constant 0 : i32
    return %c0_i32, %c0_i32_0 : i32, i32
  }
  func.func @transform_2(%arg0: i32) -> (i32, i32) {
    %c0_i32 = arith.constant 0 : i32
    %c0_i32_0 = arith.constant 0 : i32
    %c0_i32_1 = arith.constant 0 : i32
    return %c0_i32, %c0_i32_0 : i32, i32
  }
  func.func @transform_3(%arg0: i32) -> (i32, i32) {
    %c0_i32 = arith.constant 0 : i32
    %c0_i32_0 = arith.constant 0 : i32
    %c0_i32_1 = arith.constant 0 : i32
    return %c0_i32, %c0_i32_0 : i32, i32
  }
  func.func @transform_4(%arg0: i32) -> (i32, i32) {
    %c0_i32 = arith.constant 0 : i32
    %c0_i32_0 = arith.constant 0 : i32
    %c0_i32_1 = arith.constant 0 : i32
    return %c0_i32, %c0_i32_0 : i32, i32
  }
  func.func @transform_5(%arg0: i32) -> (i32, i32) {
    %c0_i32 = arith.constant 0 : i32
    %c0_i32_0 = arith.constant 0 : i32
    %c0_i32_1 = arith.constant 0 : i32
    return %c0_i32, %c0_i32_0 : i32, i32
  }
  func.func @transform_6(%arg0: i32) -> (i32, i32) {
    %c0_i32 = arith.constant 0 : i32
    %c0_i32_0 = arith.constant 0 : i32
    %c0_i32_1 = arith.constant 0 : i32
    return %c0_i32, %c0_i32_0 : i32, i32
  }
  func.func @transform_7(%arg0: i32) -> (i32, i32) {
    %c0_i32 = arith.constant 0 : i32
    %c0_i32_0 = arith.constant 0 : i32
    %c0_i32_1 = arith.constant 0 : i32
    return %c0_i32, %c0_i32_0 : i32, i32
  }
  func.func @transform_8(%arg0: i32) -> (i32, i32) {
    %c0_i32 = arith.constant 0 : i32
    %c0_i32_0 = arith.constant 0 : i32
    %c0_i32_1 = arith.constant 0 : i32
    return %c0_i32, %c0_i32_0 : i32, i32
  }
  func.func @transform_9(%arg0: i32) -> (i32, i32) {
    %c0_i32 = arith.constant 0 : i32
    %c0_i32_0 = arith.constant 0 : i32
    %c0_i32_1 = arith.constant 0 : i32
    return %c0_i32, %c0_i32_0 : i32, i32
  }
  func.func @transform_10(%arg0: i32) -> (i32, i32) {
    %c0_i32 = arith.constant 0 : i32
    %c0_i32_0 = arith.constant 0 : i32
    %c0_i32_1 = arith.constant 0 : i32
    return %c0_i32, %c0_i32_0 : i32, i32
  }
  func.func @transform_11(%arg0: i32) -> (i32, i32) {
    %c0_i32 = arith.constant 0 : i32
    %c0_i32_0 = arith.constant 0 : i32
    %c0_i32_1 = arith.constant 0 : i32
    return %c0_i32, %c0_i32_0 : i32, i32
  }
  func.func @transform_12(%arg0: i32) -> (i32, i32, i32) {
    %c0_i32 = arith.constant 0 : i32
    %c0_i32_0 = arith.constant 0 : i32
    %c0_i32_1 = arith.constant 0 : i32
    return %arg0, %c0_i32, %c0_i32_0 : i32, i32, i32
  }
}

</mosaic_0001>

<bundles_post_ra>
// kernel: basic_rfb_small_pallas.1
= control target key start
LH: loop header
LB: loop body
LE: loop exit
PB: predicated region body
PF: predicated region fallthrough
CT: control target
= control target key end

     0   :  { %s16295_s21 = smov 0   ;;  %s21372_s0 = inlined_call_operand.vmem [shape: f32[2,128,1024], index: 0, kind: input, shape index: {}]   ;;  %s21373_s1 = inlined_call_operand.vmem [shape: f32[1,512], index: 1, kind: input, shape index: {}]   ;;  %s21374_s2 = inlined_call_operand.vmem [shape: f32[240,128], index: 2, kind: input, shape index: {}]   ;;  %s21375_s3 = inlined_call_operand.vmem [shape: f32[128,288], index: 3, kind: input, shape index: {}]   ;;  %s21376_s4 = inlined_call_operand.vmem [shape: f32[32,96], index: 4, kind: input, shape index: {}]   ;;  %s21377_s5 = inlined_call_operand.vmem [shape: f32[128,288], index: 5, kind: input, shape index: {}]   ;;  %s21378_s6 = inlined_call_operand.vmem [shape: f32[32,96], index: 6, kind: input, shape index: {}]   ;;  %s21379_s7 = inlined_call_operand.vmem [shape: f32[128,288], index: 7, kind: input, shape index: {}]   ;;  %s21380_s8 = inlined_call_operand.vmem [shape: f32[24,48], index: 8, kind: input, shape index: {}]   ;;  %s21381_s9 = inlined_call_operand.vmem [shape: f32[32,72], index: 9, kind: input, shape index: {}]   ;;  %s21382_s10 = inlined_call_operand.vmem [shape: f32[128,288], index: 10, kind: input, shape index: {}]   ;;  %s21383_s11 = inlined_call_operand.vmem [shape: f32[488,1], index: 11, kind: input, shape index: {}]   ;;  %s21384_s12 = inlined_call_operand.vmem [shape: f32[2,128,512], index: 12, kind: output, shape index: {}]  }
   0x1 LB: > { %s12719_s22 = sadd.s32 4294967295, %s16206_s21   ;;  %p12723_p0 = scmp.ge.s32.totalorder %s16206_s21, 1  ;;  %s16206_s21 = sphi %s16295_s21, %s22_s21  }
   0x2   : > { %p362_p1 = scmp.lt.s32.totalorder %s16206_s21, 3 }
   0x4   : > { %p363_p2 = pnand %p12723_p0, %p362_p1 }
   0x6   : > { %366 = sbr.rel (%p363_p2) target bundleno = 3200 (0xc80), region = 68 }
   0xd   : > { %p404_p3 = scmp.lt.s32.totalorder %s12719_s22, 1  ;;  %v21393_v0 = vmov 0.0   ;;  %v1087_v1 = vld [vmem:[%s21383_s11] sm:$0xff]  ;;  %v16209_v2 = vmov 0   ;;  %v1089_v3 = vld [vmem:[%s21383_s11 + $0x10] sm:$0xff]  ;;  %v1088_v4 = vld [vmem:[%s21383_s11 + $0x8] sm:$0xff] }
   0xe   : > { %661 = vmatprep.mubr.f32.mxu0 %v21393_v0  ;;  %906 = vmatprep.mubr.f32.mxu1 %v21393_v0  ;;  %v1090_v5 = vld [vmem:[%s21383_s11 + $0x18] sm:$0xff]  ;;  %s16210_s19 = smov 33   ;;  %s21431_s20 = smov 32   ;;  %vm1784_vm0 = vcmask 269312   ;;  %vm1913_vm1 = vcmask 261120   ;;  %vm2042_vm2 = vcmask 252928  }
   0xf   : > { %s21791_s22 = smov (!%p404_p3, %s12719_s22), 1  ;;  %14288 = vset.pattern.permute.xlu0 %v16209_v2  ;;  %14289 = vset.pattern.permute.xlu1 %v16209_v2  ;;  %s16212_s23 = smov 31   ;;  %vm2171_vm3 = vcmask 7168   ;;  %vm2332_vm4 = vcmask 1039360   ;;  %vm2461_vm5 = vcmask 793600   ;;  %vm2590_vm6 = vcmask 785408  }
  0x10   : > { %1103 = vperm.xlu0 %14288, %v1087_v1   ;;  %1113 = vperm.xlu1 %14289, %v1089_v3   ;;  %s12888_s27 = sshll.u32 %s21791_s22, 10  ;;  %s16213_s24 = smov 1   ;;  %vm2719_vm7 = vcmask 777216   ;;  %vm4526_vm8 = vcmask 809984   ;;  %vm4783_vm9 = vcmask 760832   ;;  %vm4912_vm10 = vcmask 23552  }
  0x11   : > { %s16323_s16 = scalar_lea.vmem %s21372_s0, %s12888_s27  ;;  %s16214_s25 = smov 127   ;;  %vm5073_vm11 = vcmask 1022976   ;;  %vm5202_vm12 = vcmask 285696   ;;  %vm5459_vm13 = vcmask 236544   ;;  %vm9443_vm14 = vcmask 392192  }
  0x12   : > { %v534_v6 = vld [vmem:[%s16323_s16 + $0x18] sm:$0xff]  ;;  %v536_v8 = vld [vmem:[%s16323_s16 + $0x28] sm:$0xff]  ;;  %v533_v11 = vld [vmem:[%s16323_s16 + $0x10] sm:$0xff]  ;;  %s16217_s26 = smov 95   ;;  %s16218_s18 = smov 99   ;;  %vm9935_vm15 = vcmask 588800  }
  0x13   : > { %v538_v7 = vld [vmem:[%s16323_s16 + $0x58] sm:$0xff]  ;;  %v540_v10 = vld [vmem:[%s16323_s16 + $0x68] sm:$0xff]  ;;  %v537_v12 = vld [vmem:[%s16323_s16 + $0x50] sm:$0xff]  ;;  %s16220_s27 = smov 3   ;;  %s16221_s28 = smov 125  }
  0x14   : > { %v12890_v9 = vpack.c.bf16 %v538_v7, %v534_v6  ;;  %1108 = vperm.xlu0 %14288, %v1088_v4   ;;  %1118 = vperm.xlu1 %14289, %v1090_v5   ;;  %v12922_v13 = vpack.c.bf16 %v540_v10, %v536_v8  ;;  %v12892_v14 = vpack.c.bf16 %v537_v12, %v533_v11  ;;  %v535_v15 = vld [vmem:[%s16323_s16 + $0x20] sm:$0xff]  ;;  %v542_v17 = vld [vmem:[%s16323_s16 + $0x98] sm:$0xff]  ;;  %v544_v20 = vld [vmem:[%s16323_s16 + $0xa8] sm:$0xff]  ;;  %s16222_s29 = smov 35   ;;  %s21429_s13 = smov 29  }
  0x15   : > { %v539_v16 = vld [vmem:[%s16323_s16 + $0x60] sm:$0xff]  ;;  %v546_v19 = vld [vmem:[%s16323_s16 + $0xd8] sm:$0xff]  ;;  %v548_v21 = vld [vmem:[%s16323_s16 + $0xe8] sm:$0xff]  ;;  %s21681_s14 = smov 29   ;;  %s16225_s30 = smov 27  }
  0x16   : > { %12891 = vmatprep.subr.bf16.mxu0 %v12890_v9  ;;  %v12924_v18 = vpack.c.bf16 %v539_v16, %v535_v15  ;;  %12923 = vmatprep.subr.bf16.mxu1 %v12922_v13  ;;  %v12894_v22 = vpack.c.bf16 %v546_v19, %v542_v17  ;;  %v12926_v23 = vpack.c.bf16 %v548_v21, %v544_v20  ;;  %v541_v24 = vld [vmem:[%s16323_s16 + $0x90] sm:$0xff]  ;;  %v543_v26 = vld [vmem:[%s16323_s16 + $0xa0] sm:$0xff]  ;;  %v550_v29 = vld [vmem:[%s16323_s16 + $0x118] sm:$0xff] }
  0x17   : > { %12893 = vmatpush1.bf16.msra.mxu0 %v12892_v14  ;;  %v545_v25 = vld [vmem:[%s16323_s16 + $0xd0] sm:$0xff]  ;;  %v547_v28 = vld [vmem:[%s16323_s16 + $0xe0] sm:$0xff]  ;;  %v554_v30 = vld [vmem:[%s16323_s16 + $0x158] sm:$0xff] }
  0x18   : > { %12925 = vmatpush1.bf16.msra.mxu1 %v12924_v18  ;;  %v12896_v27 = vpack.c.bf16 %v545_v25, %v541_v24  ;;  %12895 = vmatprep.subr.bf16.mxu0 %v12894_v22  ;;  %v12928_v31 = vpack.c.bf16 %v547_v28, %v543_v26  ;;  %v12898_v32 = vpack.c.bf16 %v554_v30, %v550_v29  ;;  %v552_v33 = vld [vmem:[%s16323_s16 + $0x128] sm:$0xff]  ;;  %v549_v35 = vld [vmem:[%s16323_s16 + $0x110] sm:$0xff]  ;;  %v551_v38 = vld [vmem:[%s16323_s16 + $0x120] sm:$0xff] }
  0x19   : > { %12927 = vmatprep.subr.bf16.mxu1 %v12926_v23  ;;  %v556_v34 = vld [vmem:[%s16323_s16 + $0x168] sm:$0xff]  ;;  %v553_v37 = vld [vmem:[%s16323_s16 + $0x150] sm:$0xff]  ;;  %v555_v39 = vld [vmem:[%s16323_s16 + $0x160] sm:$0xff] }
  0x1a   : > { %v12930_v36 = vpack.c.bf16 %v556_v34, %v552_v33  ;;  %v12900_v40 = vpack.c.bf16 %v553_v37, %v549_v35  ;;  %v558_v41 = vld [vmem:[%s16323_s16 + $0x198] sm:$0xff]  ;;  %v560_v43 = vld [vmem:[%s16323_s16 + $0x1a8] sm:$0xff]  ;;  %v12932_v44 = vpack.c.bf16 %v555_v39, %v551_v38  ;;  %v557_v47 = vld [vmem:[%s16323_s16 + $0x190] sm:$0xff] }
  0x1b   : > { %12897 = vmatpush1.bf16.msra.mxu0 %v12896_v27  ;;  %v562_v42 = vld [vmem:[%s16323_s16 + $0x1d8] sm:$0xff]  ;;  %v564_v46 = vld [vmem:[%s16323_s16 + $0x1e8] sm:$0xff]  ;;  %v561_v48 = vld [vmem:[%s16323_s16 + $0x1d0] sm:$0xff] }
  0x1c   : > { %12929 = vmatpush1.bf16.msra.mxu1 %v12928_v31  ;;  %12899 = vmatprep.subr.bf16.mxu0 %v12898_v32  ;;  %v12902_v45 = vpack.c.bf16 %v562_v42, %v558_v41  ;;  %v12934_v49 = vpack.c.bf16 %v564_v46, %v560_v43  ;;  %v559_v50 = vld [vmem:[%s16323_s16 + $0x1a0] sm:$0xff]  ;;  %v566_v52 = vld [vmem:[%s16323_s16 + $0x218] sm:$0xff]  ;;  %v568_v54 = vld [vmem:[%s16323_s16 + $0x228] sm:$0xff]  ;;  %v12904_v56 = vpack.c.bf16 %v561_v48, %v557_v47  ;;  %v1284_v47 = vlaneseq }
  0x1d   : > { %12931 = vmatprep.subr.bf16.mxu1 %v12930_v36  ;;  %v563_v51 = vld [vmem:[%s16323_s16 + $0x1e0] sm:$0xff]  ;;  %v570_v53 = vld [vmem:[%s16323_s16 + $0x258] sm:$0xff]  ;;  %v572_v55 = vld [vmem:[%s16323_s16 + $0x268] sm:$0xff] }
  0x1e   : > { %v12936_v57 = vpack.c.bf16 %v563_v51, %v559_v50  ;;  %v12906_v58 = vpack.c.bf16 %v570_v53, %v566_v52  ;;  %v565_v59 = vld [vmem:[%s16323_s16 + $0x210] sm:$0xff]  ;;  %v567_v61 = vld [vmem:[%s16323_s16 + $0x220] sm:$0xff]  ;;  %v12938_v62 = vpack.c.bf16 %v572_v55, %v568_v54  ;;  %v574_v1 = vld [vmem:[%s16323_s16 + $0x298] sm:$0xff]  ;;  %v1285_v48 = vshrl.u32 %v1284_v47, 7 }
  0x1f   : > { %12901 = vmatpush1.bf16.msra.mxu0 %v12900_v40  ;;  %v569_v60 = vld [vmem:[%s16323_s16 + $0x250] sm:$0xff]  ;;  %v571_v63 = vld [vmem:[%s16323_s16 + $0x260] sm:$0xff]  ;;  %v578_v2 = vld [vmem:[%s16323_s16 + $0x2d8] sm:$0xff] }
  0x20   : > { %12933 = vmatpush1.bf16.msra.mxu1 %v12932_v44  ;;  %12903 = vmatprep.subr.bf16.mxu0 %v12902_v45  ;;  %v576_v3 = vld [vmem:[%s16323_s16 + $0x2a8] sm:$0xff]  ;;  %v12908_v5 = vpack.c.bf16 %v569_v60, %v565_v59  ;;  %v12940_v6 = vpack.c.bf16 %v571_v63, %v567_v61  ;;  %v12910_v7 = vpack.c.bf16 %v578_v2, %v574_v1  ;;  %v573_v8 = vld [vmem:[%s16323_s16 + $0x290] sm:$0xff]  ;;  %v575_v10 = vld [vmem:[%s16323_s16 + $0x2a0] sm:$0xff]  ;;  %v1286_v50 = vsub.s32 0, %v1285_v48 }
  0x21   : > { %12935 = vmatprep.subr.bf16.mxu1 %v12934_v49  ;;  %v580_v4 = vld [vmem:[%s16323_s16 + $0x2e8] sm:$0xff]  ;;  %v577_v9 = vld [vmem:[%s16323_s16 + $0x2d0] sm:$0xff]  ;;  %v579_v12 = vld [vmem:[%s16323_s16 + $0x2e0] sm:$0xff]  ;;  %v1294_v51 = vsub.s32 2, %v1285_v48  ;;  %v1290_v53 = vsub.s32 1, %v1285_v48  ;;  %v1298_v54 = vsub.s32 3, %v1285_v48 }
  0x22   : > { %v12942_v11 = vpack.c.bf16 %v580_v4, %v576_v3  ;;  %v582_v13 = vld [vmem:[%s16323_s16 + $0x318] sm:$0xff]  ;;  %v584_v15 = vld [vmem:[%s16323_s16 + $0x328] sm:$0xff]  ;;  %v12912_v17 = vpack.c.bf16 %v577_v9, %v573_v8  ;;  %v12944_v18 = vpack.c.bf16 %v579_v12, %v575_v10  ;;  %v581_v20 = vld [vmem:[%s16323_s16 + $0x310] sm:$0xff] }
  0x23   : > { %12905 = vmatpush1.bf16.msra.mxu0 %v12904_v56  ;;  %v586_v14 = vld [vmem:[%s16323_s16 + $0x358] sm:$0xff]  ;;  %v588_v16 = vld [vmem:[%s16323_s16 + $0x368] sm:$0xff]  ;;  %v585_v21 = vld [vmem:[%s16323_s16 + $0x350] sm:$0xff] }
  0x24   : > { %12937 = vmatpush1.bf16.msra.mxu1 %v12936_v57  ;;  %12907 = vmatprep.subr.bf16.mxu0 %v12906_v58  ;;  %v12914_v19 = vpack.c.bf16 %v586_v14, %v582_v13  ;;  %v583_v22 = vld [vmem:[%s16323_s16 + $0x320] sm:$0xff]  ;;  %v12946_v23 = vpack.c.bf16 %v588_v16, %v584_v15  ;;  %v590_v25 = vld [vmem:[%s16323_s16 + $0x398] sm:$0xff]  ;;  %v592_v27 = vld [vmem:[%s16323_s16 + $0x3a8] sm:$0xff]  ;;  %v12916_v29 = vpack.c.bf16 %v585_v21, %v581_v20 }
  0x25   : > { %12939 = vmatprep.subr.bf16.mxu1 %v12938_v62  ;;  %v587_v24 = vld [vmem:[%s16323_s16 + $0x360] sm:$0xff]  ;;  %v594_v26 = vld [vmem:[%s16323_s16 + $0x3d8] sm:$0xff]  ;;  %v596_v28 = vld [vmem:[%s16323_s16 + $0x3e8] sm:$0xff] }
  0x26   : > { %v12948_v30 = vpack.c.bf16 %v587_v24, %v583_v22  ;;  %v12918_v31 = vpack.c.bf16 %v594_v26, %v590_v25  ;;  %v589_v32 = vld [vmem:[%s16323_s16 + $0x390] sm:$0xff]  ;;  %v12950_v34 = vpack.c.bf16 %v596_v28, %v592_v27  ;;  %v591_v35 = vld [vmem:[%s16323_s16 + $0x3a0] sm:$0xff]  ;;  %v504_v40 = vld [vmem:[%s21374_s2 + $0x8] sm:$0xff] }
  0x27   : > { %12909 = vmatpush1.bf16.msra.mxu0 %v12908_v5  ;;  %v593_v33 = vld [vmem:[%s16323_s16 + $0x3d0] sm:$0xff]  ;;  %v595_v36 = vld [vmem:[%s16323_s16 + $0x3e0] sm:$0xff]  ;;  %v506_v42 = vld [vmem:[%s21374_s2 + $0x18] sm:$0xff]  ;;  %s16215_s16 = smov 97  }
  0x28   : > { %12941 = vmatpush1.bf16.msra.mxu1 %v12940_v6  ;;  %12911 = vmatprep.subr.bf16.mxu0 %v12910_v7  ;;  %v12920_v37 = vpack.c.bf16 %v593_v33, %v589_v32  ;;  %v12952_v38 = vpack.c.bf16 %v595_v36, %v591_v35  ;;  %v503_v39 = vld [vmem:[%s21374_s2] sm:$0xff]  ;;  %v505_v41 = vld [vmem:[%s21374_s2 + $0x10] sm:$0xff]  ;;  %v508_v44 = vld [vmem:[%s21374_s2 + $0x28] sm:$0xff] }
  0x29   : > { %12943 = vmatprep.subr.bf16.mxu1 %v12942_v11  ;;  %v507_v43 = vld [vmem:[%s21374_s2 + $0x20] sm:$0xff]  ;;  %v509_v45 = vld [vmem:[%s21374_s2 + $0x30] sm:$0xff]  ;;  %v510_v46 = vld [vmem:[%s21374_s2 + $0x38] sm:$0xff] }
  0x2a   : > { %v414_v52 = vld [vmem:[%s21373_s1] sm:$0xf] }
  0x2b   : > { %12913 = vmatpush1.bf16.msra.mxu0 %v12912_v17  ;;  %v16432_v59 = vrot.slane %v414_v52, %v1286_v50  ;;  %v16434_v61 = vrot.slane %v414_v52, %v1294_v51  ;;  %v16436_v2 = vrot.slane %v414_v52, %v1290_v53  ;;  %v16438_v4 = vrot.slane %v414_v52, %v1298_v54 }
  0x2c   : > { %12945 = vmatpush1.bf16.msra.mxu1 %v12944_v18  ;;  %12915 = vmatprep.subr.bf16.mxu0 %v12914_v19 }
  0x2d   : > { %12947 = vmatprep.subr.bf16.mxu1 %v12946_v23  ;;  %21473 = vst [vmem:[#allocation7_spill] sm:$0xff] %v16432_v59  ;;  %21474 = vst [vmem:[#allocation8_spill] sm:$0xff] %v16434_v61 }
  0x2e   : > { %21475 = vst [vmem:[#allocation9_spill] sm:$0xff] %v16436_v2  ;;  %21476 = vst [vmem:[#allocation10_spill] sm:$0xff] %v16438_v4 }
  0x2f   : > { %12917 = vmatpush1.bf16.msra.mxu0 %v12916_v29 }
  0x30   : > { %12949 = vmatpush1.bf16.msra.mxu1 %v12948_v30  ;;  %12919 = vmatprep.subr.bf16.mxu0 %v12918_v31 }
  0x31   : > { %12951 = vmatprep.subr.bf16.mxu1 %v12950_v34 }
  0x33   : > { %12921 = vmatpush1.bf16.msra.mxu0 %v12920_v37 }
  0x34   : > { %12953 = vmatpush1.bf16.msra.mxu1 %v12952_v38 }
  0x36   : > { %662 = vmatmul.mubr.f32.vlgmr.msra.gmra.mrb[0].mxu0 %v503_v39 }
  0x37   : > { %907 = vmatmul.mubr.f32.vlgmr.msra.gmra.mrb[0].mxu1 %v503_v39  ;;  %667 = vmatprep.mubr.f32.mxu0 %v21393_v0 }
  0x38   : > { %912 = vmatprep.mubr.f32.mxu1 %v21393_v0 }
  0x3a   : > { %668 = vmatmul.mubr.f32.gmra.mrb[2].mxu0 %v504_v40 }
  0x3b   : > { %913 = vmatmul.mubr.f32.gmra.mrb[2].mxu1 %v504_v40  ;;  %673 = vmatprep.mubr.f32.mxu0 %v21393_v0 }
  0x3c   : > { %918 = vmatprep.mubr.f32.mxu1 %v21393_v0 }
  0x3e   : > { %674 = vmatmul.mubr.f32.gmra.mrb[4].mxu0 %v505_v41 }
  0x3f   : > { %919 = vmatmul.mubr.f32.gmra.mrb[4].mxu1 %v505_v41  ;;  %679 = vmatprep.mubr.f32.mxu0 %v21393_v0 }
  0x40   : > { %924 = vmatprep.mubr.f32.mxu1 %v21393_v0 }
  0x42   : > { %680 = vmatmul.mubr.f32.gmra.mrb[6].mxu0 %v506_v42 }
  0x43   : > { %925 = vmatmul.mubr.f32.gmra.mrb[6].mxu1 %v506_v42  ;;  %685 = vmatprep.mubr.f32.mxu0 %v21393_v0 }
  0x44   : > { %930 = vmatprep.mubr.f32.mxu1 %v21393_v0 }
  0x46   : > { %686 = vmatmul.mubr.f32.gmra.mrb[8].mxu0 %v507_v43 }
  0x47   : > { %931 = vmatmul.mubr.f32.gmra.mrb[8].mxu1 %v507_v43  ;;  %691 = vmatprep.mubr.f32.mxu0 %v21393_v0 }
  0x48   : > { %936 = vmatprep.mubr.f32.mxu1 %v21393_v0 }
  0x4a   : > { %692 = vmatmul.mubr.f32.gmra.mrb[10].mxu0 %v508_v44 }
  0x4b   : > { %937 = vmatmul.mubr.f32.gmra.mrb[10].mxu1 %v508_v44  ;;  %697 = vmatprep.mubr.f32.mxu0 %v21393_v0 }
  0x4c   : > { %942 = vmatprep.mubr.f32.mxu1 %v21393_v0 }
  0x4e   : > { %698 = vmatmul.mubr.f32.gmra.mrb[12].mxu0 %v509_v45 }
  0x4f   : > { %943 = vmatmul.mubr.f32.gmra.mrb[12].mxu1 %v509_v45  ;;  %703 = vmatprep.mubr.f32.mxu0 %v21393_v0 }
  0x50   : > { %948 = vmatprep.mubr.f32.mxu1 %v21393_v0 }
  0x52   : > { %704 = vmatmul.mubr.f32.gmra.mrb[14].mxu0 %v510_v46 }
  0x53   : > { %949 = vmatmul.mubr.f32.gmra.mrb[14].mxu1 %v510_v46  ;;  %709 = vmatprep.mubr.f32.mxu0 %v21393_v0 }
  0x54   : > { %954 = vmatprep.mubr.f32.mxu1 %v21393_v0 }
  0x8f   : > { %v1104_v49 = vpop.permute.xlu0 %1103  ;;  %v1114_v18 = vpop.permute.xlu1 %1113 }
  0x93   : > { %v1109_v5 = vpop.permute.xlu0 %1108  ;;  %v1119_v38 = vpop.permute.xlu1 %1118 }
 0x109   : > { %v663_v55 = vpop.f32.mrb[0].mxu0 }
 0x10a   : > { %v1171_v56 = vadd.f32 %v1104_v49, %v663_v55  ;;  %v908_v57 = vpop.f32.mrb[0].mxu1  ;;  %v665_v58 = vpop.f32.mrb[1].mxu0 }
 0x10b   : > { %v1173_v60 = vadd.f32 %v1104_v49, %v908_v57  ;;  %v1172_v62 = vadd.f32 %v1104_v49, %v665_v58  ;;  %v910_v63 = vpop.f32.mrb[1].mxu1 }
 0x10c   : > { %v1227_v1 = vmax.f32 %v1171_v56, 0.0  ;;  %v1174_v3 = vadd.f32 %v1104_v49, %v910_v63 }
 0x10d   : > { %v1229_v6 = vmax.f32 %v1173_v60, 0.0  ;;  %v1228_v7 = vmax.f32 %v1172_v62, 0.0  ;;  %v669_v8 = vpop.f32.mrb[2].mxu0 }
 0x10e   : > { %v1230_v9 = vmax.f32 %v1174_v3, 0.0  ;;  %v1175_v10 = vadd.f32 %v1109_v5, %v669_v8  ;;  %v914_v11 = vpop.f32.mrb[2].mxu1  ;;  %v671_v12 = vpop.f32.mrb[3].mxu0  ;;  %v16441_v13 = vmul.f32 %v16432_v59, %v1227_v1 }
 0x10f   : > { %v16444_v14 = vmul.f32 %v16434_v61, %v1229_v6  ;;  %v1177_v15 = vadd.f32 %v1109_v5, %v914_v11  ;;  %v1176_v16 = vadd.f32 %v1109_v5, %v671_v12  ;;  %v916_v17 = vpop.f32.mrb[3].mxu1  ;;  %v16447_v19 = vmul.f32 %v16436_v2, %v1228_v7 }
 0x110   : > { %v16450_v20 = vmul.f32 %v16438_v4, %v1230_v9  ;;  %v1231_v21 = vmax.f32 %v1175_v10, 0.0  ;;  %v1178_v22 = vadd.f32 %v1109_v5, %v916_v17 }
 0x111   : > { %21477 = vst [vmem:[#allocation11_spill] sm:$0xff] %v16444_v14  ;;  %v1233_v23 = vmax.f32 %v1177_v15, 0.0  ;;  %v1232_v24 = vmax.f32 %v1176_v16, 0.0  ;;  %v14290_v25 = vpack.i.bf16 %v16444_v14, %v21393_v0  ;;  %v675_v26 = vpop.f32.mrb[4].mxu0  ;;  %v16469_v35 = vpack.i.bf16 %v16447_v19, %v16441_v13 }
 0x112   : > { %21478 = vst [vmem:[#allocation12_spill] sm:$0xff] %v16450_v20  ;;  %v16455_v27 = vmul.f32 %v16432_v59, %v1231_v21  ;;  %v1234_v28 = vmax.f32 %v1178_v22, 0.0  ;;  %v14315_v29 = vpack.i.bf16 %v21393_v0, %v16450_v20  ;;  %v920_v30 = vpop.f32.mrb[4].mxu1  ;;  %v677_v31 = vpop.f32.mrb[5].mxu0  ;;  %v16481_v42 = vpack.i.bf16 %v16444_v14, %v16447_v19 }
 0x113   : > { %v16460_v32 = vmul.f32 %v16436_v2, %v1232_v24  ;;  %14291 = vrot.lane.b32.xlu0 %v14290_v25, %s16210_s19  ;;  %v922_v33 = vpop.f32.mrb[5].mxu1  ;;  %v16464_v34 = vmul.f32 %v16434_v61, %v1233_v23  ;;  %v1179_v43 = vadd.f32 %v1114_v18, %v675_v26  ;;  %v1181_v46 = vadd.f32 %v1114_v18, %v920_v30 }
 0x114   : > { %14316 = vrot.lane.b32.xlu1 %v14315_v29, %s16210_s19  ;;  %v16476_v39 = vmul.f32 %v16438_v4, %v1234_v28  ;;  %v1182_v44 = vadd.f32 %v1114_v18, %v922_v33  ;;  %v1180_v47 = vadd.f32 %v1114_v18, %v677_v31  ;;  %v16494_v1 = vpack.i.bf16 %v16450_v20, %v16441_v13 }
 0x115   : > { %21479 = vst [vmem:[#allocation13_spill] sm:$0xff] %v16464_v34  ;;  %v16473_v36 = vpack.i.bf16 %v16460_v32, %v16455_v27  ;;  %v681_v37 = vpop.f32.mrb[6].mxu0  ;;  %v1235_v50 = vmax.f32 %v1179_v43, 0.0  ;;  %v1237_v60 = vmax.f32 %v1181_v46, 0.0  ;;  %v16501_v5 = vpack.i.bf16 %v16464_v34, %v16460_v32  ;;  %v514_v43 = vld [vmem:[%s21374_s2 + $0x58] sm:$0xff]  ;;  %v517_v46 = vld [vmem:[%s21374_s2 + $0x70] sm:$0xff] }
 0x116   : > { %21480 = vst [vmem:[#allocation14_spill] sm:$0xff] %v16476_v39  ;;  %v926_v40 = vpop.f32.mrb[6].mxu1  ;;  %v683_v41 = vpop.f32.mrb[7].mxu0  ;;  %v1183_v48 = vadd.f32 %v1119_v38, %v681_v37  ;;  %v1238_v51 = vmax.f32 %v1182_v44, 0.0  ;;  %v1236_v54 = vmax.f32 %v1180_v47, 0.0  ;;  %v14370_v6 = vpack.i.bf16 %v16476_v39, %v16464_v34  ;;  %v511_v37 = vld [vmem:[%s21374_s2 + $0x40] sm:$0xff] }
 0x117   : > { %14296 = vrot.lane.b32.xlu0 %v14290_v25, %s21431_s20  ;;  %v928_v45 = vpop.f32.mrb[7].mxu1  ;;  %v1185_v49 = vadd.f32 %v1119_v38, %v926_v40  ;;  %v1184_v52 = vadd.f32 %v1119_v38, %v683_v41  ;;  %v16487_v62 = vmul.f32 %v16432_v59, %v1235_v50  ;;  %v16520_v11 = vmul.f32 %v16434_v61, %v1237_v60  ;;  %v513_v41 = vld [vmem:[%s21374_s2 + $0x50] sm:$0xff]  ;;  %v515_v44 = vld [vmem:[%s21374_s2 + $0x60] sm:$0xff]  ;;  %v518_v47 = vld [vmem:[%s21374_s2 + $0x78] sm:$0xff] }
 0x118   : > { %14326 = vrot.lane.b32.xlu1 %v14315_v29, %s21431_s20  ;;  %v1186_v53 = vadd.f32 %v1119_v38, %v928_v45  ;;  %v1239_v55 = vmax.f32 %v1183_v48, 0.0  ;;  %v16490_v63 = vmul.f32 %v16436_v2, %v1236_v54  ;;  %v16497_v3 = vmul.f32 %v16438_v4, %v1238_v51  ;;  %710 = vmatmul.mubr.f32.gmra.mrb[16].mxu0 %v511_v37  ;;  %v512_v38 = vld [vmem:[%s21374_s2 + $0x48] sm:$0xff]  ;;  %v519_v48 = vld [vmem:[%s21374_s2 + $0x80] sm:$0xff]  ;;  %v521_v50 = vld [vmem:[%s21374_s2 + $0x90] sm:$0xff] }
 0x119   : > { %v1241_v56 = vmax.f32 %v1185_v49, 0.0  ;;  %v1240_v57 = vmax.f32 %v1184_v52, 0.0  ;;  %21481 = vst [vmem:[#allocation15_spill] sm:$0xff] %v16487_v62  ;;  %21488 = vst [vmem:[#allocation22_spill] sm:$0xff] %v16520_v11  ;;  %v16526_v15 = vpack.i.bf16 %v16455_v27, %v21393_v0  ;;  %v14415_v33 = vpack.i.bf16 %v16520_v11, %v21393_v0  ;;  %955 = vmatmul.mubr.f32.gmra.mrb[16].mxu1 %v511_v37  ;;  %v516_v45 = vld [vmem:[%s21374_s2 + $0x68] sm:$0xff]  ;;  %v522_v51 = vld [vmem:[%s21374_s2 + $0x98] sm:$0xff] }
 0x11a   : > { %v1242_v58 = vmax.f32 %v1186_v53, 0.0  ;;  %21482 = vst [vmem:[#allocation16_spill] sm:$0xff] %v16490_v63  ;;  %21483 = vst [vmem:[#allocation17_spill] sm:$0xff] %v16497_v3  ;;  %v16506_v7 = vmul.f32 %v16432_v59, %v1239_v55  ;;  %v14435_v12 = vpack.i.bf16 %v16490_v63, %v16487_v62  ;;  %v16530_v16 = vpack.i.bf16 %v16520_v11, %v16490_v63  ;;  %v520_v49 = vld [vmem:[%s21374_s2 + $0x88] sm:$0xff]  ;;  %v523_v55 = vld [vmem:[%s21374_s2 + $0xa0] sm:$0xff]  ;;  %v16776_v37 = vpop.f32.mrb[8].mxu0 }
 0x11b   : > { %14301 = vrot.lane.b32.xlu0 %v14290_v25, %s16212_s23  ;;  %v16509_v8 = vmul.f32 %v16436_v2, %v1240_v57  ;;  %v16513_v9 = vmul.f32 %v16434_v61, %v1241_v56  ;;  %v16538_v18 = vpack.i.bf16 %v16497_v3, %v16487_v62  ;;  %715 = vmatprep.mubr.f32.mxu0 %v21393_v0  ;;  %v524_v60 = vld [vmem:[%s21374_s2 + $0xa8] sm:$0xff] }
 0x11c   : > { %14336 = vrot.lane.b32.xlu1 %v14315_v29, %s16212_s23  ;;  %21484 = vst [vmem:[#allocation18_spill] sm:$0xff] %v16506_v7  ;;  %v16516_v10 = vmul.f32 %v16438_v4, %v1242_v58  ;;  %960 = vmatprep.mubr.f32.mxu1 %v21393_v0  ;;  %v16632_v40 = vpack.i.bf16 %v16506_v7, %v21393_v0  ;;  %21489 = vst [vmem:[#allocation23_spill] sm:$0xff] %v16776_v37 }
 0x11d   : > { %21485 = vst [vmem:[#allocation19_spill] sm:$0xff] %v16509_v8  ;;  %21486 = vst [vmem:[#allocation20_spill] sm:$0xff] %v16513_v9  ;;  %v16534_v17 = vpack.i.bf16 %v16509_v8, %v16506_v7  ;;  %v16552_v22 = vpack.i.bf16 %v16513_v9, %v16509_v8  ;;  %716 = vmatmul.mubr.f32.gmra.mrb[18].mxu0 %v512_v38  ;;  %961 = vmatmul.mubr.f32.gmra.mrb[18].mxu1 %v512_v38 }
 0x11e   : > { %21487 = vst [vmem:[#allocation21_spill] sm:$0xff] %v16516_v10  ;;  %v16544_v21 = vpack.i.bf16 %v16516_v10, %v16513_v9  ;;  %721 = vmatprep.mubr.f32.mxu0 %v21393_v0  ;;  %966 = vmatprep.mubr.f32.mxu1 %v21393_v0  ;;  %v16737_v57 = vpack.i.bf16 %v21393_v0, %v16516_v10 }
 0x11f   : > { %14306 = vrot.lane.b32.xlu0 %v14290_v25, %s16213_s24  ;;  %v1092_v25 = vld [vmem:[%s21383_s11 + $0x28] sm:$0xff] }
 0x120   : > { %14346 = vrot.lane.b32.xlu1 %v14315_v29, %s16213_s24 }
 0x121   : > { %722 = vmatmul.mubr.f32.gmra.mrb[20].mxu0 %v513_v41  ;;  %967 = vmatmul.mubr.f32.gmra.mrb[20].mxu1 %v513_v41  ;;  %v16780_v41 = vpop.f32.mrb[8].mxu1 }
 0x122   : > { %727 = vmatprep.mubr.f32.mxu0 %v21393_v0  ;;  %972 = vmatprep.mubr.f32.mxu1 %v21393_v0  ;;  %21490 = vst [vmem:[#allocation24_spill] sm:$0xff] %v16780_v41 }
 0x123   : > { %14311 = vrot.lane.b32.xlu0 %v16469_v35, %s16210_s19 }
 0x124   : > { %14361 = vrot.lane.b32.xlu1 %v16526_v15, %s16214_s25 }
 0x125   : > { %728 = vmatmul.mubr.f32.gmra.mrb[22].mxu0 %v514_v43  ;;  %973 = vmatmul.mubr.f32.gmra.mrb[22].mxu1 %v514_v43  ;;  %v527_v43 = vld [vmem:[%s21374_s2 + $0xc0] sm:$0xff] }
 0x126   : > { %733 = vmatprep.mubr.f32.mxu0 %v21393_v0  ;;  %978 = vmatprep.mubr.f32.mxu1 %v21393_v0 }
 0x127   : > { %14321 = vrot.lane.b32.xlu0 %v16469_v35, %s21431_s20 }
 0x128   : > { %14366 = vrot.lane.b32.xlu1 %v16473_v36, %s16210_s19 }
 0x129   : > { %734 = vmatmul.mubr.f32.gmra.mrb[24].mxu0 %v515_v44  ;;  %979 = vmatmul.mubr.f32.gmra.mrb[24].mxu1 %v515_v44  ;;  %v16788_v44 = vpop.f32.mrb[9].mxu0 }
 0x12a   : > { %739 = vmatprep.mubr.f32.mxu0 %v21393_v0  ;;  %984 = vmatprep.mubr.f32.mxu1 %v21393_v0  ;;  %21491 = vst [vmem:[#allocation25_spill] sm:$0xff] %v16788_v44 }
 0x12b   : > { %14331 = vrot.lane.b32.xlu0 %v16469_v35, %s16212_s23 }
 0x12c   : > { %14376 = vrot.lane.b32.xlu1 %v16473_v36, %s21431_s20 }
 0x12d   : > { %740 = vmatmul.mubr.f32.gmra.mrb[26].mxu0 %v516_v45  ;;  %985 = vmatmul.mubr.f32.gmra.mrb[26].mxu1 %v516_v45  ;;  %v16790_v45 = vpop.f32.mrb[9].mxu1 }
 0x12e   : > { %745 = vmatprep.mubr.f32.mxu0 %v21393_v0  ;;  %990 = vmatprep.mubr.f32.mxu1 %v21393_v0  ;;  %21492 = vst [vmem:[#allocation26_spill] sm:$0xff] %v16790_v45 }
 0x12f   : > { %14341 = vrot.lane.b32.xlu0 %v16469_v35, %s16213_s24  ;;  %v16600_v35 = vpack.i.bf16 %v21393_v0, %v16476_v39 }
 0x130   : > { %14386 = vrot.lane.b32.xlu1 %v16473_v36, %s16212_s23 }
 0x131   : > { %746 = vmatmul.mubr.f32.gmra.mrb[28].mxu0 %v517_v46  ;;  %991 = vmatmul.mubr.f32.gmra.mrb[28].mxu1 %v517_v46  ;;  %v16795_v46 = vpop.f32.mrb[10].mxu1 }
 0x132   : > { %751 = vmatprep.mubr.f32.mxu0 %v21393_v0  ;;  %996 = vmatprep.mubr.f32.mxu1 %v21393_v0  ;;  %21493 = vst [vmem:[#allocation27_spill] sm:$0xff] %v16795_v46 }
 0x133   : > { %14351 = vrot.lane.b32.xlu0 %v16481_v42, %s16214_s25 }
 0x134   : > { %14396 = vrot.lane.b32.xlu1 %v16473_v36, %s16213_s24  ;;  %v14440_v36 = vpack.i.bf16 %v21393_v0, %v16497_v3 }
 0x135   : > { %752 = vmatmul.mubr.f32.gmra.mrb[30].mxu0 %v518_v47  ;;  %997 = vmatmul.mubr.f32.gmra.mrb[30].mxu1 %v518_v47 }
 0x136   : > { %757 = vmatprep.mubr.f32.mxu0 %v21393_v0  ;;  %1002 = vmatprep.mubr.f32.mxu1 %v21393_v0 }
 0x137   : > { %14356 = vrot.lane.b32.xlu0 %v16494_v1, %s16214_s25 }
 0x138   : > { %14406 = vrot.lane.b32.xlu1 %v16501_v5, %s16214_s25 }
 0x139   : > { %758 = vmatmul.mubr.f32.gmra.mrb[32].mxu0 %v519_v48  ;;  %1003 = vmatmul.mubr.f32.gmra.mrb[32].mxu1 %v519_v48 }
 0x13a   : > { %763 = vmatprep.mubr.f32.mxu0 %v21393_v0  ;;  %1008 = vmatprep.mubr.f32.mxu1 %v21393_v0 }
 0x13b   : > { %14371 = vrot.lane.b32.xlu0 %v14370_v6, %s16210_s19 }
 0x13c   : > { %14416 = vrot.lane.b32.xlu1 %v14415_v33, %s16210_s19 }
 0x13d   : > { %764 = vmatmul.mubr.f32.gmra.mrb[34].mxu0 %v520_v49  ;;  %1009 = vmatmul.mubr.f32.gmra.mrb[34].mxu1 %v520_v49 }
 0x13e   : > { %769 = vmatprep.mubr.f32.mxu0 %v21393_v0  ;;  %1014 = vmatprep.mubr.f32.mxu1 %v21393_v0 }
 0x13f   : > { %14381 = vrot.lane.b32.xlu0 %v14370_v6, %s21431_s20 }
 0x140   : > { %14421 = vrot.lane.b32.xlu1 %v14415_v33, %s21431_s20 }
 0x141   : > { %770 = vmatmul.mubr.f32.gmra.mrb[36].mxu0 %v521_v50  ;;  %1015 = vmatmul.mubr.f32.gmra.mrb[36].mxu1 %v521_v50 }
 0x142   : > { %775 = vmatprep.mubr.f32.mxu0 %v21393_v0  ;;  %1020 = vmatprep.mubr.f32.mxu1 %v21393_v0 }
 0x143   : > { %14391 = vrot.lane.b32.xlu0 %v14370_v6, %s16212_s23 }
 0x144   : > { %14426 = vrot.lane.b32.xlu1 %v14415_v33, %s16212_s23 }
 0x145   : > { %776 = vmatmul.mubr.f32.gmra.mrb[38].mxu0 %v522_v51  ;;  %1021 = vmatmul.mubr.f32.gmra.mrb[38].mxu1 %v522_v51 }
 0x146   : > { %781 = vmatprep.mubr.f32.mxu0 %v21393_v0  ;;  %1026 = vmatprep.mubr.f32.mxu1 %v21393_v0 }
 0x147   : > { %14401 = vrot.lane.b32.xlu0 %v14370_v6, %s16213_s24 }
 0x148   : > { %14431 = vrot.lane.b32.xlu1 %v14415_v33, %s16213_s24  ;;  %v526_v33 = vld [vmem:[%s21374_s2 + $0xb8] sm:$0xff] }
 0x149   : > { %782 = vmatmul.mubr.f32.gmra.mrb[40].mxu0 %v523_v55  ;;  %1027 = vmatmul.mubr.f32.gmra.mrb[40].mxu1 %v523_v55 }
 0x14a   : > { %787 = vmatprep.mubr.f32.mxu0 %v21393_v0  ;;  %1032 = vmatprep.mubr.f32.mxu1 %v21393_v0 }
 0x14b   : > { %14411 = vrot.lane.b32.xlu0 %v16600_v35, %s16214_s25 }
 0x14c   : > { %14436 = vrot.lane.b32.xlu1 %v14435_v12, %s16210_s19 }
 0x14d   : > { %788 = vmatmul.mubr.f32.gmra.mrb[42].mxu0 %v524_v60  ;;  %1033 = vmatmul.mubr.f32.gmra.mrb[42].mxu1 %v524_v60 }
 0x14e   : > { %793 = vmatprep.mubr.f32.mxu0 %v21393_v0  ;;  %1038 = vmatprep.mubr.f32.mxu1 %v21393_v0 }
 0x14f   : > { %14441 = vrot.lane.b32.xlu0 %v14440_v36, %s16210_s19 }
 0x150   : > { %14446 = vrot.lane.b32.xlu1 %v14435_v12, %s21431_s20 }
 0x153   : > { %14451 = vrot.lane.b32.xlu0 %v14440_v36, %s21431_s20 }
 0x154   : > { %14456 = vrot.lane.b32.xlu1 %v14435_v12, %s16212_s23 }
 0x157   : > { %14461 = vrot.lane.b32.xlu0 %v14440_v36, %s16212_s23 }
 0x158   : > { %14466 = vrot.lane.b32.xlu1 %v14435_v12, %s16213_s24 }
 0x15b   : > { %14471 = vrot.lane.b32.xlu0 %v14440_v36, %s16213_s24 }
 0x15c   : > { %14476 = vrot.lane.b32.xlu1 %v16530_v16, %s16214_s25 }
 0x15f   : > { %14486 = vrot.lane.b32.xlu0 %v16534_v17, %s16210_s19 }
 0x160   : > { %14481 = vrot.lane.b32.xlu1 %v16538_v18, %s16214_s25 }
 0x163   : > { %14491 = vrot.lane.b32.xlu0 %v16632_v40, %s16214_s25 }
 0x164   : > { %14496 = vrot.lane.b32.xlu1 %v16544_v21, %s16210_s19  ;;  %s16216_s19 = smov 96  }
 0x167   : > { %14501 = vrot.lane.b32.xlu0 %v16534_v17, %s21431_s20 }
 0x168   : > { %14511 = vrot.lane.b32.xlu1 %v16501_v5, %s16215_s16 }
 0x16b   : > { %14506 = vrot.lane.b32.xlu0 %v16481_v42, %s16215_s16 }
 0x16c   : > { %14516 = vrot.lane.b32.xlu1 %v16544_v21, %s21431_s20 }
 0x16f   : > { %14521 = vrot.lane.b32.xlu0 %v16534_v17, %s16212_s23 }
 0x170   : > { %14531 = vrot.lane.b32.xlu1 %v16526_v15, %s16215_s16 }
 0x173   : > { %14526 = vrot.lane.b32.xlu0 %v16494_v1, %s16215_s16 }
 0x174   : > { %14536 = vrot.lane.b32.xlu1 %v16544_v21, %s16212_s23 }
 0x177   : > { %14541 = vrot.lane.b32.xlu0 %v16534_v17, %s16213_s24  ;;  %v525_v17 = vld [vmem:[%s21374_s2 + $0xb0] sm:$0xff] }
 0x178   : > { %14551 = vrot.lane.b32.xlu1 %v16530_v16, %s16215_s16  ;;  %794 = vmatmul.mubr.f32.gmra.mrb[44].mxu0 %v525_v17 }
 0x179   : > { %1039 = vmatmul.mubr.f32.gmra.mrb[44].mxu1 %v525_v17  ;;  %799 = vmatprep.mubr.f32.mxu0 %v21393_v0 }
 0x17a   : > { %1044 = vmatprep.mubr.f32.mxu1 %v21393_v0 }
 0x17b   : > { %14546 = vrot.lane.b32.xlu0 %v16600_v35, %s16215_s16 }
 0x17c   : > { %14556 = vrot.lane.b32.xlu1 %v16544_v21, %s16213_s24  ;;  %800 = vmatmul.mubr.f32.gmra.mrb[46].mxu0 %v526_v33 }
 0x17d   : > { %1045 = vmatmul.mubr.f32.gmra.mrb[46].mxu1 %v526_v33  ;;  %805 = vmatprep.mubr.f32.mxu0 %v21393_v0  ;;  %v528_v33 = vld [vmem:[%s21374_s2 + $0xc8] sm:$0xff] }
 0x17e   : > { %1050 = vmatprep.mubr.f32.mxu1 %v21393_v0 }
 0x17f   : > { %14566 = vrot.lane.b32.xlu0 %v16632_v40, %s16215_s16 }
 0x180   : > { %14561 = vrot.lane.b32.xlu1 %v16538_v18, %s16215_s16  ;;  %806 = vmatmul.mubr.f32.gmra.mrb[48].mxu0 %v527_v43 }
 0x181   : > { %1051 = vmatmul.mubr.f32.gmra.mrb[48].mxu1 %v527_v43  ;;  %811 = vmatprep.mubr.f32.mxu0 %v21393_v0  ;;  %v1091_v43 = vld [vmem:[%s21383_s11 + $0x20] sm:$0xff] }
 0x182   : > { %1056 = vmatprep.mubr.f32.mxu1 %v21393_v0 }
 0x183   : > { %14571 = vrot.lane.b32.xlu0 %v16481_v42, %s16216_s19 }
 0x184   : > { %14576 = vrot.lane.b32.xlu1 %v16501_v5, %s16216_s19  ;;  %812 = vmatmul.mubr.f32.gmra.mrb[50].mxu0 %v528_v33 }
 0x185   : > { %v16718_v52 = vpop.permute.xlu0 %14291  ;;  %1057 = vmatmul.mubr.f32.gmra.mrb[50].mxu1 %v528_v33  ;;  %817 = vmatprep.mubr.f32.mxu0 %v21393_v0  ;;  %v529_v33 = vld [vmem:[%s21374_s2 + $0xd0] sm:$0xff] }
 0x186   : > { %v16720_v53 = vpop.permute.xlu1 %14316  ;;  %v14293_v51 = vunpack.i.l.bf16 %v16718_v52  ;;  %1062 = vmatprep.mubr.f32.mxu1 %v21393_v0 }
 0x187   : > { %14581 = vrot.lane.b32.xlu0 %v16552_v22, %s16214_s25  ;;  %v14319_v55 = vunpack.i.h.bf16 %v16720_v53  ;;  %v14318_v2 = vunpack.i.l.bf16 %v16720_v53 }
 0x188   : > { %14591 = vrot.lane.b32.xlu1 %v16526_v15, %s16216_s19  ;;  %818 = vmatmul.mubr.f32.gmra.mrb[52].mxu0 %v529_v33 }
 0x189   : > { %v16728_v54 = vpop.permute.xlu0 %14296  ;;  %1063 = vmatmul.mubr.f32.gmra.mrb[52].mxu1 %v529_v33  ;;  %823 = vmatprep.mubr.f32.mxu0 %v21393_v0 }
 0x18a   : > { %v16733_v56 = vpop.permute.xlu1 %14326  ;;  %1068 = vmatprep.mubr.f32.mxu1 %v21393_v0  ;;  %v530_v0 = vld [vmem:[%s21374_s2 + $0xd8] sm:$0xff] }
 0x18b   : > { %14586 = vrot.lane.b32.xlu0 %v16494_v1, %s16216_s19 }
 0x18c   : > { %14596 = vrot.lane.b32.xlu1 %v16737_v57, %s16214_s25  ;;  %824 = vmatmul.mubr.f32.gmra.mrb[54].mxu0 %v530_v0 }
 0x18d   : > { %v16745_v58 = vpop.permute.xlu0 %14301  ;;  %1069 = vmatmul.mubr.f32.gmra.mrb[54].mxu1 %v530_v0 }
 0x18e   : > { %v16750_v6 = vpop.permute.xlu1 %14336 }
 0x18f   : > { %14601 = vrot.lane.b32.xlu0 %v16552_v22, %s16215_s16 }
 0x190   : > { %14611 = vrot.lane.b32.xlu1 %v16530_v16, %s16216_s19 }
 0x191   : > { %v16758_v12 = vpop.permute.xlu0 %14306 }
 0x192   : > { %v16763_v21 = vpop.permute.xlu1 %14346  ;;  %v14308_v41 = vunpack.i.l.bf16 %v16758_v12 }
 0x193   : > { %14606 = vrot.lane.b32.xlu0 %v16600_v35, %s16216_s19 }
 0x194   : > { %14616 = vrot.lane.b32.xlu1 %v16737_v57, %s16215_s16 }
 0x195   : > { %v16774_v36 = vpop.permute.xlu0 %14311 }
 0x196   : > { %v16778_v38 = vpop.permute.xlu1 %14361  ;;  %v21386_v47 = vunpack.i.h.bf16 %v16774_v36  ;;  %v14313_v48 = vunpack.i.l.bf16 %v16774_v36 }
 0x197   : > { %14626 = vrot.lane.b32.xlu0 %v16552_v22, %s16216_s19 }
 0x198   : > { %14621 = vrot.lane.b32.xlu1 %v16538_v18, %s16216_s19  ;;  %v1785_v31 = vsel %vm1784_vm0, %v14293_v51, %v14313_v48  ;;  %v1786_v28 = vsel %vm1784_vm0, %v14313_v48, %v21386_v47  ;;  %v1093_v48 = vld [vmem:[%s21383_s11 + $0x30] sm:$0xff] }
 0x199   : > { %v16799_v49 = vpop.permute.xlu0 %14321 }
 0x19a   : > { %v16801_v50 = vpop.permute.xlu1 %14366 }
 0x19b   : > { %v21385_v60 = vunpack.i.h.bf16 %v16801_v50  ;;  %v14368_v17 = vunpack.i.l.bf16 %v16801_v50  ;;  %14631 = vrot.lane.b32.xlu0 %v16632_v40, %s16216_s19 }
 0x19c   : > { %14636 = vrot.lane.b32.xlu1 %v16737_v57, %s16216_s19 }
 0x19d   : > { %v1789_v30 = vsel %vm1784_vm0, %v14319_v55, %v14368_v17  ;;  %v16821_v29 = vpop.permute.xlu0 %14331  ;;  %v1790_v26 = vsel %vm1784_vm0, %v14368_v17, %v21385_v60  ;;  %v1094_v17 = vld [vmem:[%s21383_s11 + $0x38] sm:$0xff] }
 0x19e   : > { %v16832_v24 = vpop.permute.xlu1 %14376  ;;  %v12954_v23 = vpack.c.bf16 %v1790_v26, %v1786_v28  ;;  %v12956_v51 = vpack.c.bf16 %v1789_v30, %v1785_v31  ;;  %v16843_v26 = vpop.f32.mrb[10].mxu0  ;;  %v14333_v46 = vunpack.i.l.bf16 %v16821_v29 }
 0x19f   : > { %1123 = vperm.xlu0 %14288, %v1091_v43   ;;  %21494 = vst [vmem:[#allocation28_spill] sm:$0xff] %v16843_v26  ;;  %v16848_v30 = vpop.f32.mrb[11].mxu1  ;;  %v14303_v26 = vunpack.i.l.bf16 %v16745_v58 }
 0x1a0   : > { %12955 = vmatprep.subr.bf16.mxu0 %v12954_v23  ;;  %1128 = vperm.xlu1 %14289, %v1092_v25   ;;  %21495 = vst [vmem:[#allocation29_spill] sm:$0xff] %v16848_v30  ;;  %v16850_v23 = vpop.f32.mrb[11].mxu0  ;;  %v16854_v31 = vpop.f32.mrb[12].mxu1  ;;  %v14334_v30 = vunpack.i.h.bf16 %v16821_v29  ;;  %v21508_v29 = vunpack.i.h.bf16 %v16758_v12 }
 0x1a1   : > { %v16838_v55 = vpop.permute.xlu0 %14341  ;;  %12957 = vmatpush1.bf16.msra.mxu0 %v12956_v51  ;;  %21496 = vst [vmem:[#allocation30_spill] sm:$0xff] %v16850_v23  ;;  %v16852_v25 = vpop.f32.mrb[12].mxu0  ;;  %21498 = vst [vmem:[#allocation32_spill] sm:$0xff] %v16854_v31  ;;  %v14329_v23 = vunpack.i.h.bf16 %v16733_v56  ;;  %v17002_v9 = vsel %vm2042_vm2, %v14303_v26, %v14333_v46 }
 0x1a2   : > { %v16846_v28 = vpop.permute.xlu1 %14386  ;;  %21497 = vst [vmem:[#allocation31_spill] sm:$0xff] %v16852_v25  ;;  %v16861_v51 = vpop.f32.mrb[13].mxu0  ;;  %v21510_v20 = vunpack.i.l.bf16 %v16838_v55 }
 0x1a3   : > { %1133 = vperm.xlu0 %14288, %v1093_v48   ;;  %21499 = vst [vmem:[#allocation33_spill] sm:$0xff] %v16861_v51  ;;  %v16865_v48 = vpop.f32.mrb[13].mxu1  ;;  %v16873_v47 = vpop.f32.mrb[14].mxu0 }
 0x1a4   : > { %1138 = vperm.xlu1 %14289, %v1094_v17   ;;  %21500 = vst [vmem:[#allocation34_spill] sm:$0xff] %v16865_v48  ;;  %v16871_v17 = vpop.f32.mrb[14].mxu1  ;;  %21502 = vst [vmem:[#allocation36_spill] sm:$0xff] %v16873_v47  ;;  %v16879_v59 = vpop.f32.mrb[15].mxu0  ;;  %v21507_v48 = vunpack.i.h.bf16 %v16801_v50 }
 0x1a5   : > { %v16859_v43 = vpop.permute.xlu0 %14351  ;;  %21501 = vst [vmem:[#allocation35_spill] sm:$0xff] %v16871_v17  ;;  %v16877_v33 = vpop.f32.mrb[15].mxu1  ;;  %21504 = vst [vmem:[#allocation38_spill] sm:$0xff] %v16879_v59  ;;  %v531_v59 = vld [vmem:[%s21374_s2 + $0xe0] sm:$0xff] }
 0x1a6   : > { %v16863_v60 = vpop.permute.xlu1 %14396  ;;  %21503 = vst [vmem:[#allocation37_spill] sm:$0xff] %v16877_v33 }
 0x1a7   : > { %14641 = vrot.lane.b32.xlu0 %v16481_v42, %s16217_s26  ;;  %v14294_v42 = vunpack.i.h.bf16 %v16718_v52 }
 0x1a8   : > { %14646 = vrot.lane.b32.xlu1 %v16501_v5, %s16217_s26  ;;  %v21505_v5 = vmov 0.0  }
 0x1a9   : > { %v16881_v61 = vpop.permute.xlu0 %14356  ;;  %829 = vmatprep.mubr.f32.mxu0 %v21505_v5  ;;  %1074 = vmatprep.mubr.f32.mxu1 %v21505_v5 }
 0x1aa   : > { %v16883_v4 = vpop.permute.xlu1 %14406  ;;  %830 = vmatmul.mubr.f32.gmra.mrb[56].mxu0 %v531_v59  ;;  %1075 = vmatmul.mubr.f32.gmra.mrb[56].mxu1 %v531_v59 }
 0x1ab   : > { %14651 = vrot.lane.b32.xlu0 %v16494_v1, %s16217_s26  ;;  %v1788_v1 = vsel %vm1784_vm0, %v14294_v42, %v14318_v2  ;;  %835 = vmatprep.mubr.f32.mxu0 %v21505_v5 }
 0x1ac   : > { %14656 = vrot.lane.b32.xlu1 %v16526_v15, %s16217_s26  ;;  %v21506_v15 = vunpack.i.h.bf16 %v16774_v36  ;;  %v532_v36 = vld [vmem:[%s21374_s2 + $0xe8] sm:$0xff]  ;;  %1080 = vmatprep.mubr.f32.mxu1 %v21505_v5  ;;  %v14323_v5 = vunpack.i.l.bf16 %v16799_v49 }
 0x1ad   : > { %v14372_v33 = vpop.permute.xlu0 %14371 }
 0x1ae   : > { %v14374_v17 = vunpack.i.h.bf16 %v14372_v33  ;;  %v14373_v47 = vunpack.i.l.bf16 %v14372_v33  ;;  %v16898_v52 = vpop.permute.xlu1 %14416  ;;  %v1787_v53 = vsel %vm1784_vm0, %v21506_v15, %v14294_v42  ;;  %836 = vmatmul.mubr.f32.gmra.mrb[58].mxu0 %v532_v36  ;;  %1081 = vmatmul.mubr.f32.gmra.mrb[58].mxu1 %v532_v36  ;;  %v14298_v36 = vunpack.i.l.bf16 %v16728_v54 }
 0x1af   : > { %14661 = vrot.lane.b32.xlu0 %v16600_v35, %s16217_s26 }
 0x1b0   : > { %v1791_v0 = vsel %vm1784_vm0, %v21507_v48, %v14373_v47  ;;  %14666 = vrot.lane.b32.xlu1 %v16530_v16, %s16217_s26  ;;  %v1792_v33 = vsel %vm1784_vm0, %v14373_v47, %v14374_v17  ;;  %v2769_v16 = vld [vmem:[%s21375_s3 + $0x8] sm:$0xff]  ;;  %v16994_v11 = vsel %vm1913_vm1, %v14298_v36, %v14323_v5 }
 0x1b1   : > { %v16914_v31 = vpop.permute.xlu0 %14381  ;;  %v13026_v35 = vpack.c.bf16 %v1792_v33, %v1788_v1  ;;  %v13028_v2 = vpack.c.bf16 %v1791_v0, %v1787_v53  ;;  %3072 = vmatprep.mubr.f32.mxu0 %v2769_v16  ;;  %3394 = vmatprep.mubr.f32.mxu1 %v2769_v16  ;;  %v14304_v53 = vunpack.i.h.bf16 %v16745_v58  ;;  %v14338_v0 = vunpack.i.l.bf16 %v16750_v6 }
 0x1b2   : > { %v16916_v51 = vpop.permute.xlu1 %14421  ;;  %v14324_v16 = vunpack.i.h.bf16 %v16799_v49  ;;  %v14378_v49 = vunpack.i.l.bf16 %v16832_v24  ;;  %v21509_v58 = vunpack.i.h.bf16 %v16832_v24  ;;  %v14384_v34 = vunpack.i.h.bf16 %v16914_v31 }
 0x1b3   : > { %13027 = vmatprep.subr.bf16.mxu1 %v13026_v35  ;;  %14676 = vrot.lane.b32.xlu0 %v16552_v22, %s16217_s26  ;;  %v14348_v35 = vunpack.i.l.bf16 %v16763_v21  ;;  %v16981_v37 = vsel %vm2042_vm2, %v14304_v53, %v14338_v0  ;;  %v16999_v0 = vsel %vm2042_vm2, %v14334_v30, %v14304_v53 }
 0x1b4   : > { %13029 = vmatpush1.bf16.msra.mxu1 %v13028_v2  ;;  %14671 = vrot.lane.b32.xlu1 %v16538_v18, %s16217_s26  ;;  %v1919_v3 = vsel %vm1913_vm1, %v14378_v49, %v21509_v58 }
 0x1b5   : > { %v16929_v59 = vpop.permute.xlu0 %14391 }
 0x1b6   : > { %v16931_v47 = vpop.permute.xlu1 %14426 }
 0x1b7   : > { %14681 = vrot.lane.b32.xlu0 %v16632_v40, %s16217_s26  ;;  %v14299_v40 = vunpack.i.h.bf16 %v16728_v54  ;;  %v14339_v54 = vunpack.i.h.bf16 %v16750_v6  ;;  %v1918_v6 = vsel %vm1913_vm1, %v14329_v23, %v14378_v49  ;;  %v14383_v49 = vunpack.i.l.bf16 %v16914_v31 }
 0x1b8   : > { %14686 = vrot.lane.b32.xlu1 %v16737_v57, %s16217_s26  ;;  %v14328_v57 = vunpack.i.l.bf16 %v16733_v56  ;;  %v12964_v53 = vpack.c.bf16 %v1918_v6, %v16994_v11  ;;  %s16219_s26 = smov 93  }
 0x1b9   : > { %v16937_v22 = vpop.permute.xlu0 %14401  ;;  %v16991_v45 = vsel %vm1913_vm1, %v14324_v16, %v14299_v40 }
 0x1ba   : > { %v16939_v50 = vpop.permute.xlu1 %14431  ;;  %v16970_v33 = vsel %vm1913_vm1, %v14299_v40, %v14328_v57  ;;  %v16986_v57 = vsel %vm2171_vm3, %v21508_v29, %v14348_v35  ;;  %v1915_v35 = vsel %vm1913_vm1, %v14323_v5, %v14324_v16  ;;  %v17006_v29 = vsel %vm2042_vm2, %v14333_v46, %v14334_v30 }
 0x1bb   : > { %v14388_v5 = vunpack.i.l.bf16 %v16846_v28  ;;  %v14418_v30 = vunpack.i.l.bf16 %v16898_v52  ;;  %v12962_v58 = vpack.c.bf16 %v1919_v3, %v1915_v35  ;;  %v14419_v35 = vunpack.i.h.bf16 %v16898_v52 }
 0x1bc   : > { %v1921_v52 = vsel %vm1913_vm1, %v14383_v49, %v14384_v34 }
 0x1bd   : > { %v16941_v48 = vpop.permute.xlu0 %14411  ;;  %v17038_v11 = vsel %vm2042_vm2, %v14339_v54, %v14388_v5 }
 0x1be   : > { %v16943_v18 = vpop.permute.xlu1 %14436 }
 0x1bf   : > { %v14439_v40 = vunpack.i.h.bf16 %v16943_v18  ;;  %v14438_v36 = vunpack.i.l.bf16 %v16943_v18 }
 0x1c1   : > { %v16945_v17 = vpop.permute.xlu0 %14441  ;;  %v1793_v10 = vsel %vm1784_vm0, %v14418_v30, %v14438_v36  ;;  %v1794_v62 = vsel %vm1784_vm0, %v14438_v36, %v14439_v40 }
 0x1c2   : > { %v16947_v42 = vpop.permute.xlu1 %14446  ;;  %v14444_v23 = vunpack.i.h.bf16 %v16945_v17  ;;  %v14443_v39 = vunpack.i.l.bf16 %v16945_v17 }
 0x1c5   : > { %v16949_v1 = vpop.permute.xlu0 %14451 }
 0x1c6   : > { %v16951_v15 = vpop.permute.xlu1 %14456  ;;  %v14454_v54 = vunpack.i.h.bf16 %v16949_v1 }
 0x1c9   : > { %v16959_v2 = vpop.permute.xlu0 %14461 }
 0x1ca   : > { %v16964_v25 = vpop.permute.xlu1 %14466 }
 0x1cd   : > { %v16978_v56 = vpop.permute.xlu0 %14471 }
 0x1ce   : > { %v16996_v44 = vpop.permute.xlu1 %14476 }
 0x1d1   : > { %v14487_v46 = vpop.permute.xlu0 %14486 }
 0x1d2   : > { %v14489_v16 = vunpack.i.h.bf16 %v14487_v46  ;;  %v14488_v14 = vunpack.i.l.bf16 %v14487_v46  ;;  %v17020_v18 = vpop.permute.xlu1 %14481  ;;  %v17032_v46 = vsel %vm2171_vm3, %v14308_v41, %v21510_v20  ;;  %v14398_v20 = vunpack.i.l.bf16 %v16863_v60 }
 0x1d3   : > { %v14448_v41 = vunpack.i.l.bf16 %v16947_v42 }
 0x1d4   : > { %v1797_v26 = vsel %vm1784_vm0, %v14444_v23, %v14488_v14  ;;  %v1798_v7 = vsel %vm1784_vm0, %v14488_v14, %v14489_v16  ;;  %v21512_v14 = vunpack.i.h.bf16 %v16846_v28 }
 0x1d5   : > { %v17035_v63 = vpop.permute.xlu0 %14491  ;;  %v12958_v3 = vpack.c.bf16 %v1798_v7, %v1794_v62  ;;  %v12960_v31 = vpack.c.bf16 %v1797_v26, %v1793_v10  ;;  %v14423_v62 = vunpack.i.l.bf16 %v16916_v51  ;;  %v1795_v7 = vsel %vm1784_vm0, %v14439_v40, %v14419_v35 }
 0x1d6   : > { %21511 = vst [vmem:[#allocation39_spill] sm:$0xff] %v17035_v63  ;;  %v14497_v36 = vpop.permute.xlu1 %14496  ;;  %v2048_v30 = vsel %vm2042_vm2, %v14388_v5, %v21512_v14  ;;  %v14449_v10 = vunpack.i.h.bf16 %v16947_v42  ;;  %v1796_v14 = vsel %vm1784_vm0, %v14419_v35, %v14443_v39  ;;  %v21513_v42 = vunpack.i.h.bf16 %v16832_v24 }
 0x1d7   : > { %v14499_v17 = vunpack.i.h.bf16 %v14497_v36  ;;  %v14498_v23 = vunpack.i.l.bf16 %v14497_v36  ;;  %12959 = vmatprep.subr.bf16.mxu0 %v12958_v3  ;;  %v14393_v39 = vunpack.i.l.bf16 %v16929_v59  ;;  %v14453_v24 = vunpack.i.l.bf16 %v16949_v1 }
 0x1d8   : > { %12961 = vmatpush1.bf16.msra.mxu0 %v12960_v31  ;;  %v1920_v34 = vsel %vm1913_vm1, %v21513_v42, %v14383_v49  ;;  %v14394_v31 = vunpack.i.h.bf16 %v16929_v59  ;;  %v21515_v1 = vunpack.i.h.bf16 %v16863_v60 }
 0x1d9   : > { %v1799_v26 = vsel %vm1784_vm0, %v14489_v16, %v14498_v23  ;;  %v14502_v5 = vpop.permute.xlu0 %14501  ;;  %12963 = vmatprep.subr.bf16.mxu0 %v12962_v58  ;;  %v1800_v36 = vsel %vm1784_vm0, %v14498_v23, %v14499_v17  ;;  %v1922_v16 = vsel %vm1913_vm1, %v14423_v62, %v14448_v41  ;;  %v13034_v58 = vpack.c.bf16 %v1921_v52, %v16970_v33 }
 0x1da   : > { %v14504_v3 = vunpack.i.h.bf16 %v14502_v5  ;;  %v14503_v6 = vunpack.i.l.bf16 %v14502_v5  ;;  %v17055_v8 = vpop.permute.xlu1 %14511  ;;  %v13030_v40 = vpack.c.bf16 %v1800_v36, %v1796_v14  ;;  %v13032_v63 = vpack.c.bf16 %v1799_v26, %v1795_v7 }
 0x1db   : > { %v1923_v17 = vsel %vm1913_vm1, %v14448_v41, %v14449_v10  ;;  %v12970_v62 = vpack.c.bf16 %v2048_v30, %v17006_v29  ;;  %v21514_v33 = vunpack.i.h.bf16 %v16763_v21  ;;  %v14458_v41 = vunpack.i.l.bf16 %v16951_v15 }
 0x1dc   : > { %v1926_v35 = vsel %vm1913_vm1, %v14454_v54, %v14503_v6  ;;  %12965 = vmatpush1.bf16.msra.mxu0 %v12964_v53  ;;  %13031 = vmatprep.subr.bf16.mxu1 %v13030_v40  ;;  %v1927_v23 = vsel %vm1913_vm1, %v14503_v6, %v14504_v3  ;;  %v14424_v53 = vunpack.i.h.bf16 %v16916_v51  ;;  %v12972_v6 = vpack.c.bf16 %v17038_v11, %v17002_v9 }
 0x1dd   : > { %v17068_v7 = vpop.permute.xlu0 %14506  ;;  %13033 = vmatpush1.bf16.msra.mxu1 %v13032_v63  ;;  %v12966_v49 = vpack.c.bf16 %v1927_v23, %v1923_v17  ;;  %v12968_v26 = vpack.c.bf16 %v1926_v35, %v1922_v16  ;;  %v17074_v59 = vsel %vm2171_vm3, %v21514_v33, %v14398_v20  ;;  %v2177_v63 = vsel %vm2171_vm3, %v14398_v20, %v21515_v1 }
 0x1de   : > { %v14517_v52 = vpop.permute.xlu1 %14516  ;;  %13035 = vmatprep.subr.bf16.mxu1 %v13034_v58  ;;  %v13036_v21 = vpack.c.bf16 %v1920_v34, %v16991_v45  ;;  %v14428_v30 = vunpack.i.l.bf16 %v16931_v47  ;;  %v1924_v51 = vsel %vm1913_vm1, %v14449_v10, %v14424_v53  ;;  %v14459_v5 = vunpack.i.h.bf16 %v16951_v15 }
 0x1df   : > { %v14519_v54 = vunpack.i.h.bf16 %v14517_v52  ;;  %v14518_v29 = vunpack.i.l.bf16 %v14517_v52  ;;  %12967 = vmatprep.subr.bf16.mxu0 %v12966_v49  ;;  %v2050_v9 = vsel %vm2042_vm2, %v14393_v39, %v14394_v31  ;;  %v14464_v11 = vunpack.i.h.bf16 %v16959_v2 }
 0x1e0   : > { %12969 = vmatpush1.bf16.msra.mxu0 %v12968_v26  ;;  %v1925_v36 = vsel %vm1913_vm1, %v14424_v53, %v14453_v24  ;;  %v21516_v16 = vunpack.i.h.bf16 %v16846_v28  ;;  %v14404_v58 = vunpack.i.h.bf16 %v16937_v22  ;;  %v13042_v35 = vpack.c.bf16 %v2050_v9, %v16981_v37 }
 0x1e1   : > { %v1928_v20 = vsel %vm1913_vm1, %v14504_v3, %v14518_v29  ;;  %v14522_v14 = vpop.permute.xlu0 %14521  ;;  %12971 = vmatprep.subr.bf16.mxu0 %v12970_v62  ;;  %13037 = vmatpush1.bf16.msra.mxu1 %v13036_v21  ;;  %v1929_v45 = vsel %vm1913_vm1, %v14518_v29, %v14519_v54  ;;  %v2051_v3 = vsel %vm2042_vm2, %v14428_v30, %v14458_v41  ;;  %v14403_v17 = vunpack.i.l.bf16 %v16937_v22 }
 0x1e2   : > { %v14524_v40 = vunpack.i.h.bf16 %v14522_v14  ;;  %v14523_v42 = vunpack.i.l.bf16 %v14522_v14  ;;  %v17092_v34 = vpop.permute.xlu1 %14531  ;;  %v13038_v10 = vpack.c.bf16 %v1929_v45, %v1925_v36  ;;  %v13040_v15 = vpack.c.bf16 %v1928_v20, %v1924_v51 }
 0x1e3   : > { %v2049_v31 = vsel %vm2042_vm2, %v21516_v16, %v14393_v39  ;;  %v2052_v24 = vsel %vm2042_vm2, %v14458_v41, %v14459_v5  ;;  %v14463_v28 = vunpack.i.l.bf16 %v16959_v2  ;;  %v21517_v33 = vunpack.i.h.bf16 %v16838_v55 }
 0x1e4   : > { %v2055_v23 = vsel %vm2042_vm2, %v14464_v11, %v14523_v42  ;;  %12973 = vmatpush1.bf16.msra.mxu0 %v12972_v6  ;;  %13039 = vmatprep.subr.bf16.mxu1 %v13038_v10  ;;  %v2056_v49 = vsel %vm2042_vm2, %v14523_v42, %v14524_v40  ;;  %v21518_v37 = vunpack.i.l.bf16 %v16838_v55  ;;  %v14358_v53 = vunpack.i.l.bf16 %v16881_v61 }
 0x1e5   : > { %v17105_v26 = vpop.permute.xlu0 %14526  ;;  %13041 = vmatpush1.bf16.msra.mxu1 %v13040_v15  ;;  %v12974_v39 = vpack.c.bf16 %v2056_v49, %v2052_v24  ;;  %v12976_v62 = vpack.c.bf16 %v2055_v23, %v2051_v3  ;;  %v14429_v52 = vunpack.i.h.bf16 %v16931_v47  ;;  %v12980_v2 = vpack.c.bf16 %v17074_v59, %v17032_v46 }
 0x1e6   : > { %v2173_v22 = vsel %vm2171_vm3, %v21518_v37, %v21517_v33  ;;  %v14537_v6 = vpop.permute.xlu1 %14536  ;;  %13043 = vmatprep.subr.bf16.mxu1 %v13042_v35  ;;  %v14468_v41 = vunpack.i.l.bf16 %v16964_v25  ;;  %v13044_v21 = vpack.c.bf16 %v2049_v31, %v16999_v0  ;;  %v14433_v30 = vunpack.i.l.bf16 %v16939_v50 }
 0x1e7   : > { %v12978_v1 = vpack.c.bf16 %v2177_v63, %v2173_v22  ;;  %v14539_v54 = vunpack.i.h.bf16 %v14537_v6  ;;  %v14538_v29 = vunpack.i.l.bf16 %v14537_v6  ;;  %12975 = vmatprep.subr.bf16.mxu0 %v12974_v39  ;;  %v2053_v51 = vsel %vm2042_vm2, %v14459_v5, %v14429_v52 }
 0x1e8   : > { %v14469_v47 = vunpack.i.h.bf16 %v16964_v25  ;;  %12977 = vmatpush1.bf16.msra.mxu0 %v12976_v62  ;;  %v2179_v63 = vsel %vm2171_vm3, %v14403_v17, %v14404_v58  ;;  %v14474_v9 = vunpack.i.h.bf16 %v16978_v56  ;;  %v2054_v11 = vsel %vm2042_vm2, %v14429_v52, %v14463_v28 }
 0x1e9   : > { %v2057_v46 = vsel %vm2042_vm2, %v14524_v40, %v14538_v29  ;;  %v14542_v59 = vpop.permute.xlu0 %14541  ;;  %12979 = vmatprep.subr.bf16.mxu0 %v12978_v1  ;;  %13045 = vmatpush1.bf16.msra.mxu1 %v13044_v21  ;;  %v2058_v0 = vsel %vm2042_vm2, %v14538_v29, %v14539_v54  ;;  %v14409_v45 = vunpack.i.h.bf16 %v16883_v4  ;;  %v21519_v42 = vunpack.i.h.bf16 %v16863_v60 }
 0x1ea   : > { %v14544_v20 = vunpack.i.h.bf16 %v14542_v59  ;;  %v14543_v14 = vunpack.i.l.bf16 %v14542_v59  ;;  %v17126_v36 = vpop.permute.xlu1 %14551  ;;  %v13046_v5 = vpack.c.bf16 %v2058_v0, %v2054_v11  ;;  %v13048_v25 = vpack.c.bf16 %v2057_v46, %v2053_v51 }
 0x1eb   : > { %v2178_v10 = vsel %vm2171_vm3, %v21519_v42, %v14403_v17  ;;  %v2180_v40 = vsel %vm2171_vm3, %v14433_v30, %v14468_v41  ;;  %v13050_v15 = vpack.c.bf16 %v2179_v63, %v16986_v57  ;;  %v14408_v16 = vunpack.i.l.bf16 %v16883_v4  ;;  %v21530_v42 = vld [vmem:[#allocation12_spill] sm:$0xff] }
 0x1ec   : > { %v2184_v31 = vsel %vm2171_vm3, %v14474_v9, %v14543_v14  ;;  %12981 = vmatpush1.bf16.msra.mxu0 %v12980_v2  ;;  %13047 = vmatprep.subr.bf16.mxu1 %v13046_v5  ;;  %v2181_v58 = vsel %vm2171_vm3, %v14468_v41, %v14469_v47  ;;  %v2185_v3 = vsel %vm2171_vm3, %v14543_v14, %v14544_v20  ;;  %v21520_v35 = vunpack.i.h.bf16 %v16758_v12  ;;  %v21526_v5 = vld [vmem:[#allocation19_spill] sm:$0xff] }
 0x1ed   : > { %v21521_v60 = vmov %v21517_v33  ;;  %v14473_v23 = vunpack.i.l.bf16 %v16978_v56  ;;  %v17144_v57 = vpop.permute.xlu0 %14546  ;;  %13049 = vmatpush1.bf16.msra.mxu1 %v13048_v25  ;;  %v12982_v4 = vpack.c.bf16 %v2185_v3, %v2181_v58  ;;  %v12984_v24 = vpack.c.bf16 %v2184_v31, %v2180_v40  ;;  %v21527_v25 = vld [vmem:[#allocation16_spill] sm:$0xff] }
 0x1ee   : > { %v2174_v17 = vsel %vm2171_vm3, %v21521_v60, %v21520_v35  ;;  %v14354_v49 = vunpack.i.h.bf16 %v16859_v43  ;;  %v14353_v28 = vunpack.i.l.bf16 %v16859_v43  ;;  %v14434_v39 = vunpack.i.h.bf16 %v16939_v50  ;;  %v14557_v62 = vpop.permute.xlu1 %14556  ;;  %13051 = vmatprep.subr.bf16.mxu1 %v13050_v15 }
 0x1ef   : > { %v13052_v12 = vpack.c.bf16 %v2178_v10, %v2174_v17  ;;  %v14414_v55 = vunpack.i.h.bf16 %v16941_v48  ;;  %v14413_v33 = vunpack.i.l.bf16 %v16941_v48  ;;  %v14559_v56 = vunpack.i.h.bf16 %v14557_v62  ;;  %12983 = vmatprep.subr.bf16.mxu0 %v12982_v4  ;;  %v21533_v4 = vld [vmem:[#allocation18_spill] sm:$0xff] }
 0x1f0   : > { %v14558_v37 = vunpack.i.l.bf16 %v14557_v62  ;;  %v17152_v22 = vsel %vm2332_vm4, %v14358_v53, %v14353_v28  ;;  %v21522_v52 = vunpack.i.h.bf16 %v16778_v38  ;;  %v2182_v43 = vsel %vm2171_vm3, %v14469_v47, %v14434_v39  ;;  %12985 = vmatpush1.bf16.msra.mxu0 %v12984_v24  ;;  %v21534_v24 = vld [vmem:[#allocation15_spill] sm:$0xff] }
 0x1f1   : > { %v2338_v50 = vsel %vm2332_vm4, %v14408_v16, %v14409_v45  ;;  %v14359_v1 = vunpack.i.h.bf16 %v16881_v61  ;;  %v17163_v2 = vpop.permute.xlu0 %14566  ;;  %v21523_v53 = vpack.c.bf16 %v16460_v32, %v16447_v19  ;;  %13053 = vmatpush1.bf16.msra.mxu1 %v13052_v12  ;;  %v2183_v41 = vsel %vm2171_vm3, %v14434_v39, %v14473_v23 }
 0x1f2   : > { %v17157_v6 = vsel %vm2332_vm4, %v21522_v52, %v14408_v16  ;;  %v2186_v48 = vsel %vm2171_vm3, %v14544_v20, %v14558_v37  ;;  %v2187_v54 = vsel %vm2171_vm3, %v14558_v37, %v14559_v56  ;;  %v14509_v29 = vunpack.i.h.bf16 %v17068_v7  ;;  %v17172_v30 = vpop.permute.xlu1 %14561  ;;  %v21525_v20 = vld [vmem:[#allocation39_spill] sm:$0xff] }
 0x1f3   : > { %12987 = vmatprep.subr.bf16.mxu0 %v21523_v53  ;;  %v14508_v21 = vunpack.i.l.bf16 %v17068_v7  ;;  %v13054_v61 = vpack.c.bf16 %v2187_v54, %v2183_v41  ;;  %v13056_v51 = vpack.c.bf16 %v2186_v48, %v2182_v43  ;;  %v17175_v47 = vsel %vm2332_vm4, %v14409_v45, %v14413_v33  ;;  %v21539_v48 = vld [vmem:[#allocation21_spill] sm:$0xff] }
 0x1f4   : > { %v14479_v63 = vunpack.i.h.bf16 %v16996_v44  ;;  %v14478_v19 = vunpack.i.l.bf16 %v16996_v44  ;;  %v2340_v32 = vsel %vm2332_vm4, %v14413_v33, %v14414_v55  ;;  %v14484_v9 = vunpack.i.h.bf16 %v17020_v18  ;;  %v21536_v55 = vld [vmem:[#allocation13_spill] sm:$0xff]  ;;  %v21537_v33 = vld [vmem:[#allocation11_spill] sm:$0xff] }
 0x1f5   : > { %v14483_v46 = vunpack.i.l.bf16 %v17020_v18  ;;  %v14514_v59 = vunpack.i.h.bf16 %v17055_v8  ;;  %v14513_v7 = vunpack.i.l.bf16 %v17055_v8  ;;  %v21524_v11 = vpack.c.bf16 %v16455_v27, %v16441_v13  ;;  %13055 = vmatprep.subr.bf16.mxu1 %v13054_v61  ;;  %v17191_v14 = vpop.permute.xlu0 %14571  ;;  %v21529_v27 = vld [vmem:[#allocation14_spill] sm:$0xff]  ;;  %v21540_v53 = vld [vmem:[#allocation17_spill] sm:$0xff] }
 0x1f6   : > { %v17188_v0 = vsel %vm2332_vm4, %v14354_v49, %v14359_v1  ;;  %v14493_v44 = vunpack.i.l.bf16 %v21525_v20  ;;  %v21528_v45 = vpack.c.bf16 %v21526_v5, %v21527_v25  ;;  %13057 = vmatpush1.bf16.msra.mxu1 %v13056_v51  ;;  %v2334_v18 = vsel %vm2332_vm4, %v14353_v28, %v14354_v49  ;;  %v17198_v13 = vpop.permute.xlu1 %14576 }
 0x1f7   : > { %12989 = vmatpush1.bf16.msra.mxu0 %v21524_v11  ;;  %v14528_v8 = vunpack.i.l.bf16 %v17105_v26  ;;  %v21531_v10 = vpack.c.bf16 %v21529_v27, %v21530_v42  ;;  %v12994_v40 = vpack.c.bf16 %v2338_v50, %v2334_v18  ;;  %v21532_v15 = vunpack.i.l.bf16 %v16778_v38 }
 0x1f8   : > { %12991 = vmatprep.subr.bf16.mxu0 %v21528_v45  ;;  %v2463_v31 = vsel %vm2461_vm5, %v14508_v21, %v14509_v29  ;;  %v12996_v58 = vpack.c.bf16 %v17157_v6, %v17152_v22  ;;  %v2342_v35 = vsel %vm2332_vm4, %v14478_v19, %v14479_v63  ;;  %v13068_v60 = vpack.c.bf16 %v17175_v47, %v17188_v0 }
 0x1f9   : > { %13059 = vmatprep.subr.bf16.mxu1 %v21531_v10  ;;  %v2336_v16 = vsel %vm2332_vm4, %v14359_v1, %v21532_v15  ;;  %v2341_v17 = vsel %vm2332_vm4, %v14483_v46, %v14478_v19  ;;  %v17214_v23 = vsel %vm2332_vm4, %v14479_v63, %v14484_v9  ;;  %v14494_v38 = vunpack.i.h.bf16 %v21525_v20  ;;  %v14582_v12 = vpop.permute.xlu0 %14581  ;;  %v21543_v46 = vld [vmem:[#allocation22_spill] sm:$0xff] }
 0x1fa   : > { %v13066_v3 = vpack.c.bf16 %v2340_v32, %v2336_v16  ;;  %v21535_v49 = vpack.c.bf16 %v21533_v4, %v21534_v24  ;;  %v2467_v28 = vsel %vm2461_vm5, %v14513_v7, %v14514_v59  ;;  %v14534_v39 = vunpack.i.h.bf16 %v17092_v34  ;;  %v17229_v1 = vpop.permute.xlu1 %14591 }
 0x1fb   : > { %v14529_v62 = vunpack.i.h.bf16 %v17105_v26  ;;  %v21538_v56 = vpack.c.bf16 %v21536_v55, %v21537_v33  ;;  %v13002_v37 = vpack.c.bf16 %v2467_v28, %v2463_v31  ;;  %v2344_v22 = vsel %vm2332_vm4, %v14484_v9, %v14493_v44 }
 0x1fc   : > { %12993 = vmatpush1.bf16.msra.mxu0 %v21535_v49  ;;  %v14533_v52 = vunpack.i.l.bf16 %v17092_v34  ;;  %v2462_v6 = vsel %vm2461_vm5, %v14528_v8, %v14508_v21  ;;  %v14584_v43 = vunpack.i.h.bf16 %v14582_v12  ;;  %v14583_v50 = vunpack.i.l.bf16 %v14582_v12 }
 0x1fd   : > { %12995 = vmatprep.subr.bf16.mxu0 %v12994_v40  ;;  %13061 = vmatpush1.bf16.msra.mxu1 %v21538_v56  ;;  %v21541_v26 = vpack.c.bf16 %v21539_v48, %v21540_v53  ;;  %v14549_v41 = vunpack.i.h.bf16 %v17144_v57  ;;  %v14548_v54 = vunpack.i.l.bf16 %v17144_v57  ;;  %v14574_v61 = vunpack.i.h.bf16 %v17191_v14  ;;  %v17246_v9 = vpop.permute.xlu0 %14586  ;;  %v21542_v57 = vld [vmem:[#allocation20_spill] sm:$0xff] }
 0x1fe   : > { %v14573_v51 = vunpack.i.l.bf16 %v17191_v14  ;;  %v14579_v34 = vunpack.i.h.bf16 %v17198_v13  ;;  %v14578_v21 = vunpack.i.l.bf16 %v17198_v13  ;;  %v2345_v47 = vsel %vm2332_vm4, %v14494_v38, %v14583_v50  ;;  %v14597_v25 = vpop.permute.xlu1 %14596 }
 0x1ff   : > { %13063 = vmatprep.subr.bf16.mxu1 %v21541_v26  ;;  %v2346_v63 = vsel %vm2332_vm4, %v14583_v50, %v14584_v43  ;;  %v2466_v19 = vsel %vm2461_vm5, %v14534_v39, %v14513_v7  ;;  %v17244_v32 = vsel %vm2461_vm5, %v14509_v29, %v14529_v62  ;;  %v21544_v11 = vpack.c.bf16 %v21542_v57, %v21543_v46 }
 0x200   : > { %12997 = vmatpush1.bf16.msra.mxu0 %v12996_v58  ;;  %v12998_v0 = vpack.c.bf16 %v2346_v63, %v2342_v35  ;;  %v13000_v20 = vpack.c.bf16 %v2345_v47, %v2341_v17  ;;  %v14554_v44 = vunpack.i.h.bf16 %v17126_v36  ;;  %v14553_v5 = vunpack.i.l.bf16 %v17126_v36 }
 0x201   : > { %13065 = vmatpush1.bf16.msra.mxu1 %v21544_v11  ;;  %v13004_v45 = vpack.c.bf16 %v2466_v19, %v2462_v6  ;;  %v2465_v7 = vsel %vm2461_vm5, %v14529_v62, %v14533_v52  ;;  %v2468_v29 = vsel %vm2461_vm5, %v14514_v59, %v14548_v54  ;;  %v14599_v18 = vunpack.i.h.bf16 %v14597_v25  ;;  %v14602_v31 = vpop.permute.xlu0 %14601 }
 0x202   : > { %13067 = vmatprep.subr.bf16.mxu1 %v13066_v3  ;;  %v14598_v8 = vunpack.i.l.bf16 %v14597_v25  ;;  %12999 = vmatprep.subr.bf16.mxu0 %v12998_v0  ;;  %v2469_v27 = vsel %vm2461_vm5, %v14548_v54, %v14549_v41  ;;  %v14569_v42 = vunpack.i.h.bf16 %v17163_v2  ;;  %v14563_v10 = vunpack.i.l.bf16 %v17172_v30  ;;  %v17268_v17 = vpop.permute.xlu1 %14611 }
 0x203   : > { %v2592_v36 = vsel %vm2590_vm6, %v14573_v51, %v14574_v61  ;;  %v2596_v40 = vsel %vm2590_vm6, %v14578_v21, %v14579_v34  ;;  %v14594_v59 = vunpack.i.h.bf16 %v17229_v1  ;;  %v14588_v15 = vunpack.i.l.bf16 %v17246_v9 }
 0x204   : > { %13001 = vmatpush1.bf16.msra.mxu0 %v13000_v20  ;;  %v2347_v16 = vsel %vm2332_vm4, %v14584_v43, %v14598_v8  ;;  %v2348_v58 = vsel %vm2332_vm4, %v14598_v8, %v14599_v18  ;;  %v14604_v3 = vunpack.i.h.bf16 %v14602_v31  ;;  %v14603_v35 = vunpack.i.l.bf16 %v14602_v31 }
 0x205   : > { %13003 = vmatprep.subr.bf16.mxu0 %v13002_v37  ;;  %13069 = vmatpush1.bf16.msra.mxu1 %v13068_v60  ;;  %v13070_v38 = vpack.c.bf16 %v2348_v58, %v2344_v22  ;;  %v13072_v4 = vpack.c.bf16 %v2347_v16, %v17214_v23  ;;  %v14568_v24 = vunpack.i.l.bf16 %v17163_v2  ;;  %v13074_v49 = vpack.c.bf16 %v2469_v27, %v2465_v7  ;;  %v14607_v23 = vpop.permute.xlu0 %14606 }
 0x206   : > { %v2471_v28 = vsel %vm2461_vm5, %v14553_v5, %v14554_v44  ;;  %v13076_v39 = vpack.c.bf16 %v2468_v29, %v17244_v32  ;;  %v14564_v62 = vunpack.i.h.bf16 %v17172_v30  ;;  %v2470_v60 = vsel %vm2461_vm5, %v14563_v10, %v14553_v5  ;;  %v14617_v43 = vpop.permute.xlu1 %14616 }
 0x207   : > { %v2474_v12 = vsel %vm2461_vm5, %v14569_v42, %v14603_v35  ;;  %13071 = vmatprep.subr.bf16.mxu1 %v13070_v38  ;;  %v2475_v55 = vsel %vm2461_vm5, %v14603_v35, %v14604_v3  ;;  %v2591_v33 = vsel %vm2590_vm6, %v14588_v15, %v14573_v51  ;;  %v13010_v37 = vpack.c.bf16 %v2596_v40, %v2592_v36  ;;  %v2768_v35 = vld [vmem:[%s21375_s3] sm:$0xff]  ;;  %v2771_v38 = vld [vmem:[%s21375_s3 + $0x18] sm:$0xff] }
 0x208   : > { %13005 = vmatpush1.bf16.msra.mxu0 %v13004_v45  ;;  %v13006_v2 = vpack.c.bf16 %v2475_v55, %v2471_v28  ;;  %v13008_v56 = vpack.c.bf16 %v2474_v12, %v2470_v60  ;;  %v2595_v22 = vsel %vm2590_vm6, %v14594_v59, %v14578_v21  ;;  %v14589_v52 = vunpack.i.h.bf16 %v17246_v9  ;;  %v21546_v60 = vld [vmem:[#allocation25_spill] sm:$0xff]  ;;  %v21547_v55 = vld [vmem:[#allocation24_spill] sm:$0xff] }
 0x209   : > { %13073 = vmatpush1.bf16.msra.mxu1 %v13072_v4  ;;  %v14609_v30 = vunpack.i.h.bf16 %v14607_v23  ;;  %v14608_v6 = vunpack.i.l.bf16 %v14607_v23  ;;  %v14614_v50 = vunpack.i.h.bf16 %v17268_v17  ;;  %v14613_v48 = vunpack.i.l.bf16 %v17268_v17  ;;  %v14627_v63 = vpop.permute.xlu0 %14626  ;;  %v2772_v17 = vld [vmem:[%s21375_s3 + $0x20] sm:$0xff]  ;;  %v2775_v4 = vld [vmem:[%s21375_s3 + $0x38] sm:$0xff] }
 0x20a   : > { %13075 = vmatprep.subr.bf16.mxu1 %v13074_v49  ;;  %v14619_v53 = vunpack.i.h.bf16 %v14617_v43  ;;  %v14618_v26 = vunpack.i.l.bf16 %v14617_v43  ;;  %13007 = vmatprep.subr.bf16.mxu0 %v13006_v2  ;;  %v2472_v41 = vsel %vm2461_vm5, %v14554_v44, %v14564_v62  ;;  %v13012_v54 = vpack.c.bf16 %v2595_v22, %v2591_v33  ;;  %v14622_v46 = vpop.permute.xlu1 %14621  ;;  %v2778_v49 = vld [vmem:[%s21375_s3 + $0x50] sm:$0xff]  ;;  %v21548_v23 = vld [vmem:[#allocation26_spill] sm:$0xff]  ;;  %v21549_v22 = vld [vmem:[#allocation28_spill] sm:$0xff] }
 0x20b   : > { %v2473_v51 = vsel %vm2461_vm5, %v14564_v62, %v14568_v24  ;;  %v14593_v21 = vunpack.i.l.bf16 %v17229_v1  ;;  %v2598_v32 = vsel %vm2590_vm6, %v14608_v6, %v14609_v30  ;;  %v14629_v9 = vunpack.i.h.bf16 %v14627_v63  ;;  %v2774_v24 = vld [vmem:[%s21375_s3 + $0x30] sm:$0xff]  ;;  %v21550_v30 = vld [vmem:[#allocation27_spill] sm:$0xff] }
 0x20c   : > { %13009 = vmatpush1.bf16.msra.mxu0 %v13008_v56  ;;  %v2476_v47 = vsel %vm2461_vm5, %v14604_v3, %v14618_v26  ;;  %v2477_v19 = vsel %vm2461_vm5, %v14618_v26, %v14619_v53  ;;  %v14628_v57 = vunpack.i.l.bf16 %v14627_v63  ;;  %v2600_v44 = vsel %vm2590_vm6, %v14613_v48, %v14614_v50  ;;  %v21551_v43 = vld [vmem:[#allocation29_spill] sm:$0xff]  ;;  %v2781_v26 = vld [vmem:[%s21375_s3 + $0x68] sm:$0xff] }
 0x20d   : > { %13011 = vmatprep.subr.bf16.mxu0 %v13010_v37  ;;  %13077 = vmatpush1.bf16.msra.mxu1 %v13076_v39  ;;  %v13078_v11 = vpack.c.bf16 %v2477_v19, %v2473_v51  ;;  %v13080_v0 = vpack.c.bf16 %v2476_v47, %v2472_v41  ;;  %v2594_v20 = vsel %vm2590_vm6, %v14589_v52, %v14593_v21  ;;  %v14623_v5 = vunpack.i.l.bf16 %v14622_v46  ;;  %v14632_v29 = vpop.permute.xlu0 %14631  ;;  %v21545_v39 = vld [vmem:[#allocation23_spill] sm:$0xff]  ;;  %v2777_v37 = vld [vmem:[%s21375_s3 + $0x48] sm:$0xff] }
 0x20e   : > { %v2597_v1 = vsel %vm2590_vm6, %v14579_v34, %v14608_v6  ;;  %v13082_v25 = vpack.c.bf16 %v2598_v32, %v2594_v20  ;;  %v2604_v45 = vsel %vm2590_vm6, %v14628_v57, %v14629_v9  ;;  %v14624_v7 = vunpack.i.h.bf16 %v14622_v46  ;;  %v14637_v10 = vpop.permute.xlu1 %14636  ;;  %v21554_v46 = vld [vmem:[#allocation33_spill] sm:$0xff] }
 0x20f   : > { %13079 = vmatprep.subr.bf16.mxu1 %v13078_v11  ;;  %v13014_v18 = vpack.c.bf16 %v2604_v45, %v2600_v44  ;;  %v2593_v8 = vsel %vm2590_vm6, %v14574_v61, %v14589_v52  ;;  %v14634_v27 = vunpack.i.h.bf16 %v14632_v29  ;;  %v14633_v42 = vunpack.i.l.bf16 %v14632_v29  ;;  %v21556_v44 = vld [vmem:[#allocation34_spill] sm:$0xff] }
 0x210   : > { %13013 = vmatpush1.bf16.msra.mxu0 %v13012_v54  ;;  %v14639_v13 = vunpack.i.h.bf16 %v14637_v10  ;;  %v14638_v34 = vunpack.i.l.bf16 %v14637_v10  ;;  %v13084_v36 = vpack.c.bf16 %v2597_v1, %v2593_v8  ;;  %v2599_v40 = vsel %vm2590_vm6, %v14623_v5, %v14613_v48  ;;  %v21552_v48 = vld [vmem:[#allocation30_spill] sm:$0xff]  ;;  %v2784_v10 = vld [vmem:[%s21375_s3 + $0x80] sm:$0xff] }
 0x211   : > { %13081 = vmatpush1.bf16.msra.mxu1 %v13080_v0  ;;  %13015 = vmatprep.subr.bf16.mxu0 %v13014_v18  ;;  %v2603_v59 = vsel %vm2590_vm6, %v14634_v27, %v14628_v57  ;;  %v2602_v15 = vsel %vm2590_vm6, %v14624_v7, %v14633_v42  ;;  %v2601_v16 = vsel %vm2590_vm6, %v14614_v50, %v14624_v7  ;;  %v21555_v0 = vld [vmem:[#allocation32_spill] sm:$0xff]  ;;  %v21558_v18 = vld [vmem:[#allocation35_spill] sm:$0xff]  ;;  %v21559_v27 = vld [vmem:[#allocation37_spill] sm:$0xff]  ;;  %vm10704_vm0 = vcmask 39936  }
 0x212   : > { %13083 = vmatprep.subr.bf16.mxu1 %v13082_v25  ;;  %v2605_v14 = vsel %vm2590_vm6, %v14629_v9, %v14638_v34  ;;  %v13016_v61 = vpack.c.bf16 %v2603_v59, %v2599_v40  ;;  %v2606_v31 = vsel %vm2590_vm6, %v14638_v34, %v14639_v13  ;;  %v21553_v9 = vld [vmem:[#allocation31_spill] sm:$0xff]  ;;  %v21557_v7 = vld [vmem:[#allocation36_spill] sm:$0xff]  ;;  %v21560_v13 = vld [vmem:[#allocation9_spill] sm:$0xff]  ;;  %vm10318_vm2 = vcmask 302080  }
 0x213   : > { %v13086_v58 = vpack.c.bf16 %v2606_v31, %v2602_v15  ;;  %v13088_v3 = vpack.c.bf16 %v2605_v14, %v2601_v16  ;;  %v2780_v25 = vld [vmem:[%s21375_s3 + $0x60] sm:$0xff]  ;;  %vm10994_vm5 = vcmask 826368  }
 0x214   : > { %13017 = vmatpush1.bf16.msra.mxu0 %v13016_v61  ;;  %v21561_v61 = vld [vmem:[#allocation38_spill] sm:$0xff] }
 0x215   : > { %13085 = vmatpush1.bf16.msra.mxu1 %v13084_v36 }
 0x216   : > { %13087 = vmatprep.subr.bf16.mxu1 %v13086_v58 }
 0x217   : > { %3073 = vmatmul.mubr.f32.vlgmr.msra.gmra.mrb[28].mxu0 %v2768_v35 }
 0x218   : > { %3078 = vmatprep.mubr.f32.mxu0 %v2772_v17 }
 0x219   : > { %13089 = vmatpush1.bf16.msra.mxu1 %v13088_v3 }
 0x21b   : > { %3079 = vmatmul.mubr.f32.gmra.mrb[30].mxu0 %v2771_v38 }
 0x21c   : > { %3395 = vmatmul.mubr.f32.vlgmr.msra.gmra.mrb[28].mxu1 %v2768_v35  ;;  %3084 = vmatprep.mubr.f32.mxu0 %v2775_v4 }
 0x21d   : > { %3400 = vmatprep.mubr.f32.mxu1 %v2772_v17 }
 0x21e   : > { %v1124_v28 = vpop.permute.xlu0 %1123 }
 0x21f   : > { %3085 = vmatmul.mubr.f32.gmra.mrb[32].mxu0 %v2774_v24  ;;  %v17323_v62 = vadd.f32 %v1124_v28, %v21545_v39  ;;  %v17326_v12 = vadd.f32 %v1124_v28, %v21546_v60  ;;  %v1189_v33 = vadd.f32 %v1124_v28, %v21547_v55  ;;  %v1190_v2 = vadd.f32 %v1124_v28, %v21548_v23  ;;  %v1129_v56 = vpop.permute.xlu1 %1128  ;;  %v2783_v28 = vld [vmem:[%s21375_s3 + $0x78] sm:$0xff] }
 0x220   : > { %3401 = vmatmul.mubr.f32.gmra.mrb[30].mxu1 %v2771_v38  ;;  %3090 = vmatprep.mubr.f32.mxu0 %v2778_v49  ;;  %v17334_v52 = vadd.f32 %v1129_v56, %v21549_v22  ;;  %v17337_v6 = vadd.f32 %v1129_v56, %v21550_v30  ;;  %v17340_v50 = vadd.f32 %v1129_v56, %v21551_v43  ;;  %v21562_v38 = vld [vmem:[#allocation10_spill] sm:$0xff] }
 0x221   : > { %3406 = vmatprep.mubr.f32.mxu1 %v2775_v4  ;;  %v1192_v53 = vadd.f32 %v1129_v56, %v21552_v48  ;;  %v1243_v41 = vmax.f32 %v17323_v62, 0.0  ;;  %v1244_v54 = vmax.f32 %v17326_v12, 0.0  ;;  %v1245_v51 = vmax.f32 %v1189_v33, 0.0  ;;  %v21565_v56 = vld [vmem:[#allocation7_spill] sm:$0xff]  ;;  %v2787_v22 = vld [vmem:[%s21375_s3 + $0x98] sm:$0xff] }
 0x222   : > { %v1246_v21 = vmax.f32 %v1190_v2, 0.0  ;;  %v1247_v47 = vmax.f32 %v17334_v52, 0.0  ;;  %v1249_v63 = vmax.f32 %v17337_v6, 0.0  ;;  %v1134_v32 = vpop.permute.xlu0 %1133  ;;  %v1250_v45 = vmax.f32 %v17340_v50, 0.0 }
 0x223   : > { %v1248_v19 = vmax.f32 %v1192_v53, 0.0  ;;  %3091 = vmatmul.mubr.f32.gmra.mrb[34].mxu0 %v2777_v37  ;;  %v17351_v57 = vadd.f32 %v1134_v32, %v21553_v9  ;;  %v17354_v11 = vadd.f32 %v1134_v32, %v21554_v46  ;;  %v17357_v20 = vadd.f32 %v1134_v32, %v21555_v0  ;;  %v1139_v5 = vpop.permute.xlu1 %1138 }
 0x224   : > { %3407 = vmatmul.mubr.f32.gmra.mrb[32].mxu1 %v2774_v24  ;;  %v17360_v1 = vadd.f32 %v1134_v32, %v21556_v44  ;;  %3096 = vmatprep.mubr.f32.mxu0 %v2781_v26  ;;  %v17367_v29 = vadd.f32 %v1139_v5, %v21557_v7  ;;  %v1201_v8 = vadd.f32 %v1139_v5, %v21558_v18  ;;  %v21563_v24 = vld [vmem:[#allocation8_spill] sm:$0xff]  ;;  %v21564_v33 = vmov 0.0  }
 0x225   : > { %3412 = vmatprep.mubr.f32.mxu1 %v2778_v49  ;;  %v1202_v42 = vadd.f32 %v1139_v5, %v21559_v27  ;;  %v17375_v34 = vmul.f32 %v21560_v13, %v1248_v19  ;;  %v1251_v36 = vmax.f32 %v17351_v57, 0.0  ;;  %v1252_v40 = vmax.f32 %v17354_v11, 0.0  ;;  %v2790_v27 = vld [vmem:[%s21375_s3 + $0xb0] sm:$0xff] }
 0x226   : > { %v1253_v59 = vmax.f32 %v17357_v20, 0.0  ;;  %v1254_v15 = vmax.f32 %v17360_v1, 0.0  ;;  %v1257_v16 = vmax.f32 %v1201_v8, 0.0  ;;  %v1200_v31 = vadd.f32 %v1139_v5, %v21561_v61  ;;  %v14642_v58 = vpop.permute.xlu0 %14641 }
 0x227   : > { %v1258_v14 = vmax.f32 %v1202_v42, 0.0  ;;  %3097 = vmatmul.mubr.f32.gmra.mrb[36].mxu0 %v2780_v25  ;;  %v14644_v3 = vunpack.i.h.bf16 %v14642_v58  ;;  %v14643_v35 = vunpack.i.l.bf16 %v14642_v58  ;;  %v17382_v17 = vpop.permute.xlu1 %14646  ;;  %v17385_v4 = vmul.f32 %v21562_v38, %v1246_v21 }
 0x228   : > { %3413 = vmatmul.mubr.f32.gmra.mrb[34].mxu1 %v2777_v37  ;;  %v17388_v49 = vmul.f32 %v21563_v24, %v1245_v51  ;;  %3102 = vmatprep.mubr.f32.mxu0 %v2784_v10  ;;  %v1255_v39 = vmax.f32 %v17367_v29, 0.0  ;;  %v17395_v62 = vmul.f32 %v21563_v24, %v1257_v16  ;;  %v1256_v60 = vmax.f32 %v1200_v31, 0.0  ;;  %v2786_v51 = vld [vmem:[%s21375_s3 + $0x90] sm:$0xff]  ;;  %v2789_v31 = vld [vmem:[%s21375_s3 + $0xa8] sm:$0xff] }
 0x229   : > { %3418 = vmatprep.mubr.f32.mxu1 %v2781_v26  ;;  %v14649_v12 = vunpack.i.h.bf16 %v17382_v17  ;;  %v14648_v55 = vunpack.i.l.bf16 %v17382_v17  ;;  %v14700_v23 = vpack.i.bf16 %v21564_v33, %v17385_v4  ;;  %v17404_v37 = vmul.f32 %v21565_v56, %v1243_v41 }
 0x22a   : > { %v14690_v2 = vpack.i.bf16 %v17388_v49, %v21564_v33  ;;  %v17410_v52 = vmul.f32 %v21562_v38, %v1258_v14  ;;  %v14652_v30 = vpop.permute.xlu0 %14651  ;;  %v17413_v6 = vmul.f32 %v21560_v13, %v1244_v54  ;;  %v17416_v43 = vmul.f32 %v21565_v56, %v1247_v47 }
 0x22b   : > { %v2721_v50 = vsel %vm2719_vm7, %v14643_v35, %v14644_v3  ;;  %3103 = vmatmul.mubr.f32.gmra.mrb[38].mxu0 %v2783_v28  ;;  %v17420_v48 = vmul.f32 %v21560_v13, %v1256_v60  ;;  %14701 = vrot.lane.b32.xlu1 %v14700_v23, %s21431_s20  ;;  %v14653_v53 = vunpack.i.l.bf16 %v14652_v30  ;;  %v14657_v26 = vpop.permute.xlu1 %14656  ;;  %v2725_v41 = vsel %vm2719_vm7, %v14648_v55, %v14649_v12 }
 0x22c   : > { %3419 = vmatmul.mubr.f32.gmra.mrb[36].mxu1 %v2780_v25  ;;  %14691 = vrot.lane.b32.xlu0 %v14690_v2, %s21431_s20  ;;  %v17426_v54 = vmul.f32 %v21563_v24, %v1249_v63  ;;  %v14654_v21 = vunpack.i.h.bf16 %v14652_v30  ;;  %v14659_v47 = vunpack.i.h.bf16 %v14657_v26  ;;  %v14695_v19 = vpack.i.bf16 %v17413_v6, %v17404_v37 }
 0x22d   : > { %3424 = vmatprep.mubr.f32.mxu1 %v2784_v10  ;;  %v14705_v32 = vpack.i.bf16 %v17375_v34, %v17416_v43  ;;  %3108 = vmatprep.mubr.f32.mxu0 %v2787_v22  ;;  %v2720_v9 = vsel %vm2719_vm7, %v14653_v53, %v14643_v35  ;;  %v14658_v57 = vunpack.i.l.bf16 %v14657_v26  ;;  %v13018_v46 = vpack.c.bf16 %v2725_v41, %v2721_v50 }
 0x22e   : > { %v17437_v63 = vmul.f32 %v21562_v38, %v1250_v45  ;;  %v2724_v0 = vsel %vm2719_vm7, %v14659_v47, %v14648_v55  ;;  %v14662_v20 = vpop.permute.xlu0 %14661  ;;  %v17441_v44 = vmul.f32 %v21563_v24, %v1253_v59  ;;  %v17444_v1 = vmul.f32 %v21562_v38, %v1254_v15 }
 0x22f   : > { %v17447_v5 = vmul.f32 %v21565_v56, %v1251_v36  ;;  %3109 = vmatmul.mubr.f32.gmra.mrb[40].mxu0 %v2786_v51  ;;  %14706 = vrot.lane.b32.xlu1 %v14705_v32, %s21431_s20  ;;  %v14664_v25 = vunpack.i.h.bf16 %v14662_v20  ;;  %v14663_v45 = vunpack.i.l.bf16 %v14662_v20  ;;  %v14667_v7 = vpop.permute.xlu1 %14666  ;;  %v13020_v8 = vpack.c.bf16 %v2724_v0, %v2720_v9 }
 0x230   : > { %3425 = vmatmul.mubr.f32.gmra.mrb[38].mxu1 %v2783_v28  ;;  %14696 = vrot.lane.b32.xlu0 %v14695_v19, %s21431_s20  ;;  %v14710_v18 = vpack.i.bf16 %v17437_v63, %v17426_v54  ;;  %v2722_v42 = vsel %vm2719_vm7, %v14644_v3, %v14654_v21  ;;  %v14669_v10 = vunpack.i.h.bf16 %v14667_v7  ;;  %v14668_v36 = vunpack.i.l.bf16 %v14667_v7 }
 0x231   : > { %3430 = vmatprep.mubr.f32.mxu1 %v2787_v22  ;;  %13019 = vmatprep.subr.bf16.mxu0 %v13018_v46  ;;  %v14715_v59 = vpack.i.bf16 %v17441_v44, %v21564_v33  ;;  %v2726_v15 = vsel %vm2719_vm7, %v14649_v12, %v14663_v45  ;;  %v17463_v16 = vmul.f32 %v21560_v13, %v1252_v40 }
 0x232   : > { %13021 = vmatpush1.bf16.msra.mxu0 %v13020_v8  ;;  %v2723_v14 = vsel %vm2719_vm7, %v14654_v21, %v14658_v57  ;;  %v2727_v61 = vsel %vm2719_vm7, %v14663_v45, %v14664_v25  ;;  %v14677_v58 = vpop.permute.xlu0 %14676  ;;  %v13092_v35 = vpack.c.bf16 %v2726_v15, %v2722_v42  ;;  %v14740_v17 = vpack.i.bf16 %v17426_v54, %v17375_v34  ;;  %v2793_v21 = vld [vmem:[%s21375_s3 + $0xc8] sm:$0xff]  ;;  %v2792_v57 = vld [vmem:[%s21375_s3 + $0xc0] sm:$0xff] }
 0x233   : > { %v13090_v3 = vpack.c.bf16 %v2727_v61, %v2723_v14  ;;  %v17475_v11 = vmul.f32 %v21565_v56, %v1255_v39  ;;  %3114 = vmatprep.mubr.f32.mxu0 %v2790_v27  ;;  %14716 = vrot.lane.b32.xlu1 %v14715_v59, %s21431_s20  ;;  %v14679_v40 = vunpack.i.h.bf16 %v14677_v58  ;;  %v14678_v28 = vunpack.i.l.bf16 %v14677_v58  ;;  %v14672_v60 = vpop.permute.xlu1 %14671  ;;  %v2795_v14 = vld [vmem:[%s21375_s3 + $0xd8] sm:$0xff] }
 0x234   : > { %3431 = vmatmul.mubr.f32.gmra.mrb[40].mxu1 %v2786_v51  ;;  %14711 = vrot.lane.b32.xlu0 %v14710_v18, %s21431_s20  ;;  %v14725_v12 = vpack.i.bf16 %v21564_v33, %v17444_v1  ;;  %v14720_v55 = vpack.i.bf16 %v17463_v16, %v17447_v5  ;;  %v14673_v23 = vunpack.i.l.bf16 %v14672_v60  ;;  %v2729_v39 = vsel %vm2719_vm7, %v14668_v36, %v14669_v10 }
 0x235   : > { %13091 = vmatprep.subr.bf16.mxu1 %v13090_v3  ;;  %v14730_v29 = vpack.i.bf16 %v17420_v48, %v17475_v11  ;;  %v14750_v2 = vpack.i.bf16 %v17410_v52, %v17395_v62  ;;  %3115 = vmatmul.mubr.f32.gmra.mrb[42].mxu0 %v2789_v31  ;;  %v14674_v22 = vunpack.i.h.bf16 %v14672_v60  ;;  %v2733_v30 = vsel %vm2719_vm7, %v14678_v28, %v14679_v40  ;;  %v2798_v60 = vld [vmem:[%s21375_s3 + $0xf0] sm:$0xff] }
 0x236   : > { %13093 = vmatpush1.bf16.msra.mxu1 %v13092_v35  ;;  %v14735_v50 = vpack.i.bf16 %v17388_v49, %v17413_v6  ;;  %v14745_v53 = vpack.i.bf16 %v17385_v4, %v17404_v37  ;;  %v14682_v26 = vpop.permute.xlu0 %14681  ;;  %v13022_v41 = vpack.c.bf16 %v2733_v30, %v2729_v39  ;;  %v14765_v51 = vpack.i.bf16 %v17441_v44, %v17463_v16  ;;  %v2799_v35 = vld [vmem:[%s21375_s3 + $0xf8] sm:$0xff]  ;;  %v2804_v30 = vld [vmem:[%s21375_s3 + $0x120] sm:$0xff] }
 0x237   : > { %3436 = vmatprep.mubr.f32.mxu1 %v2790_v27  ;;  %14721 = vrot.lane.b32.xlu1 %v14720_v55, %s21431_s20  ;;  %v14684_v47 = vunpack.i.h.bf16 %v14682_v26  ;;  %v14683_v19 = vunpack.i.l.bf16 %v14682_v26  ;;  %v14687_v32 = vpop.permute.xlu1 %14686  ;;  %v14770_v9 = vpack.i.bf16 %v17444_v1, %v17447_v5  ;;  %v2728_v46 = vsel %vm2719_vm7, %v14673_v23, %v14668_v36  ;;  %v2796_v36 = vld [vmem:[%s21375_s3 + $0xe0] sm:$0xff]  ;;  %v2802_v55 = vld [vmem:[%s21375_s3 + $0x110] sm:$0xff]  ;;  %v2801_v23 = vld [vmem:[%s21375_s3 + $0x108] sm:$0xff] }
 0x238   : > { %14726 = vrot.lane.b32.xlu0 %v14725_v12, %s21431_s20  ;;  %v14689_v0 = vunpack.i.h.bf16 %v14687_v32  ;;  %v14688_v20 = vunpack.i.l.bf16 %v14687_v32  ;;  %13023 = vmatprep.subr.bf16.mxu0 %v13022_v41  ;;  %v14775_v25 = vpack.i.bf16 %v17395_v62, %v17420_v48  ;;  %v2730_v45 = vsel %vm2719_vm7, %v14669_v10, %v14674_v22  ;;  %v2807_v41 = vld [vmem:[%s21375_s3 + $0x138] sm:$0xff] }
 0x239   : > { %3437 = vmatmul.mubr.f32.gmra.mrb[42].mxu1 %v2789_v31  ;;  %v2732_v7 = vsel %vm2719_vm7, %v14684_v47, %v14678_v28  ;;  %v2731_v18 = vsel %vm2719_vm7, %v14674_v22, %v14683_v19  ;;  %3120 = vmatprep.mubr.f32.mxu0 %v2793_v21  ;;  %v14755_v12 = vpack.i.bf16 %v17416_v43, %v21564_v33  ;;  %v2811_v32 = vld [vmem:[%s21375_s3 + $0x158] sm:$0xff] }
 0x23a   : > { %3442 = vmatprep.mubr.f32.mxu1 %v2793_v21  ;;  %v2734_v8 = vsel %vm2719_vm7, %v14679_v40, %v14688_v20  ;;  %v13024_v27 = vpack.c.bf16 %v2732_v7, %v2728_v46  ;;  %v2735_v42 = vsel %vm2719_vm7, %v14688_v20, %v14689_v0  ;;  %3121 = vmatmul.mubr.f32.gmra.mrb[44].mxu0 %v2792_v57  ;;  %v4121_v46 = vld [vmem:[%s21383_s11 + $0xf8] sm:$0xff]  ;;  %v4120_v0 = vld [vmem:[%s21383_s11 + $0xf0] sm:$0xff]  ;;  %v2813_v7 = vld [vmem:[%s21375_s3 + $0x168] sm:$0xff]  ;;  %vm11251_vm7 = vcmask 744448  }
 0x23b   : > { %14741 = vrot.lane.b32.xlu1 %v14740_v17, %s16216_s19  ;;  %v13094_v10 = vpack.c.bf16 %v2735_v42, %v2731_v18  ;;  %v13096_v15 = vpack.c.bf16 %v2734_v8, %v2730_v45  ;;  %3126 = vmatprep.mubr.f32.mxu0 %v2796_v36  ;;  %v14760_v39 = vpack.i.bf16 %v21564_v33, %v17437_v63  ;;  %v17619_v45 = vpop.f32.mrb[16].mxu0  ;;  %v4122_v42 = vld [vmem:[%s21383_s11 + $0x100] sm:$0xff] }
 0x23c   : > { %14731 = vrot.lane.b32.xlu0 %v14730_v29, %s21431_s20  ;;  %13025 = vmatpush1.bf16.msra.mxu0 %v13024_v27  ;;  %v17555_v29 = vpop.f32.mrb[16].mxu1  ;;  %v14785_v47 = vpack.i.bf16 %v21564_v33, %v17410_v52  ;;  %v14780_v19 = vpack.i.bf16 %v17475_v11, %v21564_v33  ;;  %21574 = vst [vmem:[#allocation11_spill] sm:$0xff] %v17619_v45  ;;  %v17624_v18 = vpop.f32.mrb[17].mxu0  ;;  %v4123_v27 = vld [vmem:[%s21383_s11 + $0x108] sm:$0xff] }
 0x23d   : > { %3443 = vmatmul.mubr.f32.gmra.mrb[44].mxu1 %v2792_v57  ;;  %13095 = vmatprep.subr.bf16.mxu1 %v13094_v10  ;;  %21566 = vst [vmem:[#allocation39_spill] sm:$0xff] %v17555_v29  ;;  %v17562_v22 = vpop.f32.mrb[17].mxu1  ;;  %21575 = vst [vmem:[#allocation21_spill] sm:$0xff] %v17624_v18  ;;  %v17636_v10 = vpop.f32.mrb[18].mxu0 }
 0x23e   : > { %13097 = vmatpush1.bf16.msra.mxu1 %v13096_v15  ;;  %3127 = vmatmul.mubr.f32.gmra.mrb[46].mxu0 %v2795_v14  ;;  %21567 = vst [vmem:[#allocation19_spill] sm:$0xff] %v17562_v22  ;;  %21578 = vst [vmem:[#allocation22_spill] sm:$0xff] %v17636_v10  ;;  %v2770_v15 = vld [vmem:[%s21375_s3 + $0x10] sm:$0xff] }
 0x23f   : > { %14751 = vrot.lane.b32.xlu1 %v14750_v2, %s21431_s20  ;;  %3448 = vmatprep.mubr.f32.mxu1 %v2796_v36  ;;  %v2805_v2 = vld [vmem:[%s21375_s3 + $0x128] sm:$0xff] }
 0x240   : > { %14736 = vrot.lane.b32.xlu0 %v14735_v50, %s16216_s19  ;;  %3132 = vmatprep.mubr.f32.mxu0 %v2799_v35  ;;  %v17572_v50 = vpop.f32.mrb[18].mxu1 }
 0x241   : > { %3449 = vmatmul.mubr.f32.gmra.mrb[46].mxu1 %v2795_v14  ;;  %21568 = vst [vmem:[#allocation16_spill] sm:$0xff] %v17572_v50  ;;  %v17577_v26 = vpop.f32.mrb[19].mxu1  ;;  %v17641_v14 = vpop.f32.mrb[19].mxu0 }
 0x242   : > { %3133 = vmatmul.mubr.f32.gmra.mrb[48].mxu0 %v2798_v60  ;;  %3454 = vmatprep.mubr.f32.mxu1 %v2799_v35  ;;  %21569 = vst [vmem:[#allocation14_spill] sm:$0xff] %v17577_v26  ;;  %21579 = vst [vmem:[#allocation23_spill] sm:$0xff] %v17641_v14 }
 0x243   : > { %14756 = vrot.lane.b32.xlu1 %v14755_v12, %s16216_s19  ;;  %3138 = vmatprep.mubr.f32.mxu0 %v2802_v55 }
 0x244   : > { %14746 = vrot.lane.b32.xlu0 %v14745_v53, %s16216_s19  ;;  %v2808_v53 = vld [vmem:[%s21375_s3 + $0x140] sm:$0xff] }
 0x245   : > { %3455 = vmatmul.mubr.f32.gmra.mrb[48].mxu1 %v2798_v60  ;;  %v17646_v60 = vpop.f32.mrb[20].mxu0 }
 0x246   : > { %3139 = vmatmul.mubr.f32.gmra.mrb[50].mxu0 %v2801_v23  ;;  %3460 = vmatprep.mubr.f32.mxu1 %v2802_v55  ;;  %21581 = vst [vmem:[#allocation24_spill] sm:$0xff] %v17646_v60  ;;  %v17650_v55 = vpop.f32.mrb[21].mxu0 }
 0x247   : > { %14766 = vrot.lane.b32.xlu1 %v14765_v51, %s16216_s19  ;;  %3144 = vmatprep.mubr.f32.mxu0 %v2805_v2  ;;  %v17590_v51 = vpop.f32.mrb[20].mxu1  ;;  %21583 = vst [vmem:[#allocation28_spill] sm:$0xff] %v17650_v55 }
 0x248   : > { %14761 = vrot.lane.b32.xlu0 %v14760_v39, %s16216_s19  ;;  %21570 = vst [vmem:[#allocation12_spill] sm:$0xff] %v17590_v51  ;;  %v17592_v21 = vpop.f32.mrb[21].mxu1  ;;  %v2773_v39 = vld [vmem:[%s21375_s3 + $0x28] sm:$0xff] }
 0x249   : > { %3461 = vmatmul.mubr.f32.gmra.mrb[50].mxu1 %v2801_v23  ;;  %21571 = vst [vmem:[#allocation18_spill] sm:$0xff] %v17592_v21  ;;  %v17606_v57 = vpop.f32.mrb[22].mxu1  ;;  %v17654_v23 = vpop.f32.mrb[22].mxu0 }
 0x24a   : > { %3145 = vmatmul.mubr.f32.gmra.mrb[52].mxu0 %v2804_v30  ;;  %3466 = vmatprep.mubr.f32.mxu1 %v2805_v2  ;;  %21572 = vst [vmem:[#allocation15_spill] sm:$0xff] %v17606_v57  ;;  %v17614_v20 = vpop.f32.mrb[23].mxu1  ;;  %21584 = vst [vmem:[#allocation27_spill] sm:$0xff] %v17654_v23  ;;  %v17660_v2 = vpop.f32.mrb[23].mxu0 }
 0x24b   : > { %14771 = vrot.lane.b32.xlu1 %v14770_v9, %s16216_s19  ;;  %3150 = vmatprep.mubr.f32.mxu0 %v2808_v53  ;;  %v2810_v9 = vld [vmem:[%s21375_s3 + $0x150] sm:$0xff]  ;;  %21573 = vst [vmem:[#allocation13_spill] sm:$0xff] %v17614_v20  ;;  %v17626_v8 = vpop.f32.mrb[24].mxu1  ;;  %21585 = vst [vmem:[#allocation29_spill] sm:$0xff] %v17660_v2 }
 0x24c   : > { %14776 = vrot.lane.b32.xlu0 %v14775_v25, %s16216_s19  ;;  %v2814_v25 = vld [vmem:[%s21375_s3 + $0x170] sm:$0xff]  ;;  %21576 = vst [vmem:[#allocation17_spill] sm:$0xff] %v17626_v8  ;;  %v17634_v36 = vpop.f32.mrb[25].mxu1 }
 0x24d   : > { %3467 = vmatmul.mubr.f32.gmra.mrb[52].mxu1 %v2804_v30  ;;  %21577 = vst [vmem:[#allocation20_spill] sm:$0xff] %v17634_v36  ;;  %v17643_v35 = vpop.f32.mrb[26].mxu1  ;;  %v17662_v30 = vpop.f32.mrb[24].mxu0 }
 0x24e   : > { %3151 = vmatmul.mubr.f32.gmra.mrb[54].mxu0 %v2807_v41  ;;  %3472 = vmatprep.mubr.f32.mxu1 %v2808_v53  ;;  %21580 = vst [vmem:[#allocation25_spill] sm:$0xff] %v17643_v35  ;;  %v17648_v12 = vpop.f32.mrb[27].mxu1  ;;  %21586 = vst [vmem:[#allocation30_spill] sm:$0xff] %v17662_v30  ;;  %v17665_v53 = vpop.f32.mrb[25].mxu0 }
 0x24f   : > { %14786 = vrot.lane.b32.xlu1 %v14785_v47, %s16216_s19  ;;  %3156 = vmatprep.mubr.f32.mxu0 %v2811_v32  ;;  %21582 = vst [vmem:[#allocation26_spill] sm:$0xff] %v17648_v12  ;;  %21587 = vst [vmem:[#allocation31_spill] sm:$0xff] %v17665_v53  ;;  %v2776_v47 = vld [vmem:[%s21375_s3 + $0x40] sm:$0xff] }
 0x250   : > { %14781 = vrot.lane.b32.xlu0 %v14780_v19, %s16216_s19 }
 0x251   : > { %3473 = vmatmul.mubr.f32.gmra.mrb[54].mxu1 %v2807_v41  ;;  %v17669_v41 = vpop.f32.mrb[26].mxu0 }
 0x252   : > { %3157 = vmatmul.mubr.f32.gmra.mrb[56].mxu0 %v2810_v9  ;;  %3478 = vmatprep.mubr.f32.mxu1 %v2811_v32  ;;  %21588 = vst [vmem:[#allocation33_spill] sm:$0xff] %v17669_v41  ;;  %v17675_v19 = vpop.f32.mrb[27].mxu0  ;;  %v2779_v32 = vld [vmem:[%s21375_s3 + $0x58] sm:$0xff] }
 0x253   : > { %4131 = vperm.xlu1 %14289, %v4121_v46   ;;  %3162 = vmatprep.mubr.f32.mxu0 %v2814_v25  ;;  %21589 = vst [vmem:[#allocation32_spill] sm:$0xff] %v17675_v19  ;;  %v2785_v46 = vld [vmem:[%s21375_s3 + $0x88] sm:$0xff] }
 0x254   : > { %4126 = vperm.xlu0 %14288, %v4120_v0   ;;  %v2788_v0 = vld [vmem:[%s21375_s3 + $0xa0] sm:$0xff] }
 0x255   : > { %3479 = vmatmul.mubr.f32.gmra.mrb[56].mxu1 %v2810_v9  ;;  %v2782_v9 = vld [vmem:[%s21375_s3 + $0x70] sm:$0xff] }
 0x256   : > { %3163 = vmatmul.mubr.f32.gmra.mrb[58].mxu0 %v2813_v7  ;;  %3484 = vmatprep.mubr.f32.mxu1 %v2814_v25  ;;  %v2791_v25 = vld [vmem:[%s21375_s3 + $0xb8] sm:$0xff] }
 0x257   : > { %4141 = vperm.xlu1 %14289, %v4123_v27   ;;  %3233 = vmatprep.mubr.f32.mxu0 %v21564_v33  ;;  %v2797_v27 = vld [vmem:[%s21375_s3 + $0xe8] sm:$0xff] }
 0x258   : > { %4136 = vperm.xlu0 %14288, %v4122_v42   ;;  %v2800_v42 = vld [vmem:[%s21375_s3 + $0x100] sm:$0xff] }
 0x259   : > { %3485 = vmatmul.mubr.f32.gmra.mrb[58].mxu1 %v2813_v7  ;;  %v2794_v7 = vld [vmem:[%s21375_s3 + $0xd0] sm:$0xff] }
 0x25a   : > { %12728 = vmatmul.mubr.msk.f32.vlgmr.msra.gmra.mrb[28].mxu0 %vm1913_vm1, %v2770_v15  ;;  %3555 = vmatprep.mubr.f32.mxu1 %v21564_v33 }
 0x25b   : > { %3239 = vmatprep.mubr.f32.mxu0 %v21564_v33 }
 0x25d   : > { %12744 = vmatmul.mubr.msk.f32.vlgmr.msra.gmra.mrb[28].mxu1 %vm1913_vm1, %v2770_v15  ;;  %v2803_v15 = vld [vmem:[%s21375_s3 + $0x118] sm:$0xff] }
 0x25e   : > { %12729 = vmatmul.mubr.msk.f32.gmra.mrb[30].mxu0 %vm1913_vm1, %v2773_v39  ;;  %3561 = vmatprep.mubr.f32.mxu1 %v21564_v33 }
 0x25f   : > { %3245 = vmatprep.mubr.f32.mxu0 %v21564_v33 }
 0x261   : > { %12745 = vmatmul.mubr.msk.f32.gmra.mrb[30].mxu1 %vm1913_vm1, %v2773_v39  ;;  %v2806_v39 = vld [vmem:[%s21375_s3 + $0x130] sm:$0xff] }
 0x262   : > { %12730 = vmatmul.mubr.msk.f32.gmra.mrb[32].mxu0 %vm1913_vm1, %v2776_v47  ;;  %3567 = vmatprep.mubr.f32.mxu1 %v21564_v33 }
 0x263   : > { %3251 = vmatprep.mubr.f32.mxu0 %v21564_v33 }
 0x265   : > { %12746 = vmatmul.mubr.msk.f32.gmra.mrb[32].mxu1 %vm1913_vm1, %v2776_v47  ;;  %v2809_v47 = vld [vmem:[%s21375_s3 + $0x148] sm:$0xff] }
 0x266   : > { %12731 = vmatmul.mubr.msk.f32.gmra.mrb[34].mxu0 %vm1913_vm1, %v2779_v32  ;;  %3573 = vmatprep.mubr.f32.mxu1 %v21564_v33 }
 0x267   : > { %3257 = vmatprep.mubr.f32.mxu0 %v21564_v33 }
 0x269   : > { %12747 = vmatmul.mubr.msk.f32.gmra.mrb[34].mxu1 %vm1913_vm1, %v2779_v32  ;;  %v2812_v32 = vld [vmem:[%s21375_s3 + $0x160] sm:$0xff] }
 0x26a   : > { %12732 = vmatmul.mubr.msk.f32.gmra.mrb[36].mxu0 %vm1913_vm1, %v2782_v9  ;;  %3579 = vmatprep.mubr.f32.mxu1 %v21564_v33 }
 0x26b   : > { %3263 = vmatprep.mubr.f32.mxu0 %v21564_v33 }
 0x26d   : > { %12748 = vmatmul.mubr.msk.f32.gmra.mrb[36].mxu1 %vm1913_vm1, %v2782_v9  ;;  %v2815_v9 = vld [vmem:[%s21375_s3 + $0x178] sm:$0xff] }
 0x26e   : > { %12733 = vmatmul.mubr.msk.f32.gmra.mrb[38].mxu0 %vm1913_vm1, %v2785_v46  ;;  %3585 = vmatprep.mubr.f32.mxu1 %v21564_v33 }
 0x26f   : > { %3269 = vmatprep.mubr.f32.mxu0 %v21564_v33 }
 0x271   : > { %12749 = vmatmul.mubr.msk.f32.gmra.mrb[38].mxu1 %vm1913_vm1, %v2785_v46 }
 0x272   : > { %12734 = vmatmul.mubr.msk.f32.gmra.mrb[40].mxu0 %vm1913_vm1, %v2788_v0  ;;  %3591 = vmatprep.mubr.f32.mxu1 %v21564_v33 }
 0x273   : > { %3275 = vmatprep.mubr.f32.mxu0 %v21564_v33 }
 0x275   : > { %12750 = vmatmul.mubr.msk.f32.gmra.mrb[40].mxu1 %vm1913_vm1, %v2788_v0 }
 0x276   : > { %12735 = vmatmul.mubr.msk.f32.gmra.mrb[42].mxu0 %vm1913_vm1, %v2791_v25  ;;  %3597 = vmatprep.mubr.f32.mxu1 %v21564_v33 }
 0x277   : > { %3281 = vmatprep.mubr.f32.mxu0 %v21564_v33 }
 0x279   : > { %12751 = vmatmul.mubr.msk.f32.gmra.mrb[42].mxu1 %vm1913_vm1, %v2791_v25 }
 0x27a   : > { %12736 = vmatmul.mubr.msk.f32.gmra.mrb[44].mxu0 %vm1913_vm1, %v2794_v7  ;;  %3603 = vmatprep.mubr.f32.mxu1 %v21564_v33 }
 0x27b   : > { %3287 = vmatprep.mubr.f32.mxu0 %v21564_v33 }
 0x27d   : > { %12752 = vmatmul.mubr.msk.f32.gmra.mrb[44].mxu1 %vm1913_vm1, %v2794_v7 }
 0x27e   : > { %12737 = vmatmul.mubr.msk.f32.gmra.mrb[46].mxu0 %vm1913_vm1, %v2797_v27  ;;  %3609 = vmatprep.mubr.f32.mxu1 %v21564_v33 }
 0x27f   : > { %3293 = vmatprep.mubr.f32.mxu0 %v21564_v33 }
 0x281   : > { %12753 = vmatmul.mubr.msk.f32.gmra.mrb[46].mxu1 %vm1913_vm1, %v2797_v27 }
 0x282   : > { %12738 = vmatmul.mubr.msk.f32.gmra.mrb[48].mxu0 %vm1913_vm1, %v2800_v42  ;;  %3615 = vmatprep.mubr.f32.mxu1 %v21564_v33 }
 0x283   : > { %3299 = vmatprep.mubr.f32.mxu0 %v21564_v33 }
 0x285   : > { %12754 = vmatmul.mubr.msk.f32.gmra.mrb[48].mxu1 %vm1913_vm1, %v2800_v42 }
 0x286   : > { %12739 = vmatmul.mubr.msk.f32.gmra.mrb[50].mxu0 %vm1913_vm1, %v2803_v15  ;;  %3621 = vmatprep.mubr.f32.mxu1 %v21564_v33 }
 0x287   : > { %3305 = vmatprep.mubr.f32.mxu0 %v21564_v33 }
 0x289   : > { %12755 = vmatmul.mubr.msk.f32.gmra.mrb[50].mxu1 %vm1913_vm1, %v2803_v15 }
 0x28a   : > { %12740 = vmatmul.mubr.msk.f32.gmra.mrb[52].mxu0 %vm1913_vm1, %v2806_v39  ;;  %3627 = vmatprep.mubr.f32.mxu1 %v21564_v33 }
 0x28b   : > { %3311 = vmatprep.mubr.f32.mxu0 %v21564_v33 }
 0x28d   : > { %12756 = vmatmul.mubr.msk.f32.gmra.mrb[52].mxu1 %vm1913_vm1, %v2806_v39 }
 0x28e   : > { %12741 = vmatmul.mubr.msk.f32.gmra.mrb[54].mxu0 %vm1913_vm1, %v2809_v47  ;;  %3633 = vmatprep.mubr.f32.mxu1 %v21564_v33 }
 0x28f   : > { %3317 = vmatprep.mubr.f32.mxu0 %v21564_v33 }
 0x291   : > { %12757 = vmatmul.mubr.msk.f32.gmra.mrb[54].mxu1 %vm1913_vm1, %v2809_v47 }
 0x292   : > { %12742 = vmatmul.mubr.msk.f32.gmra.mrb[56].mxu0 %vm1913_vm1, %v2812_v32  ;;  %3639 = vmatprep.mubr.f32.mxu1 %v21564_v33 }
 0x293   : > { %3323 = vmatprep.mubr.f32.mxu0 %v21564_v33 }
 0x295   : > { %12758 = vmatmul.mubr.msk.f32.gmra.mrb[56].mxu1 %vm1913_vm1, %v2812_v32 }
 0x296   : > { %12743 = vmatmul.mubr.msk.f32.gmra.mrb[58].mxu0 %vm1913_vm1, %v2815_v9  ;;  %3645 = vmatprep.mubr.f32.mxu1 %v21564_v33 }
 0x297   : > { %4220 = vmatprep.mubr.f32.mxu0 %v21564_v33 }
 0x299   : > { %12759 = vmatmul.mubr.msk.f32.gmra.mrb[58].mxu1 %vm1913_vm1, %v2815_v9 }
 0x29a   : > { %4309 = vmatprep.mubr.f32.mxu1 %v21564_v33 }
 0x29d   : > { %v14702_v46 = vpop.permute.xlu1 %14701 }
 0x29e   : > { %v14692_v0 = vpop.permute.xlu0 %14691  ;;  %v14704_v25 = vunpack.i.h.bf16 %v14702_v46  ;;  %v14703_v28 = vunpack.i.l.bf16 %v14702_v46 }
 0x29f   : > { %v14693_v7 = vunpack.i.l.bf16 %v14692_v0  ;;  %v14694_v40 = vunpack.i.h.bf16 %v14692_v0 }
 0x2a1   : > { %v14707_v42 = vpop.permute.xlu1 %14706  ;;  %v3863_v46 = vsel %vm1913_vm1, %v14694_v40, %v14703_v28 }
 0x2a2   : > { %v14697_v27 = vpop.permute.xlu0 %14696  ;;  %v14709_v47 = vunpack.i.h.bf16 %v14707_v42  ;;  %v14708_v32 = vunpack.i.l.bf16 %v14707_v42 }
 0x2a3   : > { %v14699_v15 = vunpack.i.h.bf16 %v14697_v27  ;;  %v14698_v39 = vunpack.i.l.bf16 %v14697_v27 }
 0x2a4   : > { %v3864_v3 = vsel %vm1913_vm1, %v14704_v25, %v14708_v32  ;;  %v3865_v61 = vsel %vm1913_vm1, %v14708_v32, %v14709_v47 }
 0x2a5   : > { %v3860_v17 = vsel %vm1913_vm1, %v14693_v7, %v14698_v39  ;;  %v3861_v9 = vsel %vm1913_vm1, %v14698_v39, %v14699_v15  ;;  %v14717_v31 = vpop.permute.xlu1 %14716  ;;  %v3862_v27 = vsel %vm1913_vm1, %v14699_v15, %v14694_v40 }
 0x2a6   : > { %v14712_v58 = vpop.permute.xlu0 %14711  ;;  %v13100_v35 = vpack.c.bf16 %v3864_v3, %v3860_v17  ;;  %v13098_v19 = vpack.c.bf16 %v3865_v61, %v3861_v9  ;;  %v14718_v3 = vunpack.i.l.bf16 %v14717_v31 }
 0x2a7   : > { %v14714_v59 = vunpack.i.h.bf16 %v14712_v58  ;;  %v14713_v12 = vunpack.i.l.bf16 %v14712_v58 }
 0x2a8   : > { %13099 = vmatprep.subr.bf16.mxu0 %v13098_v19  ;;  %v14719_v19 = vunpack.i.h.bf16 %v14717_v31 }
 0x2a9   : > { %v3866_v42 = vsel %vm1913_vm1, %v14709_v47, %v14713_v12  ;;  %v3867_v0 = vsel %vm1913_vm1, %v14713_v12, %v14714_v59  ;;  %v14722_v7 = vpop.permute.xlu1 %14721  ;;  %13101 = vmatpush1.bf16.msra.mxu0 %v13100_v35 }
 0x2aa   : > { %v14727_v25 = vpop.permute.xlu0 %14726  ;;  %v13122_v39 = vpack.c.bf16 %v3867_v0, %v3863_v46  ;;  %v13124_v41 = vpack.c.bf16 %v3866_v42, %v3862_v27  ;;  %v14724_v32 = vunpack.i.h.bf16 %v14722_v7  ;;  %v14723_v36 = vunpack.i.l.bf16 %v14722_v7 }
 0x2ab   : > { %v14729_v17 = vunpack.i.h.bf16 %v14727_v25  ;;  %v14728_v40 = vunpack.i.l.bf16 %v14727_v25 }
 0x2ac   : > { %13123 = vmatprep.subr.bf16.mxu1 %v13122_v39  ;;  %v3868_v59 = vsel %vm1913_vm1, %v14718_v3, %v14723_v36  ;;  %v3869_v12 = vsel %vm1913_vm1, %v14723_v36, %v14724_v32  ;;  %v3870_v7 = vsel %vm1913_vm1, %v14724_v32, %v14719_v19 }
 0x2ad   : > { %13125 = vmatpush1.bf16.msra.mxu1 %v13124_v41  ;;  %v17782_v58 = vpop.permute.xlu1 %14741  ;;  %v3871_v25 = vsel %vm1913_vm1, %v14719_v19, %v14728_v40 }
 0x2ae   : > { %v14732_v61 = vpop.permute.xlu0 %14731  ;;  %v14744_v31 = vunpack.i.h.bf16 %v17782_v58 }
 0x2af   : > { %v14734_v15 = vunpack.i.h.bf16 %v14732_v61  ;;  %v14733_v47 = vunpack.i.l.bf16 %v14732_v61 }
 0x2b1   : > { %v3872_v28 = vsel %vm1913_vm1, %v14729_v17, %v14733_v47  ;;  %v3873_v35 = vsel %vm1913_vm1, %v14733_v47, %v14734_v15  ;;  %v14752_v9 = vpop.permute.xlu1 %14751  ;;  %v14743_v17 = vunpack.i.l.bf16 %v17782_v58 }
 0x2b2   : > { %v14737_v27 = vpop.permute.xlu0 %14736  ;;  %v13102_v41 = vpack.c.bf16 %v3873_v35, %v3869_v12  ;;  %v13104_v42 = vpack.c.bf16 %v3872_v28, %v3868_v59  ;;  %v14754_v46 = vunpack.i.h.bf16 %v14752_v9  ;;  %v14753_v0 = vunpack.i.l.bf16 %v14752_v9 }
 0x2b3   : > { %v14739_v61 = vunpack.i.h.bf16 %v14737_v27  ;;  %v14738_v3 = vunpack.i.l.bf16 %v14737_v27  ;;  %v21590_v28 = vpack.c.bf16 %v17375_v34, %v17413_v6  ;;  %v21592_v34 = vpack.c.bf16 %v17420_v48, %v17463_v16 }
 0x2b4   : > { %13103 = vmatprep.subr.bf16.mxu0 %v13102_v41  ;;  %v3874_v39 = vsel %vm1913_vm1, %v14734_v15, %v14753_v0  ;;  %v3875_v36 = vsel %vm1913_vm1, %v14753_v0, %v14754_v46  ;;  %v21591_v15 = vpack.c.bf16 %v17416_v43, %v17404_v37  ;;  %v21593_v6 = vpack.c.bf16 %v17437_v63, %v17385_v4 }
 0x2b5   : > { %13105 = vmatpush1.bf16.msra.mxu0 %v13104_v42  ;;  %v14757_v47 = vpop.permute.xlu1 %14756  ;;  %v13126_v32 = vpack.c.bf16 %v3875_v36, %v3871_v25  ;;  %v13128_v12 = vpack.c.bf16 %v3874_v39, %v3870_v7  ;;  %v4021_v19 = vsel %vm2590_vm6, %v14738_v3, %v14739_v61  ;;  %v4025_v42 = vsel %vm2590_vm6, %v14743_v17, %v14744_v31 }
 0x2b6   : > { %v14747_v59 = vpop.permute.xlu0 %14746  ;;  %13107 = vmatprep.subr.bf16.mxu0 %v21590_v28  ;;  %v14759_v40 = vunpack.i.h.bf16 %v14757_v47  ;;  %v14758_v9 = vunpack.i.l.bf16 %v14757_v47  ;;  %v13114_v7 = vpack.c.bf16 %v4025_v42, %v4021_v19  ;;  %v21594_v36 = vpack.c.bf16 %v17475_v11, %v17447_v5 }
 0x2b7   : > { %v14748_v35 = vunpack.i.l.bf16 %v14747_v59  ;;  %13127 = vmatprep.subr.bf16.mxu1 %v13126_v32  ;;  %v14749_v58 = vunpack.i.h.bf16 %v14747_v59  ;;  %v21595_v48 = vpack.c.bf16 %v17426_v54, %v17388_v49 }
 0x2b8   : > { %13129 = vmatpush1.bf16.msra.mxu1 %v13128_v12  ;;  %v4024_v37 = vsel %vm2590_vm6, %v14759_v40, %v14743_v17  ;;  %v21597_v12 = vpack.c.bf16 %v17395_v62, %v17441_v44 }
 0x2b9   : > { %13109 = vmatpush1.bf16.msra.mxu0 %v21591_v15  ;;  %v14767_v27 = vpop.permute.xlu1 %14766  ;;  %13131 = vmatprep.subr.bf16.mxu1 %v21593_v6  ;;  %v4020_v43 = vsel %vm2590_vm6, %v14748_v35, %v14738_v3  ;;  %v21596_v3 = vpack.c.bf16 %v17410_v52, %v17444_v1  ;;  %v4023_v5 = vsel %vm2590_vm6, %v14749_v58, %v14758_v9 }
 0x2ba   : > { %v14762_v41 = vpop.permute.xlu0 %14761  ;;  %13111 = vmatprep.subr.bf16.mxu0 %v21592_v34  ;;  %v14769_v25 = vunpack.i.h.bf16 %v14767_v27  ;;  %v14768_v39 = vunpack.i.l.bf16 %v14767_v27  ;;  %v13116_v17 = vpack.c.bf16 %v4024_v37, %v4020_v43  ;;  %v4022_v54 = vsel %vm2590_vm6, %v14739_v61, %v14749_v58 }
 0x2bb   : > { %v14764_v46 = vunpack.i.h.bf16 %v14762_v41  ;;  %v14763_v0 = vunpack.i.l.bf16 %v14762_v41 }
 0x2bc   : > { %13133 = vmatpush1.bf16.msra.mxu1 %v21595_v48  ;;  %v4029_v52 = vsel %vm2590_vm6, %v14768_v39, %v14769_v25 }
 0x2bd   : > { %13113 = vmatpush1.bf16.msra.mxu0 %v21594_v36  ;;  %v4027_v4 = vsel %vm2590_vm6, %v14763_v0, %v14764_v46  ;;  %v14772_v63 = vpop.permute.xlu1 %14771  ;;  %13135 = vmatprep.subr.bf16.mxu1 %v21596_v3  ;;  %v4026_v47 = vsel %vm2590_vm6, %v14744_v31, %v14763_v0  ;;  %v4068_v46 = vld [vmem:[%s21376_s4] sm:$0xff]  ;;  %v4069_v0 = vld [vmem:[%s21376_s4 + $0x8] sm:$0xff] }
 0x2be   : > { %v14777_v16 = vpop.permute.xlu0 %14776  ;;  %13115 = vmatprep.subr.bf16.mxu0 %v13114_v7  ;;  %v14774_v11 = vunpack.i.h.bf16 %v14772_v63  ;;  %v14773_v32 = vunpack.i.l.bf16 %v14772_v63  ;;  %v13138_v49 = vpack.c.bf16 %v4027_v4, %v4023_v5  ;;  %v13140_v15 = vpack.c.bf16 %v4026_v47, %v4022_v54  ;;  %v4070_v7 = vld [vmem:[%s21376_s4 + $0x10] sm:$0xff] }
 0x2bf   : > { %v14779_v59 = vunpack.i.h.bf16 %v14777_v16  ;;  %v14778_v28 = vunpack.i.l.bf16 %v14777_v16 }
 0x2c0   : > { %13137 = vmatpush1.bf16.msra.mxu1 %v21597_v12  ;;  %v4028_v61 = vsel %vm2590_vm6, %v14773_v32, %v14768_v39  ;;  %v4030_v58 = vsel %vm2590_vm6, %v14769_v25, %v14774_v11  ;;  %v4071_v25 = vld [vmem:[%s21376_s4 + $0x18] sm:$0xff] }
 0x2c1   : > { %13117 = vmatpush1.bf16.msra.mxu0 %v13116_v17  ;;  %v4033_v1 = vsel %vm2590_vm6, %v14778_v28, %v14779_v59  ;;  %v14787_v40 = vpop.permute.xlu1 %14786  ;;  %13139 = vmatprep.subr.bf16.mxu1 %v13138_v49 }
 0x2c2   : > { %v14782_v31 = vpop.permute.xlu0 %14781  ;;  %v13118_v35 = vpack.c.bf16 %v4033_v1, %v4029_v52  ;;  %v14789_v19 = vunpack.i.h.bf16 %v14787_v40  ;;  %v14788_v9 = vunpack.i.l.bf16 %v14787_v40 }
 0x2c3   : > { %v14784_v27 = vunpack.i.h.bf16 %v14782_v31  ;;  %v14783_v41 = vunpack.i.l.bf16 %v14782_v31 }
 0x2c4   : > { %13119 = vmatprep.subr.bf16.mxu0 %v13118_v35  ;;  %v4034_v62 = vsel %vm2590_vm6, %v14779_v59, %v14788_v9  ;;  %13141 = vmatpush1.bf16.msra.mxu1 %v13140_v15  ;;  %v4035_v6 = vsel %vm2590_vm6, %v14788_v9, %v14789_v19 }
 0x2c5   : > { %v4032_v44 = vsel %vm2590_vm6, %v14784_v27, %v14778_v28  ;;  %v4031_v34 = vsel %vm2590_vm6, %v14774_v11, %v14783_v41  ;;  %v13144_v43 = vpack.c.bf16 %v4034_v62, %v4030_v58 }
 0x2c6   : > { %v13120_v42 = vpack.c.bf16 %v4032_v44, %v4028_v61  ;;  %v13142_v37 = vpack.c.bf16 %v4035_v6, %v4031_v34 }
 0x2c8   : > { %13121 = vmatpush1.bf16.msra.mxu0 %v13120_v42  ;;  %13143 = vmatprep.subr.bf16.mxu1 %v13142_v37 }
 0x2c9   : > { %13145 = vmatpush1.bf16.msra.mxu1 %v13144_v43 }
 0x2cb   : > { %12760 = vmatmul.mubr.msk.f32.vlgmr.msra.gmra.mrb[60].mxu0 %vm2590_vm6, %v4068_v46 }
 0x2cc   : > { %12764 = vmatmul.mubr.msk.f32.vlgmr.msra.gmra.mrb[60].mxu1 %vm2590_vm6, %v4068_v46  ;;  %4226 = vmatprep.mubr.f32.mxu0 %v21564_v33 }
 0x2cd   : > { %4315 = vmatprep.mubr.f32.mxu1 %v21564_v33 }
 0x2cf   : > { %12761 = vmatmul.mubr.msk.f32.gmra.mrb[62].mxu0 %vm2590_vm6, %v4069_v0 }
 0x2d0   : > { %12765 = vmatmul.mubr.msk.f32.gmra.mrb[62].mxu1 %vm2590_vm6, %v4069_v0  ;;  %4232 = vmatprep.mubr.f32.mxu0 %v21564_v33 }
 0x2d1   : > { %4321 = vmatprep.mubr.f32.mxu1 %v21564_v33 }
 0x2d2   : > { %v4132_v59 = vpop.permute.xlu1 %4131 }
 0x2d3   : > { %12762 = vmatmul.mubr.msk.f32.gmra.mrb[64].mxu0 %vm2590_vm6, %v4070_v7  ;;  %v4127_v39 = vpop.permute.xlu0 %4126 }
 0x2d4   : > { %12766 = vmatmul.mubr.msk.f32.gmra.mrb[64].mxu1 %vm2590_vm6, %v4070_v7  ;;  %4238 = vmatprep.mubr.f32.mxu0 %v21564_v33 }
 0x2d5   : > { %4327 = vmatprep.mubr.f32.mxu1 %v21564_v33 }
 0x2d7   : > { %12763 = vmatmul.mubr.msk.f32.gmra.mrb[66].mxu0 %vm2590_vm6, %v4071_v25  ;;  %v4137_v9 = vpop.permute.xlu0 %4136 }
 0x2d8   : > { %12767 = vmatmul.mubr.msk.f32.gmra.mrb[66].mxu1 %vm2590_vm6, %v4071_v25 }
 0x39e   : > { %v4222_v36 = vpop.f32.mrb[60].mxu0 }
 0x39f   : > { %v4224_v48 = vpop.f32.mrb[61].mxu0  ;;  %v4311_v4 = vpop.f32.mrb[60].mxu1  ;;  %v4223_v63 = vadd.f32 %v4222_v36, %v4127_v39 }
 0x3a0   : > { %v4312_v16 = vadd.f32 %v4311_v4, %v4127_v39  ;;  %v4313_v3 = vpop.f32.mrb[61].mxu1  ;;  %v4225_v17 = vadd.f32 %v4224_v48, %v4127_v39  ;;  %v4142_v48 = vpop.permute.xlu1 %4141 }
 0x3a1   : > { %v4314_v47 = vadd.f32 %v4313_v3, %v4127_v39  ;;  %v4334_v12 = vmax.f32 %v4223_v63, 0.0 }
 0x3a2   : > { %v4336_v28 = vmax.f32 %v4312_v16, 0.0  ;;  %v4228_v5 = vpop.f32.mrb[62].mxu0  ;;  %v4335_v35 = vmax.f32 %v4225_v17, 0.0 }
 0x3a3   : > { %v4337_v11 = vmax.f32 %v4314_v47, 0.0  ;;  %v4229_v32 = vadd.f32 %v4228_v5, %v4132_v59  ;;  %v4230_v49 = vpop.f32.mrb[63].mxu0  ;;  %v4317_v54 = vpop.f32.mrb[62].mxu1  ;;  %v17871_v37 = vmul.f32 %v4334_v12, %v21565_v56 }
 0x3a4   : > { %v17861_v52 = vmul.f32 %v4336_v28, %v21563_v24  ;;  %v4231_v1 = vadd.f32 %v4230_v49, %v4132_v59  ;;  %v4318_v40 = vadd.f32 %v4317_v54, %v4132_v59  ;;  %v4319_v31 = vpop.f32.mrb[63].mxu1  ;;  %v17875_v25 = vmul.f32 %v4335_v35, %v21560_v13 }
 0x3a5   : > { %v17864_v15 = vmul.f32 %v4337_v11, %v21562_v38  ;;  %v4320_v19 = vadd.f32 %v4319_v31, %v4132_v59  ;;  %v4338_v27 = vmax.f32 %v4229_v32, 0.0 }
 0x3a6   : > { %21598 = vst [vmem:[#allocation34_spill] sm:$0xff] %v17861_v52  ;;  %v4339_v41 = vmax.f32 %v4231_v1, 0.0  ;;  %v4234_v61 = vpop.f32.mrb[64].mxu0  ;;  %v14790_v58 = vpack.i.bf16 %v17861_v52, %v21564_v33  ;;  %v4340_v62 = vmax.f32 %v4318_v40, 0.0 }
 0x3a7   : > { %21599 = vst [vmem:[#allocation36_spill] sm:$0xff] %v17864_v15  ;;  %v4235_v44 = vadd.f32 %v4234_v61, %v4137_v9  ;;  %v4236_v34 = vpop.f32.mrb[65].mxu0  ;;  %v4323_v6 = vpop.f32.mrb[64].mxu1  ;;  %v14815_v42 = vpack.i.bf16 %v21564_v33, %v17864_v15  ;;  %v4341_v43 = vmax.f32 %v4320_v19, 0.0  ;;  %v17879_v4 = vmul.f32 %v4338_v27, %v21565_v56 }
 0x3a8   : > { %v4237_v46 = vadd.f32 %v4236_v34, %v4137_v9  ;;  %v4324_v0 = vadd.f32 %v4323_v6, %v4137_v9  ;;  %v4325_v7 = vpop.f32.mrb[65].mxu1  ;;  %14791 = vrot.lane.b32.xlu0 %v14790_v58, %s16218_s18  ;;  %v17882_v63 = vmul.f32 %v4339_v41, %v21560_v13  ;;  %v17885_v47 = vmul.f32 %v4340_v62, %v21563_v24 }
 0x3a9   : > { %v4342_v39 = vmax.f32 %v4235_v44, 0.0  ;;  %v4326_v36 = vadd.f32 %v4325_v7, %v4137_v9  ;;  %14816 = vrot.lane.b32.xlu1 %v14815_v42, %s16218_s18  ;;  %v17888_v32 = vmul.f32 %v4341_v43, %v21562_v38  ;;  %v14810_v9 = vpack.i.bf16 %v17875_v25, %v17871_v37 }
 0x3aa   : > { %v4343_v16 = vmax.f32 %v4237_v46, 0.0  ;;  %v4344_v3 = vmax.f32 %v4324_v0, 0.0  ;;  %v4240_v17 = vpop.f32.mrb[66].mxu0  ;;  %21600 = vst [vmem:[#allocation35_spill] sm:$0xff] %v17885_v47  ;;  %v14865_v61 = vpack.i.bf16 %v17882_v63, %v17879_v4  ;;  %v17912_v34 = vpack.i.bf16 %v17861_v52, %v17875_v25 }
 0x3ab   : > { %v4345_v59 = vmax.f32 %v4326_v36, 0.0  ;;  %v4241_v28 = vadd.f32 %v4240_v17, %v4142_v48  ;;  %v4242_v5 = vpop.f32.mrb[67].mxu0  ;;  %v4329_v11 = vpop.f32.mrb[66].mxu1  ;;  %21601 = vst [vmem:[#allocation37_spill] sm:$0xff] %v17888_v32  ;;  %v17892_v1 = vmul.f32 %v4342_v39, %v21565_v56  ;;  %v17916_v6 = vpack.i.bf16 %v17864_v15, %v17871_v37 }
 0x3ac   : > { %v4243_v49 = vadd.f32 %v4242_v5, %v4142_v48  ;;  %v4330_v54 = vadd.f32 %v4329_v11, %v4142_v48  ;;  %v4331_v12 = vpop.f32.mrb[67].mxu1  ;;  %14796 = vrot.lane.b32.xlu0 %v14790_v58, %s16216_s19  ;;  %v17896_v31 = vmul.f32 %v4343_v16, %v21560_v13  ;;  %v17899_v35 = vmul.f32 %v4344_v3, %v21563_v24 }
 0x3ad   : > { %21602 = vst [vmem:[#allocation38_spill] sm:$0xff] %v17892_v1  ;;  %v4332_v40 = vadd.f32 %v4331_v12, %v4142_v48  ;;  %14826 = vrot.lane.b32.xlu1 %v14815_v42, %s16216_s19  ;;  %v17902_v19 = vmul.f32 %v4345_v59, %v21562_v38  ;;  %v4346_v27 = vmax.f32 %v4241_v28, 0.0  ;;  %v17920_v43 = vpack.i.bf16 %v17885_v47, %v17882_v63 }
 0x3ae   : > { %21603 = vst [vmem:[#allocation40_spill] sm:$0xff] %v17896_v31  ;;  %21604 = vst [vmem:[#allocation41_spill] sm:$0xff] %v17899_v35  ;;  %v4347_v41 = vmax.f32 %v4243_v49, 0.0  ;;  %v4348_v62 = vmax.f32 %v4330_v54, 0.0  ;;  %v14870_v46 = vpack.i.bf16 %v17888_v32, %v17885_v47  ;;  %v14935_v48 = vpack.i.bf16 %v17896_v31, %v17892_v1 }
 0x3af   : > { %21605 = vst [vmem:[#allocation42_spill] sm:$0xff] %v17902_v19  ;;  %v4349_v44 = vmax.f32 %v4332_v40, 0.0  ;;  %v17925_v0 = vmul.f32 %v4346_v27, %v21565_v56  ;;  %v17942_v16 = vpack.i.bf16 %v17879_v4, %v21564_v33  ;;  %v17946_v3 = vpack.i.bf16 %v17899_v35, %v17896_v31 }
 0x3b0   : > { %14801 = vrot.lane.b32.xlu0 %v14790_v58, %s16219_s26  ;;  %v17928_v7 = vmul.f32 %v4347_v41, %v21560_v13  ;;  %v17931_v39 = vmul.f32 %v4348_v62, %v21563_v24  ;;  %v17952_v59 = vpack.i.bf16 %v17902_v19, %v17892_v1  ;;  %v18004_v41 = vpack.i.bf16 %v21564_v33, %v17888_v32 }
 0x3b1   : > { %14836 = vrot.lane.b32.xlu1 %v14815_v42, %s16219_s26  ;;  %21606 = vst [vmem:[#allocation43_spill] sm:$0xff] %v17925_v0  ;;  %v17934_v36 = vmul.f32 %v4349_v44, %v21562_v38  ;;  %v18025_v62 = vpack.i.bf16 %v17925_v0, %v21564_v33 }
 0x3b2   : > { %21607 = vst [vmem:[#allocation44_spill] sm:$0xff] %v17928_v7  ;;  %21608 = vst [vmem:[#allocation45_spill] sm:$0xff] %v17931_v39  ;;  %v14985_v17 = vpack.i.bf16 %v17928_v7, %v17925_v0 }
 0x3b3   : > { %21609 = vst [vmem:[#allocation46_spill] sm:$0xff] %v17934_v36 }
 0x3b4   : > { %14806 = vrot.lane.b32.xlu0 %v14790_v58, %s16220_s27  ;;  %v14995_v58 = vpack.i.bf16 %v17934_v36, %v17931_v39 }
 0x3b5   : > { %14846 = vrot.lane.b32.xlu1 %v14815_v42, %s16220_s27  ;;  %v17962_v42 = vpack.i.bf16 %v17931_v39, %v17928_v7 }
 0x3b8   : > { %14811 = vrot.lane.b32.xlu0 %v14810_v9, %s16218_s18 }
 0x3b9   : > { %14861 = vrot.lane.b32.xlu1 %v17942_v16, %s16221_s28 }
 0x3bc   : > { %14821 = vrot.lane.b32.xlu0 %v14810_v9, %s16216_s19 }
 0x3bd   : > { %14866 = vrot.lane.b32.xlu1 %v14865_v61, %s16218_s18 }
 0x3c0   : > { %14831 = vrot.lane.b32.xlu0 %v14810_v9, %s16219_s26 }
 0x3c1   : > { %14876 = vrot.lane.b32.xlu1 %v14865_v61, %s16216_s19 }
 0x3c4   : > { %14841 = vrot.lane.b32.xlu0 %v14810_v9, %s16220_s27  ;;  %v14915_v9 = vpack.i.bf16 %v17899_v35, %v21564_v33 }
 0x3c5   : > { %14886 = vrot.lane.b32.xlu1 %v14865_v61, %s16219_s26 }
 0x3c8   : > { %14851 = vrot.lane.b32.xlu0 %v17912_v34, %s16221_s28 }
 0x3c9   : > { %14896 = vrot.lane.b32.xlu1 %v14865_v61, %s16220_s27  ;;  %v14940_v61 = vpack.i.bf16 %v21564_v33, %v17902_v19 }
 0x3cc   : > { %14856 = vrot.lane.b32.xlu0 %v17916_v6, %s16221_s28 }
 0x3cd   : > { %14906 = vrot.lane.b32.xlu1 %v17920_v43, %s16221_s28 }
 0x3d0   : > { %14871 = vrot.lane.b32.xlu0 %v14870_v46, %s16218_s18 }
 0x3d1   : > { %14916 = vrot.lane.b32.xlu1 %v14915_v9, %s16218_s18 }
 0x3d4   : > { %14881 = vrot.lane.b32.xlu0 %v14870_v46, %s16216_s19 }
 0x3d5   : > { %14921 = vrot.lane.b32.xlu1 %v14915_v9, %s16216_s19 }
 0x3d8   : > { %14891 = vrot.lane.b32.xlu0 %v14870_v46, %s16219_s26 }
 0x3d9   : > { %14926 = vrot.lane.b32.xlu1 %v14915_v9, %s16219_s26 }
 0x3dc   : > { %14901 = vrot.lane.b32.xlu0 %v14870_v46, %s16220_s27 }
 0x3dd   : > { %14931 = vrot.lane.b32.xlu1 %v14915_v9, %s16220_s27 }
 0x3e0   : > { %14911 = vrot.lane.b32.xlu0 %v18004_v41, %s16221_s28 }
 0x3e1   : > { %14936 = vrot.lane.b32.xlu1 %v14935_v48, %s16218_s18 }
 0x3e4   : > { %14941 = vrot.lane.b32.xlu0 %v14940_v61, %s16218_s18 }
 0x3e5   : > { %14946 = vrot.lane.b32.xlu1 %v14935_v48, %s16216_s19 }
 0x3e8   : > { %14951 = vrot.lane.b32.xlu0 %v14940_v61, %s16216_s19 }
 0x3e9   : > { %14956 = vrot.lane.b32.xlu1 %v14935_v48, %s16219_s26 }
 0x3ec   : > { %14961 = vrot.lane.b32.xlu0 %v14940_v61, %s16219_s26 }
 0x3ed   : > { %14966 = vrot.lane.b32.xlu1 %v14935_v48, %s16220_s27 }
 0x3f0   : > { %14971 = vrot.lane.b32.xlu0 %v14940_v61, %s16220_s27 }
 0x3f1   : > { %14976 = vrot.lane.b32.xlu1 %v17946_v3, %s16221_s28 }
 0x3f4   : > { %14986 = vrot.lane.b32.xlu0 %v14985_v17, %s16218_s18 }
 0x3f5   : > { %14981 = vrot.lane.b32.xlu1 %v17952_v59, %s16221_s28 }
 0x3f8   : > { %14991 = vrot.lane.b32.xlu0 %v18025_v62, %s16221_s28 }
 0x3f9   : > { %14996 = vrot.lane.b32.xlu1 %v14995_v58, %s16218_s18 }
 0x3fc   : > { %15001 = vrot.lane.b32.xlu0 %v14985_v17, %s16216_s19 }
 0x3fd   : > { %15011 = vrot.lane.b32.xlu1 %v17920_v43, %s16222_s29 }
 0x400   : > { %15006 = vrot.lane.b32.xlu0 %v17912_v34, %s16222_s29 }
 0x401   : > { %15016 = vrot.lane.b32.xlu1 %v14995_v58, %s16216_s19 }
 0x404   : > { %15021 = vrot.lane.b32.xlu0 %v14985_v17, %s16219_s26 }
 0x405   : > { %15031 = vrot.lane.b32.xlu1 %v17942_v16, %s16222_s29 }
 0x408   : > { %15026 = vrot.lane.b32.xlu0 %v17916_v6, %s16222_s29 }
 0x409   : > { %15036 = vrot.lane.b32.xlu1 %v14995_v58, %s16219_s26 }
 0x40c   : > { %15041 = vrot.lane.b32.xlu0 %v14985_v17, %s16220_s27 }
 0x40d   : > { %15051 = vrot.lane.b32.xlu1 %v17946_v3, %s16222_s29 }
 0x410   : > { %15046 = vrot.lane.b32.xlu0 %v18004_v41, %s16222_s29 }
 0x411   : > { %15056 = vrot.lane.b32.xlu1 %v14995_v58, %s16220_s27  ;;  %v18070_v58 = vpack.i.bf16 %v21564_v33, %v17934_v36 }
 0x414   : > { %15066 = vrot.lane.b32.xlu0 %v18025_v62, %s16222_s29 }
 0x415   : > { %15061 = vrot.lane.b32.xlu1 %v17952_v59, %s16222_s29 }
 0x418   : > { %15071 = vrot.lane.b32.xlu0 %v17912_v34, %s21431_s20 }
 0x419   : > { %15076 = vrot.lane.b32.xlu1 %v17920_v43, %s21431_s20 }
 0x41a   : > { %v18056_v44 = vpop.permute.xlu0 %14791 }
 0x41b   : > { %v18058_v46 = vpop.permute.xlu1 %14816  ;;  %v14793_v8 = vunpack.i.l.bf16 %v18056_v44 }
 0x41c   : > { %15081 = vrot.lane.b32.xlu0 %v17962_v42, %s16221_s28  ;;  %v14819_v53 = vunpack.i.h.bf16 %v18058_v46 }
 0x41d   : > { %15091 = vrot.lane.b32.xlu1 %v17942_v16, %s21431_s20 }
 0x41e   : > { %v18064_v48 = vpop.permute.xlu0 %14796 }
 0x41f   : > { %v18066_v17 = vpop.permute.xlu1 %14826 }
 0x420   : > { %15086 = vrot.lane.b32.xlu0 %v17916_v6, %s21431_s20  ;;  %v14829_v26 = vunpack.i.h.bf16 %v18066_v17 }
 0x421   : > { %15096 = vrot.lane.b32.xlu1 %v18070_v58, %s16221_s28 }
 0x422   : > { %v18076_v9 = vpop.permute.xlu0 %14801 }
 0x423   : > { %v18078_v61 = vpop.permute.xlu1 %14836  ;;  %v14803_v10 = vunpack.i.l.bf16 %v18076_v9 }
 0x424   : > { %15101 = vrot.lane.b32.xlu0 %v17962_v42, %s16222_s29 }
 0x425   : > { %15111 = vrot.lane.b32.xlu1 %v17946_v3, %s21431_s20 }
 0x426   : > { %v18084_v27 = vpop.permute.xlu0 %14806 }
 0x427   : > { %v18086_v40 = vpop.permute.xlu1 %14846  ;;  %v14808_v29 = vunpack.i.l.bf16 %v18084_v27 }
 0x428   : > { %15106 = vrot.lane.b32.xlu0 %v18004_v41, %s21431_s20 }
 0x429   : > { %15116 = vrot.lane.b32.xlu1 %v18070_v58, %s16222_s29 }
 0x42a   : > { %v14812_v12 = vpop.permute.xlu0 %14811 }
 0x42b   : > { %v18092_v54 = vpop.permute.xlu1 %14861  ;;  %v14814_v49 = vunpack.i.h.bf16 %v14812_v12  ;;  %v14813_v11 = vunpack.i.l.bf16 %v14812_v12  ;;  %v1095_v12 = vld [vmem:[%s21383_s11 + $0x40] sm:$0xff] }
 0x42c   : > { %15126 = vrot.lane.b32.xlu0 %v17962_v42, %s21431_s20 }
 0x42d   : > { %15121 = vrot.lane.b32.xlu1 %v17952_v59, %s21431_s20  ;;  %v4527_v20 = vsel %vm4526_vm8, %v14793_v8, %v14813_v11  ;;  %v4528_v23 = vsel %vm4526_vm8, %v14813_v11, %v14814_v49  ;;  %v1097_v8 = vld [vmem:[%s21383_s11 + $0x50] sm:$0xff]  ;;  %v1098_v11 = vld [vmem:[%s21383_s11 + $0x58] sm:$0xff] }
 0x42e   : > { %v18098_v5 = vpop.permute.xlu0 %14821 }
 0x42f   : > { %v14867_v28 = vpop.permute.xlu1 %14866  ;;  %v14824_v24 = vunpack.i.h.bf16 %v18098_v5  ;;  %v14823_v13 = vunpack.i.l.bf16 %v18098_v5 }
 0x430   : > { %v14869_v30 = vunpack.i.h.bf16 %v14867_v28  ;;  %v14868_v33 = vunpack.i.l.bf16 %v14867_v28  ;;  %15131 = vrot.lane.b32.xlu0 %v18025_v62, %s21431_s20  ;;  %v1096_v28 = vld [vmem:[%s21383_s11 + $0x48] sm:$0xff] }
 0x431   : > { %15136 = vrot.lane.b32.xlu1 %v18070_v58, %s21431_s20  ;;  %s16226_s20 = smov 5  }
 0x432   : > { %v4531_v57 = vsel %vm4526_vm8, %v14819_v53, %v14868_v33  ;;  %v18111_v2 = vpop.permute.xlu0 %14831  ;;  %v4532_v21 = vsel %vm4526_vm8, %v14868_v33, %v14869_v30 }
 0x433   : > { %v18118_v51 = vpop.permute.xlu1 %14876  ;;  %v13146_v55 = vpack.c.bf16 %v4532_v21, %v4528_v23  ;;  %v13148_v60 = vpack.c.bf16 %v4531_v57, %v4527_v20  ;;  %v14834_v50 = vunpack.i.h.bf16 %v18111_v2  ;;  %v14833_v14 = vunpack.i.l.bf16 %v18111_v2 }
 0x434   : > { %1143 = vperm.xlu0 %14288, %v1095_v12   ;;  %v14878_v5 = vunpack.i.l.bf16 %v18118_v51  ;;  %v21610_v2 = vunpack.i.h.bf16 %v18084_v27 }
 0x435   : > { %1148 = vperm.xlu1 %14289, %v1096_v28   ;;  %13147 = vmatprep.subr.bf16.mxu0 %v13146_v55  ;;  %v14818_v55 = vunpack.i.l.bf16 %v18058_v46  ;;  %v18242_v39 = vsel %vm4783_vm9, %v14803_v10, %v14833_v14 }
 0x436   : > { %v18123_v53 = vpop.permute.xlu0 %14841  ;;  %13149 = vmatpush1.bf16.msra.mxu0 %v13148_v60  ;;  %v14794_v60 = vunpack.i.h.bf16 %v18056_v44 }
 0x437   : > { %v18128_v38 = vpop.permute.xlu1 %14886  ;;  %v21612_v15 = vunpack.i.l.bf16 %v18123_v53 }
 0x438   : > { %1153 = vperm.xlu0 %14288, %v1097_v8  }
 0x439   : > { %1158 = vperm.xlu1 %14289, %v1098_v11  }
 0x43a   : > { %v18130_v33 = vpop.permute.xlu0 %14851 }
 0x43b   : > { %v18132_v21 = vpop.permute.xlu1 %14896 }
 0x43c   : > { %15141 = vrot.lane.b32.xlu0 %v17912_v34, %s21429_s13 }
 0x43d   : > { %15146 = vrot.lane.b32.xlu1 %v17920_v43, %s21429_s13  ;;  %v4529_v43 = vsel %vm4526_vm8, %v14814_v49, %v14794_v60  ;;  %v5509_v49 = vld [vmem:[%s21377_s5 + $0x8] sm:$0xff] }
 0x43e   : > { %v18138_v57 = vpop.permute.xlu0 %14856  ;;  %5812 = vmatprep.mubr.f32.mxu0 %v5509_v49  ;;  %6134 = vmatprep.mubr.f32.mxu1 %v5509_v49  ;;  %v14798_v49 = vunpack.i.l.bf16 %v18064_v48 }
 0x43f   : > { %v18140_v20 = vpop.permute.xlu1 %14906 }
 0x440   : > { %15151 = vrot.lane.b32.xlu0 %v17916_v6, %s21429_s13  ;;  %v4530_v6 = vsel %vm4526_vm8, %v14794_v60, %v14818_v55  ;;  %v18234_v35 = vsel %vm2590_vm6, %v14798_v49, %v14823_v13 }
 0x441   : > { %15156 = vrot.lane.b32.xlu1 %v17942_v16, %s21429_s13 }
 0x442   : > { %v14872_v23 = vpop.permute.xlu0 %14871 }
 0x443   : > { %v14874_v12 = vunpack.i.h.bf16 %v14872_v23  ;;  %v14873_v34 = vunpack.i.l.bf16 %v14872_v23  ;;  %v18148_v28 = vpop.permute.xlu1 %14916 }
 0x444   : > { %15161 = vrot.lane.b32.xlu0 %v18004_v41, %s21429_s13 }
 0x445   : > { %v4533_v8 = vsel %vm4526_vm8, %v14869_v30, %v14873_v34  ;;  %15166 = vrot.lane.b32.xlu1 %v17946_v3, %s21429_s13  ;;  %v4534_v44 = vsel %vm4526_vm8, %v14873_v34, %v14874_v12 }
 0x446   : > { %v18158_v16 = vpop.permute.xlu0 %14881  ;;  %v13218_v46 = vpack.c.bf16 %v4534_v44, %v4530_v6  ;;  %v13220_v11 = vpack.c.bf16 %v4533_v8, %v4529_v43  ;;  %v14799_v43 = vunpack.i.h.bf16 %v18064_v48  ;;  %v14804_v8 = vunpack.i.h.bf16 %v18076_v9 }
 0x447   : > { %v18160_v23 = vpop.permute.xlu1 %14921  ;;  %v14838_v6 = vunpack.i.l.bf16 %v18078_v61  ;;  %v14839_v48 = vunpack.i.h.bf16 %v18078_v61  ;;  %v4659_v61 = vsel %vm2590_vm6, %v14829_v26, %v14878_v5  ;;  %v21611_v9 = vunpack.i.h.bf16 %v18118_v51 }
 0x448   : > { %15176 = vrot.lane.b32.xlu0 %v17962_v42, %s21429_s13  ;;  %13219 = vmatprep.subr.bf16.mxu1 %v13218_v46  ;;  %v14848_v46 = vunpack.i.l.bf16 %v18086_v40  ;;  %v18231_v22 = vsel %vm2590_vm6, %v14824_v24, %v14799_v43  ;;  %v14884_v47 = vunpack.i.h.bf16 %v18158_v16 }
 0x449   : > { %15171 = vrot.lane.b32.xlu1 %v17952_v59, %s21429_s13  ;;  %13221 = vmatpush1.bf16.msra.mxu1 %v13220_v11  ;;  %v18221_v45 = vsel %vm4783_vm9, %v14804_v8, %v14838_v6  ;;  %v18239_v6 = vsel %vm4783_vm9, %v14834_v50, %v14804_v8  ;;  %v4660_v19 = vsel %vm2590_vm6, %v14878_v5, %v21611_v9  ;;  %v14883_v5 = vunpack.i.l.bf16 %v18158_v16 }
 0x44a   : > { %v18166_v30 = vpop.permute.xlu0 %14891  ;;  %v13156_v8 = vpack.c.bf16 %v4659_v61, %v18234_v35 }
 0x44b   : > { %v18168_v3 = vpop.permute.xlu1 %14926 }
 0x44c   : > { %15181 = vrot.lane.b32.xlu0 %v18025_v62, %s21429_s13 }
 0x44d   : > { %15186 = vrot.lane.b32.xlu1 %v18070_v58, %s21429_s13  ;;  %v14828_v58 = vunpack.i.l.bf16 %v18066_v17  ;;  %s16227_s13 = smov 123  }
 0x44e   : > { %v18177_v42 = vpop.permute.xlu0 %14901 }
 0x44f   : > { %v18179_v59 = vpop.permute.xlu1 %14931  ;;  %v18210_v44 = vsel %vm2590_vm6, %v14799_v43, %v14828_v58  ;;  %v18226_v58 = vsel %vm4912_vm10, %v21610_v2, %v14848_v46  ;;  %v4656_v46 = vsel %vm2590_vm6, %v14823_v13, %v14824_v24  ;;  %v18246_v2 = vsel %vm4783_vm9, %v14833_v14, %v14834_v50 }
 0x450   : > { %v14888_v13 = vunpack.i.l.bf16 %v18128_v38  ;;  %v14918_v50 = vunpack.i.l.bf16 %v18148_v28  ;;  %v13154_v9 = vpack.c.bf16 %v4660_v19, %v4656_v46  ;;  %v14919_v46 = vunpack.i.h.bf16 %v18148_v28 }
 0x451   : > { %v4662_v28 = vsel %vm2590_vm6, %v14883_v5, %v14884_v47 }
 0x452   : > { %v18181_v41 = vpop.permute.xlu0 %14911  ;;  %v18278_v35 = vsel %vm4783_vm9, %v14839_v48, %v14888_v13 }
 0x453   : > { %v18183_v60 = vpop.permute.xlu1 %14936 }
 0x454   : > { %v14939_v43 = vunpack.i.h.bf16 %v18183_v60  ;;  %v14938_v49 = vunpack.i.l.bf16 %v18183_v60 }
 0x456   : > { %v18185_v55 = vpop.permute.xlu0 %14941  ;;  %v4535_v36 = vsel %vm4526_vm8, %v14918_v50, %v14938_v49  ;;  %v4536_v1 = vsel %vm4526_vm8, %v14938_v49, %v14939_v43 }
 0x457   : > { %v18187_v12 = vpop.permute.xlu1 %14946  ;;  %v14944_v26 = vunpack.i.h.bf16 %v18185_v55  ;;  %v14943_v32 = vunpack.i.l.bf16 %v18185_v55 }
 0x45a   : > { %v18189_v34 = vpop.permute.xlu0 %14951 }
 0x45b   : > { %v18191_v62 = vpop.permute.xlu1 %14956  ;;  %v14954_v48 = vunpack.i.h.bf16 %v18189_v34 }
 0x45e   : > { %v18199_v11 = vpop.permute.xlu0 %14961 }
 0x45f   : > { %v18204_v56 = vpop.permute.xlu1 %14966 }
 0x462   : > { %v18218_v17 = vpop.permute.xlu0 %14971 }
 0x463   : > { %v18236_v18 = vpop.permute.xlu1 %14976 }
 0x466   : > { %v14987_v24 = vpop.permute.xlu0 %14986 }
 0x467   : > { %v14989_v14 = vunpack.i.h.bf16 %v14987_v24  ;;  %v14988_v52 = vunpack.i.l.bf16 %v14987_v24  ;;  %v18260_v60 = vpop.permute.xlu1 %14981  ;;  %v18272_v24 = vsel %vm4912_vm10, %v14808_v29, %v21612_v15  ;;  %v14898_v29 = vunpack.i.l.bf16 %v18132_v21 }
 0x468   : > { %v14948_v15 = vunpack.i.l.bf16 %v18187_v12 }
 0x469   : > { %v4539_v10 = vsel %vm4526_vm8, %v14944_v26, %v14988_v52  ;;  %v4540_v0 = vsel %vm4526_vm8, %v14988_v52, %v14989_v14  ;;  %v21614_v52 = vunpack.i.h.bf16 %v18128_v38 }
 0x46a   : > { %v18275_v31 = vpop.permute.xlu0 %14991  ;;  %v13150_v19 = vpack.c.bf16 %v4540_v0, %v4536_v1  ;;  %v13152_v16 = vpack.c.bf16 %v4539_v10, %v4535_v36  ;;  %v14923_v1 = vunpack.i.l.bf16 %v18160_v23  ;;  %v4537_v0 = vsel %vm4526_vm8, %v14939_v43, %v14919_v46 }
 0x46b   : > { %21613 = vst [vmem:[#allocation47_spill] sm:$0xff] %v18275_v31  ;;  %v14997_v49 = vpop.permute.xlu1 %14996  ;;  %v4789_v50 = vsel %vm4783_vm9, %v14888_v13, %v21614_v52  ;;  %v14949_v36 = vunpack.i.h.bf16 %v18187_v12  ;;  %v4538_v52 = vsel %vm4526_vm8, %v14919_v46, %v14943_v32  ;;  %v21615_v12 = vunpack.i.h.bf16 %v18118_v51 }
 0x46c   : > { %v14999_v55 = vunpack.i.h.bf16 %v14997_v49  ;;  %v14998_v26 = vunpack.i.l.bf16 %v14997_v49  ;;  %13151 = vmatprep.subr.bf16.mxu0 %v13150_v19  ;;  %v14893_v32 = vunpack.i.l.bf16 %v18166_v30  ;;  %v14953_v51 = vunpack.i.l.bf16 %v18189_v34 }
 0x46d   : > { %13153 = vmatpush1.bf16.msra.mxu0 %v13152_v16  ;;  %v4661_v47 = vsel %vm2590_vm6, %v21615_v12, %v14883_v5  ;;  %v14894_v16 = vunpack.i.h.bf16 %v18166_v30  ;;  %v21617_v34 = vunpack.i.h.bf16 %v18132_v21 }
 0x46e   : > { %v4541_v10 = vsel %vm4526_vm8, %v14989_v14, %v14998_v26  ;;  %v15002_v13 = vpop.permute.xlu0 %15001  ;;  %13155 = vmatprep.subr.bf16.mxu0 %v13154_v9  ;;  %v4542_v49 = vsel %vm4526_vm8, %v14998_v26, %v14999_v55  ;;  %v4663_v14 = vsel %vm2590_vm6, %v14923_v1, %v14948_v15  ;;  %v13226_v9 = vpack.c.bf16 %v4662_v28, %v18210_v44 }
 0x46f   : > { %v15004_v19 = vunpack.i.h.bf16 %v15002_v13  ;;  %v15003_v61 = vunpack.i.l.bf16 %v15002_v13  ;;  %v18295_v7 = vpop.permute.xlu1 %15011  ;;  %v13222_v43 = vpack.c.bf16 %v4542_v49, %v4538_v52  ;;  %v13224_v31 = vpack.c.bf16 %v4541_v10, %v4537_v0 }
 0x470   : > { %v4664_v55 = vsel %vm2590_vm6, %v14948_v15, %v14949_v36  ;;  %v13162_v1 = vpack.c.bf16 %v4789_v50, %v18246_v2  ;;  %v21616_v44 = vunpack.i.h.bf16 %v18086_v40  ;;  %v14958_v15 = vunpack.i.l.bf16 %v18191_v62 }
 0x471   : > { %v4667_v46 = vsel %vm2590_vm6, %v14954_v48, %v15003_v61  ;;  %13157 = vmatpush1.bf16.msra.mxu0 %v13156_v8  ;;  %13223 = vmatprep.subr.bf16.mxu1 %v13222_v43  ;;  %v4668_v26 = vsel %vm2590_vm6, %v15003_v61, %v15004_v19  ;;  %v14924_v8 = vunpack.i.h.bf16 %v18160_v23  ;;  %v13164_v61 = vpack.c.bf16 %v18278_v35, %v18242_v39 }
 0x472   : > { %v18308_v0 = vpop.permute.xlu0 %15006  ;;  %13225 = vmatpush1.bf16.msra.mxu1 %v13224_v31  ;;  %v13158_v5 = vpack.c.bf16 %v4668_v26, %v4664_v55  ;;  %v13160_v10 = vpack.c.bf16 %v4667_v46, %v4663_v14  ;;  %v18314_v30 = vsel %vm4912_vm10, %v21616_v44, %v14898_v29  ;;  %v4918_v31 = vsel %vm4912_vm10, %v14898_v29, %v21617_v34 }
 0x473   : > { %v15017_v28 = vpop.permute.xlu1 %15016  ;;  %13227 = vmatprep.subr.bf16.mxu1 %v13226_v9  ;;  %v13228_v40 = vpack.c.bf16 %v4661_v47, %v18231_v22  ;;  %v14928_v50 = vunpack.i.l.bf16 %v18168_v3  ;;  %v4665_v23 = vsel %vm2590_vm6, %v14949_v36, %v14924_v8  ;;  %v14959_v13 = vunpack.i.h.bf16 %v18191_v62 }
 0x474   : > { %v15019_v48 = vunpack.i.h.bf16 %v15017_v28  ;;  %v15018_v2 = vunpack.i.l.bf16 %v15017_v28  ;;  %13159 = vmatprep.subr.bf16.mxu0 %v13158_v5  ;;  %v4791_v39 = vsel %vm4783_vm9, %v14893_v32, %v14894_v16  ;;  %v14964_v35 = vunpack.i.h.bf16 %v18199_v11 }
 0x475   : > { %13161 = vmatpush1.bf16.msra.mxu0 %v13160_v10  ;;  %v4666_v49 = vsel %vm2590_vm6, %v14924_v8, %v14953_v51  ;;  %v21618_v14 = vunpack.i.h.bf16 %v18128_v38  ;;  %v14904_v9 = vunpack.i.h.bf16 %v18177_v42  ;;  %v13234_v46 = vpack.c.bf16 %v4791_v39, %v18221_v45 }
 0x476   : > { %v4669_v29 = vsel %vm2590_vm6, %v15004_v19, %v15018_v2  ;;  %v15022_v52 = vpop.permute.xlu0 %15021  ;;  %13163 = vmatprep.subr.bf16.mxu0 %v13162_v1  ;;  %13229 = vmatpush1.bf16.msra.mxu1 %v13228_v40  ;;  %v4670_v22 = vsel %vm2590_vm6, %v15018_v2, %v15019_v48  ;;  %v4792_v19 = vsel %vm4783_vm9, %v14928_v50, %v14958_v15  ;;  %v14903_v55 = vunpack.i.l.bf16 %v18177_v42 }
 0x477   : > { %v15024_v43 = vunpack.i.h.bf16 %v15022_v52  ;;  %v15023_v12 = vunpack.i.l.bf16 %v15022_v52  ;;  %v18332_v47 = vpop.permute.xlu1 %15031  ;;  %v13230_v36 = vpack.c.bf16 %v4670_v22, %v4666_v49  ;;  %v13232_v62 = vpack.c.bf16 %v4669_v29, %v4665_v23 }
 0x478   : > { %v4790_v16 = vsel %vm4783_vm9, %v21618_v14, %v14893_v32  ;;  %v4793_v51 = vsel %vm4783_vm9, %v14958_v15, %v14959_v13  ;;  %v14963_v38 = vunpack.i.l.bf16 %v18199_v11  ;;  %v21619_v44 = vunpack.i.h.bf16 %v18123_v53 }
 0x479   : > { %v4796_v26 = vsel %vm4783_vm9, %v14964_v35, %v15023_v12  ;;  %13165 = vmatpush1.bf16.msra.mxu0 %v13164_v61  ;;  %13231 = vmatprep.subr.bf16.mxu1 %v13230_v36  ;;  %v4797_v5 = vsel %vm4783_vm9, %v15023_v12, %v15024_v43  ;;  %v21620_v45 = vunpack.i.l.bf16 %v18123_v53  ;;  %v14858_v8 = vunpack.i.l.bf16 %v18138_v57 }
 0x47a   : > { %v18345_v10 = vpop.permute.xlu0 %15026  ;;  %13233 = vmatpush1.bf16.msra.mxu1 %v13232_v62  ;;  %v13166_v32 = vpack.c.bf16 %v4797_v5, %v4793_v51  ;;  %v13168_v1 = vpack.c.bf16 %v4796_v26, %v4792_v19  ;;  %v14929_v28 = vunpack.i.h.bf16 %v18168_v3  ;;  %v13172_v11 = vpack.c.bf16 %v18314_v30, %v18272_v24 }
 0x47b   : > { %v4914_v42 = vsel %vm4912_vm10, %v21620_v45, %v21619_v44  ;;  %v15037_v61 = vpop.permute.xlu1 %15036  ;;  %13235 = vmatprep.subr.bf16.mxu1 %v13234_v46  ;;  %v14968_v15 = vunpack.i.l.bf16 %v18204_v56  ;;  %v13236_v40 = vpack.c.bf16 %v4790_v16, %v18239_v6  ;;  %v14933_v50 = vunpack.i.l.bf16 %v18179_v59 }
 0x47c   : > { %v13170_v34 = vpack.c.bf16 %v4918_v31, %v4914_v42  ;;  %v15039_v48 = vunpack.i.h.bf16 %v15037_v61  ;;  %v15038_v2 = vunpack.i.l.bf16 %v15037_v61  ;;  %13167 = vmatprep.subr.bf16.mxu0 %v13166_v32  ;;  %v4794_v23 = vsel %vm4783_vm9, %v14959_v13, %v14929_v28 }
 0x47d   : > { %v14969_v3 = vunpack.i.h.bf16 %v18204_v56  ;;  %13169 = vmatpush1.bf16.msra.mxu0 %v13168_v1  ;;  %v4920_v31 = vsel %vm4912_vm10, %v14903_v55, %v14904_v9  ;;  %v14974_v39 = vunpack.i.h.bf16 %v18218_v17  ;;  %v4795_v35 = vsel %vm4783_vm9, %v14929_v28, %v14963_v38 }
 0x47e   : > { %v4798_v24 = vsel %vm4783_vm9, %v15024_v43, %v15038_v2  ;;  %v15042_v30 = vpop.permute.xlu0 %15041  ;;  %13171 = vmatprep.subr.bf16.mxu0 %v13170_v34  ;;  %13237 = vmatpush1.bf16.msra.mxu1 %v13236_v40  ;;  %v4799_v6 = vsel %vm4783_vm9, %v15038_v2, %v15039_v48  ;;  %v14909_v22 = vunpack.i.h.bf16 %v18140_v20  ;;  %v21621_v12 = vunpack.i.h.bf16 %v18132_v21 }
 0x47f   : > { %v15044_v29 = vunpack.i.h.bf16 %v15042_v30  ;;  %v15043_v52 = vunpack.i.l.bf16 %v15042_v30  ;;  %v18366_v49 = vpop.permute.xlu1 %15051  ;;  %v13238_v13 = vpack.c.bf16 %v4799_v6, %v4795_v35  ;;  %v13240_v56 = vpack.c.bf16 %v4798_v24, %v4794_v23 }
 0x480   : > { %v4919_v36 = vsel %vm4912_vm10, %v21621_v12, %v14903_v55  ;;  %v4921_v43 = vsel %vm4912_vm10, %v14933_v50, %v14968_v15  ;;  %v13242_v62 = vpack.c.bf16 %v4920_v31, %v18226_v58  ;;  %v14908_v14 = vunpack.i.l.bf16 %v18140_v20  ;;  %v21632_v12 = vld [vmem:[#allocation36_spill] sm:$0xff] }
 0x481   : > { %v4925_v16 = vsel %vm4912_vm10, %v14974_v39, %v15043_v52  ;;  %13173 = vmatpush1.bf16.msra.mxu0 %v13172_v11  ;;  %13239 = vmatprep.subr.bf16.mxu1 %v13238_v13  ;;  %v4922_v9 = vsel %vm4912_vm10, %v14968_v15, %v14969_v3  ;;  %v4926_v19 = vsel %vm4912_vm10, %v15043_v52, %v15044_v29  ;;  %v21622_v46 = vunpack.i.h.bf16 %v18084_v27  ;;  %v21628_v13 = vld [vmem:[#allocation44_spill] sm:$0xff] }
 0x482   : > { %v21623_v21 = vmov %v21619_v44  ;;  %v14973_v26 = vunpack.i.l.bf16 %v18218_v17  ;;  %v18384_v51 = vpop.permute.xlu0 %15046  ;;  %13241 = vmatpush1.bf16.msra.mxu1 %v13240_v56  ;;  %v13174_v20 = vpack.c.bf16 %v4926_v19, %v4922_v9  ;;  %v13176_v58 = vpack.c.bf16 %v4925_v16, %v4921_v43  ;;  %v21629_v56 = vld [vmem:[#allocation40_spill] sm:$0xff] }
 0x483   : > { %v4915_v55 = vsel %vm4912_vm10, %v21623_v21, %v21622_v46  ;;  %v14854_v5 = vunpack.i.h.bf16 %v18130_v33  ;;  %v14853_v38 = vunpack.i.l.bf16 %v18130_v33  ;;  %v14934_v32 = vunpack.i.h.bf16 %v18179_v59  ;;  %v15057_v1 = vpop.permute.xlu1 %15056  ;;  %13243 = vmatprep.subr.bf16.mxu1 %v13242_v62 }
 0x484   : > { %v13244_v27 = vpack.c.bf16 %v4919_v36, %v4915_v55  ;;  %v14914_v53 = vunpack.i.h.bf16 %v18181_v41  ;;  %v14913_v44 = vunpack.i.l.bf16 %v18181_v41  ;;  %v15059_v45 = vunpack.i.h.bf16 %v15057_v1  ;;  %13175 = vmatprep.subr.bf16.mxu0 %v13174_v20  ;;  %v21635_v20 = vld [vmem:[#allocation43_spill] sm:$0xff] }
 0x485   : > { %v15058_v17 = vunpack.i.l.bf16 %v15057_v1  ;;  %v18392_v42 = vsel %vm5073_vm11, %v14858_v8, %v14853_v38  ;;  %v21624_v28 = vunpack.i.h.bf16 %v18092_v54  ;;  %v4923_v33 = vsel %vm4912_vm10, %v14969_v3, %v14934_v32  ;;  %13177 = vmatpush1.bf16.msra.mxu0 %v13176_v58  ;;  %v21636_v58 = vld [vmem:[#allocation38_spill] sm:$0xff] }
 0x486   : > { %v5079_v59 = vsel %vm5073_vm11, %v14908_v14, %v14909_v22  ;;  %v14859_v34 = vunpack.i.h.bf16 %v18138_v57  ;;  %v18403_v11 = vpop.permute.xlu0 %15066  ;;  %v21625_v8 = vpack.c.bf16 %v17882_v63, %v17875_v25  ;;  %13245 = vmatpush1.bf16.msra.mxu1 %v13244_v27  ;;  %v4924_v15 = vsel %vm4912_vm10, %v14934_v32, %v14973_v26 }
 0x487   : > { %v18397_v61 = vsel %vm5073_vm11, %v21624_v28, %v14908_v14  ;;  %v4927_v41 = vsel %vm4912_vm10, %v15044_v29, %v15058_v17  ;;  %v4928_v48 = vsel %vm4912_vm10, %v15058_v17, %v15059_v45  ;;  %v15009_v2 = vunpack.i.h.bf16 %v18308_v0  ;;  %v18412_v50 = vpop.permute.xlu1 %15061  ;;  %v21627_v29 = vld [vmem:[#allocation47_spill] sm:$0xff] }
 0x488   : > { %13179 = vmatprep.subr.bf16.mxu0 %v21625_v8  ;;  %v15008_v40 = vunpack.i.l.bf16 %v18308_v0  ;;  %v13246_v57 = vpack.c.bf16 %v4928_v48, %v4924_v15  ;;  %v13248_v23 = vpack.c.bf16 %v4927_v41, %v4923_v33  ;;  %v18415_v3 = vsel %vm5073_vm11, %v14909_v22, %v14913_v44  ;;  %v21641_v41 = vld [vmem:[#allocation46_spill] sm:$0xff] }
 0x489   : > { %v14979_v31 = vunpack.i.h.bf16 %v18236_v18  ;;  %v14978_v25 = vunpack.i.l.bf16 %v18236_v18  ;;  %v5081_v63 = vsel %vm5073_vm11, %v14913_v44, %v14914_v53  ;;  %v14984_v39 = vunpack.i.h.bf16 %v18260_v60  ;;  %v21638_v53 = vld [vmem:[#allocation35_spill] sm:$0xff]  ;;  %v21639_v44 = vld [vmem:[#allocation34_spill] sm:$0xff] }
 0x48a   : > { %v14983_v24 = vunpack.i.l.bf16 %v18260_v60  ;;  %v15014_v30 = vunpack.i.h.bf16 %v18295_v7  ;;  %v15013_v0 = vunpack.i.l.bf16 %v18295_v7  ;;  %v21626_v35 = vpack.c.bf16 %v17879_v4, %v17871_v37  ;;  %13247 = vmatprep.subr.bf16.mxu1 %v13246_v57  ;;  %v18431_v52 = vpop.permute.xlu0 %15071  ;;  %v21631_v4 = vld [vmem:[#allocation37_spill] sm:$0xff]  ;;  %v21642_v8 = vld [vmem:[#allocation42_spill] sm:$0xff] }
 0x48b   : > { %v18428_v6 = vsel %vm5073_vm11, %v14854_v5, %v14859_v34  ;;  %v14993_v18 = vunpack.i.l.bf16 %v21627_v29  ;;  %v21630_v60 = vpack.c.bf16 %v21628_v13, %v21629_v56  ;;  %13249 = vmatpush1.bf16.msra.mxu1 %v13248_v23  ;;  %v5075_v7 = vsel %vm5073_vm11, %v14853_v38, %v14854_v5  ;;  %v18438_v37 = vpop.permute.xlu1 %15076 }
 0x48c   : > { %13181 = vmatpush1.bf16.msra.mxu0 %v21626_v35  ;;  %v15028_v22 = vunpack.i.l.bf16 %v18345_v10  ;;  %v21633_v36 = vpack.c.bf16 %v21631_v4, %v21632_v12  ;;  %v13186_v43 = vpack.c.bf16 %v5079_v59, %v5075_v7  ;;  %v21634_v62 = vunpack.i.l.bf16 %v18092_v54 }
 0x48d   : > { %13183 = vmatprep.subr.bf16.mxu0 %v21630_v60  ;;  %v5204_v16 = vsel %vm5202_vm12, %v15008_v40, %v15009_v2  ;;  %v13188_v9 = vpack.c.bf16 %v18397_v61, %v18392_v42  ;;  %v5083_v46 = vsel %vm5073_vm11, %v14978_v25, %v14979_v31  ;;  %v13260_v21 = vpack.c.bf16 %v18415_v3, %v18428_v6 }
 0x48e   : > { %13251 = vmatprep.subr.bf16.mxu1 %v21633_v36  ;;  %v5077_v14 = vsel %vm5073_vm11, %v14859_v34, %v21634_v62  ;;  %v5082_v55 = vsel %vm5073_vm11, %v14983_v24, %v14978_v25  ;;  %v18454_v26 = vsel %vm5073_vm11, %v14979_v31, %v14984_v39  ;;  %v14994_v54 = vunpack.i.h.bf16 %v21627_v29  ;;  %v15082_v27 = vpop.permute.xlu0 %15081  ;;  %v21645_v24 = vld [vmem:[#allocation41_spill] sm:$0xff] }
 0x48f   : > { %v13258_v19 = vpack.c.bf16 %v5081_v63, %v5077_v14  ;;  %v21637_v5 = vpack.c.bf16 %v21635_v20, %v21636_v58  ;;  %v5208_v38 = vsel %vm5202_vm12, %v15013_v0, %v15014_v30  ;;  %v15034_v32 = vunpack.i.h.bf16 %v18332_v47  ;;  %v18469_v34 = vpop.permute.xlu1 %15091 }
 0x490   : > { %v15029_v1 = vunpack.i.h.bf16 %v18345_v10  ;;  %v21640_v45 = vpack.c.bf16 %v21638_v53, %v21639_v44  ;;  %v13194_v17 = vpack.c.bf16 %v5208_v38, %v5204_v16  ;;  %v5085_v42 = vsel %vm5073_vm11, %v14984_v39, %v14993_v18 }
 0x491   : > { %13185 = vmatpush1.bf16.msra.mxu0 %v21637_v5  ;;  %v15033_v28 = vunpack.i.l.bf16 %v18332_v47  ;;  %v5203_v61 = vsel %vm5202_vm12, %v15028_v22, %v15008_v40  ;;  %v15084_v33 = vunpack.i.h.bf16 %v15082_v27  ;;  %v15083_v59 = vunpack.i.l.bf16 %v15082_v27 }
 0x492   : > { %13187 = vmatprep.subr.bf16.mxu0 %v13186_v43  ;;  %13253 = vmatpush1.bf16.msra.mxu1 %v21640_v45  ;;  %v21643_v10 = vpack.c.bf16 %v21641_v41, %v21642_v8  ;;  %v15049_v15 = vunpack.i.h.bf16 %v18384_v51  ;;  %v15048_v48 = vunpack.i.l.bf16 %v18384_v51  ;;  %v15074_v57 = vunpack.i.h.bf16 %v18431_v52  ;;  %v18486_v39 = vpop.permute.xlu0 %15086  ;;  %v21644_v51 = vld [vmem:[#allocation45_spill] sm:$0xff] }
 0x493   : > { %v15073_v23 = vunpack.i.l.bf16 %v18431_v52  ;;  %v15079_v47 = vunpack.i.h.bf16 %v18438_v37  ;;  %v15078_v40 = vunpack.i.l.bf16 %v18438_v37  ;;  %v5086_v3 = vsel %vm5073_vm11, %v14994_v54, %v15083_v59  ;;  %v15097_v56 = vpop.permute.xlu1 %15096 }
 0x494   : > { %13255 = vmatprep.subr.bf16.mxu1 %v21643_v10  ;;  %v5087_v31 = vsel %vm5073_vm11, %v15083_v59, %v15084_v33  ;;  %v5207_v25 = vsel %vm5202_vm12, %v15034_v32, %v15013_v0  ;;  %v18484_v63 = vsel %vm5202_vm12, %v15009_v2, %v15029_v1  ;;  %v21646_v35 = vpack.c.bf16 %v21644_v51, %v21645_v24 }
 0x495   : > { %13189 = vmatpush1.bf16.msra.mxu0 %v13188_v9  ;;  %v13190_v6 = vpack.c.bf16 %v5087_v31, %v5083_v46  ;;  %v13192_v29 = vpack.c.bf16 %v5086_v3, %v5082_v55  ;;  %v15054_v18 = vunpack.i.h.bf16 %v18366_v49  ;;  %v15053_v13 = vunpack.i.l.bf16 %v18366_v49 }
 0x496   : > { %13257 = vmatpush1.bf16.msra.mxu1 %v21646_v35  ;;  %v13196_v60 = vpack.c.bf16 %v5207_v25, %v5203_v61  ;;  %v5206_v0 = vsel %vm5202_vm12, %v15029_v1, %v15033_v28  ;;  %v5209_v2 = vsel %vm5202_vm12, %v15014_v30, %v15048_v48  ;;  %v15099_v7 = vunpack.i.h.bf16 %v15097_v56  ;;  %v15102_v16 = vpop.permute.xlu0 %15101 }
 0x497   : > { %13259 = vmatprep.subr.bf16.mxu1 %v13258_v19  ;;  %v15098_v22 = vunpack.i.l.bf16 %v15097_v56  ;;  %13191 = vmatprep.subr.bf16.mxu0 %v13190_v6  ;;  %v5210_v4 = vsel %vm5202_vm12, %v15048_v48, %v15049_v15  ;;  %v15069_v12 = vunpack.i.h.bf16 %v18403_v11  ;;  %v15063_v36 = vunpack.i.l.bf16 %v18412_v50  ;;  %v18508_v55 = vpop.permute.xlu1 %15111 }
 0x498   : > { %v5332_v49 = vsel %vm1913_vm1, %v15073_v23, %v15074_v57  ;;  %v5336_v43 = vsel %vm1913_vm1, %v15078_v40, %v15079_v47  ;;  %v15094_v30 = vunpack.i.h.bf16 %v18469_v34  ;;  %v15088_v62 = vunpack.i.l.bf16 %v18486_v39 }
 0x499   : > { %13193 = vmatpush1.bf16.msra.mxu0 %v13192_v29  ;;  %v5088_v14 = vsel %vm5073_vm11, %v15084_v33, %v15098_v22  ;;  %v5089_v9 = vsel %vm5073_vm11, %v15098_v22, %v15099_v7  ;;  %v15104_v19 = vunpack.i.h.bf16 %v15102_v16  ;;  %v15103_v46 = vunpack.i.l.bf16 %v15102_v16 }
 0x49a   : > { %13195 = vmatprep.subr.bf16.mxu0 %v13194_v17  ;;  %13261 = vmatpush1.bf16.msra.mxu1 %v13260_v21  ;;  %v13262_v54 = vpack.c.bf16 %v5089_v9, %v5085_v42  ;;  %v13264_v20 = vpack.c.bf16 %v5088_v14, %v18454_v26  ;;  %v15068_v58 = vunpack.i.l.bf16 %v18403_v11  ;;  %v13266_v5 = vpack.c.bf16 %v5210_v4, %v5206_v0  ;;  %v15107_v26 = vpop.permute.xlu0 %15106 }
 0x49b   : > { %v5212_v38 = vsel %vm5202_vm12, %v15053_v13, %v15054_v18  ;;  %v13268_v32 = vpack.c.bf16 %v5209_v2, %v18484_v63  ;;  %v15064_v1 = vunpack.i.h.bf16 %v18412_v50  ;;  %v5211_v21 = vsel %vm5202_vm12, %v15063_v36, %v15053_v13  ;;  %v15117_v33 = vpop.permute.xlu1 %15116 }
 0x49c   : > { %v5215_v27 = vsel %vm5202_vm12, %v15069_v12, %v15103_v46  ;;  %13263 = vmatprep.subr.bf16.mxu1 %v13262_v54  ;;  %v5216_v53 = vsel %vm5202_vm12, %v15103_v46, %v15104_v19  ;;  %v5331_v44 = vsel %vm1913_vm1, %v15088_v62, %v15073_v23  ;;  %v13202_v17 = vpack.c.bf16 %v5336_v43, %v5332_v49  ;;  %v5508_v46 = vld [vmem:[%s21377_s5] sm:$0xff]  ;;  %v5511_v54 = vld [vmem:[%s21377_s5 + $0x18] sm:$0xff] }
 0x49d   : > { %13197 = vmatpush1.bf16.msra.mxu0 %v13196_v60  ;;  %v13198_v11 = vpack.c.bf16 %v5216_v53, %v5212_v38  ;;  %v13200_v45 = vpack.c.bf16 %v5215_v27, %v5211_v21  ;;  %v5335_v42 = vsel %vm1913_vm1, %v15094_v30, %v15078_v40  ;;  %v15089_v28 = vunpack.i.h.bf16 %v18486_v39  ;;  %v21648_v21 = vld [vmem:[#allocation21_spill] sm:$0xff]  ;;  %v21649_v53 = vld [vmem:[#allocation39_spill] sm:$0xff] }
 0x49e   : > { %13265 = vmatpush1.bf16.msra.mxu1 %v13264_v20  ;;  %v15109_v50 = vunpack.i.h.bf16 %v15107_v26  ;;  %v15108_v61 = vunpack.i.l.bf16 %v15107_v26  ;;  %v15114_v59 = vunpack.i.h.bf16 %v18508_v55  ;;  %v15113_v41 = vunpack.i.l.bf16 %v18508_v55  ;;  %v15127_v31 = vpop.permute.xlu0 %15126  ;;  %v5512_v55 = vld [vmem:[%s21377_s5 + $0x20] sm:$0xff]  ;;  %v5515_v20 = vld [vmem:[%s21377_s5 + $0x38] sm:$0xff] }
 0x49f   : > { %13267 = vmatprep.subr.bf16.mxu1 %v13266_v5  ;;  %v15119_v8 = vunpack.i.h.bf16 %v15117_v33  ;;  %v15118_v10 = vunpack.i.l.bf16 %v15117_v33  ;;  %13199 = vmatprep.subr.bf16.mxu0 %v13198_v11  ;;  %v5213_v15 = vsel %vm5202_vm12, %v15054_v18, %v15064_v1  ;;  %v13204_v48 = vpack.c.bf16 %v5335_v42, %v5331_v44  ;;  %v15122_v24 = vpop.permute.xlu1 %15121  ;;  %v5518_v5 = vld [vmem:[%s21377_s5 + $0x50] sm:$0xff]  ;;  %v21650_v26 = vld [vmem:[#allocation19_spill] sm:$0xff]  ;;  %v21651_v42 = vld [vmem:[#allocation22_spill] sm:$0xff] }
 0x4a0   : > { %v5214_v23 = vsel %vm5202_vm12, %v15064_v1, %v15068_v58  ;;  %v15093_v40 = vunpack.i.l.bf16 %v18469_v34  ;;  %v5338_v63 = vsel %vm1913_vm1, %v15108_v61, %v15109_v50  ;;  %v15129_v39 = vunpack.i.h.bf16 %v15127_v31  ;;  %v5514_v58 = vld [vmem:[%s21377_s5 + $0x30] sm:$0xff]  ;;  %v21652_v50 = vld [vmem:[#allocation23_spill] sm:$0xff]  ;;  %v21653_v33 = vld [vmem:[#allocation16_spill] sm:$0xff] }
 0x4a1   : > { %13201 = vmatpush1.bf16.msra.mxu0 %v13200_v45  ;;  %v5217_v3 = vsel %vm5202_vm12, %v15104_v19, %v15118_v10  ;;  %v5218_v25 = vsel %vm5202_vm12, %v15118_v10, %v15119_v8  ;;  %v15128_v51 = vunpack.i.l.bf16 %v15127_v31  ;;  %v5340_v18 = vsel %vm1913_vm1, %v15113_v41, %v15114_v59  ;;  %v5521_v10 = vld [vmem:[%s21377_s5 + $0x68] sm:$0xff] }
 0x4a2   : > { %13203 = vmatprep.subr.bf16.mxu0 %v13202_v17  ;;  %13269 = vmatpush1.bf16.msra.mxu1 %v13268_v32  ;;  %v13270_v35 = vpack.c.bf16 %v5218_v25, %v5214_v23  ;;  %v13272_v6 = vpack.c.bf16 %v5217_v3, %v5213_v15  ;;  %v5334_v29 = vsel %vm1913_vm1, %v15089_v28, %v15093_v40  ;;  %v15123_v13 = vunpack.i.l.bf16 %v15122_v24  ;;  %v15132_v2 = vpop.permute.xlu0 %15131  ;;  %v21647_v32 = vld [vmem:[#allocation11_spill] sm:$0xff]  ;;  %v5517_v17 = vld [vmem:[%s21377_s5 + $0x48] sm:$0xff] }
 0x4a3   : > { %v5337_v34 = vsel %vm1913_vm1, %v15079_v47, %v15108_v61  ;;  %v13274_v56 = vpack.c.bf16 %v5338_v63, %v5334_v29  ;;  %v5344_v60 = vsel %vm1913_vm1, %v15128_v51, %v15129_v39  ;;  %v15124_v0 = vunpack.i.h.bf16 %v15122_v24  ;;  %v15137_v36 = vpop.permute.xlu1 %15136  ;;  %v21655_v25 = vld [vmem:[#allocation7_spill] sm:$0xff]  ;;  %v21656_v29 = vld [vmem:[#allocation9_spill] sm:$0xff] }
 0x4a4   : > { %13271 = vmatprep.subr.bf16.mxu1 %v13270_v35  ;;  %v13206_v7 = vpack.c.bf16 %v5344_v60, %v5340_v18  ;;  %v5333_v22 = vsel %vm1913_vm1, %v15074_v57, %v15089_v28  ;;  %v15134_v4 = vunpack.i.h.bf16 %v15132_v2  ;;  %v15133_v12 = vunpack.i.l.bf16 %v15132_v2  ;;  %v5524_v2 = vld [vmem:[%s21377_s5 + $0x80] sm:$0xff] }
 0x4a5   : > { %13205 = vmatpush1.bf16.msra.mxu0 %v13204_v48  ;;  %v15139_v37 = vunpack.i.h.bf16 %v15137_v36  ;;  %v15138_v47 = vunpack.i.l.bf16 %v15137_v36  ;;  %v13276_v49 = vpack.c.bf16 %v5337_v34, %v5333_v22  ;;  %v5339_v43 = vsel %vm1913_vm1, %v15123_v13, %v15113_v41  ;;  %v21654_v41 = vld [vmem:[#allocation14_spill] sm:$0xff]  ;;  %v21657_v34 = vld [vmem:[#allocation8_spill] sm:$0xff] }
 0x4a6   : > { %13273 = vmatpush1.bf16.msra.mxu1 %v13272_v6  ;;  %13207 = vmatprep.subr.bf16.mxu0 %v13206_v7  ;;  %v5343_v30 = vsel %vm1913_vm1, %v15134_v4, %v15128_v51  ;;  %v5342_v62 = vsel %vm1913_vm1, %v15124_v0, %v15133_v12  ;;  %v5341_v14 = vsel %vm1913_vm1, %v15114_v59, %v15124_v0  ;;  %v5520_v6 = vld [vmem:[%s21377_s5 + $0x60] sm:$0xff]  ;;  %v21659_v7 = vld [vmem:[#allocation24_spill] sm:$0xff] }
 0x4a7   : > { %13275 = vmatprep.subr.bf16.mxu1 %v13274_v56  ;;  %v5345_v52 = vsel %vm1913_vm1, %v15129_v39, %v15138_v47  ;;  %v13208_v57 = vpack.c.bf16 %v5343_v30, %v5339_v43  ;;  %v5346_v16 = vsel %vm1913_vm1, %v15138_v47, %v15139_v37  ;;  %v21658_v56 = vld [vmem:[#allocation10_spill] sm:$0xff]  ;;  %v21660_v4 = vld [vmem:[#allocation28_spill] sm:$0xff]  ;;  %v21663_v43 = vld [vmem:[#allocation27_spill] sm:$0xff] }
 0x4a8   : > { %v13278_v9 = vpack.c.bf16 %v5346_v16, %v5342_v62  ;;  %v13280_v19 = vpack.c.bf16 %v5345_v52, %v5341_v14  ;;  %v21661_v36 = vld [vmem:[#allocation12_spill] sm:$0xff]  ;;  %v21662_v47 = vld [vmem:[#allocation18_spill] sm:$0xff]  ;;  %v21664_v62 = vld [vmem:[#allocation29_spill] sm:$0xff] }
 0x4a9   : > { %13209 = vmatpush1.bf16.msra.mxu0 %v13208_v57  ;;  %v21665_v52 = vld [vmem:[#allocation15_spill] sm:$0xff]  ;;  %v21666_v16 = vld [vmem:[#allocation13_spill] sm:$0xff] }
 0x4aa   : > { %13277 = vmatpush1.bf16.msra.mxu1 %v13276_v49 }
 0x4ab   : > { %13279 = vmatprep.subr.bf16.mxu1 %v13278_v9 }
 0x4ac   : > { %5813 = vmatmul.mubr.f32.vlgmr.msra.gmra.mrb[28].mxu0 %v5508_v46 }
 0x4ad   : > { %5818 = vmatprep.mubr.f32.mxu0 %v5512_v55 }
 0x4ae   : > { %13281 = vmatpush1.bf16.msra.mxu1 %v13280_v19 }
 0x4b0   : > { %5819 = vmatmul.mubr.f32.gmra.mrb[30].mxu0 %v5511_v54 }
 0x4b1   : > { %6135 = vmatmul.mubr.f32.vlgmr.msra.gmra.mrb[28].mxu1 %v5508_v46  ;;  %5824 = vmatprep.mubr.f32.mxu0 %v5515_v20 }
 0x4b2   : > { %6140 = vmatprep.mubr.f32.mxu1 %v5512_v55 }
 0x4b3   : > { %v1144_v38 = vpop.permute.xlu0 %1143 }
 0x4b4   : > { %5825 = vmatmul.mubr.f32.gmra.mrb[32].mxu0 %v5514_v58  ;;  %v1203_v1 = vadd.f32 %v1144_v38, %v21647_v32  ;;  %v1204_v27 = vadd.f32 %v1144_v38, %v21648_v21  ;;  %v1205_v44 = vadd.f32 %v1144_v38, %v21649_v53  ;;  %v1206_v11 = vadd.f32 %v1144_v38, %v21650_v26  ;;  %v1149_v45 = vpop.permute.xlu1 %1148 }
 0x4b5   : > { %6141 = vmatmul.mubr.f32.gmra.mrb[30].mxu1 %v5511_v54  ;;  %5830 = vmatprep.mubr.f32.mxu0 %v5518_v5  ;;  %v1207_v28 = vadd.f32 %v1149_v45, %v21651_v42  ;;  %v1208_v61 = vadd.f32 %v1149_v45, %v21652_v50  ;;  %v1209_v59 = vadd.f32 %v1149_v45, %v21653_v33 }
 0x4b6   : > { %6146 = vmatprep.mubr.f32.mxu1 %v5515_v20  ;;  %v1210_v8 = vadd.f32 %v1149_v45, %v21654_v41  ;;  %v1259_v15 = vmax.f32 %v1203_v1, 0.0  ;;  %v1260_v48 = vmax.f32 %v1204_v27, 0.0  ;;  %v1261_v23 = vmax.f32 %v1205_v44, 0.0  ;;  %v5527_v27 = vld [vmem:[%s21377_s5 + $0x98] sm:$0xff] }
 0x4b7   : > { %v1262_v40 = vmax.f32 %v1206_v11, 0.0  ;;  %v1263_v3 = vmax.f32 %v1207_v28, 0.0  ;;  %v1154_v31 = vpop.permute.xlu0 %1153  ;;  %v1264_v39 = vmax.f32 %v1208_v61, 0.0  ;;  %v1265_v51 = vmax.f32 %v1209_v59, 0.0 }
 0x4b8   : > { %5831 = vmatmul.mubr.f32.gmra.mrb[34].mxu0 %v5517_v17  ;;  %v18577_v63 = vmul.f32 %v21655_v25, %v1259_v15  ;;  %v1266_v24 = vmax.f32 %v1210_v8, 0.0  ;;  %v1159_v35 = vpop.permute.xlu1 %1158  ;;  %v18583_v18 = vmul.f32 %v21656_v29, %v1260_v48  ;;  %v18586_v13 = vmul.f32 %v21657_v34, %v1261_v23 }
 0x4b9   : > { %6147 = vmatmul.mubr.f32.gmra.mrb[32].mxu1 %v5514_v58  ;;  %5836 = vmatprep.mubr.f32.mxu0 %v5521_v10  ;;  %v18589_v60 = vmul.f32 %v21658_v56, %v1262_v40  ;;  %v18592_v0 = vmul.f32 %v21655_v25, %v1263_v3  ;;  %v1211_v22 = vadd.f32 %v1154_v31, %v21659_v7  ;;  %v5526_v40 = vld [vmem:[%s21377_s5 + $0x90] sm:$0xff] }
 0x4ba   : > { %6152 = vmatprep.mubr.f32.mxu1 %v5518_v5  ;;  %v1212_v12 = vadd.f32 %v1154_v31, %v21660_v4  ;;  %v1213_v37 = vadd.f32 %v1154_v31, %v21661_v36  ;;  %v18601_v49 = vadd.f32 %v1154_v31, %v21662_v47  ;;  %v1215_v30 = vadd.f32 %v1159_v35, %v21663_v43  ;;  %v5523_v5 = vld [vmem:[%s21377_s5 + $0x78] sm:$0xff] }
 0x4bb   : > { %v1216_v14 = vadd.f32 %v1159_v35, %v21664_v62  ;;  %v1217_v57 = vadd.f32 %v1159_v35, %v21665_v52  ;;  %v1218_v9 = vadd.f32 %v1159_v35, %v21666_v16  ;;  %v18607_v19 = vpop.permute.xlu0 %15141  ;;  %v18610_v46 = vmul.f32 %v21656_v29, %v1264_v39  ;;  %v5530_v35 = vld [vmem:[%s21377_s5 + $0xb0] sm:$0xff] }
 0x4bc   : > { %5837 = vmatmul.mubr.f32.gmra.mrb[36].mxu0 %v5520_v6  ;;  %v1267_v55 = vmax.f32 %v1211_v22, 0.0  ;;  %v1268_v54 = vmax.f32 %v1212_v12, 0.0  ;;  %v1269_v20 = vmax.f32 %v1213_v37, 0.0  ;;  %v15147_v58 = vpop.permute.xlu1 %15146  ;;  %v18616_v38 = vmul.f32 %v21657_v34, %v1265_v51 }
 0x4bd   : > { %6153 = vmatmul.mubr.f32.gmra.mrb[34].mxu1 %v5517_v17  ;;  %5842 = vmatprep.mubr.f32.mxu0 %v5524_v2  ;;  %v1271_v32 = vmax.f32 %v1215_v30, 0.0  ;;  %v1272_v1 = vmax.f32 %v1216_v14, 0.0  ;;  %v1273_v21 = vmax.f32 %v1217_v57, 0.0  ;;  %v18622_v53 = vmul.f32 %v21658_v56, %v1266_v24  ;;  %v5529_v57 = vld [vmem:[%s21377_s5 + $0xa8] sm:$0xff] }
 0x4be   : > { %6158 = vmatprep.mubr.f32.mxu1 %v5521_v10  ;;  %v1270_v44 = vmax.f32 %v18601_v49, 0.0  ;;  %v18626_v26 = vmul.f32 %v21655_v25, %v1267_v55  ;;  %v1274_v11 = vmax.f32 %v1218_v9, 0.0  ;;  %v18629_v45 = vmul.f32 %v21656_v29, %v1268_v54 }
 0x4bf   : > { %v18632_v17 = vmul.f32 %v21657_v34, %v1269_v20  ;;  %v18635_v42 = vmul.f32 %v21655_v25, %v1271_v32  ;;  %v18638_v28 = vmul.f32 %v21656_v29, %v1272_v1  ;;  %v15152_v50 = vpop.permute.xlu0 %15151  ;;  %v15144_v61 = vunpack.i.h.bf16 %v18607_v19 }
 0x4c0   : > { %5843 = vmatmul.mubr.f32.gmra.mrb[38].mxu0 %v5523_v5  ;;  %v15143_v33 = vunpack.i.l.bf16 %v18607_v19  ;;  %v15149_v59 = vunpack.i.h.bf16 %v15147_v58  ;;  %v15148_v41 = vunpack.i.l.bf16 %v15147_v58  ;;  %v15157_v8 = vpop.permute.xlu1 %15156  ;;  %v18643_v10 = vmul.f32 %v21657_v34, %v1273_v21 }
 0x4c1   : > { %6159 = vmatmul.mubr.f32.gmra.mrb[36].mxu1 %v5520_v6  ;;  %5848 = vmatprep.mubr.f32.mxu0 %v5527_v27  ;;  %v15190_v15 = vpack.i.bf16 %v18583_v18, %v18577_v63  ;;  %v15195_v48 = vpack.i.bf16 %v18610_v46, %v18592_v0  ;;  %v15153_v23 = vunpack.i.l.bf16 %v15152_v50  ;;  %v18653_v3 = vmul.f32 %v21658_v56, %v1274_v11 }
 0x4c2   : > { %6164 = vmatprep.mubr.f32.mxu1 %v5524_v2  ;;  %v15154_v31 = vunpack.i.h.bf16 %v15152_v50  ;;  %v15159_v39 = vunpack.i.h.bf16 %v15157_v8  ;;  %v21667_v51 = vmov 0.0   ;;  %v15158_v2 = vunpack.i.l.bf16 %v15157_v8 }
 0x4c3   : > { %v15200_v24 = vpack.i.bf16 %v18586_v13, %v21667_v51  ;;  %15191 = vrot.lane.b32.xlu0 %v15190_v15, %s16213_s24  ;;  %15196 = vrot.lane.b32.xlu1 %v15195_v48, %s16213_s24  ;;  %v5460_v6 = vsel %vm5459_vm13, %v15153_v23, %v15143_v33  ;;  %v15205_v7 = vpack.i.bf16 %v21667_v51, %v18589_v60  ;;  %v15162_v4 = vpop.permute.xlu0 %15161  ;;  %v5532_v48 = vld [vmem:[%s21377_s5 + $0xc0] sm:$0xff] }
 0x4c4   : > { %v5461_v22 = vsel %vm5459_vm13, %v15143_v33, %v15144_v61  ;;  %v5464_v12 = vsel %vm5459_vm13, %v15159_v39, %v15148_v41  ;;  %v5465_v36 = vsel %vm5459_vm13, %v15148_v41, %v15149_v59  ;;  %v15164_v37 = vunpack.i.h.bf16 %v15162_v4  ;;  %v15167_v43 = vpop.permute.xlu1 %15166  ;;  %5849 = vmatmul.mubr.f32.gmra.mrb[40].mxu0 %v5526_v40  ;;  %v5533_v41 = vld [vmem:[%s21377_s5 + $0xc8] sm:$0xff] }
 0x4c5   : > { %6165 = vmatmul.mubr.f32.gmra.mrb[38].mxu1 %v5523_v5  ;;  %v15163_v47 = vunpack.i.l.bf16 %v15162_v4  ;;  %v13210_v30 = vpack.c.bf16 %v5465_v36, %v5461_v22  ;;  %v15169_v62 = vunpack.i.h.bf16 %v15167_v43  ;;  %v15168_v14 = vunpack.i.l.bf16 %v15167_v43  ;;  %5854 = vmatprep.mubr.f32.mxu0 %v5530_v35 }
 0x4c6   : > { %6170 = vmatprep.mubr.f32.mxu1 %v5527_v27  ;;  %v15210_v52 = vpack.i.bf16 %v18622_v53, %v18616_v38  ;;  %v15215_v9 = vpack.i.bf16 %v18629_v45, %v18626_v26  ;;  %v13212_v19 = vpack.c.bf16 %v5464_v12, %v5460_v6  ;;  %v15220_v55 = vpack.i.bf16 %v18638_v28, %v18635_v42 }
 0x4c7   : > { %v5466_v16 = vsel %vm5459_vm13, %v15149_v59, %v15163_v47  ;;  %v5462_v54 = vsel %vm5459_vm13, %v15144_v61, %v15154_v31  ;;  %15201 = vrot.lane.b32.xlu0 %v15200_v24, %s16213_s24  ;;  %15206 = vrot.lane.b32.xlu1 %v15205_v7, %s16213_s24  ;;  %v15177_v20 = vpop.permute.xlu0 %15176  ;;  %v5463_v58 = vsel %vm5459_vm13, %v15154_v31, %v15158_v2 }
 0x4c8   : > { %v5467_v5 = vsel %vm5459_vm13, %v15163_v47, %v15164_v37  ;;  %13211 = vmatprep.subr.bf16.mxu0 %v13210_v30  ;;  %v15179_v32 = vunpack.i.h.bf16 %v15177_v20  ;;  %v15178_v1 = vunpack.i.l.bf16 %v15177_v20  ;;  %v15172_v21 = vpop.permute.xlu1 %15171  ;;  %v13284_v11 = vpack.c.bf16 %v5466_v16, %v5462_v54  ;;  %5855 = vmatmul.mubr.f32.gmra.mrb[42].mxu0 %v5529_v57  ;;  %v5536_v30 = vld [vmem:[%s21377_s5 + $0xe0] sm:$0xff] }
 0x4c9   : > { %6171 = vmatmul.mubr.f32.gmra.mrb[40].mxu1 %v5526_v40  ;;  %v13282_v27 = vpack.c.bf16 %v5467_v5, %v5463_v58  ;;  %v18686_v50 = vmul.f32 %v21658_v56, %v1270_v44  ;;  %13213 = vmatpush1.bf16.msra.mxu0 %v13212_v19  ;;  %v15174_v61 = vunpack.i.h.bf16 %v15172_v21  ;;  %v15173_v33 = vunpack.i.l.bf16 %v15172_v21  ;;  %v5539_v58 = vld [vmem:[%s21377_s5 + $0xf8] sm:$0xff]  ;;  %v5538_v21 = vld [vmem:[%s21377_s5 + $0xf0] sm:$0xff] }
 0x4ca   : > { %6176 = vmatprep.mubr.f32.mxu1 %v5530_v35  ;;  %v15235_v59 = vpack.i.bf16 %v18653_v3, %v18643_v10  ;;  %v5469_v8 = vsel %vm5459_vm13, %v15168_v14, %v15169_v62  ;;  %v5473_v15 = vsel %vm5459_vm13, %v15178_v1, %v15179_v32  ;;  %v15240_v49 = vpack.i.bf16 %v18586_v13, %v18583_v18 }
 0x4cb   : > { %13283 = vmatprep.subr.bf16.mxu1 %v13282_v27  ;;  %v15245_v44 = vpack.i.bf16 %v18616_v38, %v18610_v46  ;;  %15211 = vrot.lane.b32.xlu0 %v15210_v52, %s16213_s24  ;;  %v15225_v23 = vpack.i.bf16 %v18632_v17, %v21667_v51  ;;  %v15182_v40 = vpop.permute.xlu0 %15181  ;;  %v13214_v31 = vpack.c.bf16 %v5473_v15, %v5469_v8  ;;  %v5544_v8 = vld [vmem:[%s21377_s5 + $0x120] sm:$0xff] }
 0x4cc   : > { %15216 = vrot.lane.b32.xlu1 %v15215_v9, %s16213_s24  ;;  %v5468_v39 = vsel %vm5459_vm13, %v15173_v33, %v15168_v14  ;;  %13285 = vmatpush1.bf16.msra.mxu1 %v13284_v11  ;;  %v15184_v24 = vunpack.i.h.bf16 %v15182_v40  ;;  %v15183_v35 = vunpack.i.l.bf16 %v15182_v40  ;;  %v15187_v6 = vpop.permute.xlu1 %15186  ;;  %v15250_v2 = vpack.i.bf16 %v18589_v60, %v18577_v63  ;;  %v5541_v33 = vld [vmem:[%s21377_s5 + $0x108] sm:$0xff] }
 0x4cd   : > { %6177 = vmatmul.mubr.f32.gmra.mrb[42].mxu1 %v5529_v57  ;;  %5860 = vmatprep.mubr.f32.mxu0 %v5533_v41  ;;  %v5470_v7 = vsel %vm5459_vm13, %v15169_v62, %v15174_v61  ;;  %v15189_v22 = vunpack.i.h.bf16 %v15187_v6  ;;  %v15188_v4 = vunpack.i.l.bf16 %v15187_v6  ;;  %v15265_v12 = vpack.i.bf16 %v18632_v17, %v18629_v45  ;;  %v5535_v57 = vld [vmem:[%s21377_s5 + $0xd8] sm:$0xff] }
 0x4ce   : > { %13215 = vmatprep.subr.bf16.mxu0 %v13214_v31  ;;  %5861 = vmatmul.mubr.f32.gmra.mrb[44].mxu0 %v5532_v48  ;;  %v5472_v36 = vsel %vm5459_vm13, %v15184_v24, %v15178_v1  ;;  %v5471_v37 = vsel %vm5459_vm13, %v15174_v61, %v15183_v35  ;;  %v15270_v47 = vpack.i.bf16 %v18643_v10, %v18638_v28  ;;  %v5542_v61 = vld [vmem:[%s21377_s5 + $0x110] sm:$0xff]  ;;  %v5553_v24 = vld [vmem:[%s21377_s5 + $0x168] sm:$0xff]  ;;  %v6861_v6 = vld [vmem:[%s21383_s11 + $0x118] sm:$0xff] }
 0x4cf   : > { %v15275_v43 = vpack.i.bf16 %v18686_v50, %v18626_v26  ;;  %6182 = vmatprep.mubr.f32.mxu1 %v5533_v41  ;;  %15221 = vrot.lane.b32.xlu0 %v15220_v55, %s16213_s24  ;;  %v5474_v62 = vsel %vm5459_vm13, %v15179_v32, %v15188_v4  ;;  %v13216_v14 = vpack.c.bf16 %v5472_v36, %v5468_v39  ;;  %v5545_v41 = vld [vmem:[%s21377_s5 + $0x128] sm:$0xff]  ;;  %v5554_v39 = vld [vmem:[%s21377_s5 + $0x170] sm:$0xff]  ;;  %v5519_v36 = vld [vmem:[%s21377_s5 + $0x58] sm:$0xff] }
 0x4d0   : > { %15226 = vrot.lane.b32.xlu1 %v15225_v23, %s16213_s24  ;;  %v5475_v52 = vsel %vm5459_vm13, %v15188_v4, %v15189_v22  ;;  %v15230_v16 = vpack.i.bf16 %v21667_v51, %v18686_v50  ;;  %v13288_v19 = vpack.c.bf16 %v5474_v62, %v5470_v7  ;;  %5866 = vmatprep.mubr.f32.mxu0 %v5536_v30  ;;  %v5550_v23 = vld [vmem:[%s21377_s5 + $0x150] sm:$0xff]  ;;  %v6862_v7 = vld [vmem:[%s21383_s11 + $0x120] sm:$0xff]  ;;  %v6863_v22 = vld [vmem:[%s21383_s11 + $0x128] sm:$0xff] }
 0x4d1   : > { %v13286_v9 = vpack.c.bf16 %v5475_v52, %v5471_v37  ;;  %6183 = vmatmul.mubr.f32.gmra.mrb[44].mxu1 %v5532_v48  ;;  %13217 = vmatpush1.bf16.msra.mxu0 %v13216_v14  ;;  %v13298_v55 = vpack.c.bf16 %v18610_v46, %v18583_v18  ;;  %v13322_v54 = vpack.c.bf16 %v18622_v53, %v18589_v60  ;;  %v5551_v48 = vld [vmem:[%s21377_s5 + $0x158] sm:$0xff]  ;;  %v6860_v35 = vld [vmem:[%s21383_s11 + $0x110] sm:$0xff]  ;;  %v5513_v4 = vld [vmem:[%s21377_s5 + $0x28] sm:$0xff] }
 0x4d2   : > { %v13300_v20 = vpack.c.bf16 %v18592_v0, %v18577_v63  ;;  %5867 = vmatmul.mubr.f32.gmra.mrb[46].mxu0 %v5535_v57  ;;  %v13302_v5 = vpack.c.bf16 %v18638_v28, %v18629_v45  ;;  %v13324_v32 = vpack.c.bf16 %v18616_v38, %v18586_v13  ;;  %v13326_v1 = vpack.c.bf16 %v18653_v3, %v18686_v50  ;;  %v5522_v37 = vld [vmem:[%s21377_s5 + $0x70] sm:$0xff]  ;;  %v5537_v14 = vld [vmem:[%s21377_s5 + $0xe8] sm:$0xff]  ;;  %v5540_v52 = vld [vmem:[%s21377_s5 + $0x100] sm:$0xff] }
 0x4d3   : > { %13287 = vmatprep.subr.bf16.mxu1 %v13286_v9  ;;  %15231 = vrot.lane.b32.xlu0 %v15230_v16, %s16213_s24  ;;  %v13304_v27 = vpack.c.bf16 %v18635_v42, %v18626_v26  ;;  %v13328_v11 = vpack.c.bf16 %v18643_v10, %v18632_v17  ;;  %v15260_v15 = vpack.i.bf16 %v21667_v51, %v18622_v53  ;;  %v5534_v62 = vld [vmem:[%s21377_s5 + $0xd0] sm:$0xff]  ;;  %v5549_v9 = vld [vmem:[%s21377_s5 + $0x148] sm:$0xff] }
 0x4d4   : > { %15236 = vrot.lane.b32.xlu1 %v15235_v59, %s16213_s24  ;;  %13289 = vmatpush1.bf16.msra.mxu1 %v13288_v19  ;;  %v15255_v59 = vpack.i.bf16 %v18592_v0, %v21667_v51  ;;  %v15280_v40 = vpack.i.bf16 %v18635_v42, %v21667_v51  ;;  %v15285_v31 = vpack.i.bf16 %v21667_v51, %v18653_v3  ;;  %v5546_v16 = vld [vmem:[%s21377_s5 + $0x130] sm:$0xff]  ;;  %v5552_v19 = vld [vmem:[%s21377_s5 + $0x160] sm:$0xff] }
 0x4d5   : > { %6188 = vmatprep.mubr.f32.mxu1 %v5536_v30  ;;  %5872 = vmatprep.mubr.f32.mxu0 %v5539_v58  ;;  %v5531_v30 = vld [vmem:[%s21377_s5 + $0xb8] sm:$0xff] }
 0x4d6   : > { %6189 = vmatmul.mubr.f32.gmra.mrb[46].mxu1 %v5535_v57  ;;  %5873 = vmatmul.mubr.f32.gmra.mrb[48].mxu0 %v5538_v21  ;;  %v5543_v57 = vld [vmem:[%s21377_s5 + $0x118] sm:$0xff] }
 0x4d7   : > { %6194 = vmatprep.mubr.f32.mxu1 %v5539_v58  ;;  %15241 = vrot.lane.b32.xlu0 %v15240_v49, %s16214_s25  ;;  %v5548_v49 = vld [vmem:[%s21377_s5 + $0x140] sm:$0xff]  ;;  %v5555_v58 = vld [vmem:[%s21377_s5 + $0x178] sm:$0xff] }
 0x4d8   : > { %15246 = vrot.lane.b32.xlu1 %v15245_v44, %s16214_s25  ;;  %5878 = vmatprep.mubr.f32.mxu0 %v5542_v61  ;;  %v5547_v44 = vld [vmem:[%s21377_s5 + $0x138] sm:$0xff] }
 0x4da   : > { %6195 = vmatmul.mubr.f32.gmra.mrb[48].mxu1 %v5538_v21  ;;  %5879 = vmatmul.mubr.f32.gmra.mrb[50].mxu0 %v5541_v33 }
 0x4db   : > { %6200 = vmatprep.mubr.f32.mxu1 %v5542_v61  ;;  %15251 = vrot.lane.b32.xlu0 %v15250_v2, %s16214_s25  ;;  %v5510_v2 = vld [vmem:[%s21377_s5 + $0x10] sm:$0xff] }
 0x4dc   : > { %15256 = vrot.lane.b32.xlu1 %v15255_v59, %s16214_s25  ;;  %5884 = vmatprep.mubr.f32.mxu0 %v5545_v41 }
 0x4de   : > { %6201 = vmatmul.mubr.f32.gmra.mrb[50].mxu1 %v5541_v33  ;;  %5885 = vmatmul.mubr.f32.gmra.mrb[52].mxu0 %v5544_v8 }
 0x4df   : > { %6206 = vmatprep.mubr.f32.mxu1 %v5545_v41  ;;  %15261 = vrot.lane.b32.xlu0 %v15260_v15, %s16214_s25 }
 0x4e0   : > { %15266 = vrot.lane.b32.xlu1 %v15265_v12, %s16214_s25  ;;  %5890 = vmatprep.mubr.f32.mxu0 %v5548_v49  ;;  %v5516_v12 = vld [vmem:[%s21377_s5 + $0x40] sm:$0xff] }
 0x4e2   : > { %6207 = vmatmul.mubr.f32.gmra.mrb[52].mxu1 %v5544_v8  ;;  %5891 = vmatmul.mubr.f32.gmra.mrb[54].mxu0 %v5547_v44 }
 0x4e3   : > { %6212 = vmatprep.mubr.f32.mxu1 %v5548_v49  ;;  %15271 = vrot.lane.b32.xlu0 %v15270_v47, %s16214_s25  ;;  %v5525_v47 = vld [vmem:[%s21377_s5 + $0x88] sm:$0xff] }
 0x4e4   : > { %15276 = vrot.lane.b32.xlu1 %v15275_v43, %s16214_s25  ;;  %5896 = vmatprep.mubr.f32.mxu0 %v5551_v48  ;;  %v5528_v43 = vld [vmem:[%s21377_s5 + $0xa0] sm:$0xff] }
 0x4e6   : > { %6213 = vmatmul.mubr.f32.gmra.mrb[54].mxu1 %v5547_v44  ;;  %5897 = vmatmul.mubr.f32.gmra.mrb[56].mxu0 %v5550_v23 }
 0x4e7   : > { %6218 = vmatprep.mubr.f32.mxu1 %v5551_v48  ;;  %15281 = vrot.lane.b32.xlu0 %v15280_v40, %s16214_s25 }
 0x4e8   : > { %15286 = vrot.lane.b32.xlu1 %v15285_v31, %s16214_s25  ;;  %5902 = vmatprep.mubr.f32.mxu0 %v5554_v39 }
 0x4ea   : > { %6219 = vmatmul.mubr.f32.gmra.mrb[56].mxu1 %v5550_v23  ;;  %5903 = vmatmul.mubr.f32.gmra.mrb[58].mxu0 %v5553_v24 }
 0x4eb   : > { %6224 = vmatprep.mubr.f32.mxu1 %v5554_v39  ;;  %6866 = vperm.xlu0 %14288, %v6860_v35  }
 0x4ec   : > { %6871 = vperm.xlu1 %14289, %v6861_v6   ;;  %5973 = vmatprep.mubr.f32.mxu0 %v21667_v51 }
 0x4ee   : > { %6225 = vmatmul.mubr.f32.gmra.mrb[58].mxu1 %v5553_v24  ;;  %12768 = vmatmul.mubr.msk.f32.vlgmr.msra.gmra.mrb[28].mxu0 %vm1913_vm1, %v5510_v2 }
 0x4ef   : > { %6295 = vmatprep.mubr.f32.mxu1 %v21667_v51  ;;  %6876 = vperm.xlu0 %14288, %v6862_v7  }
 0x4f0   : > { %6881 = vperm.xlu1 %14289, %v6863_v22   ;;  %5979 = vmatprep.mubr.f32.mxu0 %v21667_v51 }
 0x4f2   : > { %12784 = vmatmul.mubr.msk.f32.vlgmr.msra.gmra.mrb[28].mxu1 %vm1913_vm1, %v5510_v2  ;;  %12769 = vmatmul.mubr.msk.f32.gmra.mrb[30].mxu0 %vm1913_vm1, %v5513_v4 }
 0x4f3   : > { %6301 = vmatprep.mubr.f32.mxu1 %v21667_v51  ;;  %5985 = vmatprep.mubr.f32.mxu0 %v21667_v51 }
 0x4f6   : > { %12785 = vmatmul.mubr.msk.f32.gmra.mrb[30].mxu1 %vm1913_vm1, %v5513_v4  ;;  %12770 = vmatmul.mubr.msk.f32.gmra.mrb[32].mxu0 %vm1913_vm1, %v5516_v12 }
 0x4f7   : > { %6307 = vmatprep.mubr.f32.mxu1 %v21667_v51  ;;  %5991 = vmatprep.mubr.f32.mxu0 %v21667_v51 }
 0x4fa   : > { %12786 = vmatmul.mubr.msk.f32.gmra.mrb[32].mxu1 %vm1913_vm1, %v5516_v12  ;;  %12771 = vmatmul.mubr.msk.f32.gmra.mrb[34].mxu0 %vm1913_vm1, %v5519_v36 }
 0x4fb   : > { %6313 = vmatprep.mubr.f32.mxu1 %v21667_v51  ;;  %5997 = vmatprep.mubr.f32.mxu0 %v21667_v51 }
 0x4fe   : > { %12787 = vmatmul.mubr.msk.f32.gmra.mrb[34].mxu1 %vm1913_vm1, %v5519_v36  ;;  %12772 = vmatmul.mubr.msk.f32.gmra.mrb[36].mxu0 %vm1913_vm1, %v5522_v37 }
 0x4ff   : > { %6319 = vmatprep.mubr.f32.mxu1 %v21667_v51  ;;  %6003 = vmatprep.mubr.f32.mxu0 %v21667_v51 }
 0x502   : > { %12788 = vmatmul.mubr.msk.f32.gmra.mrb[36].mxu1 %vm1913_vm1, %v5522_v37  ;;  %12773 = vmatmul.mubr.msk.f32.gmra.mrb[38].mxu0 %vm1913_vm1, %v5525_v47 }
 0x503   : > { %6325 = vmatprep.mubr.f32.mxu1 %v21667_v51  ;;  %6009 = vmatprep.mubr.f32.mxu0 %v21667_v51 }
 0x506   : > { %12789 = vmatmul.mubr.msk.f32.gmra.mrb[38].mxu1 %vm1913_vm1, %v5525_v47  ;;  %12774 = vmatmul.mubr.msk.f32.gmra.mrb[40].mxu0 %vm1913_vm1, %v5528_v43 }
 0x507   : > { %6331 = vmatprep.mubr.f32.mxu1 %v21667_v51  ;;  %6015 = vmatprep.mubr.f32.mxu0 %v21667_v51 }
 0x50a   : > { %12790 = vmatmul.mubr.msk.f32.gmra.mrb[40].mxu1 %vm1913_vm1, %v5528_v43  ;;  %12775 = vmatmul.mubr.msk.f32.gmra.mrb[42].mxu0 %vm1913_vm1, %v5531_v30 }
 0x50b   : > { %6337 = vmatprep.mubr.f32.mxu1 %v21667_v51  ;;  %6021 = vmatprep.mubr.f32.mxu0 %v21667_v51 }
 0x50e   : > { %12791 = vmatmul.mubr.msk.f32.gmra.mrb[42].mxu1 %vm1913_vm1, %v5531_v30  ;;  %12776 = vmatmul.mubr.msk.f32.gmra.mrb[44].mxu0 %vm1913_vm1, %v5534_v62 }
 0x50f   : > { %6343 = vmatprep.mubr.f32.mxu1 %v21667_v51  ;;  %6027 = vmatprep.mubr.f32.mxu0 %v21667_v51 }
 0x512   : > { %12792 = vmatmul.mubr.msk.f32.gmra.mrb[44].mxu1 %vm1913_vm1, %v5534_v62  ;;  %12777 = vmatmul.mubr.msk.f32.gmra.mrb[46].mxu0 %vm1913_vm1, %v5537_v14 }
 0x513   : > { %6349 = vmatprep.mubr.f32.mxu1 %v21667_v51  ;;  %6033 = vmatprep.mubr.f32.mxu0 %v21667_v51 }
 0x516   : > { %12793 = vmatmul.mubr.msk.f32.gmra.mrb[46].mxu1 %vm1913_vm1, %v5537_v14  ;;  %12778 = vmatmul.mubr.msk.f32.gmra.mrb[48].mxu0 %vm1913_vm1, %v5540_v52 }
 0x517   : > { %6355 = vmatprep.mubr.f32.mxu1 %v21667_v51  ;;  %6039 = vmatprep.mubr.f32.mxu0 %v21667_v51 }
 0x51a   : > { %12794 = vmatmul.mubr.msk.f32.gmra.mrb[48].mxu1 %vm1913_vm1, %v5540_v52  ;;  %12779 = vmatmul.mubr.msk.f32.gmra.mrb[50].mxu0 %vm1913_vm1, %v5543_v57 }
 0x51b   : > { %6361 = vmatprep.mubr.f32.mxu1 %v21667_v51  ;;  %6045 = vmatprep.mubr.f32.mxu0 %v21667_v51 }
 0x51e   : > { %12795 = vmatmul.mubr.msk.f32.gmra.mrb[50].mxu1 %vm1913_vm1, %v5543_v57  ;;  %12780 = vmatmul.mubr.msk.f32.gmra.mrb[52].mxu0 %vm1913_vm1, %v5546_v16 }
 0x51f   : > { %6367 = vmatprep.mubr.f32.mxu1 %v21667_v51  ;;  %6051 = vmatprep.mubr.f32.mxu0 %v21667_v51 }
 0x522   : > { %12796 = vmatmul.mubr.msk.f32.gmra.mrb[52].mxu1 %vm1913_vm1, %v5546_v16  ;;  %12781 = vmatmul.mubr.msk.f32.gmra.mrb[54].mxu0 %vm1913_vm1, %v5549_v9 }
 0x523   : > { %6373 = vmatprep.mubr.f32.mxu1 %v21667_v51  ;;  %6057 = vmatprep.mubr.f32.mxu0 %v21667_v51 }
 0x526   : > { %12797 = vmatmul.mubr.msk.f32.gmra.mrb[54].mxu1 %vm1913_vm1, %v5549_v9  ;;  %12782 = vmatmul.mubr.msk.f32.gmra.mrb[56].mxu0 %vm1913_vm1, %v5552_v19 }
 0x527   : > { %6379 = vmatprep.mubr.f32.mxu1 %v21667_v51  ;;  %6063 = vmatprep.mubr.f32.mxu0 %v21667_v51 }
 0x52a   : > { %12798 = vmatmul.mubr.msk.f32.gmra.mrb[56].mxu1 %vm1913_vm1, %v5552_v19  ;;  %12783 = vmatmul.mubr.msk.f32.gmra.mrb[58].mxu0 %vm1913_vm1, %v5555_v58 }
 0x52b   : > { %6385 = vmatprep.mubr.f32.mxu1 %v21667_v51  ;;  %6960 = vmatprep.mubr.f32.mxu0 %v21667_v51 }
 0x52e   : > { %12799 = vmatmul.mubr.msk.f32.gmra.mrb[58].mxu1 %vm1913_vm1, %v5555_v58 }
 0x52f   : > { %7049 = vmatprep.mubr.f32.mxu1 %v21667_v51 }
 0x535   : > { %v15192_v21 = vpop.permute.xlu0 %15191  ;;  %v15197_v61 = vpop.permute.xlu1 %15196 }
 0x536   : > { %v15194_v33 = vunpack.i.h.bf16 %v15192_v21  ;;  %v15193_v59 = vunpack.i.l.bf16 %v15192_v21  ;;  %v15199_v41 = vunpack.i.h.bf16 %v15197_v61  ;;  %v15198_v8 = vunpack.i.l.bf16 %v15197_v61 }
 0x538   : > { %v6601_v15 = vsel %vm2171_vm3, %v15193_v59, %v15194_v33  ;;  %v6605_v49 = vsel %vm2171_vm3, %v15198_v8, %v15199_v41 }
 0x539   : > { %v15202_v44 = vpop.permute.xlu0 %15201  ;;  %v15207_v48 = vpop.permute.xlu1 %15206  ;;  %v13290_v23 = vpack.c.bf16 %v6605_v49, %v6601_v15 }
 0x53a   : > { %v15203_v40 = vunpack.i.l.bf16 %v15202_v44  ;;  %v15209_v31 = vunpack.i.h.bf16 %v15207_v48  ;;  %v15204_v39 = vunpack.i.h.bf16 %v15202_v44  ;;  %v15208_v24 = vunpack.i.l.bf16 %v15207_v48 }
 0x53b   : > { %13291 = vmatprep.subr.bf16.mxu0 %v13290_v23 }
 0x53c   : > { %v6600_v35 = vsel %vm2171_vm3, %v15203_v40, %v15193_v59  ;;  %v6604_v6 = vsel %vm2171_vm3, %v15209_v31, %v15198_v8  ;;  %v6602_v36 = vsel %vm2171_vm3, %v15194_v33, %v15204_v39  ;;  %v6603_v37 = vsel %vm2171_vm3, %v15204_v39, %v15208_v24 }
 0x53d   : > { %v15212_v2 = vpop.permute.xlu0 %15211  ;;  %v13292_v22 = vpack.c.bf16 %v6604_v6, %v6600_v35 }
 0x53e   : > { %v15217_v7 = vpop.permute.xlu1 %15216  ;;  %v15214_v4 = vunpack.i.h.bf16 %v15212_v2  ;;  %v15213_v12 = vunpack.i.l.bf16 %v15212_v2 }
 0x53f   : > { %13293 = vmatpush1.bf16.msra.mxu0 %v13292_v22  ;;  %v15219_v43 = vunpack.i.h.bf16 %v15217_v7  ;;  %v15218_v30 = vunpack.i.l.bf16 %v15217_v7 }
 0x540   : > { %v6606_v47 = vsel %vm2171_vm3, %v15199_v41, %v15213_v12  ;;  %v6607_v62 = vsel %vm2171_vm3, %v15213_v12, %v15214_v4 }
 0x541   : > { %v15222_v14 = vpop.permute.xlu0 %15221  ;;  %v13314_v57 = vpack.c.bf16 %v6607_v62, %v6603_v37  ;;  %v13316_v16 = vpack.c.bf16 %v6606_v47, %v6602_v36  ;;  %v6609_v61 = vsel %vm2171_vm3, %v15218_v30, %v15219_v43 }
 0x542   : > { %v15227_v52 = vpop.permute.xlu1 %15226  ;;  %v15224_v9 = vunpack.i.h.bf16 %v15222_v14  ;;  %v15223_v19 = vunpack.i.l.bf16 %v15222_v14 }
 0x543   : > { %v15229_v58 = vunpack.i.h.bf16 %v15227_v52  ;;  %v15228_v21 = vunpack.i.l.bf16 %v15227_v52  ;;  %13315 = vmatprep.subr.bf16.mxu1 %v13314_v57 }
 0x544   : > { %13317 = vmatpush1.bf16.msra.mxu1 %v13316_v16  ;;  %v6613_v33 = vsel %vm2171_vm3, %v15223_v19, %v15224_v9 }
 0x545   : > { %v15232_v59 = vpop.permute.xlu0 %15231  ;;  %v13294_v8 = vpack.c.bf16 %v6613_v33, %v6609_v61  ;;  %v6608_v23 = vsel %vm2171_vm3, %v15228_v21, %v15218_v30  ;;  %v6610_v40 = vsel %vm2171_vm3, %v15219_v43, %v15229_v58 }
 0x546   : > { %v15237_v41 = vpop.permute.xlu1 %15236  ;;  %v15234_v15 = vunpack.i.h.bf16 %v15232_v59  ;;  %v15233_v49 = vunpack.i.l.bf16 %v15232_v59 }
 0x547   : > { %v15239_v44 = vunpack.i.h.bf16 %v15237_v41  ;;  %v15238_v48 = vunpack.i.l.bf16 %v15237_v41  ;;  %13295 = vmatprep.subr.bf16.mxu0 %v13294_v8 }
 0x548   : > { %v6612_v31 = vsel %vm2171_vm3, %v15234_v15, %v15223_v19  ;;  %v6611_v24 = vsel %vm2171_vm3, %v15229_v58, %v15233_v49 }
 0x549   : > { %v6614_v39 = vsel %vm2171_vm3, %v15224_v9, %v15238_v48  ;;  %v6615_v35 = vsel %vm2171_vm3, %v15238_v48, %v15239_v44  ;;  %v15242_v6 = vpop.permute.xlu0 %15241  ;;  %v13296_v7 = vpack.c.bf16 %v6612_v31, %v6608_v23 }
 0x54a   : > { %v15247_v2 = vpop.permute.xlu1 %15246  ;;  %v13318_v22 = vpack.c.bf16 %v6615_v35, %v6611_v24  ;;  %v13320_v4 = vpack.c.bf16 %v6614_v39, %v6610_v40  ;;  %v15244_v12 = vunpack.i.h.bf16 %v15242_v6  ;;  %v15243_v36 = vunpack.i.l.bf16 %v15242_v6  ;;  %v6808_v24 = vld [vmem:[%s21378_s6] sm:$0xff]  ;;  %v6809_v35 = vld [vmem:[%s21378_s6 + $0x8] sm:$0xff]  ;;  %v6810_v6 = vld [vmem:[%s21378_s6 + $0x10] sm:$0xff] }
 0x54b   : > { %v15249_v37 = vunpack.i.h.bf16 %v15247_v2  ;;  %v15248_v47 = vunpack.i.l.bf16 %v15247_v2  ;;  %13297 = vmatpush1.bf16.msra.mxu0 %v13296_v7  ;;  %v6811_v2 = vld [vmem:[%s21378_s6 + $0x18] sm:$0xff] }
 0x54c   : > { %13319 = vmatprep.subr.bf16.mxu1 %v13318_v22  ;;  %13299 = vmatprep.subr.bf16.mxu0 %v13298_v55  ;;  %v6761_v52 = vsel %vm2332_vm4, %v15243_v36, %v15244_v12 }
 0x54d   : > { %13321 = vmatpush1.bf16.msra.mxu1 %v13320_v4  ;;  %v15252_v43 = vpop.permute.xlu0 %15251  ;;  %v6765_v57 = vsel %vm2332_vm4, %v15248_v47, %v15249_v37 }
 0x54e   : > { %v15257_v30 = vpop.permute.xlu1 %15256  ;;  %13323 = vmatprep.subr.bf16.mxu1 %v13322_v54  ;;  %v15253_v62 = vunpack.i.l.bf16 %v15252_v43  ;;  %v15254_v16 = vunpack.i.h.bf16 %v15252_v43  ;;  %v13306_v46 = vpack.c.bf16 %v6765_v57, %v6761_v52 }
 0x54f   : > { %v15259_v14 = vunpack.i.h.bf16 %v15257_v30  ;;  %v15258_v9 = vunpack.i.l.bf16 %v15257_v30  ;;  %13301 = vmatpush1.bf16.msra.mxu0 %v13300_v20 }
 0x550   : > { %13303 = vmatprep.subr.bf16.mxu0 %v13302_v5  ;;  %v6760_v53 = vsel %vm2332_vm4, %v15253_v62, %v15243_v36  ;;  %v6762_v50 = vsel %vm2332_vm4, %v15244_v12, %v15254_v16 }
 0x551   : > { %13325 = vmatpush1.bf16.msra.mxu1 %v13324_v32  ;;  %v15262_v18 = vpop.permute.xlu0 %15261  ;;  %v6764_v63 = vsel %vm2332_vm4, %v15259_v14, %v15248_v47  ;;  %v6763_v13 = vsel %vm2332_vm4, %v15254_v16, %v15258_v9 }
 0x552   : > { %v15267_v60 = vpop.permute.xlu1 %15266  ;;  %13327 = vmatprep.subr.bf16.mxu1 %v13326_v1  ;;  %v15264_v0 = vunpack.i.h.bf16 %v15262_v18  ;;  %v15263_v55 = vunpack.i.l.bf16 %v15262_v18  ;;  %v13308_v5 = vpack.c.bf16 %v6764_v63, %v6760_v53 }
 0x553   : > { %13305 = vmatpush1.bf16.msra.mxu0 %v13304_v27  ;;  %v15269_v45 = vunpack.i.h.bf16 %v15267_v60  ;;  %v15268_v28 = vunpack.i.l.bf16 %v15267_v60 }
 0x554   : > { %v6766_v38 = vsel %vm2332_vm4, %v15249_v37, %v15263_v55  ;;  %13307 = vmatprep.subr.bf16.mxu0 %v13306_v46  ;;  %v6767_v3 = vsel %vm2332_vm4, %v15263_v55, %v15264_v0 }
 0x555   : > { %13329 = vmatpush1.bf16.msra.mxu1 %v13328_v11  ;;  %v15272_v54 = vpop.permute.xlu0 %15271  ;;  %v13330_v26 = vpack.c.bf16 %v6767_v3, %v6763_v13  ;;  %v13332_v1 = vpack.c.bf16 %v6766_v38, %v6762_v50  ;;  %v6769_v58 = vsel %vm2332_vm4, %v15268_v28, %v15269_v45 }
 0x556   : > { %v15277_v20 = vpop.permute.xlu1 %15276  ;;  %v15274_v42 = vunpack.i.h.bf16 %v15272_v54  ;;  %v15273_v32 = vunpack.i.l.bf16 %v15272_v54 }
 0x557   : > { %v15279_v27 = vunpack.i.h.bf16 %v15277_v20  ;;  %v15278_v19 = vunpack.i.l.bf16 %v15277_v20  ;;  %13309 = vmatpush1.bf16.msra.mxu0 %v13308_v5  ;;  %13331 = vmatprep.subr.bf16.mxu1 %v13330_v26 }
 0x558   : > { %v6773_v17 = vsel %vm2332_vm4, %v15273_v32, %v15274_v42 }
 0x559   : > { %13333 = vmatpush1.bf16.msra.mxu1 %v13332_v1  ;;  %v15282_v10 = vpop.permute.xlu0 %15281  ;;  %v13310_v21 = vpack.c.bf16 %v6773_v17, %v6769_v58  ;;  %v6768_v8 = vsel %vm2332_vm4, %v15278_v19, %v15268_v28  ;;  %v6770_v15 = vsel %vm2332_vm4, %v15269_v45, %v15279_v27 }
 0x55a   : > { %v15287_v11 = vpop.permute.xlu1 %15286  ;;  %v15284_v61 = vunpack.i.h.bf16 %v15282_v10  ;;  %v15283_v33 = vunpack.i.l.bf16 %v15282_v10 }
 0x55b   : > { %v15289_v59 = vunpack.i.h.bf16 %v15287_v11  ;;  %v15288_v41 = vunpack.i.l.bf16 %v15287_v11  ;;  %13311 = vmatprep.subr.bf16.mxu0 %v13310_v21 }
 0x55c   : > { %v6772_v49 = vsel %vm2332_vm4, %v15284_v61, %v15273_v32  ;;  %v6771_v48 = vsel %vm2332_vm4, %v15279_v27, %v15283_v33 }
 0x55d   : > { %v6774_v44 = vsel %vm2332_vm4, %v15274_v42, %v15288_v41  ;;  %v6775_v23 = vsel %vm2332_vm4, %v15288_v41, %v15289_v59  ;;  %v13312_v40 = vpack.c.bf16 %v6772_v49, %v6768_v8 }
 0x55e   : > { %v13334_v31 = vpack.c.bf16 %v6775_v23, %v6771_v48  ;;  %v13336_v39 = vpack.c.bf16 %v6774_v44, %v6770_v15 }
 0x55f   : > { %13313 = vmatpush1.bf16.msra.mxu0 %v13312_v40 }
 0x560   : > { %13335 = vmatprep.subr.bf16.mxu1 %v13334_v31 }
 0x561   : > { %13337 = vmatpush1.bf16.msra.mxu1 %v13336_v39 }
 0x562   : > { %12800 = vmatmul.mubr.msk.f32.vlgmr.msra.gmra.mrb[68].mxu0 %vm2590_vm6, %v6808_v24 }
 0x563   : > { %6966 = vmatprep.mubr.f32.mxu0 %v21667_v51 }
 0x564   : > { %12804 = vmatmul.mubr.msk.f32.vlgmr.msra.gmra.mrb[68].mxu1 %vm2590_vm6, %v6808_v24 }
 0x565   : > { %7055 = vmatprep.mubr.f32.mxu1 %v21667_v51 }
 0x566   : > { %12801 = vmatmul.mubr.msk.f32.gmra.mrb[70].mxu0 %vm2590_vm6, %v6809_v35 }
 0x567   : > { %6972 = vmatprep.mubr.f32.mxu0 %v21667_v51 }
 0x568   : > { %12805 = vmatmul.mubr.msk.f32.gmra.mrb[70].mxu1 %vm2590_vm6, %v6809_v35 }
 0x569   : > { %7061 = vmatprep.mubr.f32.mxu1 %v21667_v51 }
 0x56a   : > { %12802 = vmatmul.mubr.msk.f32.gmra.mrb[72].mxu0 %vm2590_vm6, %v6810_v6  ;;  %v6867_v7 = vpop.permute.xlu0 %6866 }
 0x56b   : > { %6978 = vmatprep.mubr.f32.mxu0 %v21667_v51  ;;  %v6872_v62 = vpop.permute.xlu1 %6871 }
 0x56c   : > { %12806 = vmatmul.mubr.msk.f32.gmra.mrb[72].mxu1 %vm2590_vm6, %v6810_v6 }
 0x56d   : > { %7067 = vmatprep.mubr.f32.mxu1 %v21667_v51 }
 0x56e   : > { %12803 = vmatmul.mubr.msk.f32.gmra.mrb[74].mxu0 %vm2590_vm6, %v6811_v2  ;;  %v6877_v45 = vpop.permute.xlu0 %6876 }
 0x56f   : > { %v6882_v61 = vpop.permute.xlu1 %6881 }
 0x570   : > { %12807 = vmatmul.mubr.msk.f32.gmra.mrb[74].mxu1 %vm2590_vm6, %v6811_v2 }
 0x635   : > { %v6962_v22 = vpop.f32.mrb[68].mxu0 }
 0x636   : > { %v6964_v4 = vpop.f32.mrb[69].mxu0  ;;  %v6963_v36 = vadd.f32 %v6962_v22, %v6867_v7 }
 0x637   : > { %v7051_v12 = vpop.f32.mrb[68].mxu1  ;;  %v6965_v43 = vadd.f32 %v6964_v4, %v6867_v7 }
 0x638   : > { %v7052_v37 = vadd.f32 %v7051_v12, %v6867_v7  ;;  %v7053_v47 = vpop.f32.mrb[69].mxu1  ;;  %v7074_v60 = vmax.f32 %v6963_v36, 0.0 }
 0x639   : > { %v7054_v30 = vadd.f32 %v7053_v47, %v6867_v7  ;;  %v6968_v52 = vpop.f32.mrb[70].mxu0  ;;  %v7075_v55 = vmax.f32 %v6965_v43, 0.0 }
 0x63a   : > { %v7076_v14 = vmax.f32 %v7052_v37, 0.0  ;;  %v6969_v16 = vadd.f32 %v6968_v52, %v6872_v62  ;;  %v6970_v9 = vpop.f32.mrb[71].mxu0  ;;  %v19021_v1 = vmul.f32 %v7074_v60, %v21655_v25 }
 0x63b   : > { %v7077_v57 = vmax.f32 %v7054_v30, 0.0  ;;  %v7057_v18 = vpop.f32.mrb[70].mxu1  ;;  %v6971_v53 = vadd.f32 %v6970_v9, %v6872_v62  ;;  %v19025_v10 = vmul.f32 %v7075_v55, %v21656_v29 }
 0x63c   : > { %v19011_v46 = vmul.f32 %v7076_v14, %v21657_v34  ;;  %v7058_v63 = vadd.f32 %v7057_v18, %v6872_v62  ;;  %v7059_v0 = vpop.f32.mrb[71].mxu1  ;;  %v7078_v28 = vmax.f32 %v6969_v16, 0.0 }
 0x63d   : > { %v19014_v13 = vmul.f32 %v7077_v57, %v21658_v56  ;;  %v7060_v38 = vadd.f32 %v7059_v0, %v6872_v62  ;;  %v7079_v3 = vmax.f32 %v6971_v53, 0.0  ;;  %v6974_v50 = vpop.f32.mrb[72].mxu0  ;;  %v15310_v12 = vpack.i.bf16 %v19025_v10, %v19021_v1 }
 0x63e   : > { %21668 = vst [vmem:[#allocation47_spill] sm:$0xff] %v19011_v46  ;;  %v15290_v54 = vpack.i.bf16 %v19011_v46, %v21667_v51  ;;  %v7080_v20 = vmax.f32 %v7058_v63, 0.0  ;;  %v6975_v5 = vadd.f32 %v6974_v50, %v6877_v45  ;;  %v6976_v26 = vpop.f32.mrb[73].mxu0  ;;  %v19029_v33 = vmul.f32 %v7078_v28, %v21655_v25 }
 0x63f   : > { %21669 = vst [vmem:[#allocation44_spill] sm:$0xff] %v19014_v13  ;;  %v7063_v42 = vpop.f32.mrb[72].mxu1  ;;  %v15315_v32 = vpack.i.bf16 %v21667_v51, %v19014_v13  ;;  %v7081_v27 = vmax.f32 %v7060_v38, 0.0  ;;  %v6977_v19 = vadd.f32 %v6976_v26, %v6877_v45  ;;  %v19032_v59 = vmul.f32 %v7079_v3, %v21656_v29 }
 0x640   : > { %v7064_v58 = vadd.f32 %v7063_v42, %v6877_v45  ;;  %v7065_v17 = vpop.f32.mrb[73].mxu1  ;;  %15291 = vrot.lane.b32.xlu0 %v15290_v54, %s16218_s18  ;;  %v7082_v11 = vmax.f32 %v6975_v5, 0.0  ;;  %v19035_v49 = vmul.f32 %v7080_v20, %v21657_v34  ;;  %v19062_v62 = vpack.i.bf16 %v19011_v46, %v19025_v10 }
 0x641   : > { %v7066_v21 = vadd.f32 %v7065_v17, %v6877_v45  ;;  %15316 = vrot.lane.b32.xlu1 %v15315_v32, %s16218_s18  ;;  %v7083_v41 = vmax.f32 %v6977_v19, 0.0  ;;  %v6980_v15 = vpop.f32.mrb[74].mxu0  ;;  %v19038_v31 = vmul.f32 %v7081_v27, %v21658_v56  ;;  %v15365_v47 = vpack.i.bf16 %v19032_v59, %v19029_v33 }
 0x642   : > { %v7084_v8 = vmax.f32 %v7064_v58, 0.0  ;;  %21670 = vst [vmem:[#allocation40_spill] sm:$0xff] %v19035_v49  ;;  %v6981_v48 = vadd.f32 %v6980_v15, %v6882_v61  ;;  %v6982_v23 = vpop.f32.mrb[75].mxu0  ;;  %v19042_v6 = vmul.f32 %v7082_v11, %v21655_v25  ;;  %v19066_v14 = vpack.i.bf16 %v19014_v13, %v19021_v1 }
 0x643   : > { %v7085_v44 = vmax.f32 %v7066_v21, 0.0  ;;  %v7069_v40 = vpop.f32.mrb[74].mxu1  ;;  %21671 = vst [vmem:[#allocation37_spill] sm:$0xff] %v19038_v31  ;;  %v6983_v39 = vadd.f32 %v6982_v23, %v6882_v61  ;;  %v19046_v7 = vmul.f32 %v7083_v41, %v21656_v29  ;;  %v19070_v52 = vpack.i.bf16 %v19035_v49, %v19032_v59 }
 0x644   : > { %v7070_v24 = vadd.f32 %v7069_v40, %v6882_v61  ;;  %v7071_v35 = vpop.f32.mrb[75].mxu1  ;;  %15296 = vrot.lane.b32.xlu0 %v15290_v54, %s16216_s19  ;;  %21672 = vst [vmem:[#allocation36_spill] sm:$0xff] %v19042_v6  ;;  %v19049_v22 = vmul.f32 %v7084_v8, %v21657_v34  ;;  %v7086_v36 = vmax.f32 %v6981_v48, 0.0  ;;  %v15370_v57 = vpack.i.bf16 %v19038_v31, %v19035_v49 }
 0x645   : > { %v7072_v2 = vadd.f32 %v7071_v35, %v6882_v61  ;;  %15326 = vrot.lane.b32.xlu1 %v15315_v32, %s16216_s19  ;;  %21673 = vst [vmem:[#allocation43_spill] sm:$0xff] %v19046_v7  ;;  %v19052_v4 = vmul.f32 %v7085_v44, %v21658_v56  ;;  %v7087_v37 = vmax.f32 %v6983_v39, 0.0  ;;  %v15435_v53 = vpack.i.bf16 %v19046_v7, %v19042_v6 }
 0x646   : > { %21674 = vst [vmem:[#allocation38_spill] sm:$0xff] %v19049_v22  ;;  %v7088_v43 = vmax.f32 %v7070_v24, 0.0  ;;  %v19075_v16 = vmul.f32 %v7086_v36, %v21655_v25  ;;  %v19092_v63 = vpack.i.bf16 %v19029_v33, %v21667_v51  ;;  %v19096_v0 = vpack.i.bf16 %v19049_v22, %v19046_v7 }
 0x647   : > { %21675 = vst [vmem:[#allocation35_spill] sm:$0xff] %v19052_v4  ;;  %v7089_v30 = vmax.f32 %v7072_v2, 0.0  ;;  %v19078_v9 = vmul.f32 %v7087_v37, %v21656_v29  ;;  %v19102_v38 = vpack.i.bf16 %v19052_v4, %v19042_v6  ;;  %v15415_v27 = vpack.i.bf16 %v19049_v22, %v21667_v51 }
 0x648   : > { %15301 = vrot.lane.b32.xlu0 %v15290_v54, %s16219_s26  ;;  %21676 = vst [vmem:[#allocation34_spill] sm:$0xff] %v19075_v16  ;;  %v19081_v18 = vmul.f32 %v7088_v43, %v21657_v34  ;;  %v19154_v19 = vpack.i.bf16 %v21667_v51, %v19038_v31  ;;  %v15440_v58 = vpack.i.bf16 %v21667_v51, %v19052_v4 }
 0x649   : > { %15336 = vrot.lane.b32.xlu1 %v15315_v32, %s16219_s26  ;;  %21677 = vst [vmem:[#allocation46_spill] sm:$0xff] %v19078_v9  ;;  %v19084_v60 = vmul.f32 %v7089_v30, %v21658_v56  ;;  %v15485_v55 = vpack.i.bf16 %v19078_v9, %v19075_v16  ;;  %v19175_v17 = vpack.i.bf16 %v19075_v16, %v21667_v51  ;;  %v1099_v30 = vld [vmem:[%s21383_s11 + $0x60] sm:$0xff] }
 0x64a   : > { %21678 = vst [vmem:[#allocation42_spill] sm:$0xff] %v19081_v18  ;;  %v19112_v28 = vpack.i.bf16 %v19081_v18, %v19078_v9 }
 0x64b   : > { %21679 = vst [vmem:[#allocation45_spill] sm:$0xff] %v19084_v60  ;;  %v15495_v45 = vpack.i.bf16 %v19084_v60, %v19081_v18  ;;  %v19220_v8 = vpack.i.bf16 %v21667_v51, %v19084_v60 }
 0x64c   : > { %15306 = vrot.lane.b32.xlu0 %v15290_v54, %s16220_s27 }
 0x64d   : > { %15346 = vrot.lane.b32.xlu1 %v15315_v32, %s16220_s27 }
 0x650   : > { %15311 = vrot.lane.b32.xlu0 %v15310_v12, %s16218_s18 }
 0x651   : > { %15361 = vrot.lane.b32.xlu1 %v19092_v63, %s16221_s28 }
 0x654   : > { %15321 = vrot.lane.b32.xlu0 %v15310_v12, %s16216_s19 }
 0x655   : > { %15366 = vrot.lane.b32.xlu1 %v15365_v47, %s16218_s18 }
 0x658   : > { %15331 = vrot.lane.b32.xlu0 %v15310_v12, %s16219_s26 }
 0x659   : > { %15376 = vrot.lane.b32.xlu1 %v15365_v47, %s16216_s19 }
 0x65c   : > { %15341 = vrot.lane.b32.xlu0 %v15310_v12, %s16220_s27 }
 0x65d   : > { %15386 = vrot.lane.b32.xlu1 %v15365_v47, %s16219_s26 }
 0x660   : > { %15351 = vrot.lane.b32.xlu0 %v19062_v62, %s16221_s28 }
 0x661   : > { %15396 = vrot.lane.b32.xlu1 %v15365_v47, %s16220_s27 }
 0x664   : > { %15356 = vrot.lane.b32.xlu0 %v19066_v14, %s16221_s28 }
 0x665   : > { %15406 = vrot.lane.b32.xlu1 %v19070_v52, %s16221_s28 }
 0x668   : > { %15371 = vrot.lane.b32.xlu0 %v15370_v57, %s16218_s18 }
 0x669   : > { %15416 = vrot.lane.b32.xlu1 %v15415_v27, %s16218_s18 }
 0x66c   : > { %15381 = vrot.lane.b32.xlu0 %v15370_v57, %s16216_s19 }
 0x66d   : > { %15421 = vrot.lane.b32.xlu1 %v15415_v27, %s16216_s19 }
 0x670   : > { %15391 = vrot.lane.b32.xlu0 %v15370_v57, %s16219_s26 }
 0x671   : > { %15426 = vrot.lane.b32.xlu1 %v15415_v27, %s16219_s26 }
 0x674   : > { %15401 = vrot.lane.b32.xlu0 %v15370_v57, %s16220_s27 }
 0x675   : > { %15431 = vrot.lane.b32.xlu1 %v15415_v27, %s16220_s27 }
 0x678   : > { %15411 = vrot.lane.b32.xlu0 %v19154_v19, %s16221_s28 }
 0x679   : > { %15436 = vrot.lane.b32.xlu1 %v15435_v53, %s16218_s18 }
 0x67c   : > { %15441 = vrot.lane.b32.xlu0 %v15440_v58, %s16218_s18 }
 0x67d   : > { %15446 = vrot.lane.b32.xlu1 %v15435_v53, %s16216_s19 }
 0x680   : > { %15451 = vrot.lane.b32.xlu0 %v15440_v58, %s16216_s19 }
 0x681   : > { %15456 = vrot.lane.b32.xlu1 %v15435_v53, %s16219_s26 }
 0x684   : > { %15461 = vrot.lane.b32.xlu0 %v15440_v58, %s16219_s26 }
 0x685   : > { %15466 = vrot.lane.b32.xlu1 %v15435_v53, %s16220_s27 }
 0x688   : > { %15471 = vrot.lane.b32.xlu0 %v15440_v58, %s16220_s27 }
 0x689   : > { %15476 = vrot.lane.b32.xlu1 %v19096_v0, %s16221_s28 }
 0x68c   : > { %15486 = vrot.lane.b32.xlu0 %v15485_v55, %s16218_s18 }
 0x68d   : > { %15481 = vrot.lane.b32.xlu1 %v19102_v38, %s16221_s28 }
 0x690   : > { %15491 = vrot.lane.b32.xlu0 %v19175_v17, %s16221_s28 }
 0x691   : > { %15496 = vrot.lane.b32.xlu1 %v15495_v45, %s16218_s18  ;;  %s21680_s18 = smov 32  }
 0x694   : > { %15501 = vrot.lane.b32.xlu0 %v15485_v55, %s16216_s19 }
 0x695   : > { %15511 = vrot.lane.b32.xlu1 %v19070_v52, %s16222_s29 }
 0x698   : > { %15506 = vrot.lane.b32.xlu0 %v19062_v62, %s16222_s29 }
 0x699   : > { %15516 = vrot.lane.b32.xlu1 %v15495_v45, %s16216_s19 }
 0x69c   : > { %15521 = vrot.lane.b32.xlu0 %v15485_v55, %s16219_s26 }
 0x69d   : > { %15531 = vrot.lane.b32.xlu1 %v19092_v63, %s16222_s29 }
 0x6a0   : > { %15526 = vrot.lane.b32.xlu0 %v19066_v14, %s16222_s29 }
 0x6a1   : > { %15536 = vrot.lane.b32.xlu1 %v15495_v45, %s16219_s26  ;;  %s16228_s26 = smov 101  }
 0x6a4   : > { %15541 = vrot.lane.b32.xlu0 %v15485_v55, %s16220_s27 }
 0x6a5   : > { %15551 = vrot.lane.b32.xlu1 %v19096_v0, %s16222_s29 }
 0x6a8   : > { %15546 = vrot.lane.b32.xlu0 %v19154_v19, %s16222_s29 }
 0x6a9   : > { %15556 = vrot.lane.b32.xlu1 %v15495_v45, %s16220_s27  ;;  %v1100_v45 = vld [vmem:[%s21383_s11 + $0x68] sm:$0xff] }
 0x6ac   : > { %15566 = vrot.lane.b32.xlu0 %v19175_v17, %s16222_s29 }
 0x6ad   : > { %15561 = vrot.lane.b32.xlu1 %v19102_v38, %s16222_s29 }
 0x6b0   : > { %15571 = vrot.lane.b32.xlu0 %v19062_v62, %s21680_s18 }
 0x6b1   : > { %15576 = vrot.lane.b32.xlu1 %v19070_v52, %s21680_s18 }
 0x6b2   : > { %v19206_v11 = vpop.permute.xlu0 %15291 }
 0x6b3   : > { %v19208_v21 = vpop.permute.xlu1 %15316  ;;  %v15293_v36 = vunpack.i.l.bf16 %v19206_v11 }
 0x6b4   : > { %15581 = vrot.lane.b32.xlu0 %v19112_v28, %s16221_s28  ;;  %v15319_v37 = vunpack.i.h.bf16 %v19208_v21 }
 0x6b5   : > { %15591 = vrot.lane.b32.xlu1 %v19092_v63, %s21680_s18 }
 0x6b6   : > { %v19214_v61 = vpop.permute.xlu0 %15296 }
 0x6b7   : > { %v19216_v41 = vpop.permute.xlu1 %15326  ;;  %v15298_v42 = vunpack.i.l.bf16 %v19214_v61 }
 0x6b8   : > { %15586 = vrot.lane.b32.xlu0 %v19066_v14, %s21680_s18  ;;  %v15329_v54 = vunpack.i.h.bf16 %v19216_v41 }
 0x6b9   : > { %15596 = vrot.lane.b32.xlu1 %v19220_v8, %s16221_s28 }
 0x6ba   : > { %v19226_v15 = vpop.permute.xlu0 %15301 }
 0x6bb   : > { %v19228_v44 = vpop.permute.xlu1 %15336  ;;  %v15303_v51 = vunpack.i.l.bf16 %v19226_v15 }
 0x6bc   : > { %15601 = vrot.lane.b32.xlu0 %v19112_v28, %s16222_s29  ;;  %v15339_v56 = vunpack.i.h.bf16 %v19228_v44 }
 0x6bd   : > { %15611 = vrot.lane.b32.xlu1 %v19096_v0, %s21680_s18 }
 0x6be   : > { %v19234_v48 = vpop.permute.xlu0 %15306 }
 0x6bf   : > { %v19236_v23 = vpop.permute.xlu1 %15346 }
 0x6c0   : > { %15606 = vrot.lane.b32.xlu0 %v19154_v19, %s21680_s18 }
 0x6c1   : > { %15616 = vrot.lane.b32.xlu1 %v19220_v8, %s16222_s29 }
 0x6c2   : > { %v15312_v40 = vpop.permute.xlu0 %15311 }
 0x6c3   : > { %v19242_v39 = vpop.permute.xlu1 %15361  ;;  %v15314_v24 = vunpack.i.h.bf16 %v15312_v40  ;;  %v15313_v35 = vunpack.i.l.bf16 %v15312_v40 }
 0x6c4   : > { %15626 = vrot.lane.b32.xlu0 %v19112_v28, %s21680_s18 }
 0x6c5   : > { %15621 = vrot.lane.b32.xlu1 %v19102_v38, %s21680_s18  ;;  %v7266_v57 = vsel %vm4526_vm8, %v15293_v36, %v15313_v35  ;;  %v7267_v27 = vsel %vm4526_vm8, %v15313_v35, %v15314_v24 }
 0x6c6   : > { %v19248_v2 = vpop.permute.xlu0 %15321 }
 0x6c7   : > { %v15367_v12 = vpop.permute.xlu1 %15366  ;;  %v15324_v26 = vunpack.i.h.bf16 %v19248_v2  ;;  %v15323_v5 = vunpack.i.l.bf16 %v19248_v2  ;;  %v15308_v2 = vunpack.i.l.bf16 %v19234_v48 }
 0x6c8   : > { %v15369_v47 = vunpack.i.h.bf16 %v15367_v12  ;;  %v15368_v43 = vunpack.i.l.bf16 %v15367_v12  ;;  %15631 = vrot.lane.b32.xlu0 %v19175_v17, %s21680_s18 }
 0x6c9   : > { %15636 = vrot.lane.b32.xlu1 %v19220_v8, %s21680_s18  ;;  %v19378_v22 = vsel %vm2590_vm6, %v15298_v42, %v15323_v5 }
 0x6ca   : > { %v7270_v53 = vsel %vm4526_vm8, %v15319_v37, %v15368_v43  ;;  %v19261_v55 = vpop.permute.xlu0 %15331  ;;  %v7271_v58 = vsel %vm4526_vm8, %v15368_v43, %v15369_v47 }
 0x6cb   : > { %v19268_v40 = vpop.permute.xlu1 %15376  ;;  %v13338_v12 = vpack.c.bf16 %v7271_v58, %v7267_v27  ;;  %v13340_v32 = vpack.c.bf16 %v7270_v53, %v7266_v57  ;;  %v15334_v50 = vunpack.i.h.bf16 %v19261_v55  ;;  %v15333_v3 = vunpack.i.l.bf16 %v19261_v55 }
 0x6cc   : > { %1163 = vperm.xlu0 %14288, %v1099_v30   ;;  %v15378_v34 = vunpack.i.l.bf16 %v19268_v40  ;;  %v21682_v55 = vunpack.i.h.bf16 %v19234_v48 }
 0x6cd   : > { %1168 = vperm.xlu1 %14289, %v1100_v45   ;;  %13339 = vmatprep.subr.bf16.mxu0 %v13338_v12  ;;  %v19386_v18 = vsel %vm4783_vm9, %v15303_v51, %v15333_v3 }
 0x6ce   : > { %v19270_v36 = vpop.permute.xlu0 %15341  ;;  %13341 = vmatpush1.bf16.msra.mxu0 %v13340_v32 }
 0x6cf   : > { %v19272_v37 = vpop.permute.xlu1 %15386  ;;  %v21684_v13 = vunpack.i.l.bf16 %v19270_v36 }
 0x6d0   : > { %15641 = vrot.lane.b32.xlu0 %v19062_v62, %s21681_s14  ;;  %v15294_v62 = vunpack.i.h.bf16 %v19206_v11 }
 0x6d1   : > { %15646 = vrot.lane.b32.xlu1 %v19070_v52, %s21681_s14  ;;  %v15318_v52 = vunpack.i.l.bf16 %v19208_v21 }
 0x6d2   : > { %v19278_v35 = vpop.permute.xlu0 %15351 }
 0x6d3   : > { %v19280_v43 = vpop.permute.xlu1 %15396 }
 0x6d4   : > { %15651 = vrot.lane.b32.xlu0 %v19066_v14, %s21681_s14  ;;  %v8243_v14 = vld [vmem:[%s21379_s7 + $0x8] sm:$0xff] }
 0x6d5   : > { %15656 = vrot.lane.b32.xlu1 %v19092_v63, %s21681_s14  ;;  %8546 = vmatprep.mubr.f32.mxu0 %v8243_v14 }
 0x6d6   : > { %v19286_v30 = vpop.permute.xlu0 %15356  ;;  %8868 = vmatprep.mubr.f32.mxu1 %v8243_v14 }
 0x6d7   : > { %v19288_v32 = vpop.permute.xlu1 %15406 }
 0x6d8   : > { %15661 = vrot.lane.b32.xlu0 %v19154_v19, %s21681_s14  ;;  %v7268_v19 = vsel %vm4526_vm8, %v15314_v24, %v15294_v62 }
 0x6d9   : > { %15666 = vrot.lane.b32.xlu1 %v19096_v0, %s21681_s14  ;;  %v7269_v0 = vsel %vm4526_vm8, %v15294_v62, %v15318_v52 }
 0x6da   : > { %v15372_v57 = vpop.permute.xlu0 %15371 }
 0x6db   : > { %v15374_v63 = vunpack.i.h.bf16 %v15372_v57  ;;  %v15373_v53 = vunpack.i.l.bf16 %v15372_v57  ;;  %v19299_v45 = vpop.permute.xlu1 %15416 }
 0x6dc   : > { %15676 = vrot.lane.b32.xlu0 %v19112_v28, %s21681_s14 }
 0x6dd   : > { %v7272_v11 = vsel %vm4526_vm8, %v15369_v47, %v15373_v53  ;;  %15671 = vrot.lane.b32.xlu1 %v19102_v38, %s21681_s14  ;;  %v7273_v21 = vsel %vm4526_vm8, %v15373_v53, %v15374_v63  ;;  %v15299_v53 = vunpack.i.h.bf16 %v19214_v61 }
 0x6de   : > { %v19309_v27 = vpop.permute.xlu0 %15381  ;;  %v13410_v58 = vpack.c.bf16 %v7273_v21, %v7269_v0  ;;  %v13412_v12 = vpack.c.bf16 %v7272_v11, %v7268_v19  ;;  %v15328_v19 = vunpack.i.l.bf16 %v19216_v41  ;;  %v15304_v11 = vunpack.i.h.bf16 %v19226_v15 }
 0x6df   : > { %v19311_v57 = vpop.permute.xlu1 %15421  ;;  %v15338_v0 = vunpack.i.l.bf16 %v19228_v44  ;;  %v19375_v61 = vsel %vm2590_vm6, %v15324_v26, %v15299_v53  ;;  %v7398_v44 = vsel %vm2590_vm6, %v15329_v54, %v15378_v34  ;;  %v21683_v15 = vunpack.i.h.bf16 %v19268_v40 }
 0x6e0   : > { %15681 = vrot.lane.b32.xlu0 %v19175_v17, %s21681_s14  ;;  %13411 = vmatprep.subr.bf16.mxu1 %v13410_v58  ;;  %v15348_v58 = vunpack.i.l.bf16 %v19236_v23  ;;  %v19354_v21 = vsel %vm2590_vm6, %v15299_v53, %v15328_v19  ;;  %v15384_v49 = vunpack.i.h.bf16 %v19309_v27 }
 0x6e1   : > { %15686 = vrot.lane.b32.xlu1 %v19220_v8, %s21681_s14  ;;  %13413 = vmatpush1.bf16.msra.mxu1 %v13412_v12  ;;  %v19365_v25 = vsel %vm4783_vm9, %v15304_v11, %v15338_v0  ;;  %v19383_v0 = vsel %vm4783_vm9, %v15334_v50, %v15304_v11  ;;  %v7399_v4 = vsel %vm2590_vm6, %v15378_v34, %v21683_v15  ;;  %v15383_v34 = vunpack.i.l.bf16 %v19309_v27 }
 0x6e2   : > { %v19317_v28 = vpop.permute.xlu0 %15391  ;;  %v19370_v19 = vsel %vm4912_vm10, %v21682_v55, %v15348_v58  ;;  %v7395_v58 = vsel %vm2590_vm6, %v15323_v5, %v15324_v26  ;;  %v19390_v55 = vsel %vm4783_vm9, %v15333_v3, %v15334_v50  ;;  %v15388_v5 = vunpack.i.l.bf16 %v19272_v37 }
 0x6e3   : > { %v19319_v38 = vpop.permute.xlu1 %15426  ;;  %v15418_v50 = vunpack.i.l.bf16 %v19299_v45  ;;  %v13346_v15 = vpack.c.bf16 %v7399_v4, %v7395_v58  ;;  %v13348_v11 = vpack.c.bf16 %v7398_v44, %v19378_v22  ;;  %v15419_v58 = vunpack.i.h.bf16 %v19299_v45 }
 0x6e4   : > { %v19422_v22 = vsel %vm4783_vm9, %v15339_v56, %v15388_v5 }
 0x6e6   : > { %v19321_v24 = vpop.permute.xlu0 %15401 }
 0x6e7   : > { %v19323_v47 = vpop.permute.xlu1 %15431 }
 0x6ea   : > { %v19325_v62 = vpop.permute.xlu0 %15411 }
 0x6eb   : > { %v19327_v52 = vpop.permute.xlu1 %15436 }
 0x6ec   : > { %v15439_v53 = vunpack.i.h.bf16 %v19327_v52  ;;  %v15438_v42 = vunpack.i.l.bf16 %v19327_v52 }
 0x6ee   : > { %v19329_v14 = vpop.permute.xlu0 %15441  ;;  %v7274_v60 = vsel %vm4526_vm8, %v15418_v50, %v15438_v42  ;;  %v7275_v6 = vsel %vm4526_vm8, %v15438_v42, %v15439_v53  ;;  %v7276_v56 = vsel %vm4526_vm8, %v15439_v53, %v15419_v58 }
 0x6ef   : > { %v19331_v17 = vpop.permute.xlu1 %15446  ;;  %v15444_v54 = vunpack.i.h.bf16 %v19329_v14  ;;  %v15443_v31 = vunpack.i.l.bf16 %v19329_v14 }
 0x6f0   : > { %v15448_v14 = vunpack.i.l.bf16 %v19331_v17 }
 0x6f2   : > { %v19333_v63 = vpop.permute.xlu0 %15451 }
 0x6f3   : > { %v19335_v8 = vpop.permute.xlu1 %15456  ;;  %v15454_v45 = vunpack.i.h.bf16 %v19333_v63 }
 0x6f6   : > { %v19343_v12 = vpop.permute.xlu0 %15461 }
 0x6f7   : > { %v19348_v20 = vpop.permute.xlu1 %15466 }
 0x6fa   : > { %v19362_v41 = vpop.permute.xlu0 %15471 }
 0x6fb   : > { %v19380_v29 = vpop.permute.xlu1 %15476 }
 0x6fe   : > { %v15487_v3 = vpop.permute.xlu0 %15486 }
 0x6ff   : > { %v15489_v26 = vunpack.i.h.bf16 %v15487_v3  ;;  %v15488_v46 = vunpack.i.l.bf16 %v15487_v3  ;;  %v19404_v52 = vpop.permute.xlu1 %15481  ;;  %v19416_v3 = vsel %vm4912_vm10, %v15308_v2, %v21684_v13  ;;  %v15398_v13 = vunpack.i.l.bf16 %v19280_v43 }
 0x701   : > { %v7278_v51 = vsel %vm4526_vm8, %v15444_v54, %v15488_v46  ;;  %v7279_v16 = vsel %vm4526_vm8, %v15488_v46, %v15489_v26  ;;  %v21686_v46 = vunpack.i.h.bf16 %v19272_v37 }
 0x702   : > { %v19419_v7 = vpop.permute.xlu0 %15491  ;;  %v13342_v4 = vpack.c.bf16 %v7279_v16, %v7275_v6  ;;  %v13344_v27 = vpack.c.bf16 %v7278_v51, %v7274_v60  ;;  %v15423_v6 = vunpack.i.l.bf16 %v19311_v57  ;;  %v15449_v16 = vunpack.i.h.bf16 %v19331_v17 }
 0x703   : > { %21685 = vst [vmem:[#allocation41_spill] sm:$0xff] %v19419_v7  ;;  %v15497_v42 = vpop.permute.xlu1 %15496  ;;  %v7527_v50 = vsel %vm4783_vm9, %v15388_v5, %v21686_v46  ;;  %v7401_v60 = vsel %vm2590_vm6, %v15383_v34, %v15384_v49  ;;  %v7277_v46 = vsel %vm4526_vm8, %v15419_v58, %v15443_v31  ;;  %v21687_v17 = vunpack.i.h.bf16 %v19268_v40 }
 0x704   : > { %v15499_v2 = vunpack.i.h.bf16 %v15497_v42  ;;  %v15498_v54 = vunpack.i.l.bf16 %v15497_v42  ;;  %13343 = vmatprep.subr.bf16.mxu0 %v13342_v4  ;;  %v15393_v31 = vunpack.i.l.bf16 %v19317_v28  ;;  %v15453_v40 = vunpack.i.l.bf16 %v19333_v63 }
 0x705   : > { %13345 = vmatpush1.bf16.msra.mxu0 %v13344_v27  ;;  %v7400_v49 = vsel %vm2590_vm6, %v21687_v17, %v15383_v34  ;;  %v15394_v27 = vunpack.i.h.bf16 %v19317_v28  ;;  %v21689_v63 = vunpack.i.h.bf16 %v19280_v43 }
 0x706   : > { %v7280_v51 = vsel %vm4526_vm8, %v15489_v26, %v15498_v54  ;;  %v15502_v5 = vpop.permute.xlu0 %15501  ;;  %13347 = vmatprep.subr.bf16.mxu0 %v13346_v15  ;;  %v7281_v42 = vsel %vm4526_vm8, %v15498_v54, %v15499_v2  ;;  %v7402_v26 = vsel %vm2590_vm6, %v15423_v6, %v15448_v14  ;;  %v13418_v15 = vpack.c.bf16 %v7401_v60, %v19354_v21 }
 0x707   : > { %v15504_v4 = vunpack.i.h.bf16 %v15502_v5  ;;  %v15503_v44 = vunpack.i.l.bf16 %v15502_v5  ;;  %v19439_v9 = vpop.permute.xlu1 %15511  ;;  %v13414_v53 = vpack.c.bf16 %v7281_v42, %v7277_v46  ;;  %v13416_v7 = vpack.c.bf16 %v7280_v51, %v7276_v56 }
 0x708   : > { %v7403_v2 = vsel %vm2590_vm6, %v15448_v14, %v15449_v16  ;;  %v13354_v6 = vpack.c.bf16 %v7527_v50, %v19390_v55  ;;  %v21688_v21 = vunpack.i.h.bf16 %v19236_v23  ;;  %v15458_v14 = vunpack.i.l.bf16 %v19335_v8 }
 0x709   : > { %v7406_v58 = vsel %vm2590_vm6, %v15454_v45, %v15503_v44  ;;  %13349 = vmatpush1.bf16.msra.mxu0 %v13348_v11  ;;  %13415 = vmatprep.subr.bf16.mxu1 %v13414_v53  ;;  %v7407_v54 = vsel %vm2590_vm6, %v15503_v44, %v15504_v4  ;;  %v15424_v11 = vunpack.i.h.bf16 %v19311_v57  ;;  %v13356_v44 = vpack.c.bf16 %v19422_v22, %v19386_v18 }
 0x70a   : > { %v19452_v56 = vpop.permute.xlu0 %15506  ;;  %13417 = vmatpush1.bf16.msra.mxu1 %v13416_v7  ;;  %v13350_v34 = vpack.c.bf16 %v7407_v54, %v7403_v2  ;;  %v13352_v51 = vpack.c.bf16 %v7406_v58, %v7402_v26  ;;  %v19458_v28 = vsel %vm4912_vm10, %v21688_v21, %v15398_v13  ;;  %v7655_v7 = vsel %vm4912_vm10, %v15398_v13, %v21689_v63 }
 0x70b   : > { %v15517_v60 = vpop.permute.xlu1 %15516  ;;  %13419 = vmatprep.subr.bf16.mxu1 %v13418_v15  ;;  %v13420_v23 = vpack.c.bf16 %v7400_v49, %v19375_v61  ;;  %v15428_v50 = vunpack.i.l.bf16 %v19319_v38  ;;  %v7404_v57 = vsel %vm2590_vm6, %v15449_v16, %v15424_v11  ;;  %v15459_v5 = vunpack.i.h.bf16 %v19335_v8 }
 0x70c   : > { %v15519_v45 = vunpack.i.h.bf16 %v15517_v60  ;;  %v15518_v55 = vunpack.i.l.bf16 %v15517_v60  ;;  %13351 = vmatprep.subr.bf16.mxu0 %v13350_v34  ;;  %v7529_v18 = vsel %vm4783_vm9, %v15393_v31, %v15394_v27  ;;  %v15464_v22 = vunpack.i.h.bf16 %v19343_v12 }
 0x70d   : > { %13353 = vmatpush1.bf16.msra.mxu0 %v13352_v51  ;;  %v7405_v42 = vsel %vm2590_vm6, %v15424_v11, %v15453_v40  ;;  %v21690_v26 = vunpack.i.h.bf16 %v19272_v37  ;;  %v15404_v15 = vunpack.i.h.bf16 %v19321_v24  ;;  %v13426_v58 = vpack.c.bf16 %v7529_v18, %v19365_v25 }
 0x70e   : > { %v7408_v13 = vsel %vm2590_vm6, %v15504_v4, %v15518_v55  ;;  %v15522_v46 = vpop.permute.xlu0 %15521  ;;  %13355 = vmatprep.subr.bf16.mxu0 %v13354_v6  ;;  %13421 = vmatpush1.bf16.msra.mxu1 %v13420_v23  ;;  %v7409_v61 = vsel %vm2590_vm6, %v15518_v55, %v15519_v45  ;;  %v7530_v4 = vsel %vm4783_vm9, %v15428_v50, %v15458_v14  ;;  %v15403_v2 = vunpack.i.l.bf16 %v19321_v24 }
 0x70f   : > { %v15524_v53 = vunpack.i.h.bf16 %v15522_v46  ;;  %v15523_v17 = vunpack.i.l.bf16 %v15522_v46  ;;  %v19476_v49 = vpop.permute.xlu1 %15531  ;;  %v13422_v16 = vpack.c.bf16 %v7409_v61, %v7405_v42  ;;  %v13424_v8 = vpack.c.bf16 %v7408_v13, %v7404_v57 }
 0x710   : > { %v7528_v27 = vsel %vm4783_vm9, %v21690_v26, %v15393_v31  ;;  %v7531_v40 = vsel %vm4783_vm9, %v15458_v14, %v15459_v5  ;;  %v15463_v37 = vunpack.i.l.bf16 %v19343_v12  ;;  %v21691_v21 = vunpack.i.h.bf16 %v19270_v36 }
 0x711   : > { %v7534_v54 = vsel %vm4783_vm9, %v15464_v22, %v15523_v17  ;;  %13357 = vmatpush1.bf16.msra.mxu0 %v13356_v44  ;;  %13423 = vmatprep.subr.bf16.mxu1 %v13422_v16  ;;  %v7535_v34 = vsel %vm4783_vm9, %v15523_v17, %v15524_v53  ;;  %v21692_v25 = vunpack.i.l.bf16 %v19270_v36  ;;  %v15358_v11 = vunpack.i.l.bf16 %v19286_v30 }
 0x712   : > { %v19489_v51 = vpop.permute.xlu0 %15526  ;;  %13425 = vmatpush1.bf16.msra.mxu1 %v13424_v8  ;;  %v13358_v31 = vpack.c.bf16 %v7535_v34, %v7531_v40  ;;  %v13360_v6 = vpack.c.bf16 %v7534_v54, %v7530_v4  ;;  %v15429_v60 = vunpack.i.h.bf16 %v19319_v38  ;;  %v13364_v12 = vpack.c.bf16 %v19458_v28, %v19416_v3 }
 0x713   : > { %v7651_v24 = vsel %vm4912_vm10, %v21692_v25, %v21691_v21  ;;  %v15537_v44 = vpop.permute.xlu1 %15536  ;;  %13427 = vmatprep.subr.bf16.mxu1 %v13426_v58  ;;  %v15468_v14 = vunpack.i.l.bf16 %v19348_v20  ;;  %v13428_v23 = vpack.c.bf16 %v7528_v27, %v19383_v0  ;;  %v15433_v50 = vunpack.i.l.bf16 %v19323_v47 }
 0x714   : > { %v13362_v63 = vpack.c.bf16 %v7655_v7, %v7651_v24  ;;  %v15539_v45 = vunpack.i.h.bf16 %v15537_v44  ;;  %v15538_v55 = vunpack.i.l.bf16 %v15537_v44  ;;  %13359 = vmatprep.subr.bf16.mxu0 %v13358_v31  ;;  %v7532_v57 = vsel %vm4783_vm9, %v15459_v5, %v15429_v60 }
 0x715   : > { %v15469_v18 = vunpack.i.h.bf16 %v19348_v20  ;;  %13361 = vmatpush1.bf16.msra.mxu0 %v13360_v6  ;;  %v7657_v38 = vsel %vm4912_vm10, %v15403_v2, %v15404_v15  ;;  %v15474_v7 = vunpack.i.h.bf16 %v19362_v41  ;;  %v7533_v22 = vsel %vm4783_vm9, %v15429_v60, %v15463_v37 }
 0x716   : > { %v7536_v3 = vsel %vm4783_vm9, %v15524_v53, %v15538_v55  ;;  %v15542_v28 = vpop.permute.xlu0 %15541  ;;  %13363 = vmatprep.subr.bf16.mxu0 %v13362_v63  ;;  %13429 = vmatpush1.bf16.msra.mxu1 %v13428_v23  ;;  %v7537_v0 = vsel %vm4783_vm9, %v15538_v55, %v15539_v45  ;;  %v15409_v61 = vunpack.i.h.bf16 %v19288_v32  ;;  %v21693_v17 = vunpack.i.h.bf16 %v19280_v43 }
 0x717   : > { %v15544_v13 = vunpack.i.h.bf16 %v15542_v28  ;;  %v15543_v46 = vunpack.i.l.bf16 %v15542_v28  ;;  %v19510_v42 = vpop.permute.xlu1 %15551  ;;  %v13430_v5 = vpack.c.bf16 %v7537_v0, %v7533_v22  ;;  %v13432_v20 = vpack.c.bf16 %v7536_v3, %v7532_v57 }
 0x718   : > { %v7656_v16 = vsel %vm4912_vm10, %v21693_v17, %v15403_v2  ;;  %v7658_v53 = vsel %vm4912_vm10, %v15433_v50, %v15468_v14  ;;  %v13434_v8 = vpack.c.bf16 %v7657_v38, %v19370_v19  ;;  %v15408_v26 = vunpack.i.l.bf16 %v19288_v32 }
 0x719   : > { %v7662_v27 = vsel %vm4912_vm10, %v15474_v7, %v15543_v46  ;;  %13365 = vmatpush1.bf16.msra.mxu0 %v13364_v12  ;;  %13431 = vmatprep.subr.bf16.mxu1 %v13430_v5  ;;  %v7659_v15 = vsel %vm4912_vm10, %v15468_v14, %v15469_v18  ;;  %v7663_v4 = vsel %vm4912_vm10, %v15543_v46, %v15544_v13  ;;  %v21694_v58 = vunpack.i.h.bf16 %v19234_v48  ;;  %v21700_v5 = vld [vmem:[#allocation46_spill] sm:$0xff] }
 0x71a   : > { %v21695_v43 = vmov %v21691_v21  ;;  %v15473_v54 = vunpack.i.l.bf16 %v19362_v41  ;;  %v19528_v40 = vpop.permute.xlu0 %15546  ;;  %13433 = vmatpush1.bf16.msra.mxu1 %v13432_v20  ;;  %v13366_v32 = vpack.c.bf16 %v7663_v4, %v7659_v15  ;;  %v13368_v19 = vpack.c.bf16 %v7662_v27, %v7658_v53  ;;  %v21701_v20 = vld [vmem:[#allocation43_spill] sm:$0xff] }
 0x71b   : > { %v7652_v2 = vsel %vm4912_vm10, %v21695_v43, %v21694_v58  ;;  %v15354_v34 = vunpack.i.h.bf16 %v19278_v35  ;;  %v15353_v37 = vunpack.i.l.bf16 %v19278_v35  ;;  %v15434_v31 = vunpack.i.h.bf16 %v19323_v47  ;;  %v15557_v6 = vpop.permute.xlu1 %15556  ;;  %13435 = vmatprep.subr.bf16.mxu1 %v13434_v8 }
 0x71c   : > { %v13436_v48 = vpack.c.bf16 %v7656_v16, %v7652_v2  ;;  %v15414_v36 = vunpack.i.h.bf16 %v19325_v62  ;;  %v15413_v21 = vunpack.i.l.bf16 %v19325_v62  ;;  %v15559_v25 = vunpack.i.h.bf16 %v15557_v6  ;;  %13367 = vmatprep.subr.bf16.mxu0 %v13366_v32  ;;  %v21707_v32 = vld [vmem:[#allocation34_spill] sm:$0xff] }
 0x71d   : > { %v15558_v41 = vunpack.i.l.bf16 %v15557_v6  ;;  %v19536_v24 = vsel %vm5073_vm11, %v15358_v11, %v15353_v37  ;;  %v21696_v60 = vunpack.i.h.bf16 %v19242_v39  ;;  %v7660_v35 = vsel %vm4912_vm10, %v15469_v18, %v15434_v31  ;;  %13369 = vmatpush1.bf16.msra.mxu0 %v13368_v19  ;;  %v21708_v19 = vld [vmem:[#allocation36_spill] sm:$0xff] }
 0x71e   : > { %v7815_v47 = vsel %vm5073_vm11, %v15408_v26, %v15409_v61  ;;  %v15359_v63 = vunpack.i.h.bf16 %v19286_v30  ;;  %v19547_v12 = vpop.permute.xlu0 %15566  ;;  %v21697_v11 = vpack.c.bf16 %v19032_v59, %v19025_v10  ;;  %13437 = vmatpush1.bf16.msra.mxu1 %v13436_v48  ;;  %v7661_v14 = vsel %vm4912_vm10, %v15434_v31, %v15473_v54 }
 0x71f   : > { %v19541_v44 = vsel %vm5073_vm11, %v21696_v60, %v15408_v26  ;;  %v7664_v62 = vsel %vm4912_vm10, %v15544_v13, %v15558_v41  ;;  %v7665_v45 = vsel %vm4912_vm10, %v15558_v41, %v15559_v25  ;;  %v15509_v55 = vunpack.i.h.bf16 %v19452_v56  ;;  %v19556_v50 = vpop.permute.xlu1 %15561  ;;  %v21699_v13 = vld [vmem:[#allocation41_spill] sm:$0xff] }
 0x720   : > { %13371 = vmatprep.subr.bf16.mxu0 %v21697_v11  ;;  %v15508_v23 = vunpack.i.l.bf16 %v19452_v56  ;;  %v13438_v30 = vpack.c.bf16 %v7665_v45, %v7661_v14  ;;  %v13440_v57 = vpack.c.bf16 %v7664_v62, %v7660_v35  ;;  %v19559_v18 = vsel %vm5073_vm11, %v15409_v61, %v15413_v21  ;;  %v21713_v62 = vld [vmem:[#allocation45_spill] sm:$0xff]  ;;  %v21714_v11 = vld [vmem:[#allocation35_spill] sm:$0xff] }
 0x721   : > { %v15479_v38 = vunpack.i.h.bf16 %v19380_v29  ;;  %v15478_v10 = vunpack.i.l.bf16 %v19380_v29  ;;  %v7817_v59 = vsel %vm5073_vm11, %v15413_v21, %v15414_v36  ;;  %v15484_v7 = vunpack.i.h.bf16 %v19404_v52  ;;  %v21710_v36 = vld [vmem:[#allocation40_spill] sm:$0xff]  ;;  %v21711_v21 = vld [vmem:[#allocation47_spill] sm:$0xff] }
 0x722   : > { %v15483_v3 = vunpack.i.l.bf16 %v19404_v52  ;;  %v15514_v28 = vunpack.i.h.bf16 %v19439_v9  ;;  %v15513_v56 = vunpack.i.l.bf16 %v19439_v9  ;;  %v21698_v22 = vpack.c.bf16 %v19029_v33, %v19021_v1  ;;  %13439 = vmatprep.subr.bf16.mxu1 %v13438_v30  ;;  %v19575_v46 = vpop.permute.xlu0 %15571  ;;  %v21703_v1 = vld [vmem:[#allocation37_spill] sm:$0xff]  ;;  %v21704_v33 = vld [vmem:[#allocation44_spill] sm:$0xff] }
 0x723   : > { %v19572_v0 = vsel %vm5073_vm11, %v15354_v34, %v15359_v63  ;;  %v15493_v29 = vunpack.i.l.bf16 %v21699_v13  ;;  %v21702_v61 = vpack.c.bf16 %v21700_v5, %v21701_v20  ;;  %13441 = vmatpush1.bf16.msra.mxu1 %v13440_v57  ;;  %v7811_v52 = vsel %vm5073_vm11, %v15353_v37, %v15354_v34  ;;  %v19582_v17 = vpop.permute.xlu1 %15576 }
 0x724   : > { %13373 = vmatpush1.bf16.msra.mxu0 %v21698_v22  ;;  %v15528_v9 = vunpack.i.l.bf16 %v19489_v51  ;;  %v21705_v16 = vpack.c.bf16 %v21703_v1, %v21704_v33  ;;  %v13378_v53 = vpack.c.bf16 %v7815_v47, %v7811_v52  ;;  %v21706_v8 = vunpack.i.l.bf16 %v19242_v39 }
 0x725   : > { %13375 = vmatprep.subr.bf16.mxu0 %v21702_v61  ;;  %v7939_v27 = vsel %vm5202_vm12, %v15508_v23, %v15509_v55  ;;  %v13380_v15 = vpack.c.bf16 %v19541_v44, %v19536_v24  ;;  %v7819_v58 = vsel %vm5073_vm11, %v15478_v10, %v15479_v38  ;;  %v13452_v43 = vpack.c.bf16 %v19559_v18, %v19572_v0 }
 0x726   : > { %13443 = vmatprep.subr.bf16.mxu1 %v21705_v16  ;;  %v7813_v26 = vsel %vm5073_vm11, %v15359_v63, %v21706_v8  ;;  %v7818_v2 = vsel %vm5073_vm11, %v15483_v3, %v15478_v10  ;;  %v19598_v54 = vsel %vm5073_vm11, %v15479_v38, %v15484_v7  ;;  %v15494_v39 = vunpack.i.h.bf16 %v21699_v13  ;;  %v15582_v48 = vpop.permute.xlu0 %15581  ;;  %v21717_v3 = vld [vmem:[#allocation38_spill] sm:$0xff] }
 0x727   : > { %v13450_v4 = vpack.c.bf16 %v7817_v59, %v7813_v26  ;;  %v21709_v34 = vpack.c.bf16 %v21707_v32, %v21708_v19  ;;  %v7943_v37 = vsel %vm5202_vm12, %v15513_v56, %v15514_v28  ;;  %v15534_v31 = vunpack.i.h.bf16 %v19476_v49  ;;  %v19613_v63 = vpop.permute.xlu1 %15591 }
 0x728   : > { %v15529_v6 = vunpack.i.h.bf16 %v19489_v51  ;;  %v21712_v25 = vpack.c.bf16 %v21710_v36, %v21711_v21  ;;  %v13386_v41 = vpack.c.bf16 %v7943_v37, %v7939_v27  ;;  %v7821_v24 = vsel %vm5073_vm11, %v15484_v7, %v15493_v29 }
 0x729   : > { %13377 = vmatpush1.bf16.msra.mxu0 %v21709_v34  ;;  %v15533_v60 = vunpack.i.l.bf16 %v19476_v49  ;;  %v7938_v44 = vsel %vm5202_vm12, %v15528_v9, %v15508_v23  ;;  %v15584_v35 = vunpack.i.h.bf16 %v15582_v48  ;;  %v15583_v47 = vunpack.i.l.bf16 %v15582_v48 }
 0x72a   : > { %13379 = vmatprep.subr.bf16.mxu0 %v13378_v53  ;;  %13445 = vmatpush1.bf16.msra.mxu1 %v21712_v25  ;;  %v21715_v51 = vpack.c.bf16 %v21713_v62, %v21714_v11  ;;  %v15549_v14 = vunpack.i.h.bf16 %v19528_v40  ;;  %v15548_v45 = vunpack.i.l.bf16 %v19528_v40  ;;  %v15574_v30 = vunpack.i.h.bf16 %v19575_v46  ;;  %v19630_v7 = vpop.permute.xlu0 %15586  ;;  %v21716_v40 = vld [vmem:[#allocation42_spill] sm:$0xff] }
 0x72b   : > { %v15573_v57 = vunpack.i.l.bf16 %v19575_v46  ;;  %v15579_v49 = vunpack.i.h.bf16 %v19582_v17  ;;  %v15578_v23 = vunpack.i.l.bf16 %v19582_v17  ;;  %v7822_v18 = vsel %vm5073_vm11, %v15494_v39, %v15583_v47  ;;  %v15597_v20 = vpop.permute.xlu1 %15596 }
 0x72c   : > { %13447 = vmatprep.subr.bf16.mxu1 %v21715_v51  ;;  %v7823_v38 = vsel %vm5073_vm11, %v15583_v47, %v15584_v35  ;;  %v7942_v10 = vsel %vm5202_vm12, %v15534_v31, %v15513_v56  ;;  %v19628_v59 = vsel %vm5202_vm12, %v15509_v55, %v15529_v6  ;;  %v21718_v22 = vpack.c.bf16 %v21716_v40, %v21717_v3 }
 0x72d   : > { %13381 = vmatpush1.bf16.msra.mxu0 %v13380_v15  ;;  %v13382_v0 = vpack.c.bf16 %v7823_v38, %v7819_v58  ;;  %v13384_v13 = vpack.c.bf16 %v7822_v18, %v7818_v2  ;;  %v15554_v29 = vunpack.i.h.bf16 %v19510_v42  ;;  %v15553_v5 = vunpack.i.l.bf16 %v19510_v42 }
 0x72e   : > { %13449 = vmatpush1.bf16.msra.mxu1 %v21718_v22  ;;  %v13388_v61 = vpack.c.bf16 %v7942_v10, %v7938_v44  ;;  %v7941_v56 = vsel %vm5202_vm12, %v15529_v6, %v15533_v60  ;;  %v7944_v55 = vsel %vm5202_vm12, %v15514_v28, %v15548_v45  ;;  %v15599_v52 = vunpack.i.h.bf16 %v15597_v20  ;;  %v15602_v27 = vpop.permute.xlu0 %15601 }
 0x72f   : > { %13451 = vmatprep.subr.bf16.mxu1 %v13450_v4  ;;  %v15598_v9 = vunpack.i.l.bf16 %v15597_v20  ;;  %13383 = vmatprep.subr.bf16.mxu0 %v13382_v0  ;;  %v7945_v1 = vsel %vm5202_vm12, %v15548_v45, %v15549_v14  ;;  %v15569_v33 = vunpack.i.h.bf16 %v19547_v12  ;;  %v15563_v16 = vunpack.i.l.bf16 %v19556_v50  ;;  %v19652_v2 = vpop.permute.xlu1 %15611 }
 0x730   : > { %v8067_v42 = vsel %vm1913_vm1, %v15573_v57, %v15574_v30  ;;  %v8071_v53 = vsel %vm1913_vm1, %v15578_v23, %v15579_v49  ;;  %v15594_v28 = vunpack.i.h.bf16 %v19613_v63  ;;  %v15588_v8 = vunpack.i.l.bf16 %v19630_v7 }
 0x731   : > { %13385 = vmatpush1.bf16.msra.mxu0 %v13384_v13  ;;  %v7824_v26 = vsel %vm5073_vm11, %v15584_v35, %v15598_v9  ;;  %v7825_v15 = vsel %vm5073_vm11, %v15598_v9, %v15599_v52  ;;  %v15604_v4 = vunpack.i.h.bf16 %v15602_v27  ;;  %v15603_v58 = vunpack.i.l.bf16 %v15602_v27 }
 0x732   : > { %13387 = vmatprep.subr.bf16.mxu0 %v13386_v41  ;;  %13453 = vmatpush1.bf16.msra.mxu1 %v13452_v43  ;;  %v13454_v39 = vpack.c.bf16 %v7825_v15, %v7821_v24  ;;  %v13456_v32 = vpack.c.bf16 %v7824_v26, %v19598_v54  ;;  %v15568_v19 = vunpack.i.l.bf16 %v19547_v12  ;;  %v13458_v34 = vpack.c.bf16 %v7945_v1, %v7941_v56  ;;  %v15607_v54 = vpop.permute.xlu0 %15606 }
 0x733   : > { %v7947_v37 = vsel %vm5202_vm12, %v15553_v5, %v15554_v29  ;;  %v13460_v31 = vpack.c.bf16 %v7944_v55, %v19628_v59  ;;  %v15564_v6 = vunpack.i.h.bf16 %v19556_v50  ;;  %v7946_v43 = vsel %vm5202_vm12, %v15563_v16, %v15553_v5  ;;  %v15617_v35 = vpop.permute.xlu1 %15616 }
 0x734   : > { %v7950_v48 = vsel %vm5202_vm12, %v15569_v33, %v15603_v58  ;;  %13455 = vmatprep.subr.bf16.mxu1 %v13454_v39  ;;  %v7951_v36 = vsel %vm5202_vm12, %v15603_v58, %v15604_v4  ;;  %v8066_v21 = vsel %vm1913_vm1, %v15588_v8, %v15573_v57  ;;  %v13394_v41 = vpack.c.bf16 %v8071_v53, %v8067_v42  ;;  %v8242_v58 = vld [vmem:[%s21379_s7] sm:$0xff]  ;;  %v8245_v39 = vld [vmem:[%s21379_s7 + $0x18] sm:$0xff] }
 0x735   : > { %13389 = vmatpush1.bf16.msra.mxu0 %v13388_v61  ;;  %v13390_v12 = vpack.c.bf16 %v7951_v36, %v7947_v37  ;;  %v13392_v25 = vpack.c.bf16 %v7950_v48, %v7946_v43  ;;  %v8070_v24 = vsel %vm1913_vm1, %v15594_v28, %v15578_v23  ;;  %v15589_v60 = vunpack.i.h.bf16 %v19630_v7  ;;  %v21720_v43 = vld [vmem:[#allocation31_spill] sm:$0xff]  ;;  %v21721_v36 = vld [vmem:[#allocation17_spill] sm:$0xff] }
 0x736   : > { %13457 = vmatpush1.bf16.msra.mxu1 %v13456_v32  ;;  %v15609_v50 = vunpack.i.h.bf16 %v15607_v54  ;;  %v15608_v44 = vunpack.i.l.bf16 %v15607_v54  ;;  %v15614_v47 = vunpack.i.h.bf16 %v19652_v2  ;;  %v15613_v62 = vunpack.i.l.bf16 %v19652_v2  ;;  %v15627_v38 = vpop.permute.xlu0 %15626  ;;  %v8246_v2 = vld [vmem:[%s21379_s7 + $0x20] sm:$0xff]  ;;  %v8249_v32 = vld [vmem:[%s21379_s7 + $0x38] sm:$0xff]  ;;  %v21722_v54 = vld [vmem:[#allocation20_spill] sm:$0xff] }
 0x737   : > { %13459 = vmatprep.subr.bf16.mxu1 %v13458_v34  ;;  %v15619_v11 = vunpack.i.h.bf16 %v15617_v35  ;;  %v15618_v51 = vunpack.i.l.bf16 %v15617_v35  ;;  %13391 = vmatprep.subr.bf16.mxu0 %v13390_v12  ;;  %v7948_v14 = vsel %vm5202_vm12, %v15554_v29, %v15564_v6  ;;  %v13396_v45 = vpack.c.bf16 %v8070_v24, %v8066_v21  ;;  %v15622_v3 = vpop.permute.xlu1 %15621  ;;  %v8252_v34 = vld [vmem:[%s21379_s7 + $0x50] sm:$0xff] }
 0x738   : > { %v7949_v57 = vsel %vm5202_vm12, %v15564_v6, %v15568_v19  ;;  %v15593_v23 = vunpack.i.l.bf16 %v19613_v63  ;;  %v8073_v59 = vsel %vm1913_vm1, %v15608_v44, %v15609_v50  ;;  %v15629_v7 = vunpack.i.h.bf16 %v15627_v38  ;;  %v8248_v19 = vld [vmem:[%s21379_s7 + $0x30] sm:$0xff]  ;;  %v21724_v50 = vld [vmem:[#allocation32_spill] sm:$0xff] }
 0x739   : > { %13393 = vmatpush1.bf16.msra.mxu0 %v13392_v25  ;;  %v7952_v18 = vsel %vm5202_vm12, %v15604_v4, %v15618_v51  ;;  %v7953_v10 = vsel %vm5202_vm12, %v15618_v51, %v15619_v11  ;;  %v15628_v40 = vunpack.i.l.bf16 %v15627_v38  ;;  %v8075_v29 = vsel %vm1913_vm1, %v15613_v62, %v15614_v47  ;;  %v21723_v24 = vld [vmem:[#allocation33_spill] sm:$0xff]  ;;  %v8255_v51 = vld [vmem:[%s21379_s7 + $0x68] sm:$0xff] }
 0x73a   : > { %13395 = vmatprep.subr.bf16.mxu0 %v13394_v41  ;;  %13461 = vmatpush1.bf16.msra.mxu1 %v13460_v31  ;;  %v13462_v22 = vpack.c.bf16 %v7953_v10, %v7949_v57  ;;  %v13464_v0 = vpack.c.bf16 %v7952_v18, %v7948_v14  ;;  %v8069_v13 = vsel %vm1913_vm1, %v15589_v60, %v15593_v23  ;;  %v15623_v5 = vunpack.i.l.bf16 %v15622_v3  ;;  %v15632_v55 = vpop.permute.xlu0 %15631  ;;  %v21719_v31 = vld [vmem:[#allocation30_spill] sm:$0xff]  ;;  %v8251_v41 = vld [vmem:[%s21379_s7 + $0x48] sm:$0xff]  ;;  %v21725_v35 = vld [vmem:[#allocation25_spill] sm:$0xff] }
 0x73b   : > { %v8072_v63 = vsel %vm1913_vm1, %v15579_v49, %v15608_v44  ;;  %v13466_v20 = vpack.c.bf16 %v8073_v59, %v8069_v13  ;;  %v8079_v61 = vsel %vm1913_vm1, %v15628_v40, %v15629_v7  ;;  %v15624_v56 = vunpack.i.h.bf16 %v15622_v3  ;;  %v15637_v16 = vpop.permute.xlu1 %15636  ;;  %v21729_v13 = vld [vmem:[#allocation8_spill] sm:$0xff] }
 0x73c   : > { %13463 = vmatprep.subr.bf16.mxu1 %v13462_v22  ;;  %v13398_v52 = vpack.c.bf16 %v8079_v61, %v8075_v29  ;;  %v8068_v9 = vsel %vm1913_vm1, %v15574_v30, %v15589_v60  ;;  %v15634_v1 = vunpack.i.h.bf16 %v15632_v55  ;;  %v15633_v33 = vunpack.i.l.bf16 %v15632_v55  ;;  %v21728_v22 = vld [vmem:[#allocation9_spill] sm:$0xff]  ;;  %v21730_v55 = vld [vmem:[#allocation10_spill] sm:$0xff] }
 0x73d   : > { %13397 = vmatpush1.bf16.msra.mxu0 %v13396_v45  ;;  %v15639_v17 = vunpack.i.h.bf16 %v15637_v16  ;;  %v15638_v49 = vunpack.i.l.bf16 %v15637_v16  ;;  %v13468_v42 = vpack.c.bf16 %v8072_v63, %v8068_v9  ;;  %v8074_v53 = vsel %vm1913_vm1, %v15623_v5, %v15613_v62  ;;  %v21726_v62 = vld [vmem:[#allocation26_spill] sm:$0xff]  ;;  %v8254_v5 = vld [vmem:[%s21379_s7 + $0x60] sm:$0xff] }
 0x73e   : > { %13465 = vmatpush1.bf16.msra.mxu1 %v13464_v0  ;;  %13399 = vmatprep.subr.bf16.mxu0 %v13398_v52  ;;  %v8078_v28 = vsel %vm1913_vm1, %v15634_v1, %v15628_v40  ;;  %v8077_v8 = vsel %vm1913_vm1, %v15624_v56, %v15633_v33  ;;  %v8076_v26 = vsel %vm1913_vm1, %v15614_v47, %v15624_v56  ;;  %v21727_v40 = vld [vmem:[#allocation7_spill] sm:$0xff] }
 0x73f   : > { %13467 = vmatprep.subr.bf16.mxu1 %v13466_v20  ;;  %v8080_v46 = vsel %vm1913_vm1, %v15629_v7, %v15638_v49  ;;  %v13400_v30 = vpack.c.bf16 %v8078_v28, %v8074_v53  ;;  %v8081_v27 = vsel %vm1913_vm1, %v15638_v49, %v15639_v17  ;;  %v8258_v9 = vld [vmem:[%s21379_s7 + $0x80] sm:$0xff] }
 0x740   : > { %v13470_v15 = vpack.c.bf16 %v8081_v27, %v8077_v8  ;;  %v13472_v4 = vpack.c.bf16 %v8080_v46, %v8076_v26 }
 0x741   : > { %13401 = vmatpush1.bf16.msra.mxu0 %v13400_v30 }
 0x742   : > { %13469 = vmatpush1.bf16.msra.mxu1 %v13468_v42 }
 0x743   : > { %13471 = vmatprep.subr.bf16.mxu1 %v13470_v15 }
 0x744   : > { %8547 = vmatmul.mubr.f32.vlgmr.msra.gmra.mrb[28].mxu0 %v8242_v58 }
 0x745   : > { %8552 = vmatprep.mubr.f32.mxu0 %v8246_v2 }
 0x746   : > { %13473 = vmatpush1.bf16.msra.mxu1 %v13472_v4 }
 0x748   : > { %8553 = vmatmul.mubr.f32.gmra.mrb[30].mxu0 %v8245_v39 }
 0x749   : > { %8869 = vmatmul.mubr.f32.vlgmr.msra.gmra.mrb[28].mxu1 %v8242_v58  ;;  %8558 = vmatprep.mubr.f32.mxu0 %v8249_v32 }
 0x74a   : > { %8874 = vmatprep.mubr.f32.mxu1 %v8246_v2 }
 0x74b   : > { %v1164_v37 = vpop.permute.xlu0 %1163 }
 0x74c   : > { %8559 = vmatmul.mubr.f32.gmra.mrb[32].mxu0 %v8248_v19  ;;  %v1219_v6 = vadd.f32 %v1164_v37, %v21719_v31  ;;  %v1220_v48 = vadd.f32 %v1164_v37, %v21720_v43  ;;  %v1221_v21 = vadd.f32 %v1164_v37, %v21721_v36  ;;  %v1222_v12 = vadd.f32 %v1164_v37, %v21722_v54  ;;  %v1169_v25 = vpop.permute.xlu1 %1168 }
 0x74d   : > { %8875 = vmatmul.mubr.f32.gmra.mrb[30].mxu1 %v8245_v39  ;;  %8564 = vmatprep.mubr.f32.mxu0 %v8252_v34  ;;  %v1223_v60 = vadd.f32 %v1169_v25, %v21723_v24  ;;  %v1224_v44 = vadd.f32 %v1169_v25, %v21724_v50  ;;  %v1225_v47 = vadd.f32 %v1169_v25, %v21725_v35  ;;  %v8257_v39 = vld [vmem:[%s21379_s7 + $0x78] sm:$0xff] }
 0x74e   : > { %8880 = vmatprep.mubr.f32.mxu1 %v8249_v32  ;;  %v1226_v11 = vadd.f32 %v1169_v25, %v21726_v62  ;;  %v1275_v14 = vmax.f32 %v1219_v6, 0.0  ;;  %v1276_v45 = vmax.f32 %v1220_v48, 0.0  ;;  %v1277_v57 = vmax.f32 %v1221_v21, 0.0  ;;  %v8261_v24 = vld [vmem:[%s21379_s7 + $0x98] sm:$0xff] }
 0x74f   : > { %v1278_v23 = vmax.f32 %v1222_v12, 0.0  ;;  %v1279_v18 = vmax.f32 %v1223_v60, 0.0  ;;  %v1280_v38 = vmax.f32 %v1224_v44, 0.0  ;;  %v1281_v10 = vmax.f32 %v1225_v47, 0.0  ;;  %v15642_v7 = vpop.permute.xlu0 %15641  ;;  %v8260_v44 = vld [vmem:[%s21379_s7 + $0x90] sm:$0xff] }
 0x750   : > { %v1282_v59 = vmax.f32 %v1226_v11, 0.0  ;;  %8565 = vmatmul.mubr.f32.gmra.mrb[34].mxu0 %v8251_v41  ;;  %v19721_v3 = vmul.f32 %v21727_v40, %v1275_v14  ;;  %v19724_v0 = vmul.f32 %v21728_v22, %v1276_v45  ;;  %v19727_v29 = vmul.f32 %v21729_v13, %v1277_v57  ;;  %v15647_v63 = vpop.permute.xlu1 %15646 }
 0x751   : > { %8881 = vmatmul.mubr.f32.gmra.mrb[32].mxu1 %v8248_v19  ;;  %8570 = vmatprep.mubr.f32.mxu0 %v8255_v51  ;;  %v19733_v20 = vmul.f32 %v21727_v40, %v1279_v18  ;;  %v19736_v61 = vmul.f32 %v21728_v22, %v1280_v38  ;;  %v19739_v56 = vmul.f32 %v21729_v13, %v1281_v10  ;;  %v15644_v1 = vunpack.i.h.bf16 %v15642_v7 }
 0x752   : > { %8886 = vmatprep.mubr.f32.mxu1 %v8252_v34  ;;  %v19742_v52 = vmul.f32 %v21730_v55, %v1282_v59  ;;  %v15643_v33 = vunpack.i.l.bf16 %v15642_v7  ;;  %v15649_v16 = vunpack.i.h.bf16 %v15647_v63  ;;  %v15648_v17 = vunpack.i.l.bf16 %v15647_v63  ;;  %v8264_v59 = vld [vmem:[%s21379_s7 + $0xb0] sm:$0xff] }
 0x753   : > { %v19748_v49 = vmul.f32 %v21730_v55, %v1278_v23  ;;  %v15652_v42 = vpop.permute.xlu0 %15651  ;;  %v15690_v53 = vpack.i.bf16 %v19724_v0, %v19721_v3  ;;  %v15695_v28 = vpack.i.bf16 %v19736_v61, %v19733_v20  ;;  %v15715_v19 = vpack.i.bf16 %v19727_v29, %v19724_v0 }
 0x754   : > { %8571 = vmatmul.mubr.f32.gmra.mrb[36].mxu0 %v8254_v5  ;;  %v15654_v8 = vunpack.i.h.bf16 %v15652_v42  ;;  %v15653_v26 = vunpack.i.l.bf16 %v15652_v42  ;;  %v15657_v46 = vpop.permute.xlu1 %15656  ;;  %v8195_v30 = vsel %vm5459_vm13, %v15643_v33, %v15644_v1  ;;  %v8199_v27 = vsel %vm5459_vm13, %v15648_v17, %v15649_v16 }
 0x755   : > { %8887 = vmatmul.mubr.f32.gmra.mrb[34].mxu1 %v8251_v41  ;;  %8576 = vmatprep.mubr.f32.mxu0 %v8258_v9  ;;  %v15659_v15 = vunpack.i.h.bf16 %v15657_v46  ;;  %v15658_v4 = vunpack.i.l.bf16 %v15657_v46  ;;  %v13402_v58 = vpack.c.bf16 %v8199_v27, %v8195_v30  ;;  %v15710_v2 = vpack.i.bf16 %v19742_v52, %v19739_v56 }
 0x756   : > { %8892 = vmatprep.mubr.f32.mxu1 %v8255_v51  ;;  %15691 = vrot.lane.b32.xlu0 %v15690_v53, %s16213_s24  ;;  %v8194_v32 = vsel %vm5459_vm13, %v15653_v26, %v15643_v33  ;;  %v15720_v34 = vpack.i.bf16 %v19739_v56, %v19736_v61  ;;  %v21731_v6 = vmov 0.0   ;;  %v15725_v36 = vpack.i.bf16 %v19748_v49, %v19721_v3  ;;  %v8267_v26 = vld [vmem:[%s21379_s7 + $0xc8] sm:$0xff] }
 0x757   : > { %15696 = vrot.lane.b32.xlu1 %v15695_v28, %s16213_s24  ;;  %v8198_v37 = vsel %vm5459_vm13, %v15659_v15, %v15648_v17  ;;  %13403 = vmatprep.subr.bf16.mxu0 %v13402_v58  ;;  %v15662_v31 = vpop.permute.xlu0 %15661  ;;  %v15700_v43 = vpack.i.bf16 %v19727_v29, %v21731_v6  ;;  %v15705_v48 = vpack.i.bf16 %v21731_v6, %v19748_v49 }
 0x758   : > { %v8196_v21 = vsel %vm5459_vm13, %v15644_v1, %v15654_v8  ;;  %v15664_v54 = vunpack.i.h.bf16 %v15662_v31  ;;  %v15663_v12 = vunpack.i.l.bf16 %v15662_v31  ;;  %v15667_v25 = vpop.permute.xlu1 %15666  ;;  %v13404_v41 = vpack.c.bf16 %v8198_v37, %v8194_v32  ;;  %8577 = vmatmul.mubr.f32.gmra.mrb[38].mxu0 %v8257_v39 }
 0x759   : > { %8893 = vmatmul.mubr.f32.gmra.mrb[36].mxu1 %v8254_v5  ;;  %v15669_v60 = vunpack.i.h.bf16 %v15667_v25  ;;  %v8197_v50 = vsel %vm5459_vm13, %v15654_v8, %v15658_v4  ;;  %v13486_v35 = vpack.c.bf16 %v19736_v61, %v19724_v0  ;;  %v13488_v47 = vpack.c.bf16 %v19733_v20, %v19721_v3  ;;  %8582 = vmatprep.mubr.f32.mxu0 %v8261_v24  ;;  %v8263_v5 = vld [vmem:[%s21379_s7 + $0xa8] sm:$0xff]  ;;  %v8266_v4 = vld [vmem:[%s21379_s7 + $0xc0] sm:$0xff] }
 0x75a   : > { %8898 = vmatprep.mubr.f32.mxu1 %v8258_v9  ;;  %15701 = vrot.lane.b32.xlu0 %v15700_v43, %s16213_s24  ;;  %v8200_v62 = vsel %vm5459_vm13, %v15649_v16, %v15663_v12  ;;  %v15668_v11 = vunpack.i.l.bf16 %v15667_v25  ;;  %v8201_v51 = vsel %vm5459_vm13, %v15663_v12, %v15664_v54  ;;  %v13498_v14 = vpack.c.bf16 %v19742_v52, %v19748_v49  ;;  %v8270_v43 = vld [vmem:[%s21379_s7 + $0xe0] sm:$0xff]  ;;  %v8273_v54 = vld [vmem:[%s21379_s7 + $0xf8] sm:$0xff]  ;;  %v8272_v12 = vld [vmem:[%s21379_s7 + $0xf0] sm:$0xff] }
 0x75b   : > { %15706 = vrot.lane.b32.xlu1 %v15705_v48, %s16213_s24  ;;  %13405 = vmatpush1.bf16.msra.mxu0 %v13404_v41  ;;  %v15677_v45 = vpop.permute.xlu0 %15676  ;;  %v13474_v57 = vpack.c.bf16 %v8201_v51, %v8197_v50  ;;  %v13476_v23 = vpack.c.bf16 %v8200_v62, %v8196_v21  ;;  %v13500_v7 = vpack.c.bf16 %v19739_v56, %v19727_v29  ;;  %v8269_v48 = vld [vmem:[%s21379_s7 + $0xd8] sm:$0xff]  ;;  %v9427_v25 = vld [vmem:[%s21383_s11 + $0x140] sm:$0xff]  ;;  %v8276_v41 = vld [vmem:[%s21379_s7 + $0x110] sm:$0xff] }
 0x75c   : > { %v15679_v18 = vunpack.i.h.bf16 %v15677_v45  ;;  %v15678_v38 = vunpack.i.l.bf16 %v15677_v45  ;;  %v15672_v10 = vpop.permute.xlu1 %15671  ;;  %8583 = vmatmul.mubr.f32.gmra.mrb[40].mxu0 %v8260_v44  ;;  %v8203_v1 = vsel %vm5459_vm13, %v15668_v11, %v15669_v60  ;;  %v15730_v8 = vpack.i.bf16 %v19733_v20, %v21731_v6  ;;  %v9426_v21 = vld [vmem:[%s21383_s11 + $0x138] sm:$0xff]  ;;  %v8278_v50 = vld [vmem:[%s21379_s7 + $0x120] sm:$0xff]  ;;  %v8284_v51 = vld [vmem:[%s21379_s7 + $0x150] sm:$0xff] }
 0x75d   : > { %8899 = vmatmul.mubr.f32.gmra.mrb[38].mxu1 %v8257_v39  ;;  %v15673_v63 = vunpack.i.l.bf16 %v15672_v10  ;;  %v15674_v9 = vunpack.i.h.bf16 %v15672_v10  ;;  %13475 = vmatprep.subr.bf16.mxu1 %v13474_v57  ;;  %v15735_v15 = vpack.i.bf16 %v21731_v6, %v19742_v52  ;;  %v8281_v62 = vld [vmem:[%s21379_s7 + $0x138] sm:$0xff]  ;;  %v8288_v45 = vld [vmem:[%s21379_s7 + $0x170] sm:$0xff]  ;;  %v8287_v57 = vld [vmem:[%s21379_s7 + $0x168] sm:$0xff] }
 0x75e   : > { %8904 = vmatprep.mubr.f32.mxu1 %v8261_v24  ;;  %15711 = vrot.lane.b32.xlu0 %v15710_v2, %s16213_s24  ;;  %v8207_v33 = vsel %vm5459_vm13, %v15678_v38, %v15679_v18  ;;  %v8275_v24 = vld [vmem:[%s21379_s7 + $0x108] sm:$0xff]  ;;  %v8253_v10 = vld [vmem:[%s21379_s7 + $0x58] sm:$0xff]  ;;  %v9400_v56 = vld [vmem:[%s21380_s8 + $0x10] sm:$0xff]  ;;  %s12889_s24 = sshll.u32 %s21791_s22, 9 }
 0x75f   : > { %15716 = vrot.lane.b32.xlu1 %v15715_v19, %s16214_s25  ;;  %13477 = vmatpush1.bf16.msra.mxu1 %v13476_v23  ;;  %v15682_v16 = vpop.permute.xlu0 %15681  ;;  %v13406_v17 = vpack.c.bf16 %v8207_v33, %v8203_v1  ;;  %v8202_v46 = vsel %vm5459_vm13, %v15673_v63, %v15668_v11  ;;  %v8204_v58 = vsel %vm5459_vm13, %v15669_v60, %v15674_v9  ;;  %v8279_v60 = vld [vmem:[%s21379_s7 + $0x128] sm:$0xff]  ;;  %v8285_v11 = vld [vmem:[%s21379_s7 + $0x158] sm:$0xff]  ;;  %v8244_v23 = vld [vmem:[%s21379_s7 + $0x10] sm:$0xff]  ;;  %s21251_s27 = scalar_lea.vmem %s21384_s12, %s12889_s24 }
 0x760   : > { %8588 = vmatprep.mubr.f32.mxu0 %v8264_v59  ;;  %v15684_v42 = vunpack.i.h.bf16 %v15682_v16  ;;  %v15683_v53 = vunpack.i.l.bf16 %v15682_v16  ;;  %v15687_v28 = vpop.permute.xlu1 %15686  ;;  %v8259_v63 = vld [vmem:[%s21379_s7 + $0x88] sm:$0xff]  ;;  %v8268_v1 = vld [vmem:[%s21379_s7 + $0xd0] sm:$0xff]  ;;  %v8274_v16 = vld [vmem:[%s21379_s7 + $0x100] sm:$0xff] }
 0x761   : > { %8905 = vmatmul.mubr.f32.gmra.mrb[40].mxu1 %v8260_v44  ;;  %8589 = vmatmul.mubr.f32.gmra.mrb[42].mxu0 %v8263_v5  ;;  %v15689_v30 = vunpack.i.h.bf16 %v15687_v28  ;;  %v15688_v27 = vunpack.i.l.bf16 %v15687_v28  ;;  %v8282_v44 = vld [vmem:[%s21379_s7 + $0x140] sm:$0xff]  ;;  %v8271_v33 = vld [vmem:[%s21379_s7 + $0xe8] sm:$0xff] }
 0x762   : > { %8910 = vmatprep.mubr.f32.mxu1 %v8264_v59  ;;  %15721 = vrot.lane.b32.xlu0 %v15720_v34, %s16214_s25  ;;  %v8206_v2 = vsel %vm5459_vm13, %v15684_v42, %v15678_v38  ;;  %v8205_v39 = vsel %vm5459_vm13, %v15674_v9, %v15683_v53  ;;  %v8250_v38 = vld [vmem:[%s21379_s7 + $0x40] sm:$0xff]  ;;  %v8256_v59 = vld [vmem:[%s21379_s7 + $0x70] sm:$0xff]  ;;  %v8265_v9 = vld [vmem:[%s21379_s7 + $0xb8] sm:$0xff] }
 0x763   : > { %15726 = vrot.lane.b32.xlu1 %v15725_v36, %s16214_s25  ;;  %13407 = vmatprep.subr.bf16.mxu0 %v13406_v17  ;;  %v8208_v32 = vsel %vm5459_vm13, %v15679_v18, %v15688_v27  ;;  %v13408_v19 = vpack.c.bf16 %v8206_v2, %v8202_v46  ;;  %v8209_v34 = vsel %vm5459_vm13, %v15688_v27, %v15689_v30  ;;  %v9425_v36 = vld [vmem:[%s21383_s11 + $0x130] sm:$0xff]  ;;  %v8247_v18 = vld [vmem:[%s21379_s7 + $0x28] sm:$0xff]  ;;  %v8277_v17 = vld [vmem:[%s21379_s7 + $0x118] sm:$0xff] }
 0x764   : > { %8594 = vmatprep.mubr.f32.mxu0 %v8267_v26  ;;  %v13478_v37 = vpack.c.bf16 %v8209_v34, %v8205_v39  ;;  %v13480_v31 = vpack.c.bf16 %v8208_v32, %v8204_v58  ;;  %v8280_v42 = vld [vmem:[%s21379_s7 + $0x130] sm:$0xff]  ;;  %v8283_v53 = vld [vmem:[%s21379_s7 + $0x148] sm:$0xff]  ;;  %v8286_v28 = vld [vmem:[%s21379_s7 + $0x160] sm:$0xff] }
 0x765   : > { %8911 = vmatmul.mubr.f32.gmra.mrb[42].mxu1 %v8263_v5  ;;  %8595 = vmatmul.mubr.f32.gmra.mrb[44].mxu0 %v8266_v4  ;;  %v8262_v5 = vld [vmem:[%s21379_s7 + $0xa0] sm:$0xff]  ;;  %v9399_v29 = vld [vmem:[%s21380_s8 + $0x8] sm:$0xff] }
 0x766   : > { %8916 = vmatprep.mubr.f32.mxu1 %v8267_v26  ;;  %15731 = vrot.lane.b32.xlu0 %v15730_v8, %s16214_s25  ;;  %v8289_v8 = vld [vmem:[%s21379_s7 + $0x178] sm:$0xff] }
 0x767   : > { %15736 = vrot.lane.b32.xlu1 %v15735_v15, %s16214_s25  ;;  %13409 = vmatpush1.bf16.msra.mxu0 %v13408_v19  ;;  %s16224_s25 = smov 37  }
 0x768   : > { %13479 = vmatprep.subr.bf16.mxu1 %v13478_v37  ;;  %8600 = vmatprep.mubr.f32.mxu0 %v8270_v43 }
 0x769   : > { %13481 = vmatpush1.bf16.msra.mxu1 %v13480_v31  ;;  %8601 = vmatmul.mubr.f32.gmra.mrb[46].mxu0 %v8269_v48 }
 0x76a   : > { %8917 = vmatmul.mubr.f32.gmra.mrb[44].mxu1 %v8266_v4  ;;  %9430 = vperm.xlu0 %14288, %v9425_v36  }
 0x76b   : > { %9435 = vperm.xlu1 %14289, %v9426_v21   ;;  %8922 = vmatprep.mubr.f32.mxu1 %v8270_v43 }
 0x76c   : > { %8606 = vmatprep.mubr.f32.mxu0 %v8273_v54 }
 0x76d   : > { %8607 = vmatmul.mubr.f32.gmra.mrb[48].mxu0 %v8272_v12 }
 0x76e   : > { %8923 = vmatmul.mubr.f32.gmra.mrb[46].mxu1 %v8269_v48  ;;  %9440 = vperm.xlu0 %14288, %v9427_v25  }
 0x76f   : > { %8928 = vmatprep.mubr.f32.mxu1 %v8273_v54  ;;  %8612 = vmatprep.mubr.f32.mxu0 %v8276_v41 }
 0x771   : > { %8613 = vmatmul.mubr.f32.gmra.mrb[50].mxu0 %v8275_v24 }
 0x772   : > { %8929 = vmatmul.mubr.f32.gmra.mrb[48].mxu1 %v8272_v12  ;;  %8618 = vmatprep.mubr.f32.mxu0 %v8279_v60 }
 0x773   : > { %8934 = vmatprep.mubr.f32.mxu1 %v8276_v41 }
 0x775   : > { %8619 = vmatmul.mubr.f32.gmra.mrb[52].mxu0 %v8278_v50 }
 0x776   : > { %8935 = vmatmul.mubr.f32.gmra.mrb[50].mxu1 %v8275_v24  ;;  %8624 = vmatprep.mubr.f32.mxu0 %v8282_v44 }
 0x777   : > { %8940 = vmatprep.mubr.f32.mxu1 %v8279_v60 }
 0x779   : > { %8625 = vmatmul.mubr.f32.gmra.mrb[54].mxu0 %v8281_v62 }
 0x77a   : > { %8941 = vmatmul.mubr.f32.gmra.mrb[52].mxu1 %v8278_v50  ;;  %8630 = vmatprep.mubr.f32.mxu0 %v8285_v11 }
 0x77b   : > { %8946 = vmatprep.mubr.f32.mxu1 %v8282_v44 }
 0x77d   : > { %8631 = vmatmul.mubr.f32.gmra.mrb[56].mxu0 %v8284_v51 }
 0x77e   : > { %8947 = vmatmul.mubr.f32.gmra.mrb[54].mxu1 %v8281_v62  ;;  %8636 = vmatprep.mubr.f32.mxu0 %v8288_v45 }
 0x77f   : > { %8952 = vmatprep.mubr.f32.mxu1 %v8285_v11 }
 0x781   : > { %8637 = vmatmul.mubr.f32.gmra.mrb[58].mxu0 %v8287_v57 }
 0x782   : > { %8953 = vmatmul.mubr.f32.gmra.mrb[56].mxu1 %v8284_v51  ;;  %8707 = vmatprep.mubr.f32.mxu0 %v21731_v6 }
 0x783   : > { %8958 = vmatprep.mubr.f32.mxu1 %v8288_v45 }
 0x785   : > { %12808 = vmatmul.mubr.msk.f32.vlgmr.msra.gmra.mrb[28].mxu0 %vm1913_vm1, %v8244_v23 }
 0x786   : > { %8959 = vmatmul.mubr.f32.gmra.mrb[58].mxu1 %v8287_v57  ;;  %8713 = vmatprep.mubr.f32.mxu0 %v21731_v6 }
 0x787   : > { %9029 = vmatprep.mubr.f32.mxu1 %v21731_v6 }
 0x789   : > { %12809 = vmatmul.mubr.msk.f32.gmra.mrb[30].mxu0 %vm1913_vm1, %v8247_v18 }
 0x78a   : > { %12824 = vmatmul.mubr.msk.f32.vlgmr.msra.gmra.mrb[28].mxu1 %vm1913_vm1, %v8244_v23  ;;  %8719 = vmatprep.mubr.f32.mxu0 %v21731_v6 }
 0x78b   : > { %9035 = vmatprep.mubr.f32.mxu1 %v21731_v6 }
 0x78d   : > { %12810 = vmatmul.mubr.msk.f32.gmra.mrb[32].mxu0 %vm1913_vm1, %v8250_v38 }
 0x78e   : > { %12825 = vmatmul.mubr.msk.f32.gmra.mrb[30].mxu1 %vm1913_vm1, %v8247_v18  ;;  %8725 = vmatprep.mubr.f32.mxu0 %v21731_v6 }
 0x78f   : > { %9041 = vmatprep.mubr.f32.mxu1 %v21731_v6 }
 0x791   : > { %12811 = vmatmul.mubr.msk.f32.gmra.mrb[34].mxu0 %vm1913_vm1, %v8253_v10 }
 0x792   : > { %12826 = vmatmul.mubr.msk.f32.gmra.mrb[32].mxu1 %vm1913_vm1, %v8250_v38  ;;  %8731 = vmatprep.mubr.f32.mxu0 %v21731_v6 }
 0x793   : > { %9047 = vmatprep.mubr.f32.mxu1 %v21731_v6 }
 0x795   : > { %12812 = vmatmul.mubr.msk.f32.gmra.mrb[36].mxu0 %vm1913_vm1, %v8256_v59 }
 0x796   : > { %12827 = vmatmul.mubr.msk.f32.gmra.mrb[34].mxu1 %vm1913_vm1, %v8253_v10  ;;  %8737 = vmatprep.mubr.f32.mxu0 %v21731_v6 }
 0x797   : > { %9053 = vmatprep.mubr.f32.mxu1 %v21731_v6 }
 0x799   : > { %12813 = vmatmul.mubr.msk.f32.gmra.mrb[38].mxu0 %vm1913_vm1, %v8259_v63 }
 0x79a   : > { %12828 = vmatmul.mubr.msk.f32.gmra.mrb[36].mxu1 %vm1913_vm1, %v8256_v59  ;;  %8743 = vmatprep.mubr.f32.mxu0 %v21731_v6 }
 0x79b   : > { %9059 = vmatprep.mubr.f32.mxu1 %v21731_v6 }
 0x79d   : > { %12814 = vmatmul.mubr.msk.f32.gmra.mrb[40].mxu0 %vm1913_vm1, %v8262_v5 }
 0x79e   : > { %12829 = vmatmul.mubr.msk.f32.gmra.mrb[38].mxu1 %vm1913_vm1, %v8259_v63  ;;  %8749 = vmatprep.mubr.f32.mxu0 %v21731_v6 }
 0x79f   : > { %9065 = vmatprep.mubr.f32.mxu1 %v21731_v6 }
 0x7a1   : > { %12815 = vmatmul.mubr.msk.f32.gmra.mrb[42].mxu0 %vm1913_vm1, %v8265_v9 }
 0x7a2   : > { %12830 = vmatmul.mubr.msk.f32.gmra.mrb[40].mxu1 %vm1913_vm1, %v8262_v5  ;;  %8755 = vmatprep.mubr.f32.mxu0 %v21731_v6 }
 0x7a3   : > { %9071 = vmatprep.mubr.f32.mxu1 %v21731_v6 }
 0x7a5   : > { %12816 = vmatmul.mubr.msk.f32.gmra.mrb[44].mxu0 %vm1913_vm1, %v8268_v1 }
 0x7a6   : > { %12831 = vmatmul.mubr.msk.f32.gmra.mrb[42].mxu1 %vm1913_vm1, %v8265_v9  ;;  %8761 = vmatprep.mubr.f32.mxu0 %v21731_v6 }
 0x7a7   : > { %9077 = vmatprep.mubr.f32.mxu1 %v21731_v6 }
 0x7a9   : > { %12817 = vmatmul.mubr.msk.f32.gmra.mrb[46].mxu0 %vm1913_vm1, %v8271_v33 }
 0x7aa   : > { %12832 = vmatmul.mubr.msk.f32.gmra.mrb[44].mxu1 %vm1913_vm1, %v8268_v1  ;;  %8767 = vmatprep.mubr.f32.mxu0 %v21731_v6 }
 0x7ab   : > { %9083 = vmatprep.mubr.f32.mxu1 %v21731_v6 }
 0x7ad   : > { %12818 = vmatmul.mubr.msk.f32.gmra.mrb[48].mxu0 %vm1913_vm1, %v8274_v16 }
 0x7ae   : > { %12833 = vmatmul.mubr.msk.f32.gmra.mrb[46].mxu1 %vm1913_vm1, %v8271_v33  ;;  %8773 = vmatprep.mubr.f32.mxu0 %v21731_v6 }
 0x7af   : > { %9089 = vmatprep.mubr.f32.mxu1 %v21731_v6 }
 0x7b1   : > { %12819 = vmatmul.mubr.msk.f32.gmra.mrb[50].mxu0 %vm1913_vm1, %v8277_v17 }
 0x7b2   : > { %12834 = vmatmul.mubr.msk.f32.gmra.mrb[48].mxu1 %vm1913_vm1, %v8274_v16  ;;  %8779 = vmatprep.mubr.f32.mxu0 %v21731_v6 }
 0x7b3   : > { %9095 = vmatprep.mubr.f32.mxu1 %v21731_v6 }
 0x7b5   : > { %12820 = vmatmul.mubr.msk.f32.gmra.mrb[52].mxu0 %vm1913_vm1, %v8280_v42 }
 0x7b6   : > { %12835 = vmatmul.mubr.msk.f32.gmra.mrb[50].mxu1 %vm1913_vm1, %v8277_v17  ;;  %8785 = vmatprep.mubr.f32.mxu0 %v21731_v6 }
 0x7b7   : > { %9101 = vmatprep.mubr.f32.mxu1 %v21731_v6 }
 0x7b9   : > { %12821 = vmatmul.mubr.msk.f32.gmra.mrb[54].mxu0 %vm1913_vm1, %v8283_v53 }
 0x7ba   : > { %12836 = vmatmul.mubr.msk.f32.gmra.mrb[52].mxu1 %vm1913_vm1, %v8280_v42  ;;  %8791 = vmatprep.mubr.f32.mxu0 %v21731_v6 }
 0x7bb   : > { %9107 = vmatprep.mubr.f32.mxu1 %v21731_v6 }
 0x7bd   : > { %12822 = vmatmul.mubr.msk.f32.gmra.mrb[56].mxu0 %vm1913_vm1, %v8286_v28 }
 0x7be   : > { %12837 = vmatmul.mubr.msk.f32.gmra.mrb[54].mxu1 %vm1913_vm1, %v8283_v53  ;;  %8797 = vmatprep.mubr.f32.mxu0 %v21731_v6 }
 0x7bf   : > { %9113 = vmatprep.mubr.f32.mxu1 %v21731_v6 }
 0x7c1   : > { %12823 = vmatmul.mubr.msk.f32.gmra.mrb[58].mxu0 %vm1913_vm1, %v8289_v8 }
 0x7c2   : > { %12838 = vmatmul.mubr.msk.f32.gmra.mrb[56].mxu1 %vm1913_vm1, %v8286_v28  ;;  %9517 = vmatprep.mubr.f32.mxu0 %v21731_v6  ;;  %v9398_v28 = vld [vmem:[%s21380_s8] sm:$0xff] }
 0x7c3   : > { %9119 = vmatprep.mubr.f32.mxu1 %v21731_v6 }
 0x7c6   : > { %12839 = vmatmul.mubr.msk.f32.gmra.mrb[58].mxu1 %vm1913_vm1, %v8289_v8 }
 0x7c7   : > { %9600 = vmatprep.mubr.f32.mxu1 %v21731_v6 }
 0x7c8   : > { %v15692_v26 = vpop.permute.xlu0 %15691 }
 0x7c9   : > { %v15697_v46 = vpop.permute.xlu1 %15696  ;;  %v15694_v30 = vunpack.i.h.bf16 %v15692_v26  ;;  %v15693_v27 = vunpack.i.l.bf16 %v15692_v26 }
 0x7ca   : > { %v15699_v15 = vunpack.i.h.bf16 %v15697_v46  ;;  %v15698_v4 = vunpack.i.l.bf16 %v15697_v46 }
 0x7cb   : > { %v9295_v58 = vsel %vm2171_vm3, %v15693_v27, %v15694_v30 }
 0x7cc   : > { %v9299_v2 = vsel %vm2171_vm3, %v15698_v4, %v15699_v15  ;;  %v15702_v39 = vpop.permute.xlu0 %15701 }
 0x7cd   : > { %v15707_v32 = vpop.permute.xlu1 %15706  ;;  %v13482_v19 = vpack.c.bf16 %v9299_v2, %v9295_v58  ;;  %v15703_v34 = vunpack.i.l.bf16 %v15702_v39  ;;  %v15704_v31 = vunpack.i.h.bf16 %v15702_v39 }
 0x7ce   : > { %v15709_v37 = vunpack.i.h.bf16 %v15707_v32  ;;  %v15708_v43 = vunpack.i.l.bf16 %v15707_v32 }
 0x7cf   : > { %13483 = vmatprep.subr.bf16.mxu0 %v13482_v19  ;;  %v9294_v48 = vsel %vm2171_vm3, %v15703_v34, %v15693_v27  ;;  %v9296_v24 = vsel %vm2171_vm3, %v15694_v30, %v15704_v31 }
 0x7d0   : > { %v9298_v36 = vsel %vm2171_vm3, %v15709_v37, %v15698_v4  ;;  %v15712_v21 = vpop.permute.xlu0 %15711  ;;  %v9297_v60 = vsel %vm2171_vm3, %v15704_v31, %v15708_v43 }
 0x7d1   : > { %v15717_v54 = vpop.permute.xlu1 %15716  ;;  %v13484_v12 = vpack.c.bf16 %v9298_v36, %v9294_v48  ;;  %v15714_v25 = vunpack.i.h.bf16 %v15712_v21  ;;  %v15713_v41 = vunpack.i.l.bf16 %v15712_v21 }
 0x7d2   : > { %v15719_v44 = vunpack.i.h.bf16 %v15717_v54  ;;  %v15718_v62 = vunpack.i.l.bf16 %v15717_v54 }
 0x7d3   : > { %13485 = vmatpush1.bf16.msra.mxu0 %v13484_v12  ;;  %v9300_v50 = vsel %vm2171_vm3, %v15699_v15, %v15713_v41  ;;  %v9301_v11 = vsel %vm2171_vm3, %v15713_v41, %v15714_v25  ;;  %vm10865_vm3 = vcmask 1006592  }
 0x7d4   : > { %13487 = vmatprep.subr.bf16.mxu0 %v13486_v35  ;;  %v15722_v51 = vpop.permute.xlu0 %15721  ;;  %v13494_v57 = vpack.c.bf16 %v9301_v11, %v9297_v60  ;;  %v13496_v23 = vpack.c.bf16 %v9300_v50, %v9296_v24  ;;  %v9375_v63 = vsel %vm2332_vm4, %v15718_v62, %v15719_v44 }
 0x7d5   : > { %v15727_v45 = vpop.permute.xlu1 %15726  ;;  %v15724_v18 = vunpack.i.h.bf16 %v15722_v51  ;;  %v15723_v38 = vunpack.i.l.bf16 %v15722_v51 }
 0x7d6   : > { %v15729_v10 = vunpack.i.h.bf16 %v15727_v45  ;;  %v15728_v59 = vunpack.i.l.bf16 %v15727_v45  ;;  %13495 = vmatprep.subr.bf16.mxu1 %v13494_v57 }
 0x7d7   : > { %13489 = vmatpush1.bf16.msra.mxu0 %v13488_v47  ;;  %13497 = vmatpush1.bf16.msra.mxu1 %v13496_v23  ;;  %v9379_v0 = vsel %vm2332_vm4, %v15723_v38, %v15724_v18 }
 0x7d8   : > { %v15732_v61 = vpop.permute.xlu0 %15731  ;;  %13499 = vmatprep.subr.bf16.mxu1 %v13498_v14  ;;  %v13490_v5 = vpack.c.bf16 %v9379_v0, %v9375_v63  ;;  %v9376_v17 = vsel %vm2332_vm4, %v15719_v44, %v15729_v10  ;;  %v9374_v3 = vsel %vm2332_vm4, %v15728_v59, %v15718_v62 }
 0x7d9   : > { %v15737_v35 = vpop.permute.xlu1 %15736  ;;  %v15734_v9 = vunpack.i.h.bf16 %v15732_v61  ;;  %v15733_v1 = vunpack.i.l.bf16 %v15732_v61 }
 0x7da   : > { %v15739_v33 = vunpack.i.h.bf16 %v15737_v35  ;;  %v15738_v16 = vunpack.i.l.bf16 %v15737_v35  ;;  %13491 = vmatprep.subr.bf16.mxu0 %v13490_v5 }
 0x7db   : > { %v9378_v20 = vsel %vm2332_vm4, %v15734_v9, %v15723_v38  ;;  %13501 = vmatpush1.bf16.msra.mxu1 %v13500_v7  ;;  %v9377_v52 = vsel %vm2332_vm4, %v15729_v10, %v15733_v1 }
 0x7dc   : > { %v9380_v47 = vsel %vm2332_vm4, %v15724_v18, %v15738_v16  ;;  %v9381_v49 = vsel %vm2332_vm4, %v15738_v16, %v15739_v33  ;;  %v13492_v14 = vpack.c.bf16 %v9378_v20, %v9374_v3  ;;  %vm10575_vm4 = vcmask 220160  }
 0x7dd   : > { %v13502_v42 = vpack.c.bf16 %v9381_v49, %v9377_v52  ;;  %v13504_v53 = vpack.c.bf16 %v9380_v47, %v9376_v17 }
 0x7de   : > { %13493 = vmatpush1.bf16.msra.mxu0 %v13492_v14 }
 0x7df   : > { %13503 = vmatprep.subr.bf16.mxu1 %v13502_v42 }
 0x7e0   : > { %13505 = vmatpush1.bf16.msra.mxu1 %v13504_v53 }
 0x7e1   : > { %12840 = vmatmul.mubr.msk.f32.vlgmr.msra.gmra.mrb[76].mxu0 %vm9443_vm14, %v9398_v28 }
 0x7e2   : > { %9523 = vmatprep.mubr.f32.mxu0 %v21731_v6 }
 0x7e3   : > { %12843 = vmatmul.mubr.msk.f32.vlgmr.msra.gmra.mrb[76].mxu1 %vm9443_vm14, %v9398_v28 }
 0x7e4   : > { %9606 = vmatprep.mubr.f32.mxu1 %v21731_v6 }
 0x7e5   : > { %12841 = vmatmul.mubr.msk.f32.gmra.mrb[78].mxu0 %vm9443_vm14, %v9399_v29 }
 0x7e6   : > { %9529 = vmatprep.mubr.f32.mxu0 %v21731_v6 }
 0x7e7   : > { %12844 = vmatmul.mubr.msk.f32.gmra.mrb[78].mxu1 %vm9443_vm14, %v9399_v29 }
 0x7e8   : > { %9612 = vmatprep.mubr.f32.mxu1 %v21731_v6 }
 0x7e9   : > { %12842 = vmatmul.mubr.msk.f32.gmra.mrb[80].mxu0 %vm9443_vm14, %v9400_v56  ;;  %v9431_v7 = vpop.permute.xlu0 %9430 }
 0x7ea   : > { %10012 = vmatprep.mubr.f32.mxu0 %v21731_v6  ;;  %v9436_v39 = vpop.permute.xlu1 %9435 }
 0x7eb   : > { %12845 = vmatmul.mubr.msk.f32.gmra.mrb[80].mxu1 %vm9443_vm14, %v9400_v56 }
 0x7ec   : > { %10101 = vmatprep.mubr.f32.mxu1 %v21731_v6 }
 0x7ed   : > { %v9441_v44 = vpop.permute.xlu0 %9440 }
 0x8b4   : > { %v9519_v8 = vpop.f32.mrb[76].mxu0 }
 0x8b5   : > { %v9520_v26 = vadd.f32 %v9519_v8, %v9431_v7  ;;  %v9521_v46 = vpop.f32.mrb[77].mxu0 }
 0x8b6   : > { %v9602_v30 = vpop.f32.mrb[76].mxu1  ;;  %v9522_v27 = vadd.f32 %v9521_v46, %v9431_v7 }
 0x8b7   : > { %v9603_v15 = vadd.f32 %v9602_v30, %v9431_v7  ;;  %v9604_v4 = vpop.f32.mrb[77].mxu1  ;;  %v9619_v58 = vmax.f32 %v9520_v26, 0.0 }
 0x8b8   : > { %v9605_v2 = vadd.f32 %v9604_v4, %v9431_v7  ;;  %v9620_v32 = vmax.f32 %v9522_v27, 0.0  ;;  %v9525_v34 = vpop.f32.mrb[78].mxu0 }
 0x8b9   : > { %v9621_v19 = vmax.f32 %v9603_v15, 0.0  ;;  %v9526_v31 = vadd.f32 %v9525_v34, %v9436_v39  ;;  %v9527_v43 = vpop.f32.mrb[79].mxu0  ;;  %v20034_v36 = vmul.f32 %v9619_v58, %v21727_v40  ;;  %v9911_v58 = vld [vmem:[%s21383_s11 + $0x148] sm:$0xff] }
 0x8ba   : > { %v9622_v37 = vmax.f32 %v9605_v2, 0.0  ;;  %v9608_v48 = vpop.f32.mrb[78].mxu1  ;;  %v9528_v54 = vadd.f32 %v9527_v43, %v9436_v39  ;;  %v20040_v41 = vmul.f32 %v9620_v32, %v21728_v22  ;;  %v9912_v2 = vld [vmem:[%s21383_s11 + $0x150] sm:$0xff]  ;;  %v9914_v32 = vld [vmem:[%s21383_s11 + $0x160] sm:$0xff] }
 0x8bb   : > { %v20037_v21 = vmul.f32 %v9621_v19, %v21729_v13  ;;  %v9609_v12 = vadd.f32 %v9608_v48, %v9436_v39  ;;  %v9610_v25 = vpop.f32.mrb[79].mxu1  ;;  %v9623_v60 = vmax.f32 %v9526_v31, 0.0 }
 0x8bc   : > { %v20043_v24 = vmul.f32 %v9622_v37, %v21730_v55  ;;  %v9611_v50 = vadd.f32 %v9610_v25, %v9436_v39  ;;  %v9624_v62 = vmax.f32 %v9528_v54, 0.0  ;;  %v9531_v51 = vpop.f32.mrb[80].mxu0  ;;  %v15745_v16 = vpack.i.bf16 %v20040_v41, %v20034_v36  ;;  %v9913_v39 = vld [vmem:[%s21383_s11 + $0x158] sm:$0xff] }
 0x8bd   : > { %v9625_v11 = vmax.f32 %v9609_v12, 0.0  ;;  %v15740_v45 = vpack.i.bf16 %v20037_v21, %v21731_v6  ;;  %v20048_v57 = vmul.f32 %v9623_v60, %v21727_v40  ;;  %v9532_v18 = vadd.f32 %v9531_v51, %v9441_v44  ;;  %v9533_v38 = vpop.f32.mrb[81].mxu0 }
 0x8be   : > { %v9626_v23 = vmax.f32 %v9611_v50, 0.0  ;;  %v9614_v10 = vpop.f32.mrb[80].mxu1  ;;  %v15750_v59 = vpack.i.bf16 %v21731_v6, %v20043_v24  ;;  %v20053_v63 = vmul.f32 %v9624_v62, %v21728_v22  ;;  %v9534_v61 = vadd.f32 %v9533_v38, %v9441_v44 }
 0x8bf   : > { %v20056_v0 = vmul.f32 %v9625_v11, %v21729_v13  ;;  %v9615_v35 = vadd.f32 %v9614_v10, %v9441_v44  ;;  %v9616_v5 = vpop.f32.mrb[81].mxu1  ;;  %15741 = vrot.lane.b32.xlu1 %v15740_v45, %s21680_s18  ;;  %v9627_v1 = vmax.f32 %v9532_v18, 0.0  ;;  %v15755_v56 = vpack.i.bf16 %v20037_v21, %v20040_v41 }
 0x8c0   : > { %v20060_v9 = vmul.f32 %v9626_v23, %v21730_v55  ;;  %v9617_v33 = vadd.f32 %v9616_v5, %v9441_v44  ;;  %15751 = vrot.lane.b32.xlu0 %v15750_v59, %s21680_s18  ;;  %v9628_v17 = vmax.f32 %v9534_v61, 0.0  ;;  %v15760_v20 = vpack.i.bf16 %v20053_v63, %v20048_v57 }
 0x8c1   : > { %v9629_v3 = vmax.f32 %v9615_v35, 0.0  ;;  %v15770_v47 = vpack.i.bf16 %v20056_v0, %v20053_v63  ;;  %v20070_v52 = vmul.f32 %v9627_v1, %v21727_v40  ;;  %v15780_v27 = vpack.i.bf16 %v20043_v24, %v20034_v36 }
 0x8c2   : > { %v9630_v49 = vmax.f32 %v9617_v33, 0.0  ;;  %v15765_v14 = vpack.i.bf16 %v20060_v9, %v20056_v0  ;;  %v20075_v42 = vmul.f32 %v9628_v17, %v21728_v22  ;;  %v15790_v15 = vpack.i.bf16 %v20048_v57, %v21731_v6 }
 0x8c3   : > { %v20078_v53 = vmul.f32 %v9629_v3, %v21729_v13  ;;  %15746 = vrot.lane.b32.xlu1 %v15745_v16, %s21680_s18  ;;  %v13516_v29 = vpack.c.bf16 %v20070_v52, %v20048_v57  ;;  %v15795_v4 = vpack.i.bf16 %v21731_v6, %v20060_v9 }
 0x8c4   : > { %v20082_v28 = vmul.f32 %v9630_v49, %v21730_v55  ;;  %15761 = vrot.lane.b32.xlu0 %v15760_v20, %s21680_s18  ;;  %v15785_v7 = vpack.i.bf16 %v20075_v42, %v20070_v52  ;;  %v13514_v8 = vpack.c.bf16 %v20075_v42, %v20053_v63 }
 0x8c5   : > { %v13532_v26 = vpack.c.bf16 %v20078_v53, %v20056_v0  ;;  %v15775_v30 = vpack.i.bf16 %v20078_v53, %v21731_v6  ;;  %v9871_v0 = vld [vmem:[%s21381_s9] sm:$0xff] }
 0x8c6   : > { %v13530_v46 = vpack.c.bf16 %v20082_v28, %v20060_v9 }
 0x8c7   : > { %15756 = vrot.lane.b32.xlu1 %v15755_v56, %s16216_s19 }
 0x8c8   : > { %15771 = vrot.lane.b32.xlu0 %v15770_v47, %s16216_s19 }
 0x8cb   : > { %15766 = vrot.lane.b32.xlu1 %v15765_v14, %s21680_s18 }
 0x8cc   : > { %15786 = vrot.lane.b32.xlu0 %v15785_v7, %s21680_s18 }
 0x8cf   : > { %15776 = vrot.lane.b32.xlu1 %v15775_v30, %s21680_s18 }
 0x8d0   : > { %9713 = vrot.lane.b32.xlu0 %v20082_v28, %s21680_s18 }
 0x8d3   : > { %15781 = vrot.lane.b32.xlu1 %v15780_v27, %s16216_s19 }
 0x8d4   : > { %15791 = vrot.lane.b32.xlu0 %v15790_v15, %s16216_s19 }
 0x8d7   : > { %15796 = vrot.lane.b32.xlu1 %v15795_v4, %s16216_s19 }
 0x8d8   : > { %9825 = vrot.lane.b32.xlu0 %v20070_v52, %s16216_s19 }
 0x8db   : > { %9829 = vrot.lane.b32.xlu1 %v20078_v53, %s16216_s19 }
 0x8dc   : > { %9827 = vrot.lane.b32.xlu0 %v20075_v42, %s16216_s19 }
 0x8df   : > { %9831 = vrot.lane.b32.xlu1 %v20082_v28, %s16216_s19 }
 0x8e0   : > { %9833 = vrot.lane.b32.xlu0 %v21731_v6, %s16216_s19 }
 0x8e3   : > { %9917 = vperm.xlu1 %14289, %v9911_v58  }
 0x8e4   : > { %9922 = vperm.xlu0 %14288, %v9912_v2  }
 0x8e7   : > { %9927 = vperm.xlu1 %14289, %v9913_v39  }
 0x8e8   : > { %9932 = vperm.xlu0 %14288, %v9914_v32  }
 0x8eb   : > { %15801 = vrot.lane.b32.xlu1 %v21731_v6, %s16224_s25 }
 0x8ec   : > { %15806 = vrot.lane.b32.xlu0 %v21731_v6, %s16224_s25 }
 0x8ef   : > { %15811 = vrot.lane.b32.xlu1 %v21731_v6, %s21680_s18 }
 0x8f0   : > { %15816 = vrot.lane.b32.xlu0 %v21731_v6, %s21680_s18 }
 0x8f3   : > { %15821 = vrot.lane.b32.xlu1 %v21731_v6, %s16225_s30 }
 0x8f4   : > { %15826 = vrot.lane.b32.xlu0 %v21731_v6, %s16225_s30 }
 0x8f7   : > { %15831 = vrot.lane.b32.xlu1 %v21731_v6, %s16226_s20 }
 0x8f8   : > { %15836 = vrot.lane.b32.xlu0 %v21731_v6, %s16226_s20 }
 0x931   : > { %v15742_v19 = vpop.permute.xlu1 %15741 }
 0x932   : > { %v15752_v34 = vpop.permute.xlu0 %15751  ;;  %v15743_v31 = vunpack.i.l.bf16 %v15742_v19  ;;  %v15744_v38 = vunpack.i.h.bf16 %v15742_v19 }
 0x933   : > { %v15754_v12 = vunpack.i.h.bf16 %v15752_v34  ;;  %v15753_v10 = vunpack.i.l.bf16 %v15752_v34 }
 0x935   : > { %v15747_v37 = vpop.permute.xlu1 %15746  ;;  %v9718_v17 = vsel %vm1913_vm1, %v15744_v38, %v15753_v10 }
 0x936   : > { %v15749_v43 = vunpack.i.h.bf16 %v15747_v37  ;;  %v15748_v48 = vunpack.i.l.bf16 %v15747_v37  ;;  %v15762_v54 = vpop.permute.xlu0 %15761 }
 0x937   : > { %v15764_v25 = vunpack.i.h.bf16 %v15762_v54  ;;  %v15763_v60 = vunpack.i.l.bf16 %v15762_v54 }
 0x938   : > { %v9715_v50 = vsel %vm1913_vm1, %v15743_v31, %v15748_v48  ;;  %v9716_v44 = vsel %vm1913_vm1, %v15748_v48, %v15749_v43  ;;  %v9717_v1 = vsel %vm1913_vm1, %v15749_v43, %v15744_v38 }
 0x939   : > { %v9719_v62 = vsel %vm1913_vm1, %v15754_v12, %v15763_v60  ;;  %v15757_v11 = vpop.permute.xlu1 %15756  ;;  %v9720_v51 = vsel %vm1913_vm1, %v15763_v60, %v15764_v25 }
 0x93a   : > { %v15772_v45 = vpop.permute.xlu0 %15771  ;;  %v13506_v23 = vpack.c.bf16 %v9720_v51, %v9716_v44  ;;  %v13508_v18 = vpack.c.bf16 %v9719_v62, %v9715_v50  ;;  %v15759_v3 = vunpack.i.h.bf16 %v15757_v11  ;;  %v15758_v20 = vunpack.i.l.bf16 %v15757_v11 }
 0x93b   : > { %v15774_v14 = vunpack.i.h.bf16 %v15772_v45  ;;  %v15773_v15 = vunpack.i.l.bf16 %v15772_v45 }
 0x93c   : > { %13507 = vmatprep.subr.bf16.mxu0 %v13506_v23 }
 0x93d   : > { %v15767_v59 = vpop.permute.xlu1 %15766  ;;  %13509 = vmatpush1.bf16.msra.mxu0 %v13508_v18 }
 0x93e   : > { %v15769_v61 = vunpack.i.h.bf16 %v15767_v59  ;;  %v15768_v35 = vunpack.i.l.bf16 %v15767_v59  ;;  %v15787_v5 = vpop.permute.xlu0 %15786  ;;  %v9872_v59 = vld [vmem:[%s21381_s9 + $0x8] sm:$0xff] }
 0x93f   : > { %v15789_v33 = vunpack.i.h.bf16 %v15787_v5  ;;  %v15788_v16 = vunpack.i.l.bf16 %v15787_v5 }
 0x940   : > { %v9721_v47 = vsel %vm1913_vm1, %v15764_v25, %v15768_v35  ;;  %v9722_v49 = vsel %vm1913_vm1, %v15768_v35, %v15769_v61  ;;  %v9840_v25 = vsel %vm2590_vm6, %v15773_v15, %v15774_v14  ;;  %v9873_v61 = vld [vmem:[%s21381_s9 + $0x10] sm:$0xff]  ;;  %v9874_v35 = vld [vmem:[%s21381_s9 + $0x18] sm:$0xff] }
 0x941   : > { %v15777_v56 = vpop.permute.xlu1 %15776  ;;  %v13522_v7 = vpack.c.bf16 %v9722_v49, %v9718_v17  ;;  %v9724_v30 = vsel %vm1913_vm1, %v15788_v16, %v15789_v33  ;;  %v13524_v27 = vpack.c.bf16 %v9721_v47, %v9717_v1 }
 0x942   : > { %v15779_v4 = vunpack.i.h.bf16 %v15777_v56  ;;  %v15778_v58 = vunpack.i.l.bf16 %v15777_v56  ;;  %v9714_v2 = vpop.permute.xlu0 %9713  ;;  %v13510_v39 = vpack.c.bf16 %v20040_v41, %v9724_v30  ;;  %v9836_v41 = vsel %vm2590_vm6, %v15758_v20, %v15759_v3 }
 0x943   : > { %13523 = vmatprep.subr.bf16.mxu1 %v13522_v7 }
 0x944   : > { %v9725_v32 = vsel %vm1913_vm1, %v15789_v33, %v15779_v4  ;;  %v9723_v19 = vsel %vm1913_vm1, %v15778_v58, %v15788_v16  ;;  %v9726_v34 = vsel %vm1913_vm1, %v15779_v4, %v9714_v2  ;;  %13511 = vmatprep.subr.bf16.mxu0 %v13510_v39  ;;  %13525 = vmatpush1.bf16.msra.mxu1 %v13524_v27 }
 0x945   : > { %v13526_v37 = vpack.c.bf16 %v20043_v24, %v9726_v34  ;;  %v15782_v31 = vpop.permute.xlu1 %15781  ;;  %v13512_v43 = vpack.c.bf16 %v20034_v36, %v9723_v19  ;;  %v13528_v48 = vpack.c.bf16 %v20037_v21, %v9725_v32  ;;  %v13518_v36 = vpack.c.bf16 %v9840_v25, %v9836_v41 }
 0x946   : > { %v15783_v54 = vunpack.i.l.bf16 %v15782_v31  ;;  %v15792_v12 = vpop.permute.xlu0 %15791  ;;  %v15784_v60 = vunpack.i.h.bf16 %v15782_v31 }
 0x947   : > { %v15794_v50 = vunpack.i.h.bf16 %v15792_v12  ;;  %13513 = vmatpush1.bf16.msra.mxu0 %v13512_v43  ;;  %13527 = vmatprep.subr.bf16.mxu1 %v13526_v37  ;;  %v15793_v44 = vunpack.i.l.bf16 %v15792_v12 }
 0x948   : > { %13515 = vmatprep.subr.bf16.mxu0 %v13514_v8  ;;  %13529 = vmatpush1.bf16.msra.mxu1 %v13528_v48  ;;  %v9835_v21 = vsel %vm2590_vm6, %v15783_v54, %v15758_v20  ;;  %v9837_v23 = vsel %vm2590_vm6, %v15759_v3, %v15784_v60 }
 0x949   : > { %v15797_v24 = vpop.permute.xlu1 %15796  ;;  %13531 = vmatprep.subr.bf16.mxu1 %v13530_v46  ;;  %v9839_v62 = vsel %vm2590_vm6, %v15794_v50, %v15773_v15  ;;  %v9838_v9 = vsel %vm2590_vm6, %v15784_v60, %v15793_v44 }
 0x94a   : > { %v15799_v11 = vunpack.i.h.bf16 %v15797_v24  ;;  %v15798_v51 = vunpack.i.l.bf16 %v15797_v24  ;;  %v9826_v45 = vpop.permute.xlu0 %9825  ;;  %v13520_v8 = vpack.c.bf16 %v9839_v62, %v9835_v21 }
 0x94b   : > { %13517 = vmatpush1.bf16.msra.mxu0 %v13516_v29 }
 0x94c   : > { %v9841_v63 = vsel %vm2590_vm6, %v15774_v14, %v15798_v51  ;;  %13519 = vmatprep.subr.bf16.mxu0 %v13518_v36  ;;  %13533 = vmatpush1.bf16.msra.mxu1 %v13532_v26  ;;  %v9842_v42 = vsel %vm2590_vm6, %v15798_v51, %v15799_v11 }
 0x94d   : > { %v9830_v28 = vpop.permute.xlu1 %9829  ;;  %v13534_v46 = vpack.c.bf16 %v9842_v42, %v9838_v9  ;;  %v13536_v18 = vpack.c.bf16 %v9841_v63, %v9837_v23 }
 0x94e   : > { %v9828_v38 = vpop.permute.xlu0 %9827 }
 0x94f   : > { %13521 = vmatpush1.bf16.msra.mxu0 %v13520_v8  ;;  %13535 = vmatprep.subr.bf16.mxu1 %v13534_v46  ;;  %v9844_v57 = vsel %vm2590_vm6, %v9828_v38, %v9830_v28  ;;  %v9843_v29 = vsel %vm2590_vm6, %v9826_v45, %v9828_v38 }
 0x950   : > { %9964 = vmatprep.subr.mxu0 %v9844_v57  ;;  %13537 = vmatpush1.bf16.msra.mxu1 %v13536_v18 }
 0x951   : > { %v9832_v52 = vpop.permute.xlu1 %9831 }
 0x952   : > { %v9834_v53 = vpop.permute.xlu0 %9833  ;;  %v9845_v10 = vsel %vm2590_vm6, %v9830_v28, %v9832_v52 }
 0x953   : > { %9965 = vmatpush1.msra.mxu0 %v9843_v29  ;;  %v9846_v26 = vsel %vm2590_vm6, %v9832_v52, %v9834_v53 }
 0x954   : > { %12846 = vmatmul.mubr.msk.f32.vlgmr.msra.gmra.mrb[82].mxu0 %vm9935_vm15, %v9871_v0  ;;  %10053 = vmatprep.subr.mxu1 %v9846_v26 }
 0x955   : > { %10054 = vmatpush1.msra.mxu1 %v9845_v10  ;;  %10018 = vmatprep.mubr.f32.mxu0 %v21731_v6 }
 0x956   : > { %12850 = vmatmul.mubr.msk.f32.vlgmr.msra.gmra.mrb[82].mxu1 %vm9935_vm15, %v9871_v0 }
 0x957   : > { %10107 = vmatprep.mubr.f32.mxu1 %v21731_v6 }
 0x958   : > { %12847 = vmatmul.mubr.msk.f32.gmra.mrb[84].mxu0 %vm9935_vm15, %v9872_v59 }
 0x959   : > { %10024 = vmatprep.mubr.f32.mxu0 %v21731_v6 }
 0x95a   : > { %12851 = vmatmul.mubr.msk.f32.gmra.mrb[84].mxu1 %vm9935_vm15, %v9872_v59 }
 0x95b   : > { %10113 = vmatprep.mubr.f32.mxu1 %v21731_v6 }
 0x95c   : > { %12848 = vmatmul.mubr.msk.f32.gmra.mrb[86].mxu0 %vm9935_vm15, %v9873_v61 }
 0x95d   : > { %10030 = vmatprep.mubr.f32.mxu0 %v21731_v6 }
 0x95e   : > { %12852 = vmatmul.mubr.msk.f32.gmra.mrb[86].mxu1 %vm9935_vm15, %v9873_v61 }
 0x95f   : > { %10119 = vmatprep.mubr.f32.mxu1 %v21731_v6 }
 0x960   : > { %12849 = vmatmul.mubr.msk.f32.gmra.mrb[88].mxu0 %vm9935_vm15, %v9874_v35 }
 0x962   : > { %12853 = vmatmul.mubr.msk.f32.gmra.mrb[88].mxu1 %vm9935_vm15, %v9874_v35  ;;  %v9918_v5 = vpop.permute.xlu1 %9917 }
 0x963   : > { %v9923_v14 = vpop.permute.xlu0 %9922 }
 0x966   : > { %v9928_v41 = vpop.permute.xlu1 %9927 }
 0x967   : > { %v9933_v23 = vpop.permute.xlu0 %9932 }
 0xa27   : > { %v10014_v1 = vpop.f32.mrb[82].mxu0 }
 0xa28   : > { %v10015_v33 = vadd.f32 %v10014_v1, %v9918_v5  ;;  %v10016_v16 = vpop.f32.mrb[83].mxu0 }
 0xa29   : > { %v10017_v17 = vadd.f32 %v10016_v16, %v9918_v5  ;;  %v10103_v3 = vpop.f32.mrb[82].mxu1 }
 0xa2a   : > { %v10126_v20 = vmax.f32 %v10015_v33, 0.0  ;;  %v10104_v47 = vadd.f32 %v10103_v3, %v9918_v5  ;;  %v10105_v49 = vpop.f32.mrb[83].mxu1 }
 0xa2b   : > { %v10127_v56 = vmax.f32 %v10017_v17, 0.0  ;;  %v10106_v7 = vadd.f32 %v10105_v49, %v9918_v5  ;;  %v10020_v30 = vpop.f32.mrb[84].mxu0 }
 0xa2c   : > { %v20220_v27 = vmul.f32 %v10126_v20, %v21727_v40  ;;  %v10128_v15 = vmax.f32 %v10104_v47, 0.0  ;;  %v10021_v4 = vadd.f32 %v10020_v30, %v9923_v14  ;;  %v10022_v58 = vpop.f32.mrb[85].mxu0 }
 0xa2d   : > { %v20223_v2 = vmul.f32 %v10127_v56, %v21728_v22  ;;  %v10129_v39 = vmax.f32 %v10106_v7, 0.0  ;;  %v10023_v32 = vadd.f32 %v10022_v58, %v9923_v14  ;;  %v10109_v19 = vpop.f32.mrb[84].mxu1 }
 0xa2e   : > { %21732 = vst [vmem:[#allocation11_spill] sm:$0xff] %v20220_v27  ;;  %v20226_v34 = vmul.f32 %v10128_v15, %v21729_v13  ;;  %v10110_v37 = vadd.f32 %v10109_v19, %v9923_v14  ;;  %v10111_v31 = vpop.f32.mrb[85].mxu1  ;;  %v15840_v43 = vpack.i.bf16 %v20220_v27, %v21731_v6  ;;  %v10130_v25 = vmax.f32 %v10021_v4, 0.0 }
 0xa2f   : > { %v10131_v48 = vmax.f32 %v10023_v32, 0.0  ;;  %v10112_v54 = vadd.f32 %v10111_v31, %v9923_v14  ;;  %v10026_v12 = vpop.f32.mrb[86].mxu0  ;;  %v20234_v24 = vmul.f32 %v10129_v39, %v21730_v55  ;;  %v15870_v57 = vpack.i.bf16 %v20223_v2, %v20220_v27 }
 0xa30   : > { %21733 = vst [vmem:[#allocation21_spill] sm:$0xff] %v20226_v34  ;;  %v10132_v60 = vmax.f32 %v10110_v37, 0.0  ;;  %v10028_v50 = vpop.f32.mrb[87].mxu0  ;;  %15841 = vrot.lane.b32.xlu1 %v15840_v43, %s16224_s25  ;;  %v15855_v44 = vpack.i.bf16 %v20226_v34, %v20223_v2  ;;  %v10027_v36 = vadd.f32 %v10026_v12, %v9928_v41  ;;  %v20247_v52 = vmul.f32 %v10130_v25, %v21727_v40  ;;  %v1429_v25 = vld [vmem:[%s21383_s11 + $0xd8] sm:$0xff] }
 0xa31   : > { %21734 = vst [vmem:[#allocation39_spill] sm:$0xff] %v20234_v24  ;;  %v10029_v21 = vadd.f32 %v10028_v50, %v9928_v41  ;;  %v10115_v62 = vpop.f32.mrb[86].mxu1  ;;  %v20237_v11 = vmul.f32 %v10131_v48, %v21728_v22  ;;  %v10133_v63 = vmax.f32 %v10112_v54, 0.0  ;;  %v20251_v26 = vpack.i.bf16 %v20234_v24, %v20226_v34 }
 0xa32   : > { %v10116_v51 = vadd.f32 %v10115_v62, %v9928_v41  ;;  %v10117_v45 = vpop.f32.mrb[87].mxu1  ;;  %15856 = vrot.lane.b32.xlu0 %v15855_v44, %s16224_s25  ;;  %v20241_v8 = vmul.f32 %v10132_v60, %v21729_v13  ;;  %21736 = vst [vmem:[#allocation22_spill] sm:$0xff] %v20247_v52  ;;  %v10134_v0 = vmax.f32 %v10027_v36, 0.0  ;;  %v15905_v56 = vpack.i.bf16 %v20247_v52, %v20220_v27 }
 0xa33   : > { %v10135_v9 = vmax.f32 %v10029_v21, 0.0  ;;  %v10118_v42 = vadd.f32 %v10117_v45, %v9928_v41  ;;  %v10032_v28 = vpop.f32.mrb[88].mxu0  ;;  %v20255_v35 = vmul.f32 %v10133_v63, %v21730_v55  ;;  %v15925_v4 = vpack.i.bf16 %v20237_v11, %v20247_v52  ;;  %v20402_v63 = vpop.permute.xlu1 %15801 }
 0xa34   : > { %21735 = vst [vmem:[#allocation19_spill] sm:$0xff] %v20241_v8  ;;  %v10136_v46 = vmax.f32 %v10116_v51, 0.0  ;;  %v10033_v18 = vadd.f32 %v10032_v28, %v9933_v23  ;;  %v10034_v38 = vpop.f32.mrb[89].mxu0  ;;  %15846 = vrot.lane.b32.xlu1 %v15840_v43, %s21680_s18  ;;  %v15910_v20 = vpack.i.bf16 %v20241_v8, %v20237_v11  ;;  %v20267_v47 = vmul.f32 %v10134_v0, %v21727_v40 }
 0xa35   : > { %v10035_v53 = vadd.f32 %v10034_v38, %v9933_v23  ;;  %v10121_v29 = vpop.f32.mrb[88].mxu1  ;;  %v10137_v10 = vmax.f32 %v10118_v42, 0.0  ;;  %v20258_v5 = vmul.f32 %v10135_v9, %v21728_v22  ;;  %v20283_v15 = vpack.i.bf16 %v20255_v35, %v20241_v8  ;;  %v20406_v9 = vpop.permute.xlu0 %15806 }
 0xa36   : > { %v10122_v59 = vadd.f32 %v10121_v29, %v9933_v23  ;;  %v10123_v61 = vpop.f32.mrb[89].mxu1  ;;  %15861 = vrot.lane.b32.xlu0 %v15855_v44, %s21680_s18  ;;  %v20261_v16 = vmul.f32 %v10136_v46, %v21729_v13  ;;  %v10138_v17 = vmax.f32 %v10033_v18, 0.0  ;;  %21739 = vst [vmem:[#allocation14_spill] sm:$0xff] %v20267_v47  ;;  %v20315_v37 = vpack.i.bf16 %v20237_v11, %v20223_v2  ;;  %v11301_v29 = vld [vmem:[%s21382_s10 + $0x8] sm:$0xff] }
 0xa37   : > { %21737 = vst [vmem:[#allocation23_spill] sm:$0xff] %v20258_v5  ;;  %v10139_v1 = vmax.f32 %v10035_v53, 0.0  ;;  %v10124_v33 = vadd.f32 %v10123_v61, %v9933_v23  ;;  %v20270_v14 = vmul.f32 %v10137_v10, %v21730_v55  ;;  %v15890_v48 = vpack.i.bf16 %v20247_v52, %v21731_v6  ;;  %v20412_v42 = vpop.permute.xlu1 %15811  ;;  %11926 = vmatprep.mubr.f32.mxu1 %v11301_v29 }
 0xa38   : > { %21738 = vst [vmem:[#allocation16_spill] sm:$0xff] %v20261_v16  ;;  %v10140_v3 = vmax.f32 %v10122_v59, 0.0  ;;  %15851 = vrot.lane.b32.xlu1 %v15840_v43, %s16225_s30  ;;  %v20288_v58 = vmul.f32 %v10138_v17, %v21727_v40  ;;  %v15960_v39 = vpack.i.bf16 %v20261_v16, %v20258_v5  ;;  %v15885_v40 = vpack.i.bf16 %v21731_v6, %v20234_v24 }
 0xa39   : > { %v10141_v49 = vmax.f32 %v10124_v33, 0.0  ;;  %21740 = vst [vmem:[#allocation24_spill] sm:$0xff] %v20270_v14  ;;  %v20276_v7 = vmul.f32 %v10139_v1, %v21728_v22  ;;  %v20302_v32 = vpack.i.bf16 %v20270_v14, %v20261_v16  ;;  %v15940_v62 = vpack.i.bf16 %v21731_v6, %v20255_v35  ;;  %v20416_v28 = vpop.permute.xlu0 %15816  ;;  %11604 = vmatprep.mubr.f32.mxu0 %v11301_v29 }
 0xa3a   : > { %15866 = vrot.lane.b32.xlu0 %v15855_v44, %s16225_s30  ;;  %v20279_v30 = vmul.f32 %v10140_v3, %v21729_v13  ;;  %21743 = vst [vmem:[#allocation18_spill] sm:$0xff] %v20288_v58  ;;  %v15975_v13 = vpack.i.bf16 %v20258_v5, %v20267_v47  ;;  %v15945_v51 = vpack.i.bf16 %v20267_v47, %v21731_v6  ;;  %v15813_v41 = vunpack.i.l.bf16 %v20412_v42 }
 0xa3b   : > { %21741 = vst [vmem:[#allocation28_spill] sm:$0xff] %v20276_v7  ;;  %v20294_v22 = vmul.f32 %v10141_v49, %v21730_v55  ;;  %v16010_v55 = vpack.i.bf16 %v20288_v58, %v20267_v47  ;;  %v16055_v31 = vpack.i.bf16 %v20276_v7, %v20288_v58  ;;  %v20328_v54 = vpack.i.bf16 %v20276_v7, %v20258_v5  ;;  %v20424_v18 = vpop.permute.xlu1 %15821 }
 0xa3c   : > { %21742 = vst [vmem:[#allocation12_spill] sm:$0xff] %v20279_v30  ;;  %15871 = vrot.lane.b32.xlu1 %v15870_v57, %s16226_s20  ;;  %v20308_v19 = vpack.i.bf16 %v20279_v30, %v20276_v7  ;;  %v15990_v45 = vpack.i.bf16 %v21731_v6, %v20270_v14  ;;  %v15995_v23 = vpack.i.bf16 %v20288_v58, %v21731_v6 }
 0xa3d   : > { %21744 = vst [vmem:[#allocation27_spill] sm:$0xff] %v20294_v22  ;;  %v20321_v43 = vpack.i.bf16 %v20294_v22, %v20279_v30  ;;  %v16095_v46 = vpack.i.bf16 %v21731_v6, %v20294_v22  ;;  %v20427_v38 = vpop.permute.xlu0 %15826 }
 0xa3e   : > { %15876 = vrot.lane.b32.xlu0 %v20251_v26, %s16226_s20 }
 0xa3f   : > { %v20433_v57 = vpop.permute.xlu1 %15831 }
 0xa40   : > { %15881 = vrot.lane.b32.xlu1 %v15855_v44, %s16227_s13 }
 0xa41   : > { %v20437_v0 = vpop.permute.xlu0 %15836 }
 0xa42   : > { %15886 = vrot.lane.b32.xlu0 %v15885_v40, %s16227_s13 }
 0xa44   : > { %15891 = vrot.lane.b32.xlu1 %v15890_v48, %s16224_s25 }
 0xa46   : > { %15911 = vrot.lane.b32.xlu0 %v15910_v20, %s16224_s25 }
 0xa48   : > { %15896 = vrot.lane.b32.xlu1 %v15890_v48, %s21680_s18 }
 0xa4a   : > { %15916 = vrot.lane.b32.xlu0 %v15910_v20, %s21680_s18 }
 0xa4c   : > { %15901 = vrot.lane.b32.xlu1 %v15890_v48, %s16225_s30 }
 0xa4e   : > { %15921 = vrot.lane.b32.xlu0 %v15910_v20, %s16225_s30 }
 0xa50   : > { %15906 = vrot.lane.b32.xlu1 %v15905_v56, %s16227_s13 }
 0xa52   : > { %15931 = vrot.lane.b32.xlu0 %v20283_v15, %s16226_s20 }
 0xa54   : > { %15926 = vrot.lane.b32.xlu1 %v15925_v4, %s16226_s20 }
 0xa56   : > { %15941 = vrot.lane.b32.xlu0 %v15940_v62, %s16227_s13 }
 0xa58   : > { %15936 = vrot.lane.b32.xlu1 %v15910_v20, %s16227_s13 }
 0xa5a   : > { %15946 = vrot.lane.b32.xlu0 %v15945_v51, %s16224_s25 }
 0xa5c   : > { %15961 = vrot.lane.b32.xlu1 %v15960_v39, %s16224_s25 }
 0xa5e   : > { %15951 = vrot.lane.b32.xlu0 %v15945_v51, %s21680_s18 }
 0xa60   : > { %15966 = vrot.lane.b32.xlu1 %v15960_v39, %s21680_s18 }
 0xa62   : > { %15956 = vrot.lane.b32.xlu0 %v15945_v51, %s16225_s30 }
 0xa64   : > { %15971 = vrot.lane.b32.xlu1 %v15960_v39, %s16225_s30 }
 0xa66   : > { %15976 = vrot.lane.b32.xlu0 %v15975_v13, %s16226_s20 }
 0xa68   : > { %15981 = vrot.lane.b32.xlu1 %v20302_v32, %s16226_s20 }
 0xa6a   : > { %15986 = vrot.lane.b32.xlu0 %v15960_v39, %s16227_s13 }
 0xa6c   : > { %15991 = vrot.lane.b32.xlu1 %v15990_v45, %s16227_s13 }
 0xa6e   : > { %15996 = vrot.lane.b32.xlu0 %v15995_v23, %s16224_s25 }
 0xa70   : > { %16016 = vrot.lane.b32.xlu1 %v20308_v19, %s16224_s25  ;;  %s16229_s25 = smov 91  }
 0xa72   : > { %16001 = vrot.lane.b32.xlu0 %v15995_v23, %s21680_s18 }
 0xa74   : > { %16021 = vrot.lane.b32.xlu1 %v20251_v26, %s16228_s26 }
 0xa76   : > { %16006 = vrot.lane.b32.xlu0 %v15995_v23, %s16225_s30 }
 0xa78   : > { %16031 = vrot.lane.b32.xlu1 %v20308_v19, %s21680_s18 }
 0xa7a   : > { %16011 = vrot.lane.b32.xlu0 %v16010_v55, %s16227_s13  ;;  %v15803_v55 = vunpack.i.l.bf16 %v20402_v63 }
 0xa7c   : > { %16036 = vrot.lane.b32.xlu1 %v20283_v15, %s16228_s26 }
 0xa7e   : > { %16026 = vrot.lane.b32.xlu0 %v21731_v6, %s16228_s26 }
 0xa80   : > { %16046 = vrot.lane.b32.xlu1 %v20308_v19, %s16225_s30 }
 0xa82   : > { %16041 = vrot.lane.b32.xlu0 %v21731_v6, %s16228_s26 }
 0xa84   : > { %16051 = vrot.lane.b32.xlu1 %v20315_v37, %s16228_s26 }
 0xa86   : > { %16056 = vrot.lane.b32.xlu0 %v16055_v31, %s16226_s20 }
 0xa88   : > { %16066 = vrot.lane.b32.xlu1 %v20321_v43, %s16226_s20 }
 0xa8a   : > { %16061 = vrot.lane.b32.xlu0 %v20302_v32, %s16228_s26 }
 0xa8c   : > { %16071 = vrot.lane.b32.xlu1 %v21731_v6, %s16228_s26 }
 0xa8e   : > { %16086 = vrot.lane.b32.xlu0 %v21731_v6, %s16216_s19 }
 0xa90   : > { %16076 = vrot.lane.b32.xlu1 %v21731_v6, %s16228_s26 }
 0xa92   : > { %16091 = vrot.lane.b32.xlu0 %v20308_v19, %s16227_s13  ;;  %v15804_v19 = vunpack.i.h.bf16 %v20402_v63 }
 0xa94   : > { %16081 = vrot.lane.b32.xlu1 %v20251_v26, %s16216_s19 }
 0xa96   : > { %16106 = vrot.lane.b32.xlu0 %v21731_v6, %s16216_s19 }
 0xa98   : > { %16096 = vrot.lane.b32.xlu1 %v16095_v46, %s16227_s13 }
 0xa9a   : > { %16116 = vrot.lane.b32.xlu0 %v20302_v32, %s16216_s19 }
 0xa9c   : > { %16101 = vrot.lane.b32.xlu1 %v20283_v15, %s16216_s19 }
 0xa9e   : > { %16131 = vrot.lane.b32.xlu0 %v20321_v43, %s16228_s26 }
 0xaa0   : > { %16111 = vrot.lane.b32.xlu1 %v20315_v37, %s16216_s19 }
 0xaa2   : > { %16136 = vrot.lane.b32.xlu0 %v20328_v54, %s16228_s26  ;;  %v15842_v53 = vpop.permute.xlu1 %15841 }
 0xaa3   : > { %v15844_v4 = vunpack.i.h.bf16 %v15842_v53  ;;  %v15843_v39 = vunpack.i.l.bf16 %v15842_v53 }
 0xaa4   : > { %v15857_v10 = vpop.permute.xlu0 %15856  ;;  %16121 = vrot.lane.b32.xlu1 %v21731_v6, %s16216_s19 }
 0xaa5   : > { %v15859_v31 = vunpack.i.h.bf16 %v15857_v10  ;;  %v15858_v62 = vunpack.i.l.bf16 %v15857_v10  ;;  %v10319_v23 = vsel %vm10318_vm2, %v15803_v55, %v15843_v39  ;;  %v10320_v63 = vsel %vm10318_vm2, %v15843_v39, %v15844_v4 }
 0xaa6   : > { %16141 = vrot.lane.b32.xlu0 %v20321_v43, %s16216_s19  ;;  %v20450_v59 = vpop.permute.xlu1 %15846 }
 0xaa7   : > { %v10321_v55 = vsel %vm10318_vm2, %v15844_v4, %v15858_v62  ;;  %v10322_v50 = vsel %vm10318_vm2, %v15858_v62, %v15859_v31 }
 0xaa8   : > { %v20452_v61 = vpop.permute.xlu0 %15861  ;;  %16126 = vrot.lane.b32.xlu1 %v21731_v6, %s16216_s19 }
 0xaaa   : > { %16146 = vrot.lane.b32.xlu0 %v20328_v54, %s16216_s19  ;;  %v20458_v1 = vpop.permute.xlu1 %15851 }
 0xaac   : > { %v20460_v33 = vpop.permute.xlu0 %15866  ;;  %16151 = vrot.lane.b32.xlu1 %v20251_v26, %s16229_s25 }
 0xaae   : > { %16156 = vrot.lane.b32.xlu0 %v21731_v6, %s16229_s25  ;;  %v20466_v17 = vpop.permute.xlu1 %15871 }
 0xaaf   : > { %v21456_v20 = vunpack.i.h.bf16 %v20466_v17 }
 0xab0   : > { %v20468_v3 = vpop.permute.xlu0 %15876  ;;  %16161 = vrot.lane.b32.xlu1 %v20283_v15, %s16229_s25 }
 0xab1   : > { %v21455_v49 = vunpack.i.l.bf16 %v20468_v3 }
 0xab2   : > { %16166 = vrot.lane.b32.xlu0 %v21731_v6, %s16229_s25  ;;  %v20476_v56 = vpop.permute.xlu1 %15881 }
 0xab3   : > { %v20483_v26 = vsel %vm10704_vm0, %v21456_v20, %v21455_v49  ;;  %v21454_v13 = vunpack.i.h.bf16 %v20476_v56  ;;  %v21453_v62 = vunpack.i.l.bf16 %v20476_v56  ;;  %v1430_v20 = vld [vmem:[%s21383_s11 + $0xe0] sm:$0xff] }
 0xab4   : > { %v20485_v15 = vpop.permute.xlu0 %15886  ;;  %16171 = vrot.lane.b32.xlu1 %v20315_v37, %s16229_s25 }
 0xab5   : > { %v21452_v40 = vunpack.i.l.bf16 %v20485_v15 }
 0xab6   : > { %16176 = vrot.lane.b32.xlu0 %v20302_v32, %s16229_s25  ;;  %v15892_v48 = vpop.permute.xlu1 %15891 }
 0xab7   : > { %v20500_v37 = vsel %vm10865_vm3, %v21454_v13, %v21452_v40  ;;  %v15894_v51 = vunpack.i.h.bf16 %v15892_v48  ;;  %v15893_v45 = vunpack.i.l.bf16 %v15892_v48  ;;  %v15848_v40 = vunpack.i.l.bf16 %v20450_v59 }
 0xab8   : > { %21745 = vst [vmem:[#allocation29_spill] sm:$0xff] %v20500_v37  ;;  %v15912_v46 = vpop.permute.xlu0 %15911  ;;  %16181 = vrot.lane.b32.xlu1 %v21731_v6, %s16229_s25  ;;  %v15863_v13 = vunpack.i.l.bf16 %v20452_v61 }
 0xab9   : > { %v10323_v32 = vsel %vm10318_vm2, %v15804_v19, %v15893_v45  ;;  %v15914_v53 = vunpack.i.h.bf16 %v15912_v46  ;;  %v15913_v29 = vunpack.i.l.bf16 %v15912_v46  ;;  %v10324_v10 = vsel %vm10318_vm2, %v15893_v45, %v15894_v51 }
 0xaba   : > { %v13540_v21 = vpack.c.bf16 %v10323_v32, %v10319_v23  ;;  %16191 = vrot.lane.b32.xlu0 %v20321_v43, %s16229_s25  ;;  %v20510_v36 = vpop.permute.xlu1 %15896  ;;  %v13538_v48 = vpack.c.bf16 %v10324_v10, %v10320_v63  ;;  %v1416_v43 = vld [vmem:[%s21383_s11 + $0x70] sm:$0xff]  ;;  %v1422_v10 = vld [vmem:[%s21383_s11 + $0xa0] sm:$0xff]  ;;  %v20632_v16 = vsel %vm1913_vm1, %v15813_v41, %v15848_v40 }
 0xabb   : > { %v10325_v44 = vsel %vm10318_vm2, %v15894_v51, %v15913_v29  ;;  %v10326_v39 = vsel %vm10318_vm2, %v15913_v29, %v15914_v53  ;;  %v1419_v51 = vld [vmem:[%s21383_s11 + $0x88] sm:$0xff]  ;;  %v1420_v63 = vld [vmem:[%s21383_s11 + $0x90] sm:$0xff]  ;;  %v1421_v53 = vld [vmem:[%s21383_s11 + $0x98] sm:$0xff]  ;;  %v15899_v12 = vunpack.i.h.bf16 %v20510_v36  ;;  %v15898_v49 = vunpack.i.l.bf16 %v20510_v36 }
 0xabc   : > { %v13612_v19 = vpack.c.bf16 %v10325_v44, %v10321_v55  ;;  %v20516_v60 = vpop.permute.xlu0 %15916  ;;  %16186 = vrot.lane.b32.xlu1 %v21731_v6, %s16229_s25  ;;  %13539 = vmatprep.subr.bf16.mxu0 %v13538_v48  ;;  %v13610_v45 = vpack.c.bf16 %v10326_v39, %v10322_v50  ;;  %v1417_v44 = vld [vmem:[%s21383_s11 + $0x78] sm:$0xff]  ;;  %v1418_v50 = vld [vmem:[%s21383_s11 + $0x80] sm:$0xff]  ;;  %v15853_v36 = vunpack.i.l.bf16 %v20458_v1 }
 0xabd   : > { %13541 = vmatpush1.bf16.msra.mxu0 %v13540_v21  ;;  %v20648_v41 = vsel %vm1913_vm1, %v15898_v49, %v15899_v12 }
 0xabe   : > { %16196 = vrot.lane.b32.xlu0 %v20328_v54, %s16229_s25  ;;  %13611 = vmatprep.subr.bf16.mxu1 %v13610_v45  ;;  %v20525_v4 = vpop.permute.xlu1 %15901 }
 0xabf   : > { %13613 = vmatpush1.bf16.msra.mxu1 %v13612_v19  ;;  %v1423_v19 = vld [vmem:[%s21383_s11 + $0xa8] sm:$0xff] }
 0xac0   : > { %v20530_v31 = vpop.permute.xlu0 %15921  ;;  %1434 = vperm.xlu1 %14289, %v1416_v43  }
 0xac2   : > { %1439 = vperm.xlu0 %14288, %v1417_v44   ;;  %v15907_v21 = vpop.permute.xlu1 %15906  ;;  %v1424_v44 = vld [vmem:[%s21383_s11 + $0xb0] sm:$0xff] }
 0xac3   : > { %v15908_v54 = vunpack.i.l.bf16 %v15907_v21  ;;  %v15909_v55 = vunpack.i.h.bf16 %v15907_v21 }
 0xac4   : > { %v20539_v23 = vpop.permute.xlu0 %15931  ;;  %1444 = vperm.xlu1 %14289, %v1418_v50   ;;  %v15823_v50 = vunpack.i.l.bf16 %v20424_v18 }
 0xac5   : > { %v20544_v46 = vsel %vm10865_vm3, %v15908_v54, %v21453_v62  ;;  %v1425_v54 = vld [vmem:[%s21383_s11 + $0xb8] sm:$0xff] }
 0xac6   : > { %21746 = vst [vmem:[#allocation15_spill] sm:$0xff] %v20544_v46  ;;  %1449 = vperm.xlu0 %14288, %v1419_v51   ;;  %v20549_v32 = vpop.permute.xlu1 %15926  ;;  %v15854_v46 = vunpack.i.h.bf16 %v20458_v1  ;;  %v15919_v1 = vunpack.i.h.bf16 %v20516_v60  ;;  %v20659_v14 = vsel %vm10575_vm4, %v15823_v50, %v15853_v36 }
 0xac8   : > { %v20554_v29 = vpop.permute.xlu0 %15941  ;;  %1454 = vperm.xlu1 %14289, %v1420_v63   ;;  %v1426_v63 = vld [vmem:[%s21383_s11 + $0xc0] sm:$0xff] }
 0xaca   : > { %1459 = vperm.xlu0 %14288, %v1421_v53   ;;  %v20559_v48 = vpop.permute.xlu1 %15936 }
 0xacb   : > { %v21451_v39 = vunpack.i.l.bf16 %v20559_v48 }
 0xacc   : > { %v20565_v45 = vpop.permute.xlu0 %15946  ;;  %1464 = vperm.xlu1 %14289, %v1422_v10   ;;  %v1427_v10 = vld [vmem:[%s21383_s11 + $0xc8] sm:$0xff] }
 0xacd   : > { %v20570_v43 = vsel %vm10865_vm3, %v15909_v55, %v21451_v39  ;;  %v15814_v39 = vunpack.i.h.bf16 %v20412_v42  ;;  %v1431_v42 = vld [vmem:[%s21383_s11 + $0xe8] sm:$0xff]  ;;  %v15949_v30 = vunpack.i.h.bf16 %v20565_v45  ;;  %v15948_v47 = vunpack.i.l.bf16 %v20565_v45  ;;  %v12377_v45 = vld [vmem:[%s21383_s11 + $0x170] sm:$0xff] }
 0xace   : > { %21747 = vst [vmem:[#allocation13_spill] sm:$0xff] %v20570_v43  ;;  %1469 = vperm.xlu0 %14288, %v1423_v19   ;;  %v20577_v21 = vpop.permute.xlu1 %15961  ;;  %v1428_v19 = vld [vmem:[%s21383_s11 + $0xd0] sm:$0xff]  ;;  %v12376_v43 = vld [vmem:[%s21383_s11 + $0x168] sm:$0xff] }
 0xacf   : > { %v20667_v22 = vsel %vm1913_vm1, %v15814_v39, %v15898_v49  ;;  %v15903_v39 = vunpack.i.l.bf16 %v20525_v4 }
 0xad0   : > { %v20582_v51 = vpop.permute.xlu0 %15951  ;;  %1474 = vperm.xlu1 %14289, %v1424_v44  }
 0xad2   : > { %1479 = vperm.xlu0 %14288, %v1425_v54   ;;  %v20587_v53 = vpop.permute.xlu1 %15966  ;;  %v15808_v54 = vunpack.i.l.bf16 %v20406_v9 }
 0xad4   : > { %v20592_v55 = vpop.permute.xlu0 %15956  ;;  %1484 = vperm.xlu1 %14289, %v1426_v63  }
 0xad6   : > { %1489 = vperm.xlu0 %14288, %v1427_v10   ;;  %v20597_v44 = vpop.permute.xlu1 %15971  ;;  %v15849_v10 = vunpack.i.h.bf16 %v20450_v59 }
 0xad8   : > { %v20608_v62 = vpop.permute.xlu0 %15976  ;;  %1494 = vperm.xlu1 %14289, %v1428_v19   ;;  %v15864_v19 = vunpack.i.h.bf16 %v20452_v61  ;;  %v20638_v6 = vsel %vm1913_vm1, %v15849_v10, %v15863_v13  ;;  %v20645_v63 = vsel %vm1913_vm1, %v15848_v40, %v15849_v10  ;;  %v21748_v40 = vunpack.i.l.bf16 %v20460_v33 }
 0xad9   : > { %v13546_v49 = vpack.c.bf16 %v20648_v41, %v20645_v63  ;;  %v10328_v63 = vsel %vm10318_vm2, %v15948_v47, %v15949_v30  ;;  %v21749_v41 = vunpack.i.h.bf16 %v20406_v9 }
 0xada   : > { %1499 = vperm.xlu0 %14288, %v1429_v25   ;;  %v20621_v59 = vpop.permute.xlu1 %15981  ;;  %v15918_v25 = vunpack.i.l.bf16 %v20516_v60  ;;  %v20656_v60 = vsel %vm1913_vm1, %v15863_v13, %v15864_v19  ;;  %v20664_v10 = vsel %vm10575_vm4, %v15854_v46, %v21748_v40  ;;  %v15964_v19 = vunpack.i.h.bf16 %v20577_v21 }
 0xadc   : > { %v20635_v61 = vpop.permute.xlu0 %15986  ;;  %1504 = vperm.xlu1 %14289, %v1430_v20   ;;  %v15963_v20 = vunpack.i.l.bf16 %v20577_v21  ;;  %v20676_v13 = vsel %vm1913_vm1, %v15899_v12, %v15918_v25  ;;  %v10454_v12 = vsel %vm1913_vm1, %v15918_v25, %v15919_v1  ;;  %v15954_v21 = vunpack.i.h.bf16 %v20582_v51  ;;  %v12379_v25 = vld [vmem:[%s21383_s11 + $0x180] sm:$0xff] }
 0xadd   : > { %v15953_v1 = vunpack.i.l.bf16 %v20582_v51 }
 0xade   : > { %1509 = vperm.xlu0 %14288, %v1431_v42   ;;  %v20653_v58 = vpop.permute.xlu1 %15991  ;;  %v20673_v42 = vsel %vm10575_vm4, %v15853_v36, %v15854_v46  ;;  %v12378_v46 = vld [vmem:[%s21383_s11 + $0x178] sm:$0xff]  ;;  %v10327_v36 = vsel %vm10318_vm2, %v15808_v54, %v15948_v47  ;;  %v10329_v50 = vsel %vm10318_vm2, %v15949_v30, %v15963_v20  ;;  %v10330_v47 = vsel %vm10318_vm2, %v15963_v20, %v15964_v19 }
 0xadf   : > { %v21750_v20 = vunpack.i.h.bf16 %v20525_v4 }
 0xae0   : > { %v15997_v37 = vpop.permute.xlu0 %15996  ;;  %12394 = vperm.xlu1 %14289, %v12376_v43  }
 0xae1   : > { %v15999_v40 = vunpack.i.h.bf16 %v15997_v37  ;;  %v15998_v34 = vunpack.i.l.bf16 %v15997_v37  ;;  %v20711_v19 = vsel %vm10575_vm4, %v15903_v39, %v21750_v20  ;;  %v15958_v20 = vunpack.i.l.bf16 %v20592_v55 }
 0xae2   : > { %12399 = vperm.xlu0 %14288, %v12377_v45   ;;  %v16017_v43 = vpop.permute.xlu1 %16016 }
 0xae3   : > { %v10331_v37 = vsel %vm10318_vm2, %v21749_v41, %v15998_v34  ;;  %v16019_v8 = vunpack.i.h.bf16 %v16017_v43  ;;  %v16018_v5 = vunpack.i.l.bf16 %v16017_v43  ;;  %v10332_v54 = vsel %vm10318_vm2, %v15998_v34, %v15999_v40  ;;  %v12380_v43 = vld [vmem:[%s21383_s11 + $0x188] sm:$0xff] }
 0xae4   : > { %v13544_v7 = vpack.c.bf16 %v10331_v37, %v10327_v36  ;;  %v16002_v27 = vpop.permute.xlu0 %16001  ;;  %12404 = vperm.xlu1 %14289, %v12378_v46   ;;  %v13542_v45 = vpack.c.bf16 %v10332_v54, %v10328_v63  ;;  %v15869_v34 = vunpack.i.h.bf16 %v20460_v33  ;;  %v15924_v63 = vunpack.i.h.bf16 %v20530_v31 }
 0xae5   : > { %v10333_v30 = vsel %vm10318_vm2, %v15999_v40, %v16018_v5  ;;  %v16004_v9 = vunpack.i.h.bf16 %v16002_v27  ;;  %v16003_v41 = vunpack.i.l.bf16 %v16002_v27  ;;  %v10334_v52 = vsel %vm10318_vm2, %v16018_v5, %v16019_v8  ;;  %v12381_v5 = vld [vmem:[%s21383_s11 + $0x190] sm:$0xff] }
 0xae6   : > { %v13616_v24 = vpack.c.bf16 %v10333_v30, %v10329_v50  ;;  %12409 = vperm.xlu0 %14288, %v12379_v25   ;;  %v20706_v51 = vpop.permute.xlu1 %16021  ;;  %13543 = vmatprep.subr.bf16.mxu0 %v13542_v45  ;;  %v13614_v46 = vpack.c.bf16 %v10334_v52, %v10330_v47  ;;  %v15873_v27 = vunpack.i.l.bf16 %v20466_v17  ;;  %v13548_v40 = vpack.c.bf16 %v20667_v22, %v20632_v16 }
 0xae7   : > { %v13620_v8 = vpack.c.bf16 %v20676_v13, %v20638_v6  ;;  %13545 = vmatpush1.bf16.msra.mxu0 %v13544_v7  ;;  %v10460_v52 = vsel %vm1913_vm1, %v16003_v41, %v16004_v9  ;;  %v21751_v50 = vunpack.i.h.bf16 %v20424_v18  ;;  %v15968_v37 = vunpack.i.l.bf16 %v20587_v53  ;;  %v12382_v18 = vld [vmem:[%s21383_s11 + $0x198] sm:$0xff] }
 0xae8   : > { %v20729_v16 = vpop.permute.xlu0 %16006  ;;  %12414 = vperm.xlu1 %14289, %v12380_v43   ;;  %13547 = vmatprep.subr.bf16.mxu0 %v13546_v49  ;;  %v13618_v6 = vpack.c.bf16 %v10454_v12, %v20656_v60  ;;  %v15923_v7 = vunpack.i.l.bf16 %v20530_v31  ;;  %v15969_v22 = vunpack.i.h.bf16 %v20587_v53  ;;  %v10456_v13 = vsel %vm1913_vm1, %v15953_v1, %v15954_v21 }
 0xae9   : > { %v20725_v36 = vsel %vm10575_vm4, %v21751_v50, %v15903_v39  ;;  %13615 = vmatprep.subr.bf16.mxu1 %v13614_v46  ;;  %v13554_v39 = vpack.c.bf16 %v20711_v19, %v20673_v42  ;;  %v15929_v25 = vunpack.i.h.bf16 %v20549_v32  ;;  %v15928_v49 = vunpack.i.l.bf16 %v20549_v32  ;;  %v12383_v42 = vld [vmem:[%s21383_s11 + $0x1a0] sm:$0xff] }
 0xaea   : > { %v21752_v60 = vunpack.i.h.bf16 %v20416_v28  ;;  %13617 = vmatpush1.bf16.msra.mxu1 %v13616_v24  ;;  %12419 = vperm.xlu0 %14288, %v12381_v5   ;;  %v16032_v53 = vpop.permute.xlu1 %16031  ;;  %v13550_v12 = vpack.c.bf16 %v10460_v52, %v10456_v13  ;;  %v16009_v54 = vunpack.i.h.bf16 %v20729_v16  ;;  %v16008_v45 = vunpack.i.l.bf16 %v20729_v16  ;;  %v12384_v52 = vld [vmem:[%s21383_s11 + $0x1a8] sm:$0xff] }
 0xaeb   : > { %v16034_v47 = vunpack.i.h.bf16 %v16032_v53  ;;  %v16033_v30 = vunpack.i.l.bf16 %v16032_v53  ;;  %13619 = vmatprep.subr.bf16.mxu1 %v13618_v6  ;;  %13549 = vmatpush1.bf16.msra.mxu0 %v13548_v40  ;;  %v21753_v43 = vunpack.i.l.bf16 %v20416_v28  ;;  %v10457_v24 = vsel %vm1913_vm1, %v15954_v21, %v15968_v37 }
 0xaec   : > { %v10459_v31 = vsel %vm1913_vm1, %v21752_v60, %v16003_v41  ;;  %v15959_v46 = vunpack.i.h.bf16 %v20592_v55  ;;  %v20756_v19 = vpop.permute.xlu0 %16011  ;;  %12424 = vperm.xlu1 %14289, %v12382_v18   ;;  %13551 = vmatprep.subr.bf16.mxu0 %v13550_v12  ;;  %v10458_v28 = vsel %vm1913_vm1, %v15968_v37, %v15969_v22  ;;  %v15834_v21 = vunpack.i.h.bf16 %v20433_v57  ;;  %v12385_v22 = vld [vmem:[%s21383_s11 + $0x1b0] sm:$0xff] }
 0xaed   : > { %v10455_v41 = vsel %vm1913_vm1, %v21753_v43, %v15953_v1  ;;  %v10461_v40 = vsel %vm1913_vm1, %v16004_v9, %v16033_v30  ;;  %v10462_v1 = vsel %vm1913_vm1, %v16033_v30, %v16034_v47  ;;  %v10583_v18 = vsel %vm10575_vm4, %v15923_v7, %v15924_v63 }
 0xaee   : > { %v13552_v5 = vpack.c.bf16 %v10459_v31, %v10455_v41  ;;  %v13624_v50 = vpack.c.bf16 %v10461_v40, %v10457_v24  ;;  %13621 = vmatpush1.bf16.msra.mxu1 %v13620_v8  ;;  %12429 = vperm.xlu0 %14288, %v12383_v42   ;;  %v20765_v55 = vpop.permute.xlu1 %16036  ;;  %v13622_v6 = vpack.c.bf16 %v10462_v1, %v10458_v28  ;;  %v21754_v9 = vunpack.i.h.bf16 %v20525_v4 }
 0xaef   : > { %v15934_v60 = vunpack.i.h.bf16 %v20539_v23  ;;  %v15933_v37 = vunpack.i.l.bf16 %v20539_v23  ;;  %v10589_v8 = vsel %vm10575_vm4, %v16008_v45, %v16009_v54  ;;  %v13556_v63 = vpack.c.bf16 %v20725_v36, %v20659_v14 }
 0xaf0   : > { %v10582_v13 = vsel %vm10575_vm4, %v21754_v9, %v15923_v7  ;;  %13553 = vmatpush1.bf16.msra.mxu0 %v13552_v5  ;;  %v15973_v4 = vunpack.i.l.bf16 %v20597_v44  ;;  %v20782_v31 = vpop.permute.xlu0 %16026  ;;  %12434 = vperm.xlu1 %14289, %v12384_v52   ;;  %v21755_v23 = vunpack.i.l.bf16 %v20460_v33  ;;  %v21756_v53 = vunpack.i.h.bf16 %v20466_v17  ;;  %v12387_v52 = vld [vmem:[%s21383_s11 + $0x1c0] sm:$0xff] }
 0xaf1   : > { %13555 = vmatprep.subr.bf16.mxu0 %v13554_v39  ;;  %v15974_v14 = vunpack.i.h.bf16 %v20597_v44  ;;  %13623 = vmatprep.subr.bf16.mxu1 %v13622_v6  ;;  %v12386_v39 = vld [vmem:[%s21383_s11 + $0x1b8] sm:$0xff]  ;;  %v10585_v47 = vsel %vm10575_vm4, %v15958_v20, %v15959_v46  ;;  %v10710_v33 = vsel %vm10704_vm0, %v15928_v49, %v15929_v25  ;;  %v13628_v30 = vpack.c.bf16 %v10582_v13, %v20664_v10 }
 0xaf2   : > { %v10579_v7 = vsel %vm10575_vm4, %v21755_v23, %v15869_v34  ;;  %v10706_v12 = vsel %vm10704_vm0, %v15873_v27, %v21756_v53  ;;  %v15879_v34 = vunpack.i.h.bf16 %v20468_v3  ;;  %v21757_v42 = vunpack.i.h.bf16 %v20427_v38  ;;  %13625 = vmatpush1.bf16.msra.mxu1 %v13624_v50  ;;  %12439 = vperm.xlu0 %14288, %v12385_v22   ;;  %v16047_v43 = vpop.permute.xlu1 %16046 }
 0xaf3   : > { %v13626_v36 = vpack.c.bf16 %v10583_v18, %v10579_v7  ;;  %v13558_v41 = vpack.c.bf16 %v10589_v8, %v10585_v47  ;;  %v10709_v24 = vsel %vm10704_vm0, %v15834_v21, %v15928_v49  ;;  %v16049_v5 = vunpack.i.h.bf16 %v16047_v43  ;;  %v12389_v8 = vld [vmem:[%s21383_s11 + $0x1d0] sm:$0xff] }
 0xaf4   : > { %v10588_v44 = vsel %vm10575_vm4, %v21757_v42, %v16008_v45  ;;  %v16048_v40 = vunpack.i.l.bf16 %v16047_v43  ;;  %13557 = vmatpush1.bf16.msra.mxu0 %v13556_v63  ;;  %v10712_v10 = vsel %vm10704_vm0, %v15933_v37, %v15934_v60  ;;  %v15833_v28 = vunpack.i.l.bf16 %v20433_v57  ;;  %v20817_v6 = vpop.permute.xlu0 %16041  ;;  %12444 = vperm.xlu1 %14289, %v12386_v39   ;;  %v12388_v57 = vld [vmem:[%s21383_s11 + $0x1c8] sm:$0xff] }
 0xaf5   : > { %13627 = vmatprep.subr.bf16.mxu1 %v13626_v36  ;;  %v21758_v45 = vunpack.i.l.bf16 %v20427_v38  ;;  %v10586_v50 = vsel %vm10575_vm4, %v15959_v46, %v15973_v4  ;;  %13559 = vmatprep.subr.bf16.mxu0 %v13558_v41  ;;  %v13562_v49 = vpack.c.bf16 %v10710_v33, %v10706_v12  ;;  %v10587_v38 = vsel %vm10575_vm4, %v15973_v4, %v15974_v14 }
 0xaf6   : > { %v10590_v18 = vsel %vm10575_vm4, %v16009_v54, %v16048_v40  ;;  %v15979_v46 = vunpack.i.h.bf16 %v20608_v62  ;;  %v15978_v9 = vunpack.i.l.bf16 %v20608_v62  ;;  %13629 = vmatpush1.bf16.msra.mxu1 %v13628_v30  ;;  %12449 = vperm.xlu0 %14288, %v12387_v52   ;;  %v20829_v60 = vpop.permute.xlu1 %16051  ;;  %v15839_v54 = vunpack.i.h.bf16 %v20437_v0 }
 0xaf7   : > { %v10584_v1 = vsel %vm10575_vm4, %v21758_v45, %v15958_v20  ;;  %v10591_v20 = vsel %vm10575_vm4, %v16048_v40, %v16049_v5  ;;  %v13632_v13 = vpack.c.bf16 %v10590_v18, %v10586_v50  ;;  %v10705_v22 = vsel %vm10704_vm0, %v15833_v28, %v15873_v27 }
 0xaf8   : > { %v13560_v21 = vpack.c.bf16 %v10588_v44, %v10584_v1  ;;  %v13630_v16 = vpack.c.bf16 %v10591_v20, %v10587_v38  ;;  %v21759_v63 = vunpack.i.l.bf16 %v20468_v3  ;;  %v15838_v4 = vunpack.i.l.bf16 %v20437_v0  ;;  %v16057_v53 = vpop.permute.xlu0 %16056  ;;  %12454 = vperm.xlu1 %14289, %v12388_v57   ;;  %v12390_v0 = vld [vmem:[%s21383_s11 + $0x1d8] sm:$0xff] }
 0xaf9   : > { %v10711_v23 = vsel %vm10704_vm0, %v15929_v25, %v15933_v37  ;;  %v13564_v7 = vpack.c.bf16 %v10709_v24, %v10705_v22  ;;  %v15984_v27 = vunpack.i.h.bf16 %v20621_v59  ;;  %v15983_v12 = vunpack.i.l.bf16 %v20621_v59 }
 0xafa   : > { %13561 = vmatpush1.bf16.msra.mxu0 %v13560_v21  ;;  %v10708_v62 = vsel %vm10704_vm0, %v21759_v63, %v15879_v34  ;;  %v16059_v14 = vunpack.i.h.bf16 %v16057_v53  ;;  %v16058_v36 = vunpack.i.l.bf16 %v16057_v53  ;;  %13631 = vmatprep.subr.bf16.mxu1 %v13630_v16  ;;  %v15944_v3 = vunpack.i.h.bf16 %v20554_v29  ;;  %v16067_v37 = vpop.permute.xlu1 %16066  ;;  %v12391_v34 = vld [vmem:[%s21383_s11 + $0x1e0] sm:$0xff] }
 0xafb   : > { %13563 = vmatprep.subr.bf16.mxu0 %v13562_v49  ;;  %v13634_v17 = vpack.c.bf16 %v10712_v10, %v10708_v62  ;;  %v15943_v32 = vunpack.i.l.bf16 %v20554_v29  ;;  %v10713_v25 = vsel %vm10704_vm0, %v15838_v4, %v15978_v9  ;;  %13633 = vmatpush1.bf16.msra.mxu1 %v13632_v13  ;;  %v10714_v39 = vsel %vm10704_vm0, %v15978_v9, %v15979_v46 }
 0xafc   : > { %12459 = vperm.xlu0 %14288, %v12389_v8   ;;  %v10717_v59 = vsel %vm10704_vm0, %v15839_v54, %v16058_v36  ;;  %v16069_v47 = vunpack.i.h.bf16 %v16067_v37  ;;  %v16068_v33 = vunpack.i.l.bf16 %v16067_v37  ;;  %v10718_v30 = vsel %vm10704_vm0, %v16058_v36, %v16059_v14  ;;  %v20861_v43 = vpop.permute.xlu0 %16061  ;;  %12464 = vperm.xlu1 %14289, %v12390_v0   ;;  %v21771_v36 = vld [vmem:[#allocation23_spill] sm:$0xff] }
 0xafd   : > { %13635 = vmatprep.subr.bf16.mxu1 %v13634_v17  ;;  %v15889_v29 = vunpack.i.h.bf16 %v20485_v15  ;;  %v13636_v42 = vpack.c.bf16 %v10711_v23, %v20483_v26  ;;  %v13568_v44 = vpack.c.bf16 %v10717_v59, %v10713_v25  ;;  %v13566_v41 = vpack.c.bf16 %v10718_v30, %v10714_v39  ;;  %v21774_v25 = vld [vmem:[#allocation21_spill] sm:$0xff]  ;;  %v21778_v30 = vld [vmem:[#allocation24_spill] sm:$0xff] }
 0xafe   : > { %13565 = vmatpush1.bf16.msra.mxu0 %v13564_v7  ;;  %v10715_v24 = vsel %vm10704_vm0, %v15979_v46, %v15983_v12  ;;  %v10719_v5 = vsel %vm10704_vm0, %v16059_v14, %v16068_v33  ;;  %v10716_v40 = vsel %vm10704_vm0, %v15983_v12, %v15984_v27  ;;  %v10720_v52 = vsel %vm10704_vm0, %v16068_v33, %v16069_v47  ;;  %v20868_v45 = vpop.permute.xlu1 %16071  ;;  %v21767_v7 = vld [vmem:[#allocation22_spill] sm:$0xff]  ;;  %v21770_v14 = vld [vmem:[#allocation28_spill] sm:$0xff]  ;;  %v21776_v59 = vld [vmem:[#allocation29_spill] sm:$0xff] }
 0xaff   : > { %v15939_v10 = vunpack.i.h.bf16 %v20559_v48  ;;  %v13640_v28 = vpack.c.bf16 %v10719_v5, %v10715_v24  ;;  %13637 = vmatpush1.bf16.msra.mxu1 %v13636_v42  ;;  %v13638_v26 = vpack.c.bf16 %v10720_v52, %v10716_v40  ;;  %13567 = vmatprep.subr.bf16.mxu0 %v13566_v41  ;;  %v10873_v1 = vsel %vm10865_vm3, %v15943_v32, %v15944_v3  ;;  %v21780_v41 = vld [vmem:[#allocation18_spill] sm:$0xff] }
 0xb00   : > { %12469 = vperm.xlu0 %14288, %v12391_v34   ;;  %v20871_v50 = vpop.permute.xlu0 %16086  ;;  %v21760_v49 = vpack.c.bf16 %v20237_v11, %v20223_v2  ;;  %v21761_v21 = vunpack.i.h.bf16 %v20476_v56  ;;  %v21762_v18 = vunpack.i.l.bf16 %v20476_v56  ;;  %v21763_v38 = vunpack.i.l.bf16 %v20485_v15  ;;  %v21764_v15 = vld [vmem:[#allocation39_spill] sm:$0xff]  ;;  %v21781_v24 = vld [vmem:[#allocation14_spill] sm:$0xff] }
 0xb01   : > { %13639 = vmatprep.subr.bf16.mxu1 %v13638_v26  ;;  %v20885_v46 = vsel %vm10865_vm3, %v15939_v10, %v15943_v32  ;;  %v16039_v9 = vunpack.i.h.bf16 %v20765_v55  ;;  %v16038_v13 = vunpack.i.l.bf16 %v20765_v55  ;;  %v15989_v16 = vunpack.i.h.bf16 %v20635_v61  ;;  %v21773_v32 = vld [vmem:[#allocation19_spill] sm:$0xff] }
 0xb02   : > { %13569 = vmatpush1.bf16.msra.mxu0 %v13568_v44  ;;  %v10867_v57 = vsel %vm10865_vm3, %v21762_v18, %v21761_v21  ;;  %v10869_v20 = vsel %vm10865_vm3, %v21763_v38, %v15889_v29  ;;  %v20889_v2 = vpop.permute.xlu1 %16076  ;;  %v15988_v56 = vunpack.i.l.bf16 %v20635_v61  ;;  %v15993_v54 = vunpack.i.l.bf16 %v20653_v58  ;;  %v21768_v61 = vld [vmem:[#allocation11_spill] sm:$0xff]  ;;  %v21784_v38 = vld [vmem:[#allocation16_spill] sm:$0xff] }
 0xb03   : > { %13571 = vmatprep.subr.bf16.mxu0 %v21760_v49  ;;  %13641 = vmatpush1.bf16.msra.mxu1 %v13640_v28  ;;  %v13650_v11 = vpack.c.bf16 %v10873_v1, %v10869_v20  ;;  %v21765_v22 = vpack.c.bf16 %v20255_v35, %v21764_v15  ;;  %v21766_v8 = vunpack.i.l.bf16 %v20559_v48  ;;  %v15994_v55 = vunpack.i.h.bf16 %v20653_v58  ;;  %v21777_v34 = vld [vmem:[#allocation27_spill] sm:$0xff] }
 0xb04   : > { %v16024_v62 = vunpack.i.h.bf16 %v20706_v51  ;;  %v16023_v4 = vunpack.i.l.bf16 %v20706_v51  ;;  %v16013_v23 = vunpack.i.l.bf16 %v20756_v19  ;;  %v21769_v53 = vpack.c.bf16 %v21767_v7, %v21768_v61  ;;  %v16092_v17 = vpop.permute.xlu0 %16091 }
 0xb05   : > { %13643 = vmatprep.subr.bf16.mxu1 %v21765_v22  ;;  %v10871_v63 = vsel %vm10865_vm3, %v21766_v8, %v15939_v10  ;;  %v16029_v35 = vunpack.i.h.bf16 %v20782_v31  ;;  %v16028_v27 = vunpack.i.l.bf16 %v20782_v31  ;;  %v16094_v48 = vunpack.i.h.bf16 %v16092_v17 }
 0xb06   : > { %13573 = vmatpush1.bf16.msra.mxu0 %v21769_v53  ;;  %v16093_v12 = vunpack.i.l.bf16 %v16092_v17  ;;  %v21772_v58 = vpack.c.bf16 %v21770_v14, %v21771_v36  ;;  %v16044_v0 = vunpack.i.h.bf16 %v20817_v6  ;;  %v16043_v51 = vunpack.i.l.bf16 %v20817_v6  ;;  %v20918_v39 = vpop.permute.xlu1 %16081 }
 0xb07   : > { %v16053_v3 = vunpack.i.l.bf16 %v20829_v60  ;;  %v21775_v37 = vpack.c.bf16 %v21773_v32, %v21774_v25  ;;  %v11000_v31 = vsel %vm10994_vm5, %v16038_v13, %v16039_v9  ;;  %v13652_v47 = vpack.c.bf16 %v20885_v46, %v21776_v59 }
 0xb08   : > { %13575 = vmatprep.subr.bf16.mxu0 %v21772_v58  ;;  %v10876_v33 = vsel %vm10865_vm3, %v15989_v16, %v15993_v54  ;;  %v21779_v29 = vpack.c.bf16 %v21777_v34, %v21778_v30  ;;  %v13578_v6 = vpack.c.bf16 %v10871_v63, %v10867_v57  ;;  %v10875_v42 = vsel %vm10865_vm3, %v15988_v56, %v15989_v16  ;;  %v20932_v40 = vpop.permute.xlu0 %16106  ;;  %v21783_v57 = vld [vmem:[#allocation12_spill] sm:$0xff] }
 0xb09   : > { %13645 = vmatpush1.bf16.msra.mxu1 %v21775_v37  ;;  %v16054_v44 = vunpack.i.h.bf16 %v20829_v60  ;;  %v21782_v5 = vpack.c.bf16 %v21780_v41, %v21781_v24  ;;  %v10879_v52 = vsel %vm10865_vm3, %v16093_v12, %v16094_v48  ;;  %v10996_v10 = vsel %vm10994_vm5, %v16023_v4, %v16024_v62 }
 0xb0a   : > { %13647 = vmatprep.subr.bf16.mxu1 %v21779_v29  ;;  %v10877_v28 = vsel %vm10865_vm3, %v15993_v54, %v15994_v55  ;;  %v16014_v26 = vunpack.i.h.bf16 %v20756_v19  ;;  %v10874_v1 = vsel %vm10865_vm3, %v16013_v23, %v15988_v56  ;;  %v20940_v49 = vsel %vm10994_vm5, %v16024_v62, %v16028_v27  ;;  %v16097_v46 = vpop.permute.xlu1 %16096  ;;  %v21786_v62 = vld [vmem:[#allocation13_spill] sm:$0xff] }
 0xb0b   : > { %13577 = vmatpush1.bf16.msra.mxu0 %v21782_v5  ;;  %v13586_v60 = vpack.c.bf16 %v11000_v31, %v10996_v10  ;;  %v20943_v21 = vsel %vm10994_vm5, %v16039_v9, %v16043_v51  ;;  %v10995_v18 = vsel %vm10994_vm5, %v16053_v3, %v16023_v4  ;;  %v21785_v20 = vpack.c.bf16 %v21783_v57, %v21784_v38  ;;  %v21787_v4 = vld [vmem:[#allocation15_spill] sm:$0xff] }
 0xb0c   : > { %13579 = vmatprep.subr.bf16.mxu0 %v13578_v6  ;;  %v10998_v16 = vsel %vm10994_vm5, %v16028_v27, %v16029_v35  ;;  %v11002_v19 = vsel %vm10994_vm5, %v16043_v51, %v16044_v0  ;;  %v10878_v56 = vsel %vm10865_vm3, %v16014_v26, %v16093_v12  ;;  %v16099_v54 = vunpack.i.h.bf16 %v16097_v46  ;;  %v20959_v7 = vpop.permute.xlu0 %16116 }
 0xb0d   : > { %13649 = vmatpush1.bf16.msra.mxu1 %v21785_v20  ;;  %v16098_v15 = vunpack.i.l.bf16 %v16097_v46  ;;  %v13582_v22 = vpack.c.bf16 %v10879_v52, %v10875_v42  ;;  %v10999_v9 = vsel %vm10994_vm5, %v16054_v44, %v16038_v13  ;;  %v16064_v8 = vunpack.i.h.bf16 %v20861_v43 }
 0xb0e   : > { %13651 = vmatprep.subr.bf16.mxu1 %v13650_v11  ;;  %v16063_v63 = vunpack.i.l.bf16 %v20861_v43  ;;  %v16074_v55 = vunpack.i.h.bf16 %v20868_v45  ;;  %v21788_v23 = vpack.c.bf16 %v21786_v62, %v21787_v4  ;;  %v16079_v61 = vunpack.i.h.bf16 %v20889_v2  ;;  %v16102_v27 = vpop.permute.xlu1 %16101 }
 0xb0f   : > { %v16078_v53 = vunpack.i.l.bf16 %v20889_v2  ;;  %v10880_v11 = vsel %vm10865_vm3, %v16094_v48, %v16098_v15  ;;  %v10881_v13 = vsel %vm10865_vm3, %v16098_v15, %v16099_v54  ;;  %v16073_v17 = vunpack.i.l.bf16 %v20868_v45 }
 0xb10   : > { %13581 = vmatpush1.bf16.msra.mxu0 %v21788_v23  ;;  %v13584_v43 = vpack.c.bf16 %v10878_v56, %v10874_v1  ;;  %v13656_v35 = vpack.c.bf16 %v10880_v11, %v10876_v33  ;;  %v13654_v12 = vpack.c.bf16 %v10881_v13, %v10877_v28  ;;  %v16089_v14 = vunpack.i.h.bf16 %v20871_v50  ;;  %v16132_v45 = vpop.permute.xlu0 %16131 }
 0xb11   : > { %13583 = vmatprep.subr.bf16.mxu0 %v13582_v22  ;;  %13653 = vmatpush1.bf16.msra.mxu1 %v13652_v47  ;;  %v16088_v36 = vunpack.i.l.bf16 %v20871_v50  ;;  %v16109_v58 = vunpack.i.h.bf16 %v20932_v40  ;;  %v16108_v2 = vunpack.i.l.bf16 %v20932_v40  ;;  %v13660_v48 = vpack.c.bf16 %v20943_v21, %v20940_v49 }
 0xb12   : > { %v16104_v0 = vunpack.i.h.bf16 %v16102_v27  ;;  %v16103_v51 = vunpack.i.l.bf16 %v16102_v27  ;;  %13655 = vmatprep.subr.bf16.mxu1 %v13654_v12  ;;  %v13658_v3 = vpack.c.bf16 %v11002_v19, %v10998_v16  ;;  %v13588_v32 = vpack.c.bf16 %v10999_v9, %v10995_v18  ;;  %v16112_v33 = vpop.permute.xlu1 %16111 }
 0xb13   : > { %v16134_v25 = vunpack.i.h.bf16 %v16132_v45  ;;  %v16133_v37 = vunpack.i.l.bf16 %v16132_v45  ;;  %v11010_v31 = vsel %vm10994_vm5, %v16078_v53, %v16079_v61  ;;  %v11005_v50 = vsel %vm10994_vm5, %v16064_v8, %v16073_v17 }
 0xb14   : > { %13585 = vmatpush1.bf16.msra.mxu0 %v13584_v43  ;;  %v16084_v59 = vunpack.i.h.bf16 %v20918_v39  ;;  %v16083_v47 = vunpack.i.l.bf16 %v20918_v39  ;;  %v11004_v34 = vsel %vm10994_vm5, %v16063_v63, %v16064_v8  ;;  %v11006_v29 = vsel %vm10994_vm5, %v16073_v17, %v16074_v55  ;;  %v16137_v41 = vpop.permute.xlu0 %16136 }
 0xb15   : > { %13587 = vmatprep.subr.bf16.mxu0 %v13586_v60  ;;  %13657 = vmatpush1.bf16.msra.mxu1 %v13656_v35  ;;  %v11008_v30 = vsel %vm10994_vm5, %v16133_v37, %v16134_v25  ;;  %v11126_v6 = vsel %vm2590_vm6, %v16088_v36, %v16089_v14  ;;  %v11130_v42 = vsel %vm2590_vm6, %v16108_v2, %v16109_v58  ;;  %v16114_v40 = vunpack.i.h.bf16 %v16112_v33 }
 0xb16   : > { %13659 = vmatprep.subr.bf16.mxu1 %v13658_v3  ;;  %v11009_v44 = vsel %vm10994_vm5, %v16134_v25, %v16078_v53  ;;  %v13590_v24 = vpack.c.bf16 %v11008_v30, %v11004_v34  ;;  %v13662_v5 = vpack.c.bf16 %v11010_v31, %v11006_v29  ;;  %v11128_v39 = vsel %vm2590_vm6, %v16103_v51, %v16104_v0  ;;  %v16122_v49 = vpop.permute.xlu1 %16121 }
 0xb17   : > { %v16113_v52 = vunpack.i.l.bf16 %v16112_v33  ;;  %v16139_v10 = vunpack.i.h.bf16 %v16137_v41  ;;  %v16138_v28 = vunpack.i.l.bf16 %v16137_v41  ;;  %v16119_v26 = vunpack.i.h.bf16 %v20959_v7  ;;  %v11304_v33 = vld [vmem:[%s21382_s10 + $0x20] sm:$0xff] }
 0xb18   : > { %13589 = vmatpush1.bf16.msra.mxu0 %v13588_v32  ;;  %v16118_v1 = vunpack.i.l.bf16 %v20959_v7  ;;  %v11124_v60 = vsel %vm2590_vm6, %v16083_v47, %v16084_v59  ;;  %v13666_v21 = vpack.c.bf16 %v11130_v42, %v11126_v6  ;;  %v11129_v18 = vsel %vm2590_vm6, %v16104_v0, %v16108_v2  ;;  %v16142_v54 = vpop.permute.xlu0 %16141 }
 0xb19   : > { %13661 = vmatpush1.bf16.msra.mxu1 %v13660_v48  ;;  %13591 = vmatprep.subr.bf16.mxu0 %v13590_v24  ;;  %v11003_v57 = vsel %vm10994_vm5, %v16138_v28, %v16063_v63  ;;  %v11007_v38 = vsel %vm10994_vm5, %v16139_v10, %v16133_v37  ;;  %v13594_v20 = vpack.c.bf16 %v11128_v39, %v11124_v60  ;;  %v16124_v19 = vunpack.i.h.bf16 %v16122_v49  ;;  %v11303_v39 = vld [vmem:[%s21382_s10 + $0x18] sm:$0xff] }
 0xb1a   : > { %13663 = vmatprep.subr.bf16.mxu1 %v13662_v5  ;;  %v13664_v46 = vpack.c.bf16 %v11009_v44, %v11005_v50  ;;  %v13592_v16 = vpack.c.bf16 %v11007_v38, %v11003_v57  ;;  %v16123_v56 = vunpack.i.l.bf16 %v16122_v49  ;;  %v11123_v15 = vsel %vm2590_vm6, %v16113_v52, %v16083_v47  ;;  %v16127_v62 = vpop.permute.xlu1 %16126  ;;  %v11300_v50 = vld [vmem:[%s21382_s10] sm:$0xff] }
 0xb1b   : > { %v11127_v22 = vsel %vm2590_vm6, %v16114_v40, %v16103_v51  ;;  %v16144_v9 = vunpack.i.h.bf16 %v16142_v54  ;;  %v16143_v8 = vunpack.i.l.bf16 %v16142_v54  ;;  %v11125_v55 = vsel %vm2590_vm6, %v16084_v59, %v16088_v36 }
 0xb1c   : > { %13593 = vmatpush1.bf16.msra.mxu0 %v13592_v16  ;;  %v11132_v63 = vsel %vm2590_vm6, %v16118_v1, %v16119_v26  ;;  %v13668_v4 = vpack.c.bf16 %v11129_v18, %v11125_v55  ;;  %v16129_v23 = vunpack.i.h.bf16 %v16127_v62  ;;  %v16128_v7 = vunpack.i.l.bf16 %v16127_v62  ;;  %v16147_v13 = vpop.permute.xlu0 %16146  ;;  %v11306_v16 = vld [vmem:[%s21382_s10 + $0x30] sm:$0xff]  ;;  %v11309_v55 = vld [vmem:[%s21382_s10 + $0x48] sm:$0xff] }
 0xb1d   : > { %13665 = vmatpush1.bf16.msra.mxu1 %v13664_v46  ;;  %13595 = vmatprep.subr.bf16.mxu0 %v13594_v20  ;;  %v11136_v61 = vsel %vm2590_vm6, %v16143_v8, %v16144_v9  ;;  %v13596_v53 = vpack.c.bf16 %v11127_v22, %v11123_v15  ;;  %v11133_v11 = vsel %vm2590_vm6, %v16119_v26, %v16123_v56  ;;  %v16149_v27 = vunpack.i.h.bf16 %v16147_v13  ;;  %v11307_v26 = vld [vmem:[%s21382_s10 + $0x38] sm:$0xff] }
 0xb1e   : > { %13667 = vmatprep.subr.bf16.mxu1 %v13666_v21  ;;  %v13598_v17 = vpack.c.bf16 %v11136_v61, %v11132_v63  ;;  %v11134_v43 = vsel %vm2590_vm6, %v16123_v56, %v16124_v19  ;;  %v11137_v35 = vsel %vm2590_vm6, %v16144_v9, %v16128_v7  ;;  %v16148_v12 = vunpack.i.l.bf16 %v16147_v13  ;;  %v16152_v58 = vpop.permute.xlu1 %16151  ;;  %v11310_v56 = vld [vmem:[%s21382_s10 + $0x50] sm:$0xff] }
 0xb1f   : > { %v11138_v14 = vsel %vm2590_vm6, %v16128_v7, %v16129_v23  ;;  %v13672_v36 = vpack.c.bf16 %v11137_v35, %v11133_v11  ;;  %v11135_v0 = vsel %vm2590_vm6, %v16149_v27, %v16143_v8  ;;  %v16154_v45 = vunpack.i.h.bf16 %v16152_v58  ;;  %v11313_v7 = vld [vmem:[%s21382_s10 + $0x68] sm:$0xff] }
 0xb20   : > { %13597 = vmatpush1.bf16.msra.mxu0 %v13596_v53  ;;  %v13670_v2 = vpack.c.bf16 %v11138_v14, %v11134_v43  ;;  %v11131_v48 = vsel %vm2590_vm6, %v16148_v12, %v16118_v1  ;;  %v16153_v3 = vunpack.i.l.bf16 %v16152_v58  ;;  %v16157_v32 = vpop.permute.xlu0 %16156  ;;  %v11312_v14 = vld [vmem:[%s21382_s10 + $0x60] sm:$0xff] }
 0xb21   : > { %13669 = vmatpush1.bf16.msra.mxu1 %v13668_v4  ;;  %13599 = vmatprep.subr.bf16.mxu0 %v13598_v17  ;;  %v13600_v51 = vpack.c.bf16 %v11135_v0, %v11131_v48  ;;  %v16159_v25 = vunpack.i.h.bf16 %v16157_v32  ;;  %v16158_v37 = vunpack.i.l.bf16 %v16157_v32  ;;  %v11316_v0 = vld [vmem:[%s21382_s10 + $0x80] sm:$0xff]  ;;  %v11322_v32 = vld [vmem:[%s21382_s10 + $0xb0] sm:$0xff] }
 0xb22   : > { %13671 = vmatprep.subr.bf16.mxu1 %v13670_v2  ;;  %v16162_v31 = vpop.permute.xlu1 %16161  ;;  %v11253_v30 = vsel %vm11251_vm7, %v16153_v3, %v16154_v45 }
 0xb23   : > { %v16164_v59 = vunpack.i.h.bf16 %v16162_v31  ;;  %v16163_v47 = vunpack.i.l.bf16 %v16162_v31  ;;  %v11255_v44 = vsel %vm11251_vm7, %v16158_v37, %v16159_v25  ;;  %v11254_v41 = vsel %vm11251_vm7, %v16154_v45, %v16158_v37  ;;  %v11319_v45 = vld [vmem:[%s21382_s10 + $0x98] sm:$0xff]  ;;  %v11321_v25 = vld [vmem:[%s21382_s10 + $0xa8] sm:$0xff]  ;;  %v11324_v31 = vld [vmem:[%s21382_s10 + $0xc0] sm:$0xff] }
 0xb24   : > { %13601 = vmatpush1.bf16.msra.mxu0 %v13600_v51  ;;  %v16167_v34 = vpop.permute.xlu0 %16166  ;;  %v11315_v51 = vld [vmem:[%s21382_s10 + $0x78] sm:$0xff]  ;;  %v11325_v37 = vld [vmem:[%s21382_s10 + $0xc8] sm:$0xff] }
 0xb25   : > { %13673 = vmatpush1.bf16.msra.mxu1 %v13672_v36  ;;  %v16169_v29 = vunpack.i.h.bf16 %v16167_v34  ;;  %v16168_v6 = vunpack.i.l.bf16 %v16167_v34  ;;  %v11257_v42 = vsel %vm11251_vm7, %v16163_v47, %v16164_v59  ;;  %v11334_v34 = vld [vmem:[%s21382_s10 + $0x110] sm:$0xff] }
 0xb26   : > { %v16172_v24 = vpop.permute.xlu1 %16171  ;;  %v13602_v5 = vpack.c.bf16 %v11257_v42, %v11253_v30  ;;  %v11333_v30 = vld [vmem:[%s21382_s10 + $0x108] sm:$0xff]  ;;  %v11340_v42 = vld [vmem:[%s21382_s10 + $0x140] sm:$0xff] }
 0xb27   : > { %11605 = vmatmul.mubr.f32.vlgmr.msra.gmra.mrb[28].mxu0 %v11300_v50  ;;  %v11258_v40 = vsel %vm11251_vm7, %v16164_v59, %v16168_v6  ;;  %v16174_v52 = vunpack.i.h.bf16 %v16172_v24  ;;  %v16173_v10 = vunpack.i.l.bf16 %v16172_v24  ;;  %v11259_v28 = vsel %vm11251_vm7, %v16168_v6, %v16169_v29  ;;  %v11327_v59 = vld [vmem:[%s21382_s10 + $0xd8] sm:$0xff]  ;;  %v11337_v29 = vld [vmem:[%s21382_s10 + $0x128] sm:$0xff]  ;;  %v11336_v6 = vld [vmem:[%s21382_s10 + $0x120] sm:$0xff] }
 0xb28   : > { %11927 = vmatmul.mubr.f32.vlgmr.msra.gmra.mrb[28].mxu1 %v11300_v50  ;;  %11610 = vmatprep.mubr.f32.mxu0 %v11304_v33  ;;  %v13676_v1 = vpack.c.bf16 %v11258_v40, %v11254_v41  ;;  %v16177_v49 = vpop.permute.xlu0 %16176  ;;  %v13674_v60 = vpack.c.bf16 %v11259_v28, %v11255_v44  ;;  %v11328_v50 = vld [vmem:[%s21382_s10 + $0xe0] sm:$0xff]  ;;  %v11339_v44 = vld [vmem:[%s21382_s10 + $0x138] sm:$0xff]  ;;  %v11342_v24 = vld [vmem:[%s21382_s10 + $0x150] sm:$0xff]  ;;  %v21789_v40 = vmov 0.0  }
 0xb29   : > { %11932 = vmatprep.mubr.f32.mxu1 %v11304_v33  ;;  %13603 = vmatprep.subr.bf16.mxu0 %v13602_v5  ;;  %v11252_v21 = vsel %vm11251_vm7, %v16173_v10, %v16153_v3  ;;  %v11256_v18 = vsel %vm11251_vm7, %v16174_v52, %v16163_v47  ;;  %v16179_v38 = vunpack.i.h.bf16 %v16177_v49  ;;  %v16178_v20 = vunpack.i.l.bf16 %v16177_v49  ;;  %v11318_v3 = vld [vmem:[%s21382_s10 + $0x90] sm:$0xff]  ;;  %v11331_v47 = vld [vmem:[%s21382_s10 + $0xf8] sm:$0xff]  ;;  %v11305_v10 = vld [vmem:[%s21382_s10 + $0x28] sm:$0xff] }
 0xb2a   : > { %v13604_v57 = vpack.c.bf16 %v11256_v18, %v11252_v21  ;;  %v16182_v46 = vpop.permute.xlu1 %16181  ;;  %13675 = vmatprep.subr.bf16.mxu1 %v13674_v60  ;;  %v11330_v33 = vld [vmem:[%s21382_s10 + $0xf0] sm:$0xff]  ;;  %v11343_v41 = vld [vmem:[%s21382_s10 + $0x158] sm:$0xff]  ;;  %v11308_v28 = vld [vmem:[%s21382_s10 + $0x40] sm:$0xff] }
 0xb2b   : > { %11611 = vmatmul.mubr.f32.gmra.mrb[30].mxu0 %v11303_v39  ;;  %v16184_v19 = vunpack.i.h.bf16 %v16182_v46  ;;  %13677 = vmatpush1.bf16.msra.mxu1 %v13676_v1  ;;  %v16183_v54 = vunpack.i.l.bf16 %v16182_v46  ;;  %v11261_v62 = vsel %vm11251_vm7, %v16178_v20, %v16179_v38  ;;  %v11346_v5 = vld [vmem:[%s21382_s10 + $0x170] sm:$0xff]  ;;  %v11317_v49 = vld [vmem:[%s21382_s10 + $0x88] sm:$0xff]  ;;  %v11320_v60 = vld [vmem:[%s21382_s10 + $0xa0] sm:$0xff] }
 0xb2c   : > { %11933 = vmatmul.mubr.f32.gmra.mrb[30].mxu1 %v11303_v39  ;;  %11616 = vmatprep.mubr.f32.mxu0 %v11307_v26  ;;  %v16192_v15 = vpop.permute.xlu0 %16191  ;;  %v11345_v39 = vld [vmem:[%s21382_s10 + $0x168] sm:$0xff]  ;;  %v11302_v52 = vld [vmem:[%s21382_s10 + $0x10] sm:$0xff]  ;;  %v11323_v21 = vld [vmem:[%s21382_s10 + $0xb8] sm:$0xff] }
 0xb2d   : > { %11938 = vmatprep.mubr.f32.mxu1 %v11307_v26  ;;  %13605 = vmatpush1.bf16.msra.mxu0 %v13604_v57  ;;  %v16194_v22 = vunpack.i.h.bf16 %v16192_v15  ;;  %v16193_v9 = vunpack.i.l.bf16 %v16192_v15  ;;  %v11263_v61 = vsel %vm11251_vm7, %v16183_v54, %v16184_v19  ;;  %v11262_v53 = vsel %vm11251_vm7, %v16179_v38, %v16183_v54  ;;  %v11311_v26 = vld [vmem:[%s21382_s10 + $0x58] sm:$0xff]  ;;  %v11314_v1 = vld [vmem:[%s21382_s10 + $0x70] sm:$0xff]  ;;  %v11329_v57 = vld [vmem:[%s21382_s10 + $0xe8] sm:$0xff] }
 0xb2e   : > { %v16187_v8 = vpop.permute.xlu1 %16186  ;;  %v11326_v18 = vld [vmem:[%s21382_s10 + $0xd0] sm:$0xff]  ;;  %v11332_v38 = vld [vmem:[%s21382_s10 + $0x100] sm:$0xff] }
 0xb2f   : > { %11617 = vmatmul.mubr.f32.gmra.mrb[32].mxu0 %v11306_v16  ;;  %v16189_v63 = vunpack.i.h.bf16 %v16187_v8  ;;  %v16188_v4 = vunpack.i.l.bf16 %v16187_v8  ;;  %v11265_v23 = vsel %vm11251_vm7, %v16193_v9, %v16194_v22  ;;  %v11338_v46 = vld [vmem:[%s21382_s10 + $0x130] sm:$0xff]  ;;  %v11344_v19 = vld [vmem:[%s21382_s10 + $0x160] sm:$0xff] }
 0xb30   : > { %11939 = vmatmul.mubr.f32.gmra.mrb[32].mxu1 %v11306_v16  ;;  %11622 = vmatprep.mubr.f32.mxu0 %v11310_v56  ;;  %v16197_v11 = vpop.permute.xlu0 %16196  ;;  %v13606_v13 = vpack.c.bf16 %v11265_v23, %v11261_v62  ;;  %v11341_v16 = vld [vmem:[%s21382_s10 + $0x148] sm:$0xff] }
 0xb31   : > { %11944 = vmatprep.mubr.f32.mxu1 %v11310_v56  ;;  %v11266_v17 = vsel %vm11251_vm7, %v16194_v22, %v16188_v4  ;;  %v16199_v43 = vunpack.i.h.bf16 %v16197_v11  ;;  %v16198_v35 = vunpack.i.l.bf16 %v16197_v11  ;;  %v11267_v27 = vsel %vm11251_vm7, %v16188_v4, %v16189_v63  ;;  %v11347_v56 = vld [vmem:[%s21382_s10 + $0x178] sm:$0xff] }
 0xb32   : > { %v13680_v12 = vpack.c.bf16 %v11266_v17, %v11262_v53  ;;  %13607 = vmatprep.subr.bf16.mxu0 %v13606_v13  ;;  %v13678_v36 = vpack.c.bf16 %v11267_v27, %v11263_v61 }
 0xb33   : > { %11623 = vmatmul.mubr.f32.gmra.mrb[34].mxu0 %v11309_v55  ;;  %v11260_v58 = vsel %vm11251_vm7, %v16198_v35, %v16178_v20  ;;  %v11264_v2 = vsel %vm11251_vm7, %v16199_v43, %v16193_v9  ;;  %v11335_v20 = vld [vmem:[%s21382_s10 + $0x118] sm:$0xff] }
 0xb34   : > { %11945 = vmatmul.mubr.f32.gmra.mrb[34].mxu1 %v11309_v55  ;;  %11628 = vmatprep.mubr.f32.mxu0 %v11313_v7  ;;  %v13608_v48 = vpack.c.bf16 %v11264_v2, %v11260_v58 }
 0xb35   : > { %11950 = vmatprep.mubr.f32.mxu1 %v11313_v7  ;;  %13679 = vmatprep.subr.bf16.mxu1 %v13678_v36 }
 0xb36   : > { %13681 = vmatpush1.bf16.msra.mxu1 %v13680_v12  ;;  %13609 = vmatpush1.bf16.msra.mxu0 %v13608_v48 }
 0xb37   : > { %11629 = vmatmul.mubr.f32.gmra.mrb[36].mxu0 %v11312_v14 }
 0xb38   : > { %11951 = vmatmul.mubr.f32.gmra.mrb[36].mxu1 %v11312_v14  ;;  %11634 = vmatprep.mubr.f32.mxu0 %v11316_v0 }
 0xb39   : > { %11956 = vmatprep.mubr.f32.mxu1 %v11316_v0 }
 0xb3b   : > { %11635 = vmatmul.mubr.f32.gmra.mrb[38].mxu0 %v11315_v51 }
 0xb3c   : > { %11957 = vmatmul.mubr.f32.gmra.mrb[38].mxu1 %v11315_v51  ;;  %11640 = vmatprep.mubr.f32.mxu0 %v11319_v45 }
 0xb3d   : > { %11962 = vmatprep.mubr.f32.mxu1 %v11319_v45 }
 0xb3f   : > { %11641 = vmatmul.mubr.f32.gmra.mrb[40].mxu0 %v11318_v3  ;;  %v1435_v54 = vpop.permute.xlu1 %1434 }
 0xb40   : > { %11963 = vmatmul.mubr.f32.gmra.mrb[40].mxu1 %v11318_v3  ;;  %11646 = vmatprep.mubr.f32.mxu0 %v11322_v32 }
 0xb41   : > { %11968 = vmatprep.mubr.f32.mxu1 %v11322_v32  ;;  %v1440_v15 = vpop.permute.xlu0 %1439 }
 0xb43   : > { %11647 = vmatmul.mubr.f32.gmra.mrb[42].mxu0 %v11321_v25  ;;  %v1445_v22 = vpop.permute.xlu1 %1444 }
 0xb44   : > { %11969 = vmatmul.mubr.f32.gmra.mrb[42].mxu1 %v11321_v25  ;;  %11652 = vmatprep.mubr.f32.mxu0 %v11325_v37 }
 0xb45   : > { %11974 = vmatprep.mubr.f32.mxu1 %v11325_v37  ;;  %v21221_v9 = vpop.permute.xlu0 %1449 }
 0xb47   : > { %11653 = vmatmul.mubr.f32.gmra.mrb[44].mxu0 %v11324_v31  ;;  %v21223_v8 = vpop.permute.xlu1 %1454 }
 0xb48   : > { %11975 = vmatmul.mubr.f32.gmra.mrb[44].mxu1 %v11324_v31  ;;  %11658 = vmatprep.mubr.f32.mxu0 %v11328_v50 }
 0xb49   : > { %11980 = vmatprep.mubr.f32.mxu1 %v11328_v50  ;;  %v21225_v55 = vpop.permute.xlu0 %1459 }
 0xb4b   : > { %11659 = vmatmul.mubr.f32.gmra.mrb[46].mxu0 %v11327_v59  ;;  %v21227_v62 = vpop.permute.xlu1 %1464 }
 0xb4c   : > { %11981 = vmatmul.mubr.f32.gmra.mrb[46].mxu1 %v11327_v59  ;;  %11664 = vmatprep.mubr.f32.mxu0 %v11331_v47 }
 0xb4d   : > { %11986 = vmatprep.mubr.f32.mxu1 %v11331_v47  ;;  %v21229_v63 = vpop.permute.xlu0 %1469 }
 0xb4f   : > { %11665 = vmatmul.mubr.f32.gmra.mrb[48].mxu0 %v11330_v33  ;;  %v21231_v4 = vpop.permute.xlu1 %1474 }
 0xb50   : > { %11987 = vmatmul.mubr.f32.gmra.mrb[48].mxu1 %v11330_v33  ;;  %11670 = vmatprep.mubr.f32.mxu0 %v11334_v34 }
 0xb51   : > { %11992 = vmatprep.mubr.f32.mxu1 %v11334_v34  ;;  %v21233_v23 = vpop.permute.xlu0 %1479 }
 0xb53   : > { %11671 = vmatmul.mubr.f32.gmra.mrb[50].mxu0 %v11333_v30  ;;  %v21235_v7 = vpop.permute.xlu1 %1484 }
 0xb54   : > { %11993 = vmatmul.mubr.f32.gmra.mrb[50].mxu1 %v11333_v30  ;;  %11676 = vmatprep.mubr.f32.mxu0 %v11337_v29 }
 0xb55   : > { %11998 = vmatprep.mubr.f32.mxu1 %v11337_v29  ;;  %v21237_v61 = vpop.permute.xlu0 %1489 }
 0xb57   : > { %11677 = vmatmul.mubr.f32.gmra.mrb[52].mxu0 %v11336_v6  ;;  %v21239_v53 = vpop.permute.xlu1 %1494 }
 0xb58   : > { %11999 = vmatmul.mubr.f32.gmra.mrb[52].mxu1 %v11336_v6  ;;  %11682 = vmatprep.mubr.f32.mxu0 %v11340_v42 }
 0xb59   : > { %12004 = vmatprep.mubr.f32.mxu1 %v11340_v42  ;;  %v21241_v11 = vpop.permute.xlu0 %1499 }
 0xb5b   : > { %11683 = vmatmul.mubr.f32.gmra.mrb[54].mxu0 %v11339_v44  ;;  %v21243_v13 = vpop.permute.xlu1 %1504 }
 0xb5c   : > { %12005 = vmatmul.mubr.f32.gmra.mrb[54].mxu1 %v11339_v44  ;;  %11688 = vmatprep.mubr.f32.mxu0 %v11343_v41 }
 0xb5d   : > { %12010 = vmatprep.mubr.f32.mxu1 %v11343_v41  ;;  %v21245_v17 = vpop.permute.xlu0 %1509 }
 0xb5f   : > { %11689 = vmatmul.mubr.f32.gmra.mrb[56].mxu0 %v11342_v24  ;;  %v12395_v58 = vpop.permute.xlu1 %12394 }
 0xb60   : > { %12011 = vmatmul.mubr.f32.gmra.mrb[56].mxu1 %v11342_v24  ;;  %11694 = vmatprep.mubr.f32.mxu0 %v11346_v5 }
 0xb61   : > { %12016 = vmatprep.mubr.f32.mxu1 %v11346_v5  ;;  %v12400_v34 = vpop.permute.xlu0 %12399 }
 0xb63   : > { %11695 = vmatmul.mubr.f32.gmra.mrb[58].mxu0 %v11345_v39 }
 0xb64   : > { %12017 = vmatmul.mubr.f32.gmra.mrb[58].mxu1 %v11345_v39  ;;  %11765 = vmatprep.mubr.f32.mxu0 %v21789_v40 }
 0xb65   : > { %12087 = vmatprep.mubr.f32.mxu1 %v21789_v40 }
 0xb67   : > { %12854 = vmatmul.mubr.msk.f32.vlgmr.msra.gmra.mrb[28].mxu0 %vm1913_vm1, %v11302_v52 }
 0xb68   : > { %12870 = vmatmul.mubr.msk.f32.vlgmr.msra.gmra.mrb[28].mxu1 %vm1913_vm1, %v11302_v52  ;;  %11771 = vmatprep.mubr.f32.mxu0 %v21789_v40 }
 0xb69   : > { %12093 = vmatprep.mubr.f32.mxu1 %v21789_v40 }
 0xb6b   : > { %12855 = vmatmul.mubr.msk.f32.gmra.mrb[30].mxu0 %vm1913_vm1, %v11305_v10 }
 0xb6c   : > { %12871 = vmatmul.mubr.msk.f32.gmra.mrb[30].mxu1 %vm1913_vm1, %v11305_v10  ;;  %11777 = vmatprep.mubr.f32.mxu0 %v21789_v40 }
 0xb6d   : > { %12099 = vmatprep.mubr.f32.mxu1 %v21789_v40 }
 0xb6f   : > { %12856 = vmatmul.mubr.msk.f32.gmra.mrb[32].mxu0 %vm1913_vm1, %v11308_v28 }
 0xb70   : > { %12872 = vmatmul.mubr.msk.f32.gmra.mrb[32].mxu1 %vm1913_vm1, %v11308_v28  ;;  %11783 = vmatprep.mubr.f32.mxu0 %v21789_v40 }
 0xb71   : > { %12105 = vmatprep.mubr.f32.mxu1 %v21789_v40 }
 0xb73   : > { %12857 = vmatmul.mubr.msk.f32.gmra.mrb[34].mxu0 %vm1913_vm1, %v11311_v26 }
 0xb74   : > { %12873 = vmatmul.mubr.msk.f32.gmra.mrb[34].mxu1 %vm1913_vm1, %v11311_v26  ;;  %11789 = vmatprep.mubr.f32.mxu0 %v21789_v40 }
 0xb75   : > { %12111 = vmatprep.mubr.f32.mxu1 %v21789_v40 }
 0xb77   : > { %12858 = vmatmul.mubr.msk.f32.gmra.mrb[36].mxu0 %vm1913_vm1, %v11314_v1 }
 0xb78   : > { %12874 = vmatmul.mubr.msk.f32.gmra.mrb[36].mxu1 %vm1913_vm1, %v11314_v1  ;;  %11795 = vmatprep.mubr.f32.mxu0 %v21789_v40 }
 0xb79   : > { %12117 = vmatprep.mubr.f32.mxu1 %v21789_v40 }
 0xb7b   : > { %12859 = vmatmul.mubr.msk.f32.gmra.mrb[38].mxu0 %vm1913_vm1, %v11317_v49 }
 0xb7c   : > { %12875 = vmatmul.mubr.msk.f32.gmra.mrb[38].mxu1 %vm1913_vm1, %v11317_v49  ;;  %11801 = vmatprep.mubr.f32.mxu0 %v21789_v40 }
 0xb7d   : > { %12123 = vmatprep.mubr.f32.mxu1 %v21789_v40 }
 0xb7f   : > { %12860 = vmatmul.mubr.msk.f32.gmra.mrb[40].mxu0 %vm1913_vm1, %v11320_v60 }
 0xb80   : > { %12876 = vmatmul.mubr.msk.f32.gmra.mrb[40].mxu1 %vm1913_vm1, %v11320_v60  ;;  %11807 = vmatprep.mubr.f32.mxu0 %v21789_v40  ;;  %v12405_v60 = vpop.permute.xlu1 %12404 }
 0xb81   : > { %12129 = vmatprep.mubr.f32.mxu1 %v21789_v40 }
 0xb83   : > { %12861 = vmatmul.mubr.msk.f32.gmra.mrb[42].mxu0 %vm1913_vm1, %v11323_v21 }
 0xb84   : > { %12877 = vmatmul.mubr.msk.f32.gmra.mrb[42].mxu1 %vm1913_vm1, %v11323_v21  ;;  %11813 = vmatprep.mubr.f32.mxu0 %v21789_v40 }
 0xb85   : > { %12135 = vmatprep.mubr.f32.mxu1 %v21789_v40 }
 0xb87   : > { %12862 = vmatmul.mubr.msk.f32.gmra.mrb[44].mxu0 %vm1913_vm1, %v11326_v18 }
 0xb88   : > { %12878 = vmatmul.mubr.msk.f32.gmra.mrb[44].mxu1 %vm1913_vm1, %v11326_v18  ;;  %11819 = vmatprep.mubr.f32.mxu0 %v21789_v40 }
 0xb89   : > { %12141 = vmatprep.mubr.f32.mxu1 %v21789_v40 }
 0xb8b   : > { %12863 = vmatmul.mubr.msk.f32.gmra.mrb[46].mxu0 %vm1913_vm1, %v11329_v57 }
 0xb8c   : > { %12879 = vmatmul.mubr.msk.f32.gmra.mrb[46].mxu1 %vm1913_vm1, %v11329_v57  ;;  %11825 = vmatprep.mubr.f32.mxu0 %v21789_v40 }
 0xb8d   : > { %12147 = vmatprep.mubr.f32.mxu1 %v21789_v40 }
 0xb8f   : > { %12864 = vmatmul.mubr.msk.f32.gmra.mrb[48].mxu0 %vm1913_vm1, %v11332_v38 }
 0xb90   : > { %12880 = vmatmul.mubr.msk.f32.gmra.mrb[48].mxu1 %vm1913_vm1, %v11332_v38  ;;  %11831 = vmatprep.mubr.f32.mxu0 %v21789_v40 }
 0xb91   : > { %12153 = vmatprep.mubr.f32.mxu1 %v21789_v40 }
 0xb93   : > { %12865 = vmatmul.mubr.msk.f32.gmra.mrb[50].mxu0 %vm1913_vm1, %v11335_v20 }
 0xb94   : > { %12881 = vmatmul.mubr.msk.f32.gmra.mrb[50].mxu1 %vm1913_vm1, %v11335_v20  ;;  %11837 = vmatprep.mubr.f32.mxu0 %v21789_v40 }
 0xb95   : > { %12159 = vmatprep.mubr.f32.mxu1 %v21789_v40 }
 0xb97   : > { %12866 = vmatmul.mubr.msk.f32.gmra.mrb[52].mxu0 %vm1913_vm1, %v11338_v46 }
 0xb98   : > { %12882 = vmatmul.mubr.msk.f32.gmra.mrb[52].mxu1 %vm1913_vm1, %v11338_v46  ;;  %11843 = vmatprep.mubr.f32.mxu0 %v21789_v40 }
 0xb99   : > { %12165 = vmatprep.mubr.f32.mxu1 %v21789_v40 }
 0xb9b   : > { %12867 = vmatmul.mubr.msk.f32.gmra.mrb[54].mxu0 %vm1913_vm1, %v11341_v16 }
 0xb9c   : > { %12883 = vmatmul.mubr.msk.f32.gmra.mrb[54].mxu1 %vm1913_vm1, %v11341_v16  ;;  %11849 = vmatprep.mubr.f32.mxu0 %v21789_v40 }
 0xb9d   : > { %12171 = vmatprep.mubr.f32.mxu1 %v21789_v40 }
 0xb9f   : > { %12868 = vmatmul.mubr.msk.f32.gmra.mrb[56].mxu0 %vm1913_vm1, %v11344_v19 }
 0xba0   : > { %12884 = vmatmul.mubr.msk.f32.gmra.mrb[56].mxu1 %vm1913_vm1, %v11344_v19  ;;  %11855 = vmatprep.mubr.f32.mxu0 %v21789_v40 }
 0xba1   : > { %12177 = vmatprep.mubr.f32.mxu1 %v21789_v40 }
 0xba3   : > { %12869 = vmatmul.mubr.msk.f32.gmra.mrb[58].mxu0 %vm1913_vm1, %v11347_v56 }
 0xba4   : > { %12885 = vmatmul.mubr.msk.f32.gmra.mrb[58].mxu1 %vm1913_vm1, %v11347_v56 }
 0xc3a   : > { %v11767_v35 = vpop.f32.mrb[28].mxu0 }
 0xc3b   : > { %v12089_v43 = vpop.f32.mrb[28].mxu1  ;;  %v13682_v12 = vadd.f32 %v11767_v35, %v1435_v54  ;;  %v11769_v36 = vpop.f32.mrb[29].mxu0 }
 0xc3c   : > { %v13714_v27 = vadd.f32 %v12089_v43, %v1435_v54  ;;  %v12091_v14 = vpop.f32.mrb[29].mxu1  ;;  %v13683_v48 = vadd.f32 %v11769_v36, %v1435_v54 }
 0xc3d   : > { %v13715_v2 = vadd.f32 %v12091_v14, %v1435_v54  ;;  %v12472_v51 = vadd.f32 %v13682_v12, %v12395_v58  ;;  %v12410_v14 = vpop.permute.xlu0 %12409 }
 0xc3e   : > { %v12474_v0 = vadd.f32 %v13714_v27, %v12395_v58  ;;  %v12473_v3 = vadd.f32 %v13683_v48, %v12395_v58  ;;  %v11773_v25 = vpop.f32.mrb[30].mxu0 }
 0xc3f   : > { %v12475_v45 = vadd.f32 %v13715_v2, %v12395_v58  ;;  %v12095_v32 = vpop.f32.mrb[30].mxu1  ;;  %v12536_v31 = vmax.f32 %v12472_v51, 0.0  ;;  %v13684_v59 = vadd.f32 %v11773_v25, %v1440_v15  ;;  %v11775_v33 = vpop.f32.mrb[31].mxu0 }
 0xc40   : > { %v12538_v37 = vmax.f32 %v12474_v0, 0.0  ;;  %v13716_v50 = vadd.f32 %v12095_v32, %v1440_v15  ;;  %v12097_v47 = vpop.f32.mrb[31].mxu1  ;;  %v12537_v29 = vmax.f32 %v12473_v3, 0.0  ;;  %v13685_v42 = vadd.f32 %v11775_v33, %v1440_v15  ;;  %v12415_v33 = vpop.permute.xlu1 %12414 }
 0xc41   : > { %v12539_v30 = vmax.f32 %v12475_v45, 0.0  ;;  %v13717_v6 = vadd.f32 %v12097_v47, %v1440_v15  ;;  %12600 = vst [vmem:[%s21251_s27] sm:$0xff] %v12536_v31  ;;  %v12476_v41 = vadd.f32 %v13684_v59, %v12400_v34 }
 0xc42   : > { %12602 = vst [vmem:[%s21251_s27 + $0x10] sm:$0xff] %v12538_v37  ;;  %v12478_v44 = vadd.f32 %v13716_v50, %v12400_v34  ;;  %12601 = vst [vmem:[%s21251_s27 + $0x8] sm:$0xff] %v12537_v29  ;;  %v12477_v5 = vadd.f32 %v13685_v42, %v12400_v34  ;;  %v11779_v40 = vpop.f32.mrb[32].mxu0 }
 0xc43   : > { %12603 = vst [vmem:[%s21251_s27 + $0x18] sm:$0xff] %v12539_v30  ;;  %v12479_v24 = vadd.f32 %v13717_v6, %v12400_v34  ;;  %v12101_v39 = vpop.f32.mrb[32].mxu1  ;;  %v12540_v10 = vmax.f32 %v12476_v41, 0.0  ;;  %v13686_v26 = vadd.f32 %v11779_v40, %v1445_v22  ;;  %v11781_v49 = vpop.f32.mrb[33].mxu0 }
 0xc44   : > { %v12542_v52 = vmax.f32 %v12478_v44, 0.0  ;;  %v13718_v28 = vadd.f32 %v12101_v39, %v1445_v22  ;;  %v12103_v1 = vpop.f32.mrb[33].mxu1  ;;  %v12541_v18 = vmax.f32 %v12477_v5, 0.0  ;;  %v13687_v38 = vadd.f32 %v11781_v49, %v1445_v22 }
 0xc45   : > { %v12543_v21 = vmax.f32 %v12479_v24, 0.0  ;;  %v13719_v57 = vadd.f32 %v12103_v1, %v1445_v22  ;;  %12604 = vst [vmem:[%s21251_s27 + $0x20] sm:$0xff] %v12540_v10  ;;  %v12480_v46 = vadd.f32 %v13686_v26, %v12405_v60  ;;  %v12420_v1 = vpop.permute.xlu0 %12419 }
 0xc46   : > { %12606 = vst [vmem:[%s21251_s27 + $0x30] sm:$0xff] %v12542_v52  ;;  %v12482_v20 = vadd.f32 %v13718_v28, %v12405_v60  ;;  %12605 = vst [vmem:[%s21251_s27 + $0x28] sm:$0xff] %v12541_v18  ;;  %v12481_v19 = vadd.f32 %v13687_v38, %v12405_v60  ;;  %v11785_v54 = vpop.f32.mrb[34].mxu0 }
 0xc47   : > { %12607 = vst [vmem:[%s21251_s27 + $0x38] sm:$0xff] %v12543_v21  ;;  %v12483_v16 = vadd.f32 %v13719_v57, %v12405_v60  ;;  %v12107_v56 = vpop.f32.mrb[34].mxu1  ;;  %v12544_v43 = vmax.f32 %v12480_v46, 0.0  ;;  %v13688_v22 = vadd.f32 %v11785_v54, %v21221_v9  ;;  %v11787_v12 = vpop.f32.mrb[35].mxu0 }
 0xc48   : > { %v12546_v15 = vmax.f32 %v12482_v20, 0.0  ;;  %v13720_v35 = vadd.f32 %v12107_v56, %v21221_v9  ;;  %v12109_v27 = vpop.f32.mrb[35].mxu1  ;;  %v12545_v58 = vmax.f32 %v12481_v19, 0.0  ;;  %v13689_v48 = vadd.f32 %v11787_v12, %v21221_v9 }
 0xc49   : > { %v12547_v36 = vmax.f32 %v12483_v16, 0.0  ;;  %v13721_v2 = vadd.f32 %v12109_v27, %v21221_v9  ;;  %12608 = vst [vmem:[%s21251_s27 + $0x40] sm:$0xff] %v12544_v43  ;;  %v12484_v51 = vadd.f32 %v13688_v22, %v12410_v14  ;;  %v12425_v22 = vpop.permute.xlu1 %12424 }
 0xc4a   : > { %12610 = vst [vmem:[%s21251_s27 + $0x50] sm:$0xff] %v12546_v15  ;;  %v12486_v0 = vadd.f32 %v13720_v35, %v12410_v14  ;;  %12609 = vst [vmem:[%s21251_s27 + $0x48] sm:$0xff] %v12545_v58  ;;  %v12485_v3 = vadd.f32 %v13689_v48, %v12410_v14  ;;  %v11791_v25 = vpop.f32.mrb[36].mxu0 }
 0xc4b   : > { %12611 = vst [vmem:[%s21251_s27 + $0x58] sm:$0xff] %v12547_v36  ;;  %v12487_v45 = vadd.f32 %v13721_v2, %v12410_v14  ;;  %v12113_v32 = vpop.f32.mrb[36].mxu1  ;;  %v12548_v31 = vmax.f32 %v12484_v51, 0.0  ;;  %v13690_v9 = vadd.f32 %v11791_v25, %v21223_v8  ;;  %v11793_v47 = vpop.f32.mrb[37].mxu0 }
 0xc4c   : > { %v12550_v37 = vmax.f32 %v12486_v0, 0.0  ;;  %v13722_v50 = vadd.f32 %v12113_v32, %v21223_v8  ;;  %v12115_v59 = vpop.f32.mrb[37].mxu1  ;;  %v12549_v30 = vmax.f32 %v12485_v3, 0.0  ;;  %v13691_v6 = vadd.f32 %v11793_v47, %v21223_v8 }
 0xc4d   : > { %v12551_v34 = vmax.f32 %v12487_v45, 0.0  ;;  %v13723_v29 = vadd.f32 %v12115_v59, %v21223_v8  ;;  %12612 = vst [vmem:[%s21251_s27 + $0x60] sm:$0xff] %v12548_v31  ;;  %v12488_v44 = vadd.f32 %v13690_v9, %v12415_v33 }
 0xc4e   : > { %12614 = vst [vmem:[%s21251_s27 + $0x70] sm:$0xff] %v12550_v37  ;;  %v12490_v42 = vadd.f32 %v13722_v50, %v12415_v33  ;;  %12613 = vst [vmem:[%s21251_s27 + $0x68] sm:$0xff] %v12549_v30  ;;  %v12489_v24 = vadd.f32 %v13691_v6, %v12415_v33  ;;  %v11797_v39 = vpop.f32.mrb[38].mxu0  ;;  %v12430_v50 = vpop.permute.xlu0 %12429 }
 0xc4f   : > { %12615 = vst [vmem:[%s21251_s27 + $0x78] sm:$0xff] %v12551_v34  ;;  %v12491_v41 = vadd.f32 %v13723_v29, %v12415_v33  ;;  %v12119_v5 = vpop.f32.mrb[38].mxu1  ;;  %v12552_v52 = vmax.f32 %v12488_v44, 0.0  ;;  %v13692_v8 = vadd.f32 %v11797_v39, %v21225_v55  ;;  %v11799_v26 = vpop.f32.mrb[39].mxu0 }
 0xc50   : > { %v12554_v40 = vmax.f32 %v12490_v42, 0.0  ;;  %v13724_v10 = vadd.f32 %v12119_v5, %v21225_v55  ;;  %v12121_v28 = vpop.f32.mrb[39].mxu1  ;;  %v12553_v60 = vmax.f32 %v12489_v24, 0.0  ;;  %v13693_v18 = vadd.f32 %v11799_v26, %v21225_v55 }
 0xc51   : > { %v12555_v49 = vmax.f32 %v12491_v41, 0.0  ;;  %v13725_v21 = vadd.f32 %v12121_v28, %v21225_v55  ;;  %12616 = vst [vmem:[%s21251_s27 + $0x80] sm:$0xff] %v12552_v52  ;;  %v12492_v38 = vadd.f32 %v13692_v8, %v12420_v1  ;;  %v12435_v52 = vpop.permute.xlu1 %12434 }
 0xc52   : > { %12618 = vst [vmem:[%s21251_s27 + $0x90] sm:$0xff] %v12554_v40  ;;  %v12494_v57 = vadd.f32 %v13724_v10, %v12420_v1  ;;  %12617 = vst [vmem:[%s21251_s27 + $0x88] sm:$0xff] %v12553_v60  ;;  %v12493_v46 = vadd.f32 %v13693_v18, %v12420_v1  ;;  %v11803_v19 = vpop.f32.mrb[40].mxu0 }
 0xc53   : > { %12619 = vst [vmem:[%s21251_s27 + $0x98] sm:$0xff] %v12555_v49  ;;  %v12495_v20 = vadd.f32 %v13725_v21, %v12420_v1  ;;  %v12125_v16 = vpop.f32.mrb[40].mxu1  ;;  %v12556_v54 = vmax.f32 %v12492_v38, 0.0  ;;  %v13694_v55 = vadd.f32 %v11803_v19, %v21227_v62  ;;  %v11805_v35 = vpop.f32.mrb[41].mxu0 }
 0xc54   : > { %v12558_v56 = vmax.f32 %v12494_v57, 0.0  ;;  %v13726_v15 = vadd.f32 %v12125_v16, %v21227_v62  ;;  %v12127_v43 = vpop.f32.mrb[41].mxu1  ;;  %v12557_v12 = vmax.f32 %v12493_v46, 0.0  ;;  %v13695_v36 = vadd.f32 %v11805_v35, %v21227_v62 }
 0xc55   : > { %v12559_v27 = vmax.f32 %v12495_v20, 0.0  ;;  %v13727_v14 = vadd.f32 %v12127_v43, %v21227_v62  ;;  %12620 = vst [vmem:[%s21251_s27 + $0xa0] sm:$0xff] %v12556_v54  ;;  %v12496_v2 = vadd.f32 %v13694_v55, %v12425_v22 }
 0xc56   : > { %12622 = vst [vmem:[%s21251_s27 + $0xb0] sm:$0xff] %v12558_v56  ;;  %v12498_v58 = vadd.f32 %v13726_v15, %v12425_v22  ;;  %12621 = vst [vmem:[%s21251_s27 + $0xa8] sm:$0xff] %v12557_v12  ;;  %v12497_v0 = vadd.f32 %v13695_v36, %v12425_v22  ;;  %v11809_v45 = vpop.f32.mrb[42].mxu0  ;;  %v12440_v56 = vpop.permute.xlu0 %12439 }
 0xc57   : > { %12623 = vst [vmem:[%s21251_s27 + $0xb8] sm:$0xff] %v12559_v27  ;;  %v12499_v48 = vadd.f32 %v13727_v14, %v12425_v22  ;;  %v12131_v51 = vpop.f32.mrb[42].mxu1  ;;  %v12560_v32 = vmax.f32 %v12496_v2, 0.0  ;;  %v13696_v62 = vadd.f32 %v11809_v45, %v21229_v63  ;;  %v11811_v31 = vpop.f32.mrb[43].mxu0 }
 0xc58   : > { %v12562_v3 = vmax.f32 %v12498_v58, 0.0  ;;  %v13728_v25 = vadd.f32 %v12131_v51, %v21229_v63  ;;  %v12133_v37 = vpop.f32.mrb[43].mxu1  ;;  %v12561_v59 = vmax.f32 %v12497_v0, 0.0  ;;  %v13697_v33 = vadd.f32 %v11811_v31, %v21229_v63  ;;  %v12445_v45 = vpop.permute.xlu1 %12444 }
 0xc59   : > { %v12563_v9 = vmax.f32 %v12499_v48, 0.0  ;;  %v13729_v47 = vadd.f32 %v12133_v37, %v21229_v63  ;;  %12624 = vst [vmem:[%s21251_s27 + $0xc0] sm:$0xff] %v12560_v32  ;;  %v12500_v30 = vadd.f32 %v13696_v62, %v12430_v50 }
 0xc5a   : > { %12626 = vst [vmem:[%s21251_s27 + $0xd0] sm:$0xff] %v12562_v3  ;;  %v12502_v34 = vadd.f32 %v13728_v25, %v12430_v50  ;;  %12625 = vst [vmem:[%s21251_s27 + $0xc8] sm:$0xff] %v12561_v59  ;;  %v12501_v6 = vadd.f32 %v13697_v33, %v12430_v50  ;;  %v11815_v44 = vpop.f32.mrb[44].mxu0 }
 0xc5b   : > { %12627 = vst [vmem:[%s21251_s27 + $0xd8] sm:$0xff] %v12563_v9  ;;  %v12503_v29 = vadd.f32 %v13729_v47, %v12430_v50  ;;  %v12137_v42 = vpop.f32.mrb[44].mxu1  ;;  %v12564_v24 = vmax.f32 %v12500_v30, 0.0  ;;  %v13698_v63 = vadd.f32 %v11815_v44, %v21231_v4  ;;  %v11817_v40 = vpop.f32.mrb[45].mxu0 }
 0xc5c   : > { %v12566_v41 = vmax.f32 %v12502_v34, 0.0  ;;  %v13730_v5 = vadd.f32 %v12137_v42, %v21231_v4  ;;  %v12139_v39 = vpop.f32.mrb[45].mxu1  ;;  %v12565_v8 = vmax.f32 %v12501_v6, 0.0  ;;  %v13699_v26 = vadd.f32 %v11817_v40, %v21231_v4  ;;  %v12450_v42 = vpop.permute.xlu0 %12449 }
 0xc5d   : > { %v12567_v10 = vmax.f32 %v12503_v29, 0.0  ;;  %v13731_v28 = vadd.f32 %v12139_v39, %v21231_v4  ;;  %12628 = vst [vmem:[%s21251_s27 + $0xe0] sm:$0xff] %v12564_v24  ;;  %v12504_v49 = vadd.f32 %v13698_v63, %v12435_v52 }
 0xc5e   : > { %12630 = vst [vmem:[%s21251_s27 + $0xf0] sm:$0xff] %v12566_v41  ;;  %v12506_v1 = vadd.f32 %v13730_v5, %v12435_v52  ;;  %12629 = vst [vmem:[%s21251_s27 + $0xe8] sm:$0xff] %v12565_v8  ;;  %v12505_v21 = vadd.f32 %v13699_v26, %v12435_v52  ;;  %v11821_v57 = vpop.f32.mrb[46].mxu0 }
 0xc5f   : > { %12631 = vst [vmem:[%s21251_s27 + $0xf8] sm:$0xff] %v12567_v10  ;;  %v12507_v60 = vadd.f32 %v13731_v28, %v12435_v52  ;;  %v12143_v18 = vpop.f32.mrb[46].mxu1  ;;  %v12568_v20 = vmax.f32 %v12504_v49, 0.0  ;;  %v13700_v4 = vadd.f32 %v11821_v57, %v21233_v23  ;;  %v11823_v19 = vpop.f32.mrb[47].mxu0 }
 0xc60   : > { %v12570_v38 = vmax.f32 %v12506_v1, 0.0  ;;  %v13732_v46 = vadd.f32 %v12143_v18, %v21233_v23  ;;  %v12145_v16 = vpop.f32.mrb[47].mxu1  ;;  %v12569_v15 = vmax.f32 %v12505_v21, 0.0  ;;  %v13701_v43 = vadd.f32 %v11823_v19, %v21233_v23  ;;  %v12455_v21 = vpop.permute.xlu1 %12454 }
 0xc61   : > { %v12571_v54 = vmax.f32 %v12507_v60, 0.0  ;;  %v13733_v55 = vadd.f32 %v12145_v16, %v21233_v23  ;;  %12632 = vst [vmem:[%s21251_s27 + $0x100] sm:$0xff] %v12568_v20  ;;  %v12508_v22 = vadd.f32 %v13700_v4, %v12440_v56 }
 0xc62   : > { %12634 = vst [vmem:[%s21251_s27 + $0x110] sm:$0xff] %v12570_v38  ;;  %v12510_v35 = vadd.f32 %v13732_v46, %v12440_v56  ;;  %12633 = vst [vmem:[%s21251_s27 + $0x108] sm:$0xff] %v12569_v15  ;;  %v12509_v12 = vadd.f32 %v13701_v43, %v12440_v56  ;;  %v11827_v36 = vpop.f32.mrb[48].mxu0 }
 0xc63   : > { %12635 = vst [vmem:[%s21251_s27 + $0x118] sm:$0xff] %v12571_v54  ;;  %v12511_v27 = vadd.f32 %v13733_v55, %v12440_v56  ;;  %v12149_v14 = vpop.f32.mrb[48].mxu1  ;;  %v12572_v2 = vmax.f32 %v12508_v22, 0.0  ;;  %v13702_v23 = vadd.f32 %v11827_v36, %v21235_v7  ;;  %v11829_v51 = vpop.f32.mrb[49].mxu0 }
 0xc64   : > { %v12574_v58 = vmax.f32 %v12510_v35, 0.0  ;;  %v13734_v48 = vadd.f32 %v12149_v14, %v21235_v7  ;;  %v12151_v0 = vpop.f32.mrb[49].mxu1  ;;  %v12573_v32 = vmax.f32 %v12509_v12, 0.0  ;;  %v13703_v62 = vadd.f32 %v11829_v51, %v21235_v7 }
 0xc65   : > { %v12575_v3 = vmax.f32 %v12511_v27, 0.0  ;;  %v13735_v25 = vadd.f32 %v12151_v0, %v21235_v7  ;;  %12636 = vst [vmem:[%s21251_s27 + $0x120] sm:$0xff] %v12572_v2  ;;  %v12512_v31 = vadd.f32 %v13702_v23, %v12445_v45  ;;  %v12460_v27 = vpop.permute.xlu0 %12459 }
 0xc66   : > { %12638 = vst [vmem:[%s21251_s27 + $0x130] sm:$0xff] %v12574_v58  ;;  %v12514_v37 = vadd.f32 %v13734_v48, %v12445_v45  ;;  %12637 = vst [vmem:[%s21251_s27 + $0x128] sm:$0xff] %v12573_v32  ;;  %v12513_v9 = vadd.f32 %v13703_v62, %v12445_v45  ;;  %v11833_v47 = vpop.f32.mrb[50].mxu0 }
 0xc67   : > { %12639 = vst [vmem:[%s21251_s27 + $0x138] sm:$0xff] %v12575_v3  ;;  %v12515_v50 = vadd.f32 %v13735_v25, %v12445_v45  ;;  %v12155_v59 = vpop.f32.mrb[50].mxu1  ;;  %v12576_v34 = vmax.f32 %v12512_v31, 0.0  ;;  %v13704_v7 = vadd.f32 %v11833_v47, %v21237_v61  ;;  %v11835_v6 = vpop.f32.mrb[51].mxu0 }
 0xc68   : > { %v12578_v33 = vmax.f32 %v12514_v37, 0.0  ;;  %v13736_v30 = vadd.f32 %v12155_v59, %v21237_v61  ;;  %v12157_v29 = vpop.f32.mrb[51].mxu1  ;;  %v12577_v41 = vmax.f32 %v12513_v9, 0.0  ;;  %v13705_v5 = vadd.f32 %v11835_v6, %v21237_v61  ;;  %v12465_v31 = vpop.permute.xlu1 %12464 }
 0xc69   : > { %v12579_v44 = vmax.f32 %v12515_v50, 0.0  ;;  %v13737_v24 = vadd.f32 %v12157_v29, %v21237_v61  ;;  %12640 = vst [vmem:[%s21251_s27 + $0x140] sm:$0xff] %v12576_v34  ;;  %v12516_v39 = vadd.f32 %v13704_v7, %v12450_v42 }
 0xc6a   : > { %12642 = vst [vmem:[%s21251_s27 + $0x150] sm:$0xff] %v12578_v33  ;;  %v12518_v63 = vadd.f32 %v13736_v30, %v12450_v42  ;;  %12641 = vst [vmem:[%s21251_s27 + $0x148] sm:$0xff] %v12577_v41  ;;  %v12517_v52 = vadd.f32 %v13705_v5, %v12450_v42  ;;  %v11839_v8 = vpop.f32.mrb[52].mxu0 }
 0xc6b   : > { %12643 = vst [vmem:[%s21251_s27 + $0x158] sm:$0xff] %v12579_v44  ;;  %v12519_v40 = vadd.f32 %v13737_v24, %v12450_v42  ;;  %v12161_v10 = vpop.f32.mrb[52].mxu1  ;;  %v12580_v26 = vmax.f32 %v12516_v39, 0.0  ;;  %v13706_v61 = vadd.f32 %v11839_v8, %v21239_v53  ;;  %v11841_v60 = vpop.f32.mrb[53].mxu0 }
 0xc6c   : > { %v12582_v28 = vmax.f32 %v12518_v63, 0.0  ;;  %v13738_v1 = vadd.f32 %v12161_v10, %v21239_v53  ;;  %v12163_v49 = vpop.f32.mrb[53].mxu1  ;;  %v12581_v57 = vmax.f32 %v12517_v52, 0.0  ;;  %v13707_v20 = vadd.f32 %v11841_v60, %v21239_v53  ;;  %v12470_v63 = vpop.permute.xlu0 %12469 }
 0xc6d   : > { %v12583_v18 = vmax.f32 %v12519_v40, 0.0  ;;  %v13739_v38 = vadd.f32 %v12163_v49, %v21239_v53  ;;  %12644 = vst [vmem:[%s21251_s27 + $0x160] sm:$0xff] %v12580_v26  ;;  %v12520_v4 = vadd.f32 %v13706_v61, %v12455_v21 }
 0xc6e   : > { %12646 = vst [vmem:[%s21251_s27 + $0x170] sm:$0xff] %v12582_v28  ;;  %v12522_v46 = vadd.f32 %v13738_v1, %v12455_v21  ;;  %12645 = vst [vmem:[%s21251_s27 + $0x168] sm:$0xff] %v12581_v57  ;;  %v12521_v19 = vadd.f32 %v13707_v20, %v12455_v21  ;;  %v11845_v54 = vpop.f32.mrb[54].mxu0 }
 0xc6f   : > { %12647 = vst [vmem:[%s21251_s27 + $0x178] sm:$0xff] %v12583_v18  ;;  %v12523_v16 = vadd.f32 %v13739_v38, %v12455_v21  ;;  %v12167_v56 = vpop.f32.mrb[54].mxu1  ;;  %v12584_v55 = vmax.f32 %v12520_v4, 0.0  ;;  %v13708_v53 = vadd.f32 %v11845_v54, %v21241_v11  ;;  %v11847_v22 = vpop.f32.mrb[55].mxu0 }
 0xc70   : > { %v12586_v15 = vmax.f32 %v12522_v46, 0.0  ;;  %v13740_v43 = vadd.f32 %v12167_v56, %v21241_v11  ;;  %v12169_v35 = vpop.f32.mrb[55].mxu1  ;;  %v12585_v14 = vmax.f32 %v12521_v19, 0.0  ;;  %v13709_v58 = vadd.f32 %v11847_v22, %v21241_v11 }
 0xc71   : > { %v12587_v12 = vmax.f32 %v12523_v16, 0.0  ;;  %v13741_v36 = vadd.f32 %v12169_v35, %v21241_v11  ;;  %12648 = vst [vmem:[%s21251_s27 + $0x180] sm:$0xff] %v12584_v55  ;;  %v12524_v48 = vadd.f32 %v13708_v53, %v12460_v27 }
 0xc72   : > { %12650 = vst [vmem:[%s21251_s27 + $0x190] sm:$0xff] %v12586_v15  ;;  %v12526_v2 = vadd.f32 %v13740_v43, %v12460_v27  ;;  %12649 = vst [vmem:[%s21251_s27 + $0x188] sm:$0xff] %v12585_v14  ;;  %v12525_v0 = vadd.f32 %v13709_v58, %v12460_v27  ;;  %v11851_v45 = vpop.f32.mrb[56].mxu0 }
 0xc73   : > { %12651 = vst [vmem:[%s21251_s27 + $0x198] sm:$0xff] %v12587_v12  ;;  %v12527_v23 = vadd.f32 %v13741_v36, %v12460_v27  ;;  %v12173_v51 = vpop.f32.mrb[56].mxu1  ;;  %v12588_v32 = vmax.f32 %v12524_v48, 0.0  ;;  %v13710_v11 = vadd.f32 %v11851_v45, %v21243_v13  ;;  %v11853_v37 = vpop.f32.mrb[57].mxu0 }
 0xc74   : > { %v12590_v3 = vmax.f32 %v12526_v2, 0.0  ;;  %v13742_v25 = vadd.f32 %v12173_v51, %v21243_v13  ;;  %v12175_v62 = vpop.f32.mrb[57].mxu1  ;;  %v12589_v9 = vmax.f32 %v12525_v0, 0.0  ;;  %v13711_v47 = vadd.f32 %v11853_v37, %v21243_v13 }
 0xc75   : > { %v12591_v50 = vmax.f32 %v12527_v23, 0.0  ;;  %v13743_v59 = vadd.f32 %v12175_v62, %v21243_v13  ;;  %12652 = vst [vmem:[%s21251_s27 + $0x1a0] sm:$0xff] %v12588_v32  ;;  %v12528_v34 = vadd.f32 %v13710_v11, %v12465_v31 }
 0xc76   : > { %12654 = vst [vmem:[%s21251_s27 + $0x1b0] sm:$0xff] %v12590_v3  ;;  %v12530_v33 = vadd.f32 %v13742_v25, %v12465_v31  ;;  %12653 = vst [vmem:[%s21251_s27 + $0x1a8] sm:$0xff] %v12589_v9  ;;  %v12529_v7 = vadd.f32 %v13711_v47, %v12465_v31  ;;  %v11857_v6 = vpop.f32.mrb[58].mxu0 }
 0xc77   : > { %12655 = vst [vmem:[%s21251_s27 + $0x1b8] sm:$0xff] %v12591_v50  ;;  %v12531_v30 = vadd.f32 %v13743_v59, %v12465_v31  ;;  %v12179_v29 = vpop.f32.mrb[58].mxu1  ;;  %v12592_v44 = vmax.f32 %v12528_v34, 0.0  ;;  %v13712_v13 = vadd.f32 %v11857_v6, %v21245_v17  ;;  %v11859_v5 = vpop.f32.mrb[59].mxu0 }
 0xc78   : > { %v12594_v42 = vmax.f32 %v12530_v33, 0.0  ;;  %v13744_v41 = vadd.f32 %v12179_v29, %v21245_v17  ;;  %v12181_v24 = vpop.f32.mrb[59].mxu1  ;;  %v12593_v40 = vmax.f32 %v12529_v7, 0.0  ;;  %v13713_v10 = vadd.f32 %v11859_v5, %v21245_v17 }
 0xc79   : > { %v12595_v39 = vmax.f32 %v12531_v30, 0.0  ;;  %v13745_v52 = vadd.f32 %v12181_v24, %v21245_v17  ;;  %12656 = vst [vmem:[%s21251_s27 + $0x1c0] sm:$0xff] %v12592_v44  ;;  %v12532_v28 = vadd.f32 %v13712_v13, %v12470_v63 }
 0xc7a   : > { %12658 = vst [vmem:[%s21251_s27 + $0x1d0] sm:$0xff] %v12594_v42  ;;  %v12534_v8 = vadd.f32 %v13744_v41, %v12470_v63  ;;  %12657 = vst [vmem:[%s21251_s27 + $0x1c8] sm:$0xff] %v12593_v40  ;;  %v12533_v1 = vadd.f32 %v13713_v10, %v12470_v63 }
 0xc7b   : > { %12659 = vst [vmem:[%s21251_s27 + $0x1d8] sm:$0xff] %v12595_v39  ;;  %v12535_v26 = vadd.f32 %v13745_v52, %v12470_v63  ;;  %v12596_v49 = vmax.f32 %v12532_v28, 0.0 }
 0xc7c   : > { %v12598_v61 = vmax.f32 %v12534_v8, 0.0  ;;  %v12597_v21 = vmax.f32 %v12533_v1, 0.0 }
 0xc7d   : > { %v12599_v60 = vmax.f32 %v12535_v26, 0.0  ;;  %12660 = vst [vmem:[%s21251_s27 + $0x1e0] sm:$0xff] %v12596_v49 }
 0xc7e   : > { %12662 = vst [vmem:[%s21251_s27 + $0x1f0] sm:$0xff] %v12598_v61  ;;  %12661 = vst [vmem:[%s21251_s27 + $0x1e8] sm:$0xff] %v12597_v21 }
 0xc7f   : > { %12663 = vst [vmem:[%s21251_s27 + $0x1f8] sm:$0xff] %v12599_v60 }
 0xc80 PF: > { %s22_s21 = sadd.s32 1, %s16206_s21  }
 0xc81   : > { %p19_p4 = scmp.ge.s32.totalorder %s22_s21, 4  }
 0xc83   :  { %21 = sbr.rel (!%p19_p4) target bundleno = 1 (0x1), region = 98 }

</bundles_post_ra>
